<compile_context>
chip_gen: v5e
topology: v5e:2x2
jax: 0.10.0
libtpu: 0.0.40
codegen_flags: <defaults>
</compile_context>

<pallas_src>
import functools
import math

import jax
import jax.numpy as jnp
from jax import lax
from jax.experimental import pallas as pl
from jax.experimental.pallas import tpu as pltpu

_LN_EPS = 1e-5  # PyTorch nn.LayerNorm default eps


def _round_up(x, m):
    return (x + m - 1) // m * m


def _task_heads_kernel(x_ref, w1_ref, b1_ref, g_ref, beta_ref, w2_ref, b2_ref,
                       o_ref, *, num_heads, hidden_half):
    """One row-tile grid step: fused Linear -> per-head LayerNorm -> ReLU -> Linear.

    Shapes seen inside the kernel:
      x_ref   : (tm, H)         bf16
      w1_ref  : (H, NH*H2)      bf16   (all heads' first-layer weights, concat)
      b1_ref  : (1, NH*H2)      f32
      g_ref   : (1, NH*H2)      f32    (LayerNorm weights, concat)
      beta_ref: (1, NH*H2)      f32    (LayerNorm biases, concat)
      w2_ref  : (NH*H2, 128)    bf16   (block/column-offset packed second layer)
      b2_ref  : (1, 128)        f32
      o_ref   : (tm, 128)       f32    (all heads packed along lanes)
    """
    H2 = hidden_half

    # Fused first linear: one bf16 MXU matmul for all heads, f32 accumulate.
    h = jnp.dot(x_ref[...], w1_ref[...], preferred_element_type=jnp.float32)
    h = h + b1_ref[...]

    # Per-head LayerNorm over each 128-aligned H2-wide segment.  sum and
    # sum-of-squares are independent XLU reductions; var = E[x^2] - mean^2.
    inv_h2 = 1.0 / H2
    segs = []
    for hd in range(num_heads):
        s = h[:, hd * H2:(hd + 1) * H2]
        ssum = jnp.sum(s, axis=-1, keepdims=True)
        ssq = jnp.sum(s * s, axis=-1, keepdims=True)
        mean = ssum * inv_h2
        var = jnp.maximum(ssq * inv_h2 - mean * mean, 0.0)
        segs.append((s - mean) * lax.rsqrt(var + _LN_EPS))   # EUP rsqrt
    hn = jnp.concatenate(segs, axis=-1)
    hn = hn * g_ref[...] + beta_ref[...]

    # ReLU (dropout is identity in eval-mode forward).
    hn = jnp.maximum(hn, 0.0)

    # Packed second linear: one bf16 MXU matmul writes ALL heads' outputs into
    # disjoint lane columns of a single 128-wide slab (unmasked vst).
    out = jnp.dot(hn.astype(w2_ref.dtype), w2_ref[...],
                  preferred_element_type=jnp.float32)
    o_ref[...] = (out + b2_ref[...]).astype(o_ref.dtype)


@functools.partial(jax.jit, static_argnames=("num_heads", "hidden_half", "tm"))
def task_heads_pallas(x2d, w1, b1, gamma, beta, w2, b2, *,
                      num_heads, hidden_half, tm=512):
    """Run all heads on flattened atom features (x read from HBM once).

    x2d  : [M, H]           (any float dtype; cast to bf16 for the MXU)
    w1   : [H, NH*H2]       bf16   (heads concatenated along output dim)
    b1   : [1, NH*H2]       f32
    gamma: [1, NH*H2]       f32
    beta : [1, NH*H2]       f32
    w2   : [NH*H2, 128]     bf16   (block/column-offset packed)
    b2   : [1, 128]         f32
    returns [Mp, 128] f32   (Mp = M rounded up to the row-tile size)
    """
    M, H = x2d.shape
    NHH2 = w1.shape[1]
    Dp = w2.shape[1]
    assert H % 128 == 0 and hidden_half % 128 == 0, (
        "hidden_dim must be a multiple of 256 so H and H//2 are lane-aligned")
    assert Dp % 128 == 0
    assert NHH2 == num_heads * hidden_half

    # Row-tile size: multiple of 16 (bf16 sublane packing), capped by row count.
    tm = max(16, min(tm, _round_up(M, 16)))
    Mp = _round_up(M, tm)
    if Mp != M:
        x2d = jnp.pad(x2d, ((0, Mp - M), (0, 0)))
    xb = x2d.astype(jnp.bfloat16)

    n_m = Mp // tm

    # Advisory cost estimate (x is streamed once after the head fusion).
    flops = 2 * Mp * H * NHH2 + 2 * Mp * NHH2 * Dp
    bytes_accessed = (Mp * H * 2                       # x read once (bf16)
                      + w1.size * 2 + w2.size * 2      # resident bf16 weights
                      + (b1.size + gamma.size + beta.size + b2.size) * 4
                      + Mp * Dp * 4)                   # packed f32 output
    cost = pl.CostEstimate(flops=flops, transcendentals=Mp * num_heads,
                           bytes_accessed=bytes_accessed)

    kernel = functools.partial(_task_heads_kernel,
                               num_heads=num_heads, hidden_half=hidden_half)

    return pl.pallas_call(
        kernel,
        out_shape=jax.ShapeDtypeStruct((Mp, Dp), jnp.float32),
        grid_spec=pltpu.PrefetchScalarGridSpec(
            num_scalar_prefetch=0,
            grid=(n_m,),
            in_specs=[
                pl.BlockSpec((tm, H), lambda i: (i, 0)),       # x row tile
                pl.BlockSpec((H, NHH2), lambda i: (0, 0)),     # W1 fused (resident)
                pl.BlockSpec((1, NHH2), lambda i: (0, 0)),     # b1
                pl.BlockSpec((1, NHH2), lambda i: (0, 0)),     # LN gamma
                pl.BlockSpec((1, NHH2), lambda i: (0, 0)),     # LN beta
                pl.BlockSpec((NHH2, Dp), lambda i: (0, 0)),    # W2 packed (resident)
                pl.BlockSpec((1, Dp), lambda i: (0, 0)),       # b2 packed
            ],
            out_specs=pl.BlockSpec((tm, Dp), lambda i: (i, 0)),
        ),
        compiler_params=pltpu.CompilerParams(
            # Single row-tile axis: megacore (v7x) shards rows, not heads.
            dimension_semantics=("parallel",),
        ),
        cost_estimate=cost,
    )(xb, w1, b1, gamma, beta, w2, b2)


def init_task_heads_params(key, hidden_dim, num_atom_types):
    """Deterministic init matching the PyTorch module's init scheme, with the
    four heads fused: W1 concatenated along its output dim and W2/b2 packed
    into one block/column-offset (NH*H2, 128) matrix."""
    H = hidden_dim
    H2 = H // 2
    names = ("nmr_shifts", "positions", "atom_types", "smiles_positions")
    out_dims = (2, 3, num_atom_types, 1)
    NH = len(names)
    total_out = sum(out_dims)
    assert total_out <= 128, "packed output slab assumes total out dims <= 128"
    Dp = 128  # lane-dense packed output width

    offsets = []
    off = 0
    for od in out_dims:
        offsets.append(off)
        off += od

    keys = jax.random.split(key, 4 * NH)
    w1_l, b1_l, g_l, be_l = [], [], [], []
    w2_packed = jnp.zeros((NH * H2, Dp), jnp.float32)
    b2_packed = jnp.zeros((1, Dp), jnp.float32)
    for idx, od in enumerate(out_dims):
        k1, k2, k3, k4 = keys[4 * idx: 4 * idx + 4]
        if names[idx] == "positions":
            # position_predictor: normal(0, 0.01) weights, zero biases.
            w1 = 0.01 * jax.random.normal(k1, (H, H2), jnp.float32)
            b1 = jnp.zeros((H2,), jnp.float32)
            w2 = 0.01 * jax.random.normal(k3, (H2, od), jnp.float32)
            b2 = jnp.zeros((od,), jnp.float32)
        else:
            # nn.Linear default: U(-1/sqrt(fan_in), 1/sqrt(fan_in)).
            bnd1 = 1.0 / math.sqrt(H)
            w1 = jax.random.uniform(k1, (H, H2), jnp.float32, -bnd1, bnd1)
            b1 = jax.random.uniform(k2, (H2,), jnp.float32, -bnd1, bnd1)
            bnd2 = 1.0 / math.sqrt(H2)
            w2 = jax.random.uniform(k3, (H2, od), jnp.float32, -bnd2, bnd2)
            b2 = jax.random.uniform(k4, (od,), jnp.float32, -bnd2, bnd2)
        w1_l.append(w1)
        b1_l.append(b1)
        g_l.append(jnp.ones((H2,), jnp.float32))    # LayerNorm default weight
        be_l.append(jnp.zeros((H2,), jnp.float32))  # LayerNorm default bias
        w2_packed = w2_packed.at[idx * H2:(idx + 1) * H2,
                                 offsets[idx]:offsets[idx] + od].set(w2)
        b2_packed = b2_packed.at[0, offsets[idx]:offsets[idx] + od].set(b2)

    return {
        "w1": jnp.concatenate(w1_l, axis=-1).astype(jnp.bfloat16),  # (H, NH*H2)
        "b1": jnp.concatenate(b1_l)[None, :],                       # (1, NH*H2)
        "gamma": jnp.concatenate(g_l)[None, :],
        "beta": jnp.concatenate(be_l)[None, :],
        "w2": w2_packed.astype(jnp.bfloat16),                       # (NH*H2, 128)
        "b2": b2_packed,                                            # (1, 128)
        "names": names,
        "out_dims": out_dims,
        "offsets": tuple(offsets),
        "num_heads": NH,
        "hidden_half": H2,
        "packed_out": Dp,
    }


def task_heads_forward(atom_features, params, *, tm=512):
    """atom_features: [B, N, H] -> dict of head outputs (eval-mode forward)."""
    B, N, H = atom_features.shape
    M = B * N
    packed = task_heads_pallas(
        atom_features.reshape(M, H),
        params["w1"], params["b1"], params["gamma"], params["beta"],
        params["w2"], params["b2"],
        num_heads=params["num_heads"], hidden_half=params["hidden_half"], tm=tm)
    results = {}
    for name, od, off in zip(params["names"], params["out_dims"],
                             params["offsets"]):
        results[name] = packed[:M, off:off + od].reshape(B, N, od)
    return results


def task_heads_reference(atom_features, params):
    """Pure-JAX reference (same bf16 matmul inputs / f32 accumulate)."""
    B, N, H = atom_features.shape
    H2 = params["hidden_half"]
    x = atom_features.reshape(B * N, H).astype(jnp.bfloat16)
    results = {}
    for idx, (name, od, off) in enumerate(zip(params["names"],
                                              params["out_dims"],
                                              params["offsets"])):
        w1 = params["w1"][:, idx * H2:(idx + 1) * H2]
        b1 = params["b1"][:, idx * H2:(idx + 1) * H2]
        g = params["gamma"][:, idx * H2:(idx + 1) * H2]
        be = params["beta"][:, idx * H2:(idx + 1) * H2]
        w2 = params["w2"][idx * H2:(idx + 1) * H2, off:off + od]
        b2 = params["b2"][:, off:off + od]
        h = jnp.dot(x, w1, preferred_element_type=jnp.float32) + b1
        mean = jnp.mean(h, axis=-1, keepdims=True)
        cen = h - mean
        var = jnp.mean(cen * cen, axis=-1, keepdims=True)
        h = cen * lax.rsqrt(var + _LN_EPS) * g + be
        h = jnp.maximum(h, 0.0)
        out = jnp.dot(h.astype(jnp.bfloat16), w2,
                      preferred_element_type=jnp.float32) + b2
        results[name] = out.reshape(B, N, od)
    return results


if __name__ == "__main__":
    key = jax.random.PRNGKey(0)
    k_x, k_p = jax.random.split(key)

    # Small but lane-aligned demo shapes: hidden multiple of 256 so that both
    # H and H//2 are multiples of 128 (lane-dense, no masked stores).
    batch, num_atoms, hidden, num_atom_types = 2, 128, 256, 16
    x = jax.random.normal(k_x, (batch, num_atoms, hidden), jnp.float32)

    params = init_task_heads_params(k_p, hidden, num_atom_types)

    outs = task_heads_forward(x, params, tm=512)
    outs = jax.block_until_ready(outs)

    # Shape checks against the PyTorch module's contract.
    assert outs["nmr_shifts"].shape == (batch, num_atoms, 2)
    assert outs["positions"].shape == (batch, num_atoms, 3)
    assert outs["atom_types"].shape == (batch, num_atoms, num_atom_types)
    assert outs["smiles_positions"].shape == (batch, num_atoms, 1)

    # Numerical check against the pure-JAX reference.
    ref = task_heads_reference(x, params)
    for name in params["names"]:
        assert bool(jnp.all(jnp.isfinite(outs[name]))), name
        assert bool(jnp.allclose(outs[name], ref[name], atol=2e-2, rtol=2e-2)), name

    print("KERNEL_OK")
</pallas_src>

<mosaic_0001>
module attributes {stable_mosaic.version = 11 : i64} {
  func.func @_task_heads_kernel(%arg0: i32, %arg1: memref<256x256xbf16, #tpu.memory_space<vmem>>, %arg2: memref<256x512xbf16, #tpu.memory_space<vmem>>, %arg3: memref<1x512xf32, #tpu.memory_space<vmem>>, %arg4: memref<1x512xf32, #tpu.memory_space<vmem>>, %arg5: memref<1x512xf32, #tpu.memory_space<vmem>>, %arg6: memref<512x128xbf16, #tpu.memory_space<vmem>>, %arg7: memref<1x128xf32, #tpu.memory_space<vmem>>, %arg8: memref<256x128xf32, #tpu.memory_space<vmem>>) attributes {dimension_semantics = [#tpu.dimension_semantics<parallel>], iteration_bounds = array<i64: 1>, scalar_prefetch = 0 : i64, scratch_operands = 0 : i64, tpu.core_type = #tpu.core_type<tc>, window_params = [{transform_indices = @transform_0, window_bounds = array<i64: 256, 256>}, {pipeline_mode = #tpu.pipeline_mode<synchronous>, transform_indices = @transform_1, window_bounds = array<i64: 256, 512>}, {pipeline_mode = #tpu.pipeline_mode<synchronous>, transform_indices = @transform_2, window_bounds = array<i64: 1, 512>}, {pipeline_mode = #tpu.pipeline_mode<synchronous>, transform_indices = @transform_3, window_bounds = array<i64: 1, 512>}, {pipeline_mode = #tpu.pipeline_mode<synchronous>, transform_indices = @transform_4, window_bounds = array<i64: 1, 512>}, {pipeline_mode = #tpu.pipeline_mode<synchronous>, transform_indices = @transform_5, window_bounds = array<i64: 512, 128>}, {pipeline_mode = #tpu.pipeline_mode<synchronous>, transform_indices = @transform_6, window_bounds = array<i64: 1, 128>}, {transform_indices = @transform_7, window_bounds = array<i64: 256, 128>}]} {
    %c0 = arith.constant 0 : index
    %c0_0 = arith.constant 0 : index
    %0 = vector.load %arg1[%c0, %c0_0] : memref<256x256xbf16, #tpu.memory_space<vmem>>, vector<256x256xbf16>
    %c0_1 = arith.constant 0 : index
    %c0_2 = arith.constant 0 : index
    %1 = vector.load %arg2[%c0_1, %c0_2] : memref<256x512xbf16, #tpu.memory_space<vmem>>, vector<256x512xbf16>
    %cst = arith.constant dense<0.000000e+00> : vector<256x512xf32>
    %2 = tpu.matmul %0, %1, %cst {dimension_numbers = #tpu.dot_dimension_numbers<[1], [0], [0], [1], [0, 0, 1, 1], [], []>} : vector<256x256xbf16>, vector<256x512xbf16>, vector<256x512xf32> -> vector<256x512xf32>
    %c0_3 = arith.constant 0 : index
    %c0_4 = arith.constant 0 : index
    %3 = vector.load %arg3[%c0_3, %c0_4] : memref<1x512xf32, #tpu.memory_space<vmem>>, vector<1x512xf32>
    %4 = vector.broadcast %3 : vector<1x512xf32> to vector<256x512xf32>
    %5 = arith.addf %2, %4 : vector<256x512xf32>
    %6 = vector.extract_strided_slice %5 {offsets = [0, 0], sizes = [256, 128], strides = [1, 1]} : vector<256x512xf32> to vector<256x128xf32>
    %cst_5 = arith.constant dense<0.000000e+00> : vector<256xf32>
    %7 = vector.multi_reduction <add>, %6, %cst_5 [1] : vector<256x128xf32> to vector<256xf32>
    %8 = vector.shape_cast %7 : vector<256xf32> to vector<256x1xf32>
    %9 = arith.mulf %6, %6 : vector<256x128xf32>
    %cst_6 = arith.constant dense<0.000000e+00> : vector<256xf32>
    %10 = vector.multi_reduction <add>, %9, %cst_6 [1] : vector<256x128xf32> to vector<256xf32>
    %11 = vector.shape_cast %10 : vector<256xf32> to vector<256x1xf32>
    %cst_7 = arith.constant 7.812500e-03 : f32
    %12 = vector.broadcast %cst_7 : f32 to vector<256x1xf32>
    %13 = arith.mulf %8, %12 : vector<256x1xf32>
    %cst_8 = arith.constant 7.812500e-03 : f32
    %14 = vector.broadcast %cst_8 : f32 to vector<256x1xf32>
    %15 = arith.mulf %11, %14 : vector<256x1xf32>
    %16 = arith.mulf %13, %13 : vector<256x1xf32>
    %17 = arith.subf %15, %16 : vector<256x1xf32>
    %cst_9 = arith.constant 0.000000e+00 : f32
    %18 = vector.broadcast %cst_9 : f32 to vector<256x1xf32>
    %19 = arith.maximumf %17, %18 : vector<256x1xf32>
    %20 = vector.broadcast %13 : vector<256x1xf32> to vector<256x128xf32>
    %21 = arith.subf %6, %20 : vector<256x128xf32>
    %cst_10 = arith.constant 9.99999974E-6 : f32
    %22 = vector.broadcast %cst_10 : f32 to vector<256x1xf32>
    %23 = arith.addf %19, %22 : vector<256x1xf32>
    %24 = math.rsqrt %23 : vector<256x1xf32>
    %25 = vector.broadcast %24 : vector<256x1xf32> to vector<256x128xf32>
    %26 = arith.mulf %21, %25 : vector<256x128xf32>
    %27 = vector.extract_strided_slice %5 {offsets = [0, 128], sizes = [256, 128], strides = [1, 1]} : vector<256x512xf32> to vector<256x128xf32>
    %cst_11 = arith.constant dense<0.000000e+00> : vector<256xf32>
    %28 = vector.multi_reduction <add>, %27, %cst_11 [1] : vector<256x128xf32> to vector<256xf32>
    %29 = vector.shape_cast %28 : vector<256xf32> to vector<256x1xf32>
    %30 = arith.mulf %27, %27 : vector<256x128xf32>
    %cst_12 = arith.constant dense<0.000000e+00> : vector<256xf32>
    %31 = vector.multi_reduction <add>, %30, %cst_12 [1] : vector<256x128xf32> to vector<256xf32>
    %32 = vector.shape_cast %31 : vector<256xf32> to vector<256x1xf32>
    %cst_13 = arith.constant 7.812500e-03 : f32
    %33 = vector.broadcast %cst_13 : f32 to vector<256x1xf32>
    %34 = arith.mulf %29, %33 : vector<256x1xf32>
    %cst_14 = arith.constant 7.812500e-03 : f32
    %35 = vector.broadcast %cst_14 : f32 to vector<256x1xf32>
    %36 = arith.mulf %32, %35 : vector<256x1xf32>
    %37 = arith.mulf %34, %34 : vector<256x1xf32>
    %38 = arith.subf %36, %37 : vector<256x1xf32>
    %cst_15 = arith.constant 0.000000e+00 : f32
    %39 = vector.broadcast %cst_15 : f32 to vector<256x1xf32>
    %40 = arith.maximumf %38, %39 : vector<256x1xf32>
    %41 = vector.broadcast %34 : vector<256x1xf32> to vector<256x128xf32>
    %42 = arith.subf %27, %41 : vector<256x128xf32>
    %cst_16 = arith.constant 9.99999974E-6 : f32
    %43 = vector.broadcast %cst_16 : f32 to vector<256x1xf32>
    %44 = arith.addf %40, %43 : vector<256x1xf32>
    %45 = math.rsqrt %44 : vector<256x1xf32>
    %46 = vector.broadcast %45 : vector<256x1xf32> to vector<256x128xf32>
    %47 = arith.mulf %42, %46 : vector<256x128xf32>
    %48 = vector.extract_strided_slice %5 {offsets = [0, 256], sizes = [256, 128], strides = [1, 1]} : vector<256x512xf32> to vector<256x128xf32>
    %cst_17 = arith.constant dense<0.000000e+00> : vector<256xf32>
    %49 = vector.multi_reduction <add>, %48, %cst_17 [1] : vector<256x128xf32> to vector<256xf32>
    %50 = vector.shape_cast %49 : vector<256xf32> to vector<256x1xf32>
    %51 = arith.mulf %48, %48 : vector<256x128xf32>
    %cst_18 = arith.constant dense<0.000000e+00> : vector<256xf32>
    %52 = vector.multi_reduction <add>, %51, %cst_18 [1] : vector<256x128xf32> to vector<256xf32>
    %53 = vector.shape_cast %52 : vector<256xf32> to vector<256x1xf32>
    %cst_19 = arith.constant 7.812500e-03 : f32
    %54 = vector.broadcast %cst_19 : f32 to vector<256x1xf32>
    %55 = arith.mulf %50, %54 : vector<256x1xf32>
    %cst_20 = arith.constant 7.812500e-03 : f32
    %56 = vector.broadcast %cst_20 : f32 to vector<256x1xf32>
    %57 = arith.mulf %53, %56 : vector<256x1xf32>
    %58 = arith.mulf %55, %55 : vector<256x1xf32>
    %59 = arith.subf %57, %58 : vector<256x1xf32>
    %cst_21 = arith.constant 0.000000e+00 : f32
    %60 = vector.broadcast %cst_21 : f32 to vector<256x1xf32>
    %61 = arith.maximumf %59, %60 : vector<256x1xf32>
    %62 = vector.broadcast %55 : vector<256x1xf32> to vector<256x128xf32>
    %63 = arith.subf %48, %62 : vector<256x128xf32>
    %cst_22 = arith.constant 9.99999974E-6 : f32
    %64 = vector.broadcast %cst_22 : f32 to vector<256x1xf32>
    %65 = arith.addf %61, %64 : vector<256x1xf32>
    %66 = math.rsqrt %65 : vector<256x1xf32>
    %67 = vector.broadcast %66 : vector<256x1xf32> to vector<256x128xf32>
    %68 = arith.mulf %63, %67 : vector<256x128xf32>
    %69 = vector.extract_strided_slice %5 {offsets = [0, 384], sizes = [256, 128], strides = [1, 1]} : vector<256x512xf32> to vector<256x128xf32>
    %cst_23 = arith.constant dense<0.000000e+00> : vector<256xf32>
    %70 = vector.multi_reduction <add>, %69, %cst_23 [1] : vector<256x128xf32> to vector<256xf32>
    %71 = vector.shape_cast %70 : vector<256xf32> to vector<256x1xf32>
    %72 = arith.mulf %69, %69 : vector<256x128xf32>
    %cst_24 = arith.constant dense<0.000000e+00> : vector<256xf32>
    %73 = vector.multi_reduction <add>, %72, %cst_24 [1] : vector<256x128xf32> to vector<256xf32>
    %74 = vector.shape_cast %73 : vector<256xf32> to vector<256x1xf32>
    %cst_25 = arith.constant 7.812500e-03 : f32
    %75 = vector.broadcast %cst_25 : f32 to vector<256x1xf32>
    %76 = arith.mulf %71, %75 : vector<256x1xf32>
    %cst_26 = arith.constant 7.812500e-03 : f32
    %77 = vector.broadcast %cst_26 : f32 to vector<256x1xf32>
    %78 = arith.mulf %74, %77 : vector<256x1xf32>
    %79 = arith.mulf %76, %76 : vector<256x1xf32>
    %80 = arith.subf %78, %79 : vector<256x1xf32>
    %cst_27 = arith.constant 0.000000e+00 : f32
    %81 = vector.broadcast %cst_27 : f32 to vector<256x1xf32>
    %82 = arith.maximumf %80, %81 : vector<256x1xf32>
    %83 = vector.broadcast %76 : vector<256x1xf32> to vector<256x128xf32>
    %84 = arith.subf %69, %83 : vector<256x128xf32>
    %cst_28 = arith.constant 9.99999974E-6 : f32
    %85 = vector.broadcast %cst_28 : f32 to vector<256x1xf32>
    %86 = arith.addf %82, %85 : vector<256x1xf32>
    %87 = math.rsqrt %86 : vector<256x1xf32>
    %88 = vector.broadcast %87 : vector<256x1xf32> to vector<256x128xf32>
    %89 = arith.mulf %84, %88 : vector<256x128xf32>
    %90 = tpu.concatenate %26, %47, %68, %89 in 1 : vector<256x128xf32>, vector<256x128xf32>, vector<256x128xf32>, vector<256x128xf32> -> vector<256x512xf32>
    %c0_29 = arith.constant 0 : index
    %c0_30 = arith.constant 0 : index
    %91 = vector.load %arg4[%c0_29, %c0_30] : memref<1x512xf32, #tpu.memory_space<vmem>>, vector<1x512xf32>
    %92 = vector.broadcast %91 : vector<1x512xf32> to vector<256x512xf32>
    %93 = arith.mulf %90, %92 : vector<256x512xf32>
    %c0_31 = arith.constant 0 : index
    %c0_32 = arith.constant 0 : index
    %94 = vector.load %arg5[%c0_31, %c0_32] : memref<1x512xf32, #tpu.memory_space<vmem>>, vector<1x512xf32>
    %95 = vector.broadcast %94 : vector<1x512xf32> to vector<256x512xf32>
    %96 = arith.addf %93, %95 : vector<256x512xf32>
    %cst_33 = arith.constant 0.000000e+00 : f32
    %97 = vector.broadcast %cst_33 : f32 to vector<256x512xf32>
    %98 = arith.maximumf %96, %97 : vector<256x512xf32>
    %99 = arith.truncf %98 : vector<256x512xf32> to vector<256x512xbf16>
    %c0_34 = arith.constant 0 : index
    %c0_35 = arith.constant 0 : index
    %100 = vector.load %arg6[%c0_34, %c0_35] : memref<512x128xbf16, #tpu.memory_space<vmem>>, vector<512x128xbf16>
    %cst_36 = arith.constant dense<0.000000e+00> : vector<256x128xf32>
    %101 = tpu.matmul %99, %100, %cst_36 {dimension_numbers = #tpu.dot_dimension_numbers<[1], [0], [0], [1], [0, 0, 1, 1], [], []>} : vector<256x512xbf16>, vector<512x128xbf16>, vector<256x128xf32> -> vector<256x128xf32>
    %c0_37 = arith.constant 0 : index
    %c0_38 = arith.constant 0 : index
    %102 = vector.load %arg7[%c0_37, %c0_38] : memref<1x128xf32, #tpu.memory_space<vmem>>, vector<1x128xf32>
    %103 = vector.broadcast %102 : vector<1x128xf32> to vector<256x128xf32>
    %104 = arith.addf %101, %103 : vector<256x128xf32>
    %c0_39 = arith.constant 0 : index
    %c0_40 = arith.constant 0 : index
    %105 = vector.load %arg8[%c0_39, %c0_40] : memref<256x128xf32, #tpu.memory_space<vmem>>, vector<256x128xf32>
    tpu.vector_store %arg8[%c0_39, %c0_40], %104 {strides = array<i32>} : memref<256x128xf32, #tpu.memory_space<vmem>>, vector<256x128xf32>,
    return
  }
  func.func @transform_0(%arg0: i32) -> (i32, i32) {
    %c0_i32 = arith.constant 0 : i32
    %c0_i32_0 = arith.constant 0 : i32
    return %arg0, %c0_i32 : i32, i32
  }
  func.func @transform_1(%arg0: i32) -> (i32, i32) {
    %c0_i32 = arith.constant 0 : i32
    %c0_i32_0 = arith.constant 0 : i32
    %c0_i32_1 = arith.constant 0 : i32
    return %c0_i32, %c0_i32_0 : i32, i32
  }
  func.func @transform_2(%arg0: i32) -> (i32, i32) {
    %c0_i32 = arith.constant 0 : i32
    %c0_i32_0 = arith.constant 0 : i32
    %c0_i32_1 = arith.constant 0 : i32
    return %c0_i32, %c0_i32_0 : i32, i32
  }
  func.func @transform_3(%arg0: i32) -> (i32, i32) {
    %c0_i32 = arith.constant 0 : i32
    %c0_i32_0 = arith.constant 0 : i32
    %c0_i32_1 = arith.constant 0 : i32
    return %c0_i32, %c0_i32_0 : i32, i32
  }
  func.func @transform_4(%arg0: i32) -> (i32, i32) {
    %c0_i32 = arith.constant 0 : i32
    %c0_i32_0 = arith.constant 0 : i32
    %c0_i32_1 = arith.constant 0 : i32
    return %c0_i32, %c0_i32_0 : i32, i32
  }
  func.func @transform_5(%arg0: i32) -> (i32, i32) {
    %c0_i32 = arith.constant 0 : i32
    %c0_i32_0 = arith.constant 0 : i32
    %c0_i32_1 = arith.constant 0 : i32
    return %c0_i32, %c0_i32_0 : i32, i32
  }
  func.func @transform_6(%arg0: i32) -> (i32, i32) {
    %c0_i32 = arith.constant 0 : i32
    %c0_i32_0 = arith.constant 0 : i32
    %c0_i32_1 = arith.constant 0 : i32
    return %c0_i32, %c0_i32_0 : i32, i32
  }
  func.func @transform_7(%arg0: i32) -> (i32, i32) {
    %c0_i32 = arith.constant 0 : i32
    %c0_i32_0 = arith.constant 0 : i32
    return %arg0, %c0_i32 : i32, i32
  }
}

</mosaic_0001>

<bundles_post_ra>
// kernel: task_heads_pallas.1
= control target key start
LH: loop header
LB: loop body
LE: loop exit
PB: predicated region body
PF: predicated region fallthrough
CT: control target
= control target key end

     0   :  { %12 = vsyncpa [#allocation3], 0  ;;  %s13524_s0 = inlined_call_operand.vmem [shape: bf16[256,256], index: 0, kind: input, shape index: {}]   ;;  %s13525_s1 = inlined_call_operand.vmem [shape: bf16[256,512], index: 1, kind: input, shape index: {}]   ;;  %s13526_s2 = inlined_call_operand.hbm [shape: f32[1,512], index: 2, kind: input, shape index: {}]   ;;  %s13527_s3 = inlined_call_operand.hbm [shape: f32[1,512], index: 3, kind: input, shape index: {}]   ;;  %s13528_s4 = inlined_call_operand.hbm [shape: f32[1,512], index: 4, kind: input, shape index: {}]   ;;  %s13529_s5 = inlined_call_operand.vmem [shape: bf16[512,128], index: 5, kind: input, shape index: {}]   ;;  %s13530_s6 = inlined_call_operand.hbm [shape: f32[1,128], index: 6, kind: input, shape index: {}]   ;;  %s13531_s7 = inlined_call_operand.hbm [shape: f32[256,128], index: 7, kind: output, shape index: {}]  }
   0x1   :  { %13 = vsyncpa [#allocation6], 0 }
   0x2   :  { %14 = vsyncpa [#allocation9], 0  ;;  %s36_s26 = sshll.u32 %s13527_s3, 4  ;;  %s37_s26 = int_to_ptr.hbm [resolvable:$true] %s36_s26 }
   0x3   :  { %15 = vsyncpa [#allocation4], 0  ;;  %s6499_s27 = smov [#allocation5]   ;;  %s25_s8 = sshll.u32 %s13526_s2, 4  ;;  %s26_s8 = int_to_ptr.hbm [resolvable:$true] %s25_s8 }
   0x4   :  { %s38_s28 = sshll.u32 %s6499_s27, 4  ;;  %s6500_s9 = smov [#allocation2]   ;;  %s39_s28 = int_to_ptr.vmem [resolvable:$true] %s38_s28 }
   0x5   :  { %41 = dma.hbm_to_vmem [thread:$0]  %s37_s26, 64, %s39_s28, [#allocation6]  }
   0x6   :  { %s27_s10 = sshll.u32 %s6500_s9, 4  ;;  %s47_s13 = sshll.u32 %s13528_s4, 4  ;;  %s28_s10 = int_to_ptr.vmem [resolvable:$true] %s27_s10  ;;  %s48_s13 = int_to_ptr.hbm [resolvable:$true] %s47_s13 }
   0x7   :  { %30 = dma.hbm_to_vmem [thread:$0]  %s26_s8, 64, %s28_s10, [#allocation3]  }
   0x8   :  { %s60_s15 = sshll.u32 %s13530_s6, 4  ;;  %s6501_s16 = smov [#allocation7]   ;;  %s61_s15 = int_to_ptr.hbm [resolvable:$true] %s60_s15 }
   0x9   :  { %s49_s17 = sshll.u32 %s6501_s16, 4  ;;  %s6502_s2 = smov [#allocation8]   ;;  %s50_s17 = int_to_ptr.vmem [resolvable:$true] %s49_s17 }
   0xa   :  { %52 = dma.hbm_to_vmem [thread:$0]  %s48_s13, 64, %s50_s17, [#allocation6]  }
   0xb   :  { %s62_s18 = sshll.u32 %s6502_s2, 4  ;;  %s63_s18 = int_to_ptr.vmem [resolvable:$true] %s62_s18 }
   0xc   :  { %65 = dma.hbm_to_vmem [thread:$0]  %s61_s15, 16, %s63_s18, [#allocation9]  }
   0xd   :  { %6491 = dma.done.wait [#allocation3], 64  }
   0xe   :  { %6492 = vsyncadd [#allocation3], 4294967232 }
   0xf   :  { %6493 = dma.done.wait [#allocation6], 128  }
  0x10   :  { %6494 = vsyncadd [#allocation6], 4294967168 }
  0x11   :  { %6495 = dma.done.wait [#allocation9], 16  }
  0x12   :  { %6496 = vsyncadd [#allocation9], 4294967280  ;;  %v5703_v0 = vld [vmem:[%s13525_s1 + $0xe0] sm:$0xf]  ;;  %v6035_v1 = vld [vmem:[%s13525_s1 + $0xec] sm:$0xf0] }
  0x13   :  { %v5831_v2 = vld [vmem:[%s13525_s1 + $0x1e0] sm:$0xf]  ;;  %v5704_v3 = vor.u32 %v6035_v1, %v5703_v0  ;;  %v6067_v4 = vld [vmem:[%s13525_s1 + $0x1ec] sm:$0xf0]  ;;  %v6033_v5 = vld [vmem:[%s13525_s1 + $0xe4] sm:$0xf] }
  0x14   :  { %v5705_v6 = vld [vmem:[%s13525_s1 + $0xf0] sm:$0xf0]  ;;  %v5832_v7 = vor.u32 %v6067_v4, %v5831_v2  ;;  %v6065_v9 = vld [vmem:[%s13525_s1 + $0x1e4] sm:$0xf]  ;;  %v5687_v11 = vld [vmem:[%s13525_s1 + $0xc0] sm:$0xf] }
  0x15   :  { %v5708_v8 = vor.u32 %v6033_v5, %v5705_v6  ;;  %v5833_v10 = vld [vmem:[%s13525_s1 + $0x1f0] sm:$0xf0]  ;;  %668 = vmatpush.bf16.msra.mxu0 %v5704_v3  ;;  %v6031_v13 = vld [vmem:[%s13525_s1 + $0xcc] sm:$0xf0]  ;;  %v5815_v14 = vld [vmem:[%s13525_s1 + $0x1c0] sm:$0xf] }
  0x16   :  { %v5836_v12 = vor.u32 %v6065_v9, %v5833_v10  ;;  %v6063_v15 = vld [vmem:[%s13525_s1 + $0x1cc] sm:$0xf0]  ;;  %757 = vmatpush.bf16.msra.mxu1 %v5832_v7  ;;  %v5688_v16 = vor.u32 %v6031_v13, %v5687_v11  ;;  %v6029_v18 = vld [vmem:[%s13525_s1 + $0xc4] sm:$0xf]  ;;  %v5689_v19 = vld [vmem:[%s13525_s1 + $0xd0] sm:$0xf0] }
  0x17   :  { %846 = vmatpush.bf16.msra.mxu2 %v5708_v8  ;;  %v5816_v17 = vor.u32 %v6063_v15, %v5815_v14  ;;  %v6061_v20 = vld [vmem:[%s13525_s1 + $0x1c4] sm:$0xf]  ;;  %v5692_v21 = vor.u32 %v6029_v18, %v5689_v19  ;;  %v5817_v22 = vld [vmem:[%s13525_s1 + $0x1d0] sm:$0xf0]  ;;  %v5671_v23 = vld [vmem:[%s13525_s1 + $0xa0] sm:$0xf] }
  0x18   :  { %935 = vmatpush.bf16.msra.mxu3 %v5836_v12  ;;  %v6027_v24 = vld [vmem:[%s13525_s1 + $0xac] sm:$0xf0]  ;;  %v5820_v25 = vor.u32 %v6061_v20, %v5817_v22  ;;  %v5799_v26 = vld [vmem:[%s13525_s1 + $0x1a0] sm:$0xf]  ;;  %v6025_v28 = vld [vmem:[%s13525_s1 + $0xa4] sm:$0xf] }
  0x19   :  { %v6059_v27 = vld [vmem:[%s13525_s1 + $0x1ac] sm:$0xf0]  ;;  %669 = vmatpush.bf16.msra.mxu0 %v5688_v16  ;;  %v5672_v29 = vor.u32 %v6027_v24, %v5671_v23  ;;  %v5673_v30 = vld [vmem:[%s13525_s1 + $0xb0] sm:$0xf0]  ;;  %v6057_v31 = vld [vmem:[%s13525_s1 + $0x1a4] sm:$0xf] }
  0x1a   :  { %v5801_v32 = vld [vmem:[%s13525_s1 + $0x1b0] sm:$0xf0]  ;;  %758 = vmatpush.bf16.msra.mxu1 %v5816_v17  ;;  %v5800_v33 = vor.u32 %v6059_v27, %v5799_v26  ;;  %v5676_v34 = vor.u32 %v6025_v28, %v5673_v30  ;;  %v5655_v35 = vld [vmem:[%s13525_s1 + $0x80] sm:$0xf]  ;;  %v6023_v36 = vld [vmem:[%s13525_s1 + $0x8c] sm:$0xf0] }
  0x1b   :  { %847 = vmatpush.bf16.msra.mxu2 %v5692_v21  ;;  %v5783_v37 = vld [vmem:[%s13525_s1 + $0x180] sm:$0xf]  ;;  %v5804_v38 = vor.u32 %v6057_v31, %v5801_v32  ;;  %v6055_v39 = vld [vmem:[%s13525_s1 + $0x18c] sm:$0xf0]  ;;  %v6021_v40 = vld [vmem:[%s13525_s1 + $0x84] sm:$0xf]  ;;  %v5656_v44 = vor.u32 %v6023_v36, %v5655_v35 }
  0x1c   :  { %936 = vmatpush.bf16.msra.mxu3 %v5820_v25  ;;  %v5657_v41 = vld [vmem:[%s13525_s1 + $0x90] sm:$0xf0]  ;;  %v6053_v42 = vld [vmem:[%s13525_s1 + $0x184] sm:$0xf]  ;;  %v5784_v45 = vor.u32 %v6055_v39, %v5783_v37  ;;  %v5639_v47 = vld [vmem:[%s13525_s1 + $0x60] sm:$0xf] }
  0x1d   :  { %v5785_v43 = vld [vmem:[%s13525_s1 + $0x190] sm:$0xf0]  ;;  %670 = vmatpush.bf16.msra.mxu0 %v5672_v29  ;;  %v5660_v46 = vor.u32 %v6021_v40, %v5657_v41  ;;  %v6019_v48 = vld [vmem:[%s13525_s1 + $0x6c] sm:$0xf0]  ;;  %v5767_v49 = vld [vmem:[%s13525_s1 + $0x160] sm:$0xf] }
  0x1e   :  { %759 = vmatpush.bf16.msra.mxu1 %v5800_v33  ;;  %v5788_v50 = vor.u32 %v6053_v42, %v5785_v43  ;;  %v6051_v51 = vld [vmem:[%s13525_s1 + $0x16c] sm:$0xf0]  ;;  %v6017_v52 = vld [vmem:[%s13525_s1 + $0x64] sm:$0xf]  ;;  %v5641_v53 = vld [vmem:[%s13525_s1 + $0x70] sm:$0xf0]  ;;  %v5640_v56 = vor.u32 %v6019_v48, %v5639_v47 }
  0x1f   :  { %848 = vmatpush.bf16.msra.mxu2 %v5676_v34  ;;  %v6049_v54 = vld [vmem:[%s13525_s1 + $0x164] sm:$0xf]  ;;  %v5769_v55 = vld [vmem:[%s13525_s1 + $0x170] sm:$0xf0]  ;;  %v5768_v57 = vor.u32 %v6051_v51, %v5767_v49  ;;  %v5644_v58 = vor.u32 %v6017_v52, %v5641_v53  ;;  %v5623_v59 = vld [vmem:[%s13525_s1 + $0x40] sm:$0xf] }
  0x20   :  { %937 = vmatpush.bf16.msra.mxu3 %v5804_v38  ;;  %v6015_v60 = vld [vmem:[%s13525_s1 + $0x4c] sm:$0xf0]  ;;  %v5751_v61 = vld [vmem:[%s13525_s1 + $0x140] sm:$0xf]  ;;  %v5772_v62 = vor.u32 %v6049_v54, %v5769_v55  ;;  %v6013_v0 = vld [vmem:[%s13525_s1 + $0x44] sm:$0xf] }
  0x21   :  { %671 = vmatpush.bf16.msra.mxu0 %v5656_v44  ;;  %v6047_v63 = vld [vmem:[%s13525_s1 + $0x14c] sm:$0xf0]  ;;  %v5625_v1 = vld [vmem:[%s13525_s1 + $0x50] sm:$0xf0]  ;;  %v6045_v2 = vld [vmem:[%s13525_s1 + $0x144] sm:$0xf]  ;;  %v5624_v4 = vor.u32 %v6015_v60, %v5623_v59 }
  0x22   :  { %760 = vmatpush.bf16.msra.mxu1 %v5784_v45  ;;  %v5753_v3 = vld [vmem:[%s13525_s1 + $0x150] sm:$0xf0]  ;;  %v5752_v5 = vor.u32 %v6047_v63, %v5751_v61  ;;  %v5628_v6 = vor.u32 %v6013_v0, %v5625_v1  ;;  %v5607_v7 = vld [vmem:[%s13525_s1 + $0x20] sm:$0xf]  ;;  %v6011_v8 = vld [vmem:[%s13525_s1 + $0x2c] sm:$0xf0] }
  0x23   :  { %849 = vmatpush.bf16.msra.mxu2 %v5660_v46  ;;  %v5735_v9 = vld [vmem:[%s13525_s1 + $0x120] sm:$0xf]  ;;  %v5756_v10 = vor.u32 %v6045_v2, %v5753_v3  ;;  %v6043_v11 = vld [vmem:[%s13525_s1 + $0x12c] sm:$0xf0]  ;;  %v6009_v12 = vld [vmem:[%s13525_s1 + $0x24] sm:$0xf]  ;;  %v5608_v16 = vor.u32 %v6011_v8, %v5607_v7 }
  0x24   :  { %938 = vmatpush.bf16.msra.mxu3 %v5788_v50  ;;  %v5609_v13 = vld [vmem:[%s13525_s1 + $0x30] sm:$0xf0]  ;;  %v6041_v14 = vld [vmem:[%s13525_s1 + $0x124] sm:$0xf]  ;;  %v5591_v17 = vld [vmem:[%s13525_s1] sm:$0xf]  ;;  %v5736_v18 = vor.u32 %v6043_v11, %v5735_v9 }
  0x25   :  { %672 = vmatpush.bf16.msra.mxu0 %v5640_v56  ;;  %v5737_v15 = vld [vmem:[%s13525_s1 + $0x130] sm:$0xf0]  ;;  %v5612_v19 = vor.u32 %v6009_v12, %v5609_v13  ;;  %v6007_v20 = vld [vmem:[%s13525_s1 + $0xc] sm:$0xf0]  ;;  %v5719_v21 = vld [vmem:[%s13525_s1 + $0x100] sm:$0xf] }
  0x26   :  { %761 = vmatpush.bf16.msra.mxu1 %v5768_v57  ;;  %v5740_v22 = vor.u32 %v6041_v14, %v5737_v15  ;;  %v6039_v23 = vld [vmem:[%s13525_s1 + $0x10c] sm:$0xf0]  ;;  %v6005_v24 = vld [vmem:[%s13525_s1 + $0x4] sm:$0xf]  ;;  %v5593_v25 = vld [vmem:[%s13525_s1 + $0x10] sm:$0xf0]  ;;  %v5592_v28 = vor.u32 %v6007_v20, %v5591_v17 }
  0x27   :  { %850 = vmatpush.bf16.msra.mxu2 %v5644_v58  ;;  %v6037_v26 = vld [vmem:[%s13525_s1 + $0x104] sm:$0xf]  ;;  %v5721_v27 = vld [vmem:[%s13525_s1 + $0x110] sm:$0xf0]  ;;  %v5463_v29 = vld [vmem:[%s13524_s0] sm:$0xf]  ;;  %v5720_v31 = vor.u32 %v6039_v23, %v5719_v21  ;;  %v5596_v32 = vor.u32 %v6005_v24, %v5593_v25 }
  0x28   :  { %939 = vmatpush.bf16.msra.mxu3 %v5772_v62  ;;  %v5974_v30 = vld [vmem:[%s13524_s0 + $0x4] sm:$0xf0]  ;;  %v5973_v33 = vld [vmem:[%s13524_s0 + $0x4] sm:$0xf]  ;;  %v5465_v34 = vld [vmem:[%s13524_s0 + $0x8] sm:$0xf0]  ;;  %v5724_v35 = vor.u32 %v6037_v26, %v5721_v27 }
  0x29   :  { %673 = vmatpush.bf16.msra.mxu0 %v5624_v4  ;;  %v6762_v36 = vor.u32 %v5974_v30, %v5463_v29  ;;  %v6764_v37 = vor.u32 %v5973_v33, %v5465_v34  ;;  %v5471_v38 = vld [vmem:[%s13524_s0 + $0x10] sm:$0xf]  ;;  %v5976_v39 = vld [vmem:[%s13524_s0 + $0x14] sm:$0xf0]  ;;  %v5975_v40 = vld [vmem:[%s13524_s0 + $0x14] sm:$0xf] }
  0x2a   :  { %762 = vmatpush.bf16.msra.mxu1 %v5752_v5  ;;  %v5473_v41 = vld [vmem:[%s13524_s0 + $0x18] sm:$0xf0]  ;;  %v6782_v42 = vor.u32 %v5976_v39, %v5471_v38  ;;  %v5479_v44 = vld [vmem:[%s13524_s0 + $0x20] sm:$0xf]  ;;  %v5978_v45 = vld [vmem:[%s13524_s0 + $0x24] sm:$0xf0] }
  0x2b   :  { %851 = vmatpush.bf16.msra.mxu2 %v5628_v6  ;;  %v6784_v43 = vor.u32 %v5975_v40, %v5473_v41  ;;  %v5977_v46 = vld [vmem:[%s13524_s0 + $0x24] sm:$0xf]  ;;  %v5481_v47 = vld [vmem:[%s13524_s0 + $0x28] sm:$0xf0]  ;;  %v6802_v48 = vor.u32 %v5978_v45, %v5479_v44  ;;  %v5487_v50 = vld [vmem:[%s13524_s0 + $0x30] sm:$0xf] }
  0x2c   :  { %940 = vmatpush.bf16.msra.mxu3 %v5756_v10  ;;  %v6804_v49 = vor.u32 %v5977_v46, %v5481_v47  ;;  %v5980_v51 = vld [vmem:[%s13524_s0 + $0x34] sm:$0xf0]  ;;  %v5979_v52 = vld [vmem:[%s13524_s0 + $0x34] sm:$0xf]  ;;  %v5489_v53 = vld [vmem:[%s13524_s0 + $0x38] sm:$0xf0] }
  0x2d   :  { %674 = vmatpush.bf16.msra.mxu0 %v5608_v16  ;;  %14048 = vst [vmem:[#allocation15_spill] sm:$0xff] %v6802_v48  ;;  %v6822_v54 = vor.u32 %v5980_v51, %v5487_v50  ;;  %v6824_v55 = vor.u32 %v5979_v52, %v5489_v53  ;;  %v5711_v56 = vld [vmem:[%s13525_s1 + $0xe8] sm:$0xf]  ;;  %v6036_v57 = vld [vmem:[%s13525_s1 + $0xf4] sm:$0xf0]  ;;  %s5446_s30 = sshll.u32 %s13531_s7, 4  ;;  %s5447_s30 = int_to_ptr.hbm [resolvable:$true] %s5446_s30 }
  0x2e   :  { %763 = vmatpush.bf16.msra.mxu1 %v5736_v18  ;;  %14049 = vst [vmem:[#allocation16_spill] sm:$0xff] %v6804_v49  ;;  %v6034_v58 = vld [vmem:[%s13525_s1 + $0xec] sm:$0xf]  ;;  %v5712_v59 = vor.u32 %v6036_v57, %v5711_v56  ;;  %v5713_v60 = vld [vmem:[%s13525_s1 + $0xf8] sm:$0xf0]  ;;  %s6504_s8 = smov 128  }
  0x2f   :  { %852 = vmatpush.bf16.msra.mxu2 %v5612_v19  ;;  %14050 = vst [vmem:[#allocation17_spill] sm:$0xff] %v6822_v54  ;;  %v5839_v61 = vld [vmem:[%s13525_s1 + $0x1e8] sm:$0xf]  ;;  %v6068_v62 = vld [vmem:[%s13525_s1 + $0x1f4] sm:$0xf0]  ;;  %v5716_v63 = vor.u32 %v6034_v58, %v5713_v60  ;;  %s6505_s9 = smov 8  }
  0x30   :  { %941 = vmatpush.bf16.msra.mxu3 %v5740_v22  ;;  %14051 = vst [vmem:[#allocation18_spill] sm:$0xff] %v6824_v55  ;;  %v5840_v0 = vor.u32 %v6068_v62, %v5839_v61  ;;  %v6066_v1 = vld [vmem:[%s13525_s1 + $0x1ec] sm:$0xf]  ;;  %v5841_v2 = vld [vmem:[%s13525_s1 + $0x1f8] sm:$0xf0] }
  0x31   :  { %675 = vmatpush.bf16.msra.mxu0 %v5592_v28  ;;  %v5844_v3 = vor.u32 %v6066_v1, %v5841_v2  ;;  %v5495_v4 = vld [vmem:[%s13524_s0 + $0x40] sm:$0xf]  ;;  %v5982_v5 = vld [vmem:[%s13524_s0 + $0x44] sm:$0xf0]  ;;  %v5981_v6 = vld [vmem:[%s13524_s0 + $0x44] sm:$0xf] }
  0x32   :  { %764 = vmatpush.bf16.msra.mxu1 %v5720_v31  ;;  %v5497_v7 = vld [vmem:[%s13524_s0 + $0x48] sm:$0xf0]  ;;  %v6866_v8 = vor.u32 %v5982_v5, %v5495_v4  ;;  %v5503_v10 = vld [vmem:[%s13524_s0 + $0x50] sm:$0xf]  ;;  %v5984_v11 = vld [vmem:[%s13524_s0 + $0x54] sm:$0xf0] }
  0x33   :  { %853 = vmatpush.bf16.msra.mxu2 %v5596_v32  ;;  %v6868_v9 = vor.u32 %v5981_v6, %v5497_v7  ;;  %v5983_v12 = vld [vmem:[%s13524_s0 + $0x54] sm:$0xf]  ;;  %v5505_v13 = vld [vmem:[%s13524_s0 + $0x58] sm:$0xf0]  ;;  %v6886_v14 = vor.u32 %v5984_v11, %v5503_v10  ;;  %v5695_v16 = vld [vmem:[%s13525_s1 + $0xc8] sm:$0xf] }
  0x34   :  { %942 = vmatpush.bf16.msra.mxu3 %v5724_v35  ;;  %676 = vmatmul.bf16.vlgmr.msra.gmra.mxu0 %v6762_v36  ;;  %14052 = vst [vmem:[#allocation19_spill] sm:$0xff] %v6866_v8  ;;  %v6888_v15 = vor.u32 %v5983_v12, %v5505_v13  ;;  %v6032_v17 = vld [vmem:[%s13525_s1 + $0xd4] sm:$0xf0]  ;;  %v6030_v18 = vld [vmem:[%s13525_s1 + $0xcc] sm:$0xf] }
  0x35   :  { %765 = vmatmul.bf16.vlgmr.msra.gmra.mxu1 %v6764_v37  ;;  %1024 = vmatpush.bf16.msrb.mxu0 %v5712_v59  ;;  %14053 = vst [vmem:[#allocation20_spill] sm:$0xff] %v6868_v9  ;;  %v5696_v19 = vor.u32 %v6032_v17, %v5695_v16  ;;  %v5697_v20 = vld [vmem:[%s13525_s1 + $0xd8] sm:$0xf0]  ;;  %v5823_v21 = vld [vmem:[%s13525_s1 + $0x1c8] sm:$0xf] }
  0x36   :  { %854 = vmatmul.bf16.vlgmr.msra.gmra.mxu2 %v6762_v36  ;;  %1113 = vmatpush.bf16.msrb.mxu1 %v5840_v0  ;;  %14054 = vst [vmem:[#allocation21_spill] sm:$0xff] %v6886_v14  ;;  %v6064_v22 = vld [vmem:[%s13525_s1 + $0x1d4] sm:$0xf0]  ;;  %v5700_v23 = vor.u32 %v6030_v18, %v5697_v20  ;;  %v6062_v25 = vld [vmem:[%s13525_s1 + $0x1cc] sm:$0xf] }
  0x37   :  { %943 = vmatmul.bf16.vlgmr.msra.gmra.mxu3 %v6764_v37  ;;  %1202 = vmatpush.bf16.msrb.mxu2 %v5716_v63  ;;  %14055 = vst [vmem:[#allocation22_spill] sm:$0xff] %v6888_v15  ;;  %v5824_v24 = vor.u32 %v6064_v22, %v5823_v21  ;;  %v5825_v26 = vld [vmem:[%s13525_s1 + $0x1d8] sm:$0xf0]  ;;  %v5511_v28 = vld [vmem:[%s13524_s0 + $0x60] sm:$0xf] }
  0x38   :  { %1291 = vmatpush.bf16.msrb.mxu3 %v5844_v3  ;;  %v5828_v27 = vor.u32 %v6062_v25, %v5825_v26  ;;  %v5986_v29 = vld [vmem:[%s13524_s0 + $0x64] sm:$0xf0]  ;;  %v5985_v30 = vld [vmem:[%s13524_s0 + $0x64] sm:$0xf]  ;;  %v5513_v31 = vld [vmem:[%s13524_s0 + $0x68] sm:$0xf0] }
  0x39   :  { %1025 = vmatpush.bf16.msrb.mxu0 %v5696_v19  ;;  %v6930_v32 = vor.u32 %v5986_v29, %v5511_v28  ;;  %v6932_v33 = vor.u32 %v5985_v30, %v5513_v31  ;;  %v5519_v34 = vld [vmem:[%s13524_s0 + $0x70] sm:$0xf]  ;;  %v5988_v35 = vld [vmem:[%s13524_s0 + $0x74] sm:$0xf0]  ;;  %v5987_v38 = vld [vmem:[%s13524_s0 + $0x74] sm:$0xf] }
  0x3a   :  { %1114 = vmatpush.bf16.msrb.mxu1 %v5824_v24  ;;  %v5521_v39 = vld [vmem:[%s13524_s0 + $0x78] sm:$0xf0]  ;;  %v6950_v40 = vor.u32 %v5988_v35, %v5519_v34  ;;  %v5679_v44 = vld [vmem:[%s13525_s1 + $0xa8] sm:$0xf]  ;;  %v6028_v45 = vld [vmem:[%s13525_s1 + $0xb4] sm:$0xf0] }
  0x3b   :  { %1203 = vmatpush.bf16.msrb.mxu2 %v5700_v23  ;;  %14056 = vst [vmem:[#allocation23_spill] sm:$0xff] %v6930_v32  ;;  %v6952_v41 = vor.u32 %v5987_v38, %v5521_v39  ;;  %v6026_v46 = vld [vmem:[%s13525_s1 + $0xac] sm:$0xf]  ;;  %v5680_v47 = vor.u32 %v6028_v45, %v5679_v44  ;;  %v5681_v50 = vld [vmem:[%s13525_s1 + $0xb8] sm:$0xf0] }
  0x3c   :  { %1292 = vmatpush.bf16.msrb.mxu3 %v5828_v27  ;;  %14057 = vst [vmem:[#allocation24_spill] sm:$0xff] %v6932_v33  ;;  %v5684_v51 = vor.u32 %v6026_v46, %v5681_v50  ;;  %v178_v52 = vld [vmem:[#allocation2] sm:$0xf]  ;;  %v5807_v53 = vld [vmem:[%s13525_s1 + $0x1a8] sm:$0xf] }
  0x3d   :  { %14058 = vst [vmem:[#allocation25_spill] sm:$0xff] %v6950_v40  ;;  %1026 = vmatpush.bf16.msrb.mxu0 %v5680_v47  ;;  %v6060_v56 = vld [vmem:[%s13525_s1 + $0x1b4] sm:$0xf0]  ;;  %v6058_v57 = vld [vmem:[%s13525_s1 + $0x1ac] sm:$0xf]  ;;  %v6988_v63 = vperm.slane %v178_v52, 0 }
  0x3e   :  { %14059 = vst [vmem:[#allocation26_spill] sm:$0xff] %v6952_v41  ;;  %v5808_v58 = vor.u32 %v6060_v56, %v5807_v53  ;;  %v5809_v59 = vld [vmem:[%s13525_s1 + $0x1b8] sm:$0xf0]  ;;  %v5527_v60 = vld [vmem:[%s13524_s0 + $0x80] sm:$0xf]  ;;  %v7005_v10 = vperm.slane %v178_v52, 1 }
  0x3f   :  { %1204 = vmatpush.bf16.msrb.mxu2 %v5684_v51  ;;  %v5990_v61 = vld [vmem:[%s13524_s0 + $0x84] sm:$0xf0]  ;;  %v5812_v62 = vor.u32 %v6058_v57, %v5809_v59  ;;  %v5989_v0 = vld [vmem:[%s13524_s0 + $0x84] sm:$0xf]  ;;  %v5529_v1 = vld [vmem:[%s13524_s0 + $0x88] sm:$0xf0] }
  0x40   :  { %1115 = vmatpush.bf16.msrb.mxu1 %v5808_v58  ;;  %v6996_v2 = vor.u32 %v5990_v61, %v5527_v60  ;;  %v6998_v4 = vor.u32 %v5989_v0, %v5529_v1  ;;  %v5535_v22 = vld [vmem:[%s13524_s0 + $0x90] sm:$0xf]  ;;  %v5992_v23 = vld [vmem:[%s13524_s0 + $0x94] sm:$0xf0]  ;;  %v5991_v24 = vld [vmem:[%s13524_s0 + $0x94] sm:$0xf] }
  0x41   :  { %1293 = vmatpush.bf16.msrb.mxu3 %v5812_v62  ;;  %v5537_v25 = vld [vmem:[%s13524_s0 + $0x98] sm:$0xf0]  ;;  %v7032_v27 = vor.u32 %v5992_v23, %v5535_v22  ;;  %v5663_v45 = vld [vmem:[%s13525_s1 + $0x88] sm:$0xf]  ;;  %v6024_v46 = vld [vmem:[%s13525_s1 + $0x94] sm:$0xf0] }
  0x42   :  { %14060 = vst [vmem:[#allocation27_spill] sm:$0xff] %v6996_v2  ;;  %v7035_v31 = vor.u32 %v5991_v24, %v5537_v25  ;;  %v6022_v47 = vld [vmem:[%s13525_s1 + $0x8c] sm:$0xf]  ;;  %v5664_v50 = vor.u32 %v6024_v46, %v5663_v45  ;;  %v5665_v51 = vld [vmem:[%s13525_s1 + $0x98] sm:$0xf0] }
  0x43   :  { %14061 = vst [vmem:[#allocation28_spill] sm:$0xff] %v6998_v4  ;;  %v5668_v52 = vor.u32 %v6022_v47, %v5665_v51  ;;  %v5791_v53 = vld [vmem:[%s13525_s1 + $0x188] sm:$0xf]  ;;  %v6056_v56 = vld [vmem:[%s13525_s1 + $0x194] sm:$0xf0] }
  0x44   :  { %681 = vmatmul.bf16.gmra.mxu0 %v6782_v42  ;;  %14062 = vst [vmem:[#allocation29_spill] sm:$0xff] %v7032_v27  ;;  %v6054_v57 = vld [vmem:[%s13525_s1 + $0x18c] sm:$0xf]  ;;  %v5792_v59 = vor.u32 %v6056_v56, %v5791_v53  ;;  %v5793_v60 = vld [vmem:[%s13525_s1 + $0x198] sm:$0xf0] }
  0x45   :  { %770 = vmatmul.bf16.gmra.mxu1 %v6784_v43  ;;  %14063 = vst [vmem:[#allocation30_spill] sm:$0xff] %v7035_v31  ;;  %1027 = vmatpush.bf16.msrb.mxu0 %v5664_v50  ;;  %v5796_v0 = vor.u32 %v6054_v57, %v5793_v60  ;;  %v5551_v53 = vld [vmem:[%s13524_s0 + $0xb0] sm:$0xf]  ;;  %v5996_v56 = vld [vmem:[%s13524_s0 + $0xb4] sm:$0xf0] }
  0x46   :  { %859 = vmatmul.bf16.gmra.mxu2 %v6782_v42  ;;  %1116 = vmatpush.bf16.msrb.mxu1 %v5792_v59  ;;  %v5995_v57 = vld [vmem:[%s13524_s0 + $0xb4] sm:$0xf] }
  0x47   :  { %948 = vmatmul.bf16.gmra.mxu3 %v6784_v43  ;;  %1205 = vmatpush.bf16.msrb.mxu2 %v5668_v52 }
  0x48   :  { %1294 = vmatpush.bf16.msrb.mxu3 %v5796_v0 }
  0x54   :  { %686 = vmatmul.bf16.gmra.mxu0 %v6802_v48 }
  0x55   :  { %775 = vmatmul.bf16.gmra.mxu1 %v6804_v49 }
  0x56   :  { %864 = vmatmul.bf16.gmra.mxu2 %v6802_v48 }
  0x57   :  { %953 = vmatmul.bf16.gmra.mxu3 %v6804_v49 }
  0x64   :  { %691 = vmatmul.bf16.gmra.mxu0 %v6822_v54 }
  0x65   :  { %780 = vmatmul.bf16.gmra.mxu1 %v6824_v55 }
  0x66   :  { %869 = vmatmul.bf16.gmra.mxu2 %v6822_v54 }
  0x67   :  { %958 = vmatmul.bf16.gmra.mxu3 %v6824_v55 }
  0x74   :  { %696 = vmatmul.bf16.gmra.mxu0 %v6866_v8 }
  0x75   :  { %785 = vmatmul.bf16.gmra.mxu1 %v6868_v9 }
  0x76   :  { %874 = vmatmul.bf16.gmra.mxu2 %v6866_v8 }
  0x77   :  { %963 = vmatmul.bf16.gmra.mxu3 %v6868_v9 }
  0x84   :  { %701 = vmatmul.bf16.gmra.mxu0 %v6886_v14 }
  0x85   :  { %790 = vmatmul.bf16.gmra.mxu1 %v6888_v15 }
  0x86   :  { %879 = vmatmul.bf16.gmra.mxu2 %v6886_v14 }
  0x87   :  { %968 = vmatmul.bf16.gmra.mxu3 %v6888_v15 }
  0x94   :  { %706 = vmatmul.bf16.gmra.mxu0 %v6930_v32 }
  0x95   :  { %795 = vmatmul.bf16.gmra.mxu1 %v6932_v33 }
  0x96   :  { %884 = vmatmul.bf16.gmra.mxu2 %v6930_v32 }
  0x97   :  { %973 = vmatmul.bf16.gmra.mxu3 %v6932_v33 }
  0xa4   :  { %711 = vmatmul.bf16.gmra.mxu0 %v6950_v40 }
  0xa5   :  { %800 = vmatmul.bf16.gmra.mxu1 %v6952_v41 }
  0xa6   :  { %889 = vmatmul.bf16.gmra.mxu2 %v6950_v40 }
  0xa7   :  { %978 = vmatmul.bf16.gmra.mxu3 %v6952_v41 }
  0xb1   :  { %v677_v3 = vpop.f32.mrf.mxu0 }
  0xb2   :  { %v678_v5 = vadd.f32 %v677_v3, %v6988_v63  ;;  %v766_v6 = vpop.f32.mrf.mxu1 }
  0xb4   :  { %v7001_v7 = vadd.f32 %v766_v6, %v678_v5  ;;  %716 = vmatmul.bf16.gmra.mxu0 %v6996_v2 }
  0xb5   :  { %805 = vmatmul.bf16.gmra.mxu1 %v6998_v4 }
  0xb6   :  { %894 = vmatmul.bf16.gmra.mxu2 %v6996_v2  ;;  %1380 = vadd.xlane.f32.xlu0 %v7001_v7  ;;  %v1444_v11 = vmul.f32 %v7001_v7, %v7001_v7 }
  0xb7   :  { %983 = vmatmul.bf16.gmra.mxu3 %v6998_v4 }
  0xb8   :  { %1476 = vadd.xlane.f32.xlu2 %v1444_v11 }
  0xb9   :  { %v855_v12 = vpop.f32.mrf.mxu2  ;;  %v679_v17 = vpop.f32.mrf.mxu0 }
  0xba   :  { %v856_v13 = vadd.f32 %v855_v12, %v7005_v10  ;;  %v944_v16 = vpop.f32.mrf.mxu3  ;;  %v680_v18 = vadd.f32 %v679_v17, %v6988_v63  ;;  %v768_v19 = vpop.f32.mrf.mxu1  ;;  %v5994_v17 = vld [vmem:[%s13524_s0 + $0xa4] sm:$0xf0] }
  0xbc   :  { %v7014_v20 = vadd.f32 %v944_v16, %v856_v13  ;;  %v7016_v21 = vadd.f32 %v768_v19, %v680_v18  ;;  %v5543_v16 = vld [vmem:[%s13524_s0 + $0xa0] sm:$0xf]  ;;  %v5993_v18 = vld [vmem:[%s13524_s0 + $0xa4] sm:$0xf]  ;;  %v5545_v19 = vld [vmem:[%s13524_s0 + $0xa8] sm:$0xf0] }
  0xbd   :  { %v7096_v22 = vor.u32 %v5994_v17, %v5543_v16  ;;  %v6018_v16 = vld [vmem:[%s13525_s1 + $0x6c] sm:$0xf] }
  0xbe   :  { %2116 = vadd.xlane.f32.xlu1 %v7014_v20  ;;  %1382 = vadd.xlane.f32.xlu0 %v7016_v21  ;;  %v2180_v44 = vmul.f32 %v7014_v20, %v7014_v20  ;;  %v1445_v11 = vmul.f32 %v7016_v21, %v7016_v21 }
  0xbf   :  { %14065 = vst [vmem:[#allocation32_spill] sm:$0xff] %v7096_v22 }
  0xc1   :  { %v857_v26 = vpop.f32.mrf.mxu2  ;;  %v682_v30 = vpop.f32.mrf.mxu0 }
  0xc2   :  { %v858_v28 = vadd.f32 %v857_v26, %v7005_v10  ;;  %v946_v29 = vpop.f32.mrf.mxu3  ;;  %v683_v34 = vadd.f32 %v682_v30, %v6988_v63  ;;  %v771_v35 = vpop.f32.mrf.mxu1  ;;  %v7100_v26 = vor.u32 %v5993_v18, %v5545_v19  ;;  %v5649_v18 = vld [vmem:[%s13525_s1 + $0x78] sm:$0xf0] }
  0xc3   :  { %v5652_v19 = vor.u32 %v6018_v16, %v5649_v18 }
  0xc4   :  { %v7038_v38 = vadd.f32 %v946_v29, %v858_v28  ;;  %v7040_v39 = vadd.f32 %v771_v35, %v683_v34  ;;  %721 = vmatmul.bf16.gmra.mxu0 %v7032_v27  ;;  %14067 = vst [vmem:[#allocation34_spill] sm:$0xff] %v7100_v26 }
  0xc5   :  { %810 = vmatmul.bf16.gmra.mxu1 %v7035_v31  ;;  %1206 = vmatpush.bf16.msrb.mxu2 %v5652_v19 }
  0xc6   :  { %14064 = vst [vmem:[#allocation31_spill] sm:$0xff] %v7040_v39  ;;  %2118 = vadd.xlane.f32.xlu2 %v7038_v38  ;;  %1384 = vadd.xlane.f32.xlu1 %v7040_v39  ;;  %v2181_v6 = vmul.f32 %v7038_v38, %v7038_v38  ;;  %v1446_v30 = vmul.f32 %v7040_v39, %v7040_v39 }
  0xc7   :  { %2212 = vadd.xlane.f32.xlu0 %v2180_v44  ;;  %899 = vmatmul.bf16.gmra.mxu2 %v7032_v27 }
  0xc8   :  { %988 = vmatmul.bf16.gmra.mxu3 %v7035_v31 }
  0xc9   :  { %v860_v58 = vpop.f32.mrf.mxu2  ;;  %v684_v62 = vpop.f32.mrf.mxu0 }
  0xca   :  { %v861_v61 = vadd.f32 %v860_v58, %v7005_v10  ;;  %v949_v1 = vpop.f32.mrf.mxu3  ;;  %v773_v3 = vpop.f32.mrf.mxu1  ;;  %v685_v12 = vadd.f32 %v684_v62, %v6988_v63  ;;  %v5553_v58 = vld [vmem:[%s13524_s0 + $0xb8] sm:$0xf0] }
  0xcb   :  { %v7136_v0 = vor.u32 %v5995_v57, %v5553_v58 }
  0xcc   :  { %v7075_v5 = vadd.f32 %v949_v1, %v861_v61  ;;  %v7098_v23 = vadd.f32 %v773_v3, %v685_v12  ;;  %v7134_v61 = vor.u32 %v5996_v56, %v5551_v53  ;;  %v5647_v12 = vld [vmem:[%s13525_s1 + $0x68] sm:$0xf] }
  0xcd   :  { %14071 = vst [vmem:[#allocation38_spill] sm:$0xff] %v7136_v0 }
  0xce   :  { %v2182_v13 = vmul.f32 %v7075_v5, %v7075_v5  ;;  %2214 = vadd.xlane.f32.xlu1 %v2181_v6  ;;  %14066 = vst [vmem:[#allocation33_spill] sm:$0xff] %v7098_v23  ;;  %v1447_v34 = vmul.f32 %v7098_v23, %v7098_v23 }
  0xcf   :  { %1478 = vadd.xlane.f32.xlu0 %v1445_v11  ;;  %14070 = vst [vmem:[#allocation37_spill] sm:$0xff] %v7134_v61 }
  0xd0   :  { %2216 = vadd.xlane.f32.xlu2 %v2182_v13  ;;  %v6020_v13 = vld [vmem:[%s13525_s1 + $0x74] sm:$0xf0] }
  0xd1   :  { %v862_v24 = vpop.f32.mrf.mxu2  ;;  %v687_v25 = vpop.f32.mrf.mxu0  ;;  %v5648_v17 = vor.u32 %v6020_v13, %v5647_v12 }
  0xd2   :  { %v776_v28 = vpop.f32.mrf.mxu1  ;;  %v863_v29 = vadd.f32 %v862_v24, %v7005_v10  ;;  %v951_v35 = vpop.f32.mrf.mxu3  ;;  %v688_v44 = vadd.f32 %v687_v25, %v6988_v63  ;;  %v5775_v24 = vld [vmem:[%s13525_s1 + $0x168] sm:$0xf]  ;;  %v6052_v25 = vld [vmem:[%s13525_s1 + $0x174] sm:$0xf0] }
  0xd3   :  { %1028 = vmatpush.bf16.msrb.mxu0 %v5648_v17 }
  0xd4   :  { %726 = vmatmul.bf16.gmra.mxu0 %v7096_v22  ;;  %v7112_v45 = vadd.f32 %v951_v35, %v863_v29  ;;  %v7115_v50 = vadd.f32 %v776_v28, %v688_v44  ;;  %v6050_v28 = vld [vmem:[%s13525_s1 + $0x16c] sm:$0xf] }
  0xd5   :  { %815 = vmatmul.bf16.gmra.mxu1 %v7100_v26 }
  0xd6   :  { %1480 = vadd.xlane.f32.xlu1 %v1446_v30  ;;  %14068 = vst [vmem:[#allocation35_spill] sm:$0xff] %v7112_v45  ;;  %v2183_v52 = vmul.f32 %v7112_v45, %v7112_v45  ;;  %v1448_v6 = vmul.f32 %v7115_v50, %v7115_v50  ;;  %v5776_v30 = vor.u32 %v6052_v25, %v5775_v24 }
  0xd7   :  { %2120 = vadd.xlane.f32.xlu0 %v7075_v5  ;;  %904 = vmatmul.bf16.gmra.mxu2 %v7096_v22  ;;  %14069 = vst [vmem:[#allocation36_spill] sm:$0xff] %v7115_v50 }
  0xd8   :  { %1482 = vadd.xlane.f32.xlu2 %v1447_v34  ;;  %993 = vmatmul.bf16.gmra.mxu3 %v7100_v26  ;;  %v5777_v34 = vld [vmem:[%s13525_s1 + $0x178] sm:$0xf0] }
  0xd9   :  { %v689_v46 = vpop.f32.mrf.mxu0  ;;  %v865_v51 = vpop.f32.mrf.mxu2  ;;  %1117 = vmatpush.bf16.msrb.mxu1 %v5776_v30 }
  0xda   :  { %v778_v47 = vpop.f32.mrf.mxu1  ;;  %v866_v59 = vadd.f32 %v865_v51, %v7005_v10  ;;  %v954_v60 = vpop.f32.mrf.mxu3  ;;  %v690_v35 = vadd.f32 %v689_v46, %v6988_v63  ;;  %v5998_v46 = vld [vmem:[%s13524_s0 + $0xc4] sm:$0xf0] }
  0xdc   :  { %v7138_v3 = vadd.f32 %v954_v60, %v866_v59  ;;  %v7178_v58 = vadd.f32 %v778_v47, %v690_v35  ;;  %v5559_v59 = vld [vmem:[%s13524_s0 + $0xc0] sm:$0xf]  ;;  %v5561_v47 = vld [vmem:[%s13524_s0 + $0xc8] sm:$0xf0] }
  0xdd   :  { %v7195_v12 = vor.u32 %v5998_v46, %v5559_v59  ;;  %v6000_v59 = vld [vmem:[%s13524_s0 + $0xd4] sm:$0xf0]  ;;  %v5999_v46 = vld [vmem:[%s13524_s0 + $0xd4] sm:$0xf] }
  0xde   :  { %1386 = vadd.xlane.f32.xlu1 %v7098_v23  ;;  %14072 = vst [vmem:[#allocation39_spill] sm:$0xff] %v7138_v3  ;;  %v2184_v57 = vmul.f32 %v7138_v3, %v7138_v3  ;;  %v1449_v24 = vmul.f32 %v7178_v58, %v7178_v58 }
  0xdf   :  { %2218 = vadd.xlane.f32.xlu0 %v2183_v52  ;;  %v5780_v52 = vor.u32 %v6050_v28, %v5777_v34  ;;  %14074 = vst [vmem:[#allocation41_spill] sm:$0xff] %v7178_v58 }
  0xe0   :  { %1388 = vadd.xlane.f32.xlu2 %v7115_v50  ;;  %14075 = vst [vmem:[#allocation42_spill] sm:$0xff] %v7195_v12 }
  0xe1   :  { %v692_v62 = vpop.f32.mrf.mxu0  ;;  %v867_v11 = vpop.f32.mrf.mxu2  ;;  %1295 = vmatpush.bf16.msrb.mxu3 %v5780_v52 }
  0xe2   :  { %v781_v1 = vpop.f32.mrf.mxu1  ;;  %v868_v29 = vadd.f32 %v867_v11, %v7005_v10  ;;  %v956_v44 = vpop.f32.mrf.mxu3  ;;  %v693_v60 = vadd.f32 %v692_v62, %v6988_v63 }
  0xe4   :  { %731 = vmatmul.bf16.gmra.mxu0 %v7134_v61  ;;  %v7174_v56 = vadd.f32 %v956_v44, %v868_v29  ;;  %v7199_v62 = vadd.f32 %v781_v1, %v693_v60  ;;  %v5569_v60 = vld [vmem:[%s13524_s0 + $0xd8] sm:$0xf0] }
  0xe5   :  { %820 = vmatmul.bf16.gmra.mxu1 %v7136_v0 }
  0xe6   :  { %2122 = vadd.xlane.f32.xlu1 %v7112_v45  ;;  %14073 = vst [vmem:[#allocation40_spill] sm:$0xff] %v7174_v56  ;;  %v2185_v25 = vmul.f32 %v7174_v56, %v7174_v56 }
  0xe7   :  { %1484 = vadd.xlane.f32.xlu0 %v1448_v6  ;;  %909 = vmatmul.bf16.gmra.mxu2 %v7134_v61  ;;  %v5997_v6 = vld [vmem:[%s13524_s0 + $0xc4] sm:$0xf]  ;;  %14077 = vst [vmem:[#allocation44_spill] sm:$0xff] %v7199_v62 }
  0xe8   :  { %2124 = vadd.xlane.f32.xlu2 %v7138_v3  ;;  %998 = vmatmul.bf16.gmra.mxu3 %v7136_v0  ;;  %v7197_v16 = vor.u32 %v5997_v6, %v5561_v47 }
  0xe9   :  { %v694_v51 = vpop.f32.mrf.mxu0  ;;  %v870_v11 = vpop.f32.mrf.mxu2 }
  0xea   :  { %v783_v53 = vpop.f32.mrf.mxu1  ;;  %14076 = vst [vmem:[#allocation43_spill] sm:$0xff] %v7197_v16  ;;  %v959_v18 = vpop.f32.mrf.mxu3  ;;  %v695_v19 = vadd.f32 %v694_v51, %v6988_v63  ;;  %v871_v28 = vadd.f32 %v870_v11, %v7005_v10 }
  0xec   :  { %v7211_v1 = vadd.f32 %v783_v53, %v695_v19  ;;  %v7216_v34 = vadd.f32 %v959_v18, %v871_v28  ;;  %v5567_v53 = vld [vmem:[%s13524_s0 + $0xd0] sm:$0xf]  ;;  %v7244_v18 = vor.u32 %v5999_v46, %v5569_v60 }
  0xed   :  { %v7240_v47 = vor.u32 %v6000_v59, %v5567_v53  ;;  %v5633_v59 = vld [vmem:[%s13525_s1 + $0x58] sm:$0xf0] }
  0xee   :  { %2220 = vadd.xlane.f32.xlu1 %v2184_v57  ;;  %14078 = vst [vmem:[#allocation45_spill] sm:$0xff] %v7211_v1  ;;  %v1451_v51 = vmul.f32 %v7211_v1, %v7211_v1  ;;  %v1450_v57 = vmul.f32 %v7199_v62, %v7199_v62 }
  0xef   :  { %2126 = vadd.xlane.f32.xlu0 %v7174_v56  ;;  %14079 = vst [vmem:[#allocation46_spill] sm:$0xff] %v7216_v34 }
  0xf0   :  { %1390 = vadd.xlane.f32.xlu2 %v7178_v58  ;;  %14081 = vst [vmem:[#allocation48_spill] sm:$0xff] %v7240_v47 }
  0xf1   :  { %v697_v13 = vpop.f32.mrf.mxu0  ;;  %v872_v30 = vpop.f32.mrf.mxu2  ;;  %14082 = vst [vmem:[#allocation49_spill] sm:$0xff] %v7244_v18 }
  0xf2   :  { %v786_v17 = vpop.f32.mrf.mxu1  ;;  %v873_v44 = vadd.f32 %v872_v30, %v7005_v10  ;;  %v961_v52 = vpop.f32.mrf.mxu3  ;;  %v698_v19 = vadd.f32 %v697_v13, %v6988_v63  ;;  %v2186_v30 = vmul.f32 %v7216_v34, %v7216_v34  ;;  %v6016_v13 = vld [vmem:[%s13525_s1 + $0x54] sm:$0xf0] }
  0xf4   :  { %736 = vmatmul.bf16.gmra.mxu0 %v7195_v12  ;;  %v7238_v6 = vadd.f32 %v961_v52, %v873_v44  ;;  %v5631_v44 = vld [vmem:[%s13525_s1 + $0x48] sm:$0xf]  ;;  %v7264_v52 = vadd.f32 %v786_v17, %v698_v19  ;;  %v6048_v17 = vld [vmem:[%s13525_s1 + $0x154] sm:$0xf0]  ;;  %v6046_v19 = vld [vmem:[%s13525_s1 + $0x14c] sm:$0xf] }
  0xf5   :  { %825 = vmatmul.bf16.gmra.mxu1 %v7197_v16  ;;  %v5632_v53 = vor.u32 %v6016_v13, %v5631_v44 }
  0xf6   :  { %1486 = vadd.xlane.f32.xlu1 %v1449_v24  ;;  %14080 = vst [vmem:[#allocation47_spill] sm:$0xff] %v7238_v6  ;;  %v2187_v28 = vmul.f32 %v7238_v6, %v7238_v6 }
  0xf7   :  { %1392 = vadd.xlane.f32.xlu0 %v7199_v62  ;;  %914 = vmatmul.bf16.gmra.mxu2 %v7195_v12  ;;  %14083 = vst [vmem:[#allocation50_spill] sm:$0xff] %v7264_v52  ;;  %v6008_v12 = vld [vmem:[%s13525_s1 + $0x14] sm:$0xf0] }
  0xf8   :  { %2222 = vadd.xlane.f32.xlu2 %v2185_v25  ;;  %1003 = vmatmul.bf16.gmra.mxu3 %v7197_v16  ;;  %v5759_v16 = vld [vmem:[%s13525_s1 + $0x148] sm:$0xf] }
  0xf9   :  { %v7214_v29 = vpop.f32.mrf.mxu0  ;;  %v875_v25 = vpop.f32.mrf.mxu2  ;;  %1029 = vmatpush.bf16.msrb.mxu0 %v5632_v53  ;;  %v5615_v53 = vld [vmem:[%s13525_s1 + $0x28] sm:$0xf] }
  0xfa   :  { %v7218_v35 = vpop.f32.mrf.mxu1  ;;  %v964_v46 = vpop.f32.mrf.mxu3 }
  0xfe   :  { %2128 = vadd.xlane.f32.xlu1 %v7216_v34 }
  0xff   :  { %1490 = vadd.xlane.f32.xlu0 %v1451_v51  ;;  %v6014_v51 = vld [vmem:[%s13525_s1 + $0x4c] sm:$0xf] }
 0x100   :  { %1488 = vadd.xlane.f32.xlu2 %v1450_v57  ;;  %v876_v57 = vadd.f32 %v875_v25, %v7005_v10  ;;  %v5636_v60 = vor.u32 %v6014_v51, %v5633_v59  ;;  %v5760_v25 = vor.u32 %v6048_v17, %v5759_v16  ;;  %v1452_v59 = vmul.f32 %v7264_v52, %v7264_v52  ;;  %v5575_v16 = vld [vmem:[%s13524_s0 + $0xe0] sm:$0xf] }
 0x101   :  { %v7242_v11 = vpop.f32.mrf.mxu0 }
 0x102   :  { %v7247_v24 = vpop.f32.mrf.mxu1  ;;  %1207 = vmatpush.bf16.msrb.mxu2 %v5636_v60  ;;  %v7287_v13 = vadd.f32 %v964_v46, %v876_v57  ;;  %1118 = vmatpush.bf16.msrb.mxu1 %v5760_v25  ;;  %v6012_v57 = vld [vmem:[%s13525_s1 + $0x34] sm:$0xf0]  ;;  %v877_v46 = vpop.f32.mrf.mxu2  ;;  %v6002_v60 = vld [vmem:[%s13524_s0 + $0xe4] sm:$0xf0] }
 0x103   :  { %v5616_v17 = vor.u32 %v6012_v57, %v5615_v53  ;;  %v6044_v25 = vld [vmem:[%s13525_s1 + $0x134] sm:$0xf0]  ;;  %v700_v57 = vadd.f32 %v7214_v29, %v6988_v63 }
 0x104   :  { %741 = vmatmul.bf16.gmra.mxu0 %v7240_v47  ;;  %14084 = vst [vmem:[#allocation51_spill] sm:$0xff] %v7287_v13 }
 0x105   :  { %830 = vmatmul.bf16.gmra.mxu1 %v7244_v18  ;;  %1030 = vmatpush.bf16.msrb.mxu0 %v5616_v17  ;;  %v5727_v17 = vld [vmem:[%s13525_s1 + $0x108] sm:$0xf]  ;;  %v7339_v0 = vadd.f32 %v7218_v35, %v700_v57  ;;  %v5583_v57 = vld [vmem:[%s13524_s0 + $0xf0] sm:$0xf] }
 0x106   :  { %1394 = vadd.xlane.f32.xlu1 %v7211_v1 }
 0x107   :  { %2226 = vadd.xlane.f32.xlu0 %v2187_v28  ;;  %919 = vmatmul.bf16.gmra.mxu2 %v7240_v47  ;;  %v5761_v28 = vld [vmem:[%s13525_s1 + $0x158] sm:$0xf0]  ;;  %v5599_v47 = vld [vmem:[%s13525_s1 + $0x8] sm:$0xf]  ;;  %14087 = vst [vmem:[#allocation54_spill] sm:$0xff] %v7339_v0 }
 0x108   :  { %2224 = vadd.xlane.f32.xlu2 %v2186_v30  ;;  %1008 = vmatmul.bf16.gmra.mxu3 %v7244_v18  ;;  %v5764_v44 = vor.u32 %v6046_v19, %v5761_v28  ;;  %v5743_v19 = vld [vmem:[%s13525_s1 + $0x128] sm:$0xf]  ;;  %v6001_v28 = vld [vmem:[%s13524_s0 + $0xe4] sm:$0xf]  ;;  %v878_v18 = vadd.f32 %v877_v46, %v7005_v10  ;;  %v5600_v46 = vor.u32 %v6008_v12, %v5599_v47 }
 0x109   :  { %v7285_v30 = vpop.f32.mrf.mxu0  ;;  %v5744_v53 = vor.u32 %v6044_v25, %v5743_v19  ;;  %v966_v19 = vpop.f32.mrf.mxu3  ;;  %v703_v12 = vadd.f32 %v7242_v11, %v6988_v63  ;;  %v1453_v11 = vmul.f32 %v7339_v0, %v7339_v0 }
 0x10a   :  { %v7289_v51 = vpop.f32.mrf.mxu1  ;;  %1296 = vmatpush.bf16.msrb.mxu3 %v5764_v44  ;;  %v5577_v44 = vld [vmem:[%s13524_s0 + $0xe8] sm:$0xf0]  ;;  %1031 = vmatpush.bf16.msrb.mxu0 %v5600_v46  ;;  %v7341_v61 = vadd.f32 %v966_v19, %v878_v18  ;;  %v5585_v46 = vld [vmem:[%s13524_s0 + $0xf8] sm:$0xf0] }
 0x10b   :  { %1119 = vmatpush.bf16.msrb.mxu1 %v5744_v53  ;;  %v7333_v29 = vor.u32 %v6001_v28, %v5577_v44  ;;  %v7353_v47 = vadd.f32 %v7247_v24, %v703_v12  ;;  %v880_v28 = vpop.f32.mrf.mxu2  ;;  %v2188_v44 = vmul.f32 %v7287_v13, %v7287_v13  ;;  %v6003_v24 = vld [vmem:[%s13524_s0 + $0xf4] sm:$0xf] }
 0x10c   :  { %14088 = vst [vmem:[#allocation55_spill] sm:$0xff] %v7341_v61  ;;  %v2189_v26 = vmul.f32 %v7341_v61, %v7341_v61 }
 0x10d   :  { %14086 = vst [vmem:[#allocation53_spill] sm:$0xff] %v7333_v29  ;;  %v1454_v22 = vmul.f32 %v7353_v47, %v7353_v47 }
 0x10e   :  { %1492 = vadd.xlane.f32.xlu1 %v1452_v59  ;;  %v7322_v59 = vor.u32 %v6002_v60, %v5575_v16  ;;  %v6040_v16 = vld [vmem:[%s13525_s1 + $0x114] sm:$0xf0]  ;;  %14089 = vst [vmem:[#allocation56_spill] sm:$0xff] %v7353_v47 }
 0x10f   :  { %2132 = vadd.xlane.f32.xlu0 %v7287_v13  ;;  %v5728_v53 = vor.u32 %v6040_v16, %v5727_v17  ;;  %v6004_v17 = vld [vmem:[%s13524_s0 + $0xf4] sm:$0xf0]  ;;  %v881_v16 = vadd.f32 %v880_v28, %v7005_v10 }
 0x110   :  { %2130 = vadd.xlane.f32.xlu2 %v7238_v6  ;;  %14085 = vst [vmem:[#allocation52_spill] sm:$0xff] %v7322_v59 }
 0x111   :  { %v707_v25 = vpop.f32.mrf.mxu0  ;;  %1120 = vmatpush.bf16.msrb.mxu1 %v5728_v53  ;;  %v969_v19 = vpop.f32.mrf.mxu3  ;;  %v7373_v53 = vor.u32 %v6004_v17, %v5583_v57  ;;  %v705_v17 = vadd.f32 %v7285_v30, %v6988_v63 }
 0x112   :  { %v796_v60 = vpop.f32.mrf.mxu1 }
 0x113   :  { %14090 = vst [vmem:[#allocation57_spill] sm:$0xff] %v7373_v53  ;;  %v882_v28 = vpop.f32.mrf.mxu2 }
 0x114   :  { %746 = vmatmul.bf16.gmra.mxu0 %v7322_v59 }
 0x115   :  { %835 = vmatmul.bf16.gmra.mxu1 %v7333_v29 }
 0x116   :  { %2134 = vadd.xlane.f32.xlu1 %v7341_v61 }
 0x117   :  { %1398 = vadd.xlane.f32.xlu0 %v7339_v0  ;;  %924 = vmatmul.bf16.gmra.mxu2 %v7322_v59 }
 0x118   :  { %1396 = vadd.xlane.f32.xlu2 %v7264_v52  ;;  %1013 = vmatmul.bf16.gmra.mxu3 %v7333_v29  ;;  %v7377_v29 = vor.u32 %v6003_v24, %v5585_v46 }
 0x119   :  { %v709_v35 = vpop.f32.mrf.mxu0  ;;  %v971_v57 = vpop.f32.mrf.mxu3 }
 0x11a   :  { %v798_v18 = vpop.f32.mrf.mxu1  ;;  %14091 = vst [vmem:[#allocation58_spill] sm:$0xff] %v7377_v29 }
 0x11e   :  { %1400 = vadd.xlane.f32.xlu1 %v7353_v47 }
 0x11f   :  { %2228 = vadd.xlane.f32.xlu0 %v2188_v44  ;;  %v7381_v44 = vadd.f32 %v969_v19, %v881_v16 }
 0x120   :  { %1494 = vadd.xlane.f32.xlu2 %v1453_v11  ;;  %v883_v11 = vadd.f32 %v882_v28, %v7005_v10  ;;  %v708_v28 = vadd.f32 %v707_v25, %v6988_v63  ;;  %v710_v25 = vadd.f32 %v709_v35, %v6988_v63 }
 0x121   :  { %v7375_v12 = vpop.f32.mrf.mxu0  ;;  %14092 = vst [vmem:[#allocation59_spill] sm:$0xff] %v7381_v44 }
 0x122   :  { %v7379_v59 = vpop.f32.mrf.mxu1  ;;  %v7399_v16 = vadd.f32 %v971_v57, %v883_v11  ;;  %v7415_v57 = vadd.f32 %v796_v60, %v708_v28  ;;  %v7428_v60 = vadd.f32 %v798_v18, %v710_v25 }
 0x124   :  { %751 = vmatmul.bf16.gmra.mxu0 %v7373_v53  ;;  %14093 = vst [vmem:[#allocation60_spill] sm:$0xff] %v7399_v16  ;;  %v2191_v31 = vmul.f32 %v7399_v16, %v7399_v16  ;;  %v1456_v25 = vmul.f32 %v7415_v57, %v7415_v57 }
 0x125   :  { %840 = vmatmul.bf16.gmra.mxu1 %v7377_v29  ;;  %14095 = vst [vmem:[#allocation62_spill] sm:$0xff] %v7415_v57 }
 0x126   :  { %2230 = vadd.xlane.f32.xlu1 %v2189_v26  ;;  %v7404_v26 = vadd.f32 %v7289_v51, %v705_v17  ;;  %v974_v51 = vpop.f32.mrf.mxu3  ;;  %14096 = vst [vmem:[#allocation63_spill] sm:$0xff] %v7428_v60 }
 0x127   :  { %1496 = vadd.xlane.f32.xlu0 %v1454_v22  ;;  %929 = vmatmul.bf16.gmra.mxu2 %v7373_v53  ;;  %v2190_v22 = vmul.f32 %v7381_v44, %v7381_v44 }
 0x128   :  { %2136 = vadd.xlane.f32.xlu2 %v7381_v44  ;;  %1018 = vmatmul.bf16.gmra.mxu3 %v7377_v29  ;;  %14094 = vst [vmem:[#allocation61_spill] sm:$0xff] %v7404_v26  ;;  %v885_v29 = vpop.f32.mrf.mxu2 }
 0x129   :  { %v7395_v19 = vpop.f32.mrf.mxu0  ;;  %v1381_v24 = vpop.xlane.xlu0 %1380  ;;  %v886_v27 = vadd.f32 %v885_v29, %v7005_v10 }
 0x12a   :  { %v7397_v46 = vpop.f32.mrf.mxu1  ;;  %v7443_v18 = vmul.f32 0.0078125, %v1381_v24  ;;  %v6042_v24 = vld [vmem:[%s13525_s1 + $0x12c] sm:$0xf] }
 0x12b   :  { %v1477_v17 = vpop.xlane.xlu2 %1476  ;;  %v7434_v4 = vadd.f32 %v974_v51, %v886_v27  ;;  %v6010_v27 = vld [vmem:[%s13525_s1 + $0x2c] sm:$0xf]  ;;  %v5617_v51 = vld [vmem:[%s13525_s1 + $0x38] sm:$0xf0] }
 0x12d   :  { %14097 = vst [vmem:[#allocation64_spill] sm:$0xff] %v7434_v4 }
 0x12e   :  { %2232 = vadd.xlane.f32.xlu1 %v2190_v22  ;;  %v1455_v22 = vmul.f32 %v7404_v26, %v7404_v26 }
 0x12f   :  { %2138 = vadd.xlane.f32.xlu0 %v7399_v16  ;;  %v5620_v16 = vor.u32 %v6010_v27, %v5617_v51 }
 0x130   :  { %1402 = vadd.xlane.f32.xlu2 %v7404_v26  ;;  %v887_v28 = vpop.f32.mrf.mxu2 }
 0x131   :  { %v7409_v30 = vpop.xlane.xlu1 %2116  ;;  %v7411_v53 = vpop.f32.mrf.mxu0  ;;  %v888_v29 = vadd.f32 %v887_v28, %v7005_v10  ;;  %1208 = vmatpush.bf16.msrb.mxu2 %v5620_v16 }
 0x132   :  { %v7413_v11 = vpop.xlane.xlu0 %1382  ;;  %v7417_v44 = vpop.f32.mrf.mxu1 }
 0x134   :  { %1032 = vmatmul.bf16.vlgmr.msrb.gmra.mxu0 %v6762_v36 }
 0x135   :  { %1121 = vmatmul.bf16.vlgmr.msrb.gmra.mxu1 %v6764_v37 }
 0x136   :  { %1498 = vadd.xlane.f32.xlu1 %v1455_v22  ;;  %v976_v22 = vpop.f32.mrf.mxu3 }
 0x137   :  { %1404 = vadd.xlane.f32.xlu0 %v7415_v57  ;;  %v7454_v28 = vadd.f32 %v976_v22, %v888_v29  ;;  %v1572_v57 = vmul.f32 0.0078125, %v1477_v17  ;;  %v713_v29 = vadd.f32 %v7375_v12, %v6988_v63 }
 0x138   :  { %2234 = vadd.xlane.f32.xlu2 %v2191_v31  ;;  %v1457_v31 = vmul.f32 %v7428_v60, %v7428_v60  ;;  %v890_v51 = vpop.f32.mrf.mxu2 }
 0x139   :  { %v7430_v35 = vpop.f32.mrf.mxu0  ;;  %v7432_v47 = vpop.xlane.xlu1 %1384  ;;  %14098 = vst [vmem:[#allocation65_spill] sm:$0xff] %v7454_v28  ;;  %v2193_v17 = vmul.f32 %v7454_v28, %v7454_v28  ;;  %v7479_v12 = vadd.f32 %v7379_v59, %v713_v29  ;;  %v891_v16 = vadd.f32 %v890_v51, %v7005_v10 }
 0x13a   :  { %v7436_v26 = vpop.f32.mrf.mxu1  ;;  %v2213_v52 = vpop.xlane.xlu0 %2212 }
 0x13b   :  { %v7438_v2 = vpop.xlane.xlu2 %2118  ;;  %14099 = vst [vmem:[#allocation66_spill] sm:$0xff] %v7479_v12  ;;  %v1458_v59 = vmul.f32 %v7479_v12, %v7479_v12 }
 0x13c   :  { %v7530_v33 = vmul.f32 0.0078125, %v7438_v2 }
 0x13e   :  { %2140 = vadd.xlane.f32.xlu1 %v7434_v4 }
 0x13f   :  { %1502 = vadd.xlane.f32.xlu0 %v1457_v31  ;;  %v5745_v31 = vld [vmem:[%s13525_s1 + $0x138] sm:$0xf0] }
 0x140   :  { %1500 = vadd.xlane.f32.xlu2 %v1456_v25  ;;  %v1604_v25 = vmul.f32 %v7443_v18, %v7443_v18  ;;  %v5748_v6 = vor.u32 %v6042_v24, %v5745_v31  ;;  %v2192_v24 = vmul.f32 %v7434_v4, %v7434_v4  ;;  %v979_v31 = vpop.f32.mrf.mxu3 }
 0x141   :  { %v7464_v0 = vpop.f32.mrf.mxu0  ;;  %v2215_v61 = vpop.xlane.xlu1 %2214 }
 0x142   :  { %v7468_v22 = vpop.f32.mrf.mxu1  ;;  %v1479_v27 = vpop.xlane.xlu0 %1478  ;;  %1297 = vmatpush.bf16.msrb.mxu3 %v5748_v6  ;;  %v1636_v41 = vsub.f32 %v1572_v57, %v1604_v25  ;;  %v7487_v57 = vadd.f32 %v979_v31, %v891_v16  ;;  %v7504_v16 = vmul.f32 0.0078125, %v7409_v30  ;;  %v2308_v31 = vmul.f32 0.0078125, %v2213_v52 }
 0x143   :  { %v7470_v13 = vpop.xlane.xlu2 %2216  ;;  %v718_v30 = vadd.f32 %v7411_v53, %v6988_v63  ;;  %v1573_v32 = vmul.f32 0.0078125, %v1479_v27 }
 0x144   :  { %1037 = vmatmul.bf16.gmra.mxu0 %v6782_v42  ;;  %v1668_v6 = vmax.f32 %v1636_v41, 0.0  ;;  %14100 = vst [vmem:[#allocation67_spill] sm:$0xff] %v7487_v57  ;;  %v715_v41 = vadd.f32 %v7395_v19, %v6988_v63  ;;  %v2194_v45 = vmul.f32 %v7487_v57, %v7487_v57 }
 0x145   :  { %1126 = vmatmul.bf16.gmra.mxu1 %v6784_v43 }
 0x146   :  { %1406 = vadd.xlane.f32.xlu1 %v7428_v60  ;;  %v7495_v51 = vadd.f32 1e-05, %v1668_v6  ;;  %v892_v60 = vpop.f32.mrf.mxu2 }
 0x147   :  { %2238 = vadd.xlane.f32.xlu0 %v2193_v17  ;;  %v893_v17 = vadd.f32 %v892_v60, %v7005_v10  ;;  %v7517_v60 = vadd.f32 %v7397_v46, %v715_v41  ;;  %v7534_v46 = vmul.f32 0.0078125, %v7413_v11  ;;  %v2309_v41 = vmul.f32 0.0078125, %v2215_v61 }
 0x148   :  { %2236 = vadd.xlane.f32.xlu2 %v2192_v24  ;;  %v981_v24 = vpop.f32.mrf.mxu3  ;;  %6109 = vrsqrt.f32 %v7495_v51  ;;  %v2341_v11 = vmul.f32 %v7530_v33, %v7530_v33  ;;  %vm1770_vm1 = vweird.f32 %v7495_v51 }
 0x149   :  { %v7483_v1 = vpop.f32.mrf.mxu0  ;;  %v7485_v40 = vpop.xlane.xlu1 %1480  ;;  %14102 = vst [vmem:[#allocation69_spill] sm:$0xff] %v7517_v60  ;;  %v7519_v58 = vadd.f32 %v981_v24, %v893_v17  ;;  %v1459_v27 = vmul.f32 %v7517_v60, %v7517_v60 }
 0x14a   :  { %v7489_v25 = vpop.f32.mrf.mxu1  ;;  %v2121_v4 = vpop.xlane.xlu0 %2120 }
 0x14b   :  { %v7493_v29 = vpop.xlane.xlu2 %1482  ;;  %14103 = vst [vmem:[#allocation70_spill] sm:$0xff] %v7519_v58 }
 0x14e   :  { %1504 = vadd.xlane.f32.xlu1 %v1458_v59  ;;  %v7527_v56 = vpop.eup %6109  ;;  %v895_v61 = vpop.f32.mrf.mxu2 }
 0x14f   :  { %2144 = vadd.xlane.f32.xlu0 %v7487_v57  ;;  %v1765_v53 = vmul.f32 %v7527_v56, %v7495_v51  ;;  %vm1771_vm0 = vweird.f32 %v7527_v56 }
 0x150   :  { %2142 = vadd.xlane.f32.xlu2 %v7454_v28  ;;  %v2340_v28 = vmul.f32 %v7504_v16, %v7504_v16  ;;  %vm7646_vm2 = vmor %vm1770_vm1, %vm1771_vm0 }
 0x151   :  { %v7506_v6 = vpop.f32.mrf.mxu0  ;;  %v1387_v34 = vpop.xlane.xlu1 %1386 }
 0x152   :  { %v7508_v59 = vpop.f32.mrf.mxu1  ;;  %v7510_v62 = vpop.xlane.xlu0 %2218  ;;  %v2372_v52 = vsub.f32 %v2308_v31, %v2340_v28  ;;  %v7541_v31 = vadd.f32 %v7417_v44, %v718_v30  ;;  %v2373_v44 = vsub.f32 %v2309_v41, %v2341_v11  ;;  %v6006_v30 = vld [vmem:[%s13525_s1 + $0xc] sm:$0xf]  ;;  %v5729_v41 = vld [vmem:[%s13525_s1 + $0x118] sm:$0xf0]  ;;  %v7573_v11 = vmul.f32 0.0078125, %v2121_v4 }
 0x153   :  { %14101 = vst [vmem:[#allocation68_spill] sm:$0xff] %v7508_v59  ;;  %v7514_v19 = vpop.xlane.xlu2 %1388 }
 0x154   :  { %1042 = vmatmul.bf16.gmra.mxu0 %v6802_v48  ;;  %v2404_v28 = vmax.f32 %v2372_v52, 0.0  ;;  %14105 = vst [vmem:[#allocation72_spill] sm:$0xff] %v7541_v31  ;;  %v1605_v52 = vmul.f32 %v7534_v46, %v7534_v46  ;;  %v984_v48 = vpop.f32.mrf.mxu3  ;;  %v2342_v4 = vmul.f32 %v7573_v11, %v7573_v11 }
 0x155   :  { %1131 = vmatmul.bf16.gmra.mxu1 %v6804_v49  ;;  %v1766_v49 = vmul.f32 %v7527_v56, %v1765_v53 }
 0x156   :  { %2146 = vadd.xlane.f32.xlu1 %v7519_v58  ;;  %v1637_v50 = vsub.f32 %v1573_v32, %v1605_v52  ;;  %v2405_v32 = vmax.f32 %v2373_v44, 0.0 }
 0x157   :  { %1410 = vadd.xlane.f32.xlu0 %v7517_v60  ;;  %v896_v60 = vadd.f32 %v895_v61, %v7005_v10  ;;  %v1767_v15 = vmul.f32 0.5, %v1766_v49  ;;  %v7587_v61 = vmul.f32 0.0078125, %v1387_v34  ;;  %v2195_v49 = vmul.f32 %v7519_v58, %v7519_v58 }
 0x158   :  { %1408 = vadd.xlane.f32.xlu2 %v7479_v12  ;;  %v1669_v14 = vmax.f32 %v1637_v50, 0.0  ;;  %v1460_v50 = vmul.f32 %v7541_v31, %v7541_v31 }
 0x159   :  { %v7536_v17 = vpop.f32.mrf.mxu0  ;;  %v2123_v24 = vpop.xlane.xlu1 %2122 }
 0x15a   :  { %14104 = vst [vmem:[#allocation71_spill] sm:$0xff] %v7536_v17  ;;  %v7543_v3 = vpop.f32.mrf.mxu1  ;;  %v7545_v2 = vpop.xlane.xlu0 %1484  ;;  %v7555_v17 = vadd.f32 1e-05, %v2404_v28  ;;  %v6038_v28 = vld [vmem:[%s13525_s1 + $0x10c] sm:$0xf] }
 0x15b   :  { %14106 = vst [vmem:[#allocation73_spill] sm:$0xff] %v7543_v3  ;;  %v7549_v12 = vpop.xlane.xlu2 %2124  ;;  %v5601_v3 = vld [vmem:[%s13525_s1 + $0x18] sm:$0xf0]  ;;  %v5732_v52 = vor.u32 %v6038_v28, %v5729_v41  ;;  %v7603_v34 = vadd.f32 1e-05, %v1669_v14  ;;  %v7608_v28 = vmul.f32 0.0078125, %v7432_v47  ;;  %v720_v14 = vadd.f32 %v7430_v35, %v6988_v63 }
 0x15c   :  { %v5604_v57 = vor.u32 %v6006_v30, %v5601_v3  ;;  %6111 = vrsqrt.f32 %v7555_v17  ;;  %v7589_v3 = vadd.f32 %v984_v48, %v896_v60  ;;  %v897_v30 = vpop.f32.mrf.mxu2  ;;  %v1768_v48 = vsub.f32 1.5, %v1767_v15  ;;  %v986_v15 = vpop.f32.mrf.mxu3 }
 0x15d   :  { %1298 = vmatpush.bf16.msrb.mxu3 %v5732_v52  ;;  %14109 = vst [vmem:[#allocation76_spill] sm:$0xff] %v7608_v28  ;;  %v1574_v47 = vmul.f32 0.0078125, %v7485_v40  ;;  %v1575_v52 = vmul.f32 0.0078125, %v7493_v29  ;;  %v1606_v40 = vmul.f32 %v7608_v28, %v7608_v28  ;;  %vm2506_vm3 = vweird.f32 %v7555_v17 }
 0x15e   :  { %1412 = vadd.xlane.f32.xlu1 %v7541_v31  ;;  %1209 = vmatpush.bf16.msrb.mxu2 %v5604_v57  ;;  %14108 = vst [vmem:[#allocation75_spill] sm:$0xff] %v7589_v3  ;;  %v2310_v57 = vmul.f32 0.0078125, %v7470_v13  ;;  %v7613_v13 = vmul.f32 0.0078125, %v2123_v24  ;;  %v1769_v24 = vmul.f32 %v7527_v56, %v1768_v48  ;;  %v2196_v58 = vmul.f32 %v7589_v3, %v7589_v3 }
 0x15f   :  { %2240 = vadd.xlane.f32.xlu0 %v2194_v45  ;;  %vm1780_vm7 = vweird.f32 %v7603_v34 }
 0x160   :  { %1506 = vadd.xlane.f32.xlu2 %v1459_v27  ;;  %v7598_v27 = vadd.f32 1e-05, %v2405_v32  ;;  %v2374_v41 = vsub.f32 %v2310_v57, %v2342_v4  ;;  %v1607_v32 = vmul.f32 %v7587_v61, %v7587_v61  ;;  %1299 = vmatmul.bf16.vlgmr.msrb.gmra.mxu3 %v6764_v37  ;;  %v2343_v48 = vmul.f32 %v7613_v13, %v7613_v13 }
 0x161   :  { %v7577_v53 = vpop.f32.mrf.mxu0  ;;  %v7579_v45 = vpop.xlane.xlu1 %2220  ;;  %1210 = vmatmul.bf16.vlgmr.msrb.gmra.mxu2 %v6762_v36  ;;  %v898_v36 = vadd.f32 %v897_v30, %v7005_v10  ;;  %v1773_v51 = vsel %vm7646_vm2, %v7527_v56, %v1769_v24  ;;  %v7668_v56 = vld [vmem:[#allocation7] sm:$0xf] }
 0x162   :  { %v7581_v23 = vpop.f32.mrf.mxu1  ;;  %v7583_v59 = vpop.xlane.xlu0 %2126  ;;  %6113 = vrsqrt.f32 %v7598_v27  ;;  %v2406_v29 = vmax.f32 %v2374_v41, 0.0  ;;  %v1639_v57 = vsub.f32 %v1575_v52, %v1607_v32  ;;  %v1638_v41 = vsub.f32 %v1574_v47, %v1606_v40  ;;  %v4324_v32 = vld [vmem:[#allocation5] sm:$0xf] }
 0x163   :  { %14107 = vst [vmem:[#allocation74_spill] sm:$0xff] %v7581_v23  ;;  %v7591_v44 = vpop.xlane.xlu2 %1390  ;;  %v7605_v60 = vpop.eup %6111  ;;  %6115 = vrsqrt.f32 %v7603_v34  ;;  %v7642_v31 = vadd.f32 %v986_v15, %v898_v36  ;;  %v723_v36 = vadd.f32 %v7464_v0, %v6988_v63  ;;  %v2311_v15 = vmul.f32 0.0078125, %v7510_v62 }
 0x164   :  { %1047 = vmatmul.bf16.gmra.mxu0 %v6822_v54  ;;  %v2501_v37 = vmul.f32 %v7605_v60, %v7555_v17  ;;  %v1671_v47 = vmax.f32 %v1639_v57, 0.0  ;;  %v989_v62 = vpop.f32.mrf.mxu3  ;;  %v1670_v40 = vmax.f32 %v1638_v41, 0.0  ;;  %vm2507_vm4 = vweird.f32 %v7605_v60 }
 0x165   :  { %1136 = vmatmul.bf16.gmra.mxu1 %v6824_v55  ;;  %14112 = vst [vmem:[#allocation79_spill] sm:$0xff] %v7642_v31  ;;  %v7651_v55 = vadd.f32 %v7436_v26, %v720_v14  ;;  %v1700_v26 = vsub.f32 %v7001_v7, %v7443_v18  ;;  %v7665_v14 = vadd.f32 1e-05, %v2406_v29  ;;  %v2375_v0 = vsub.f32 %v2311_v15, %v2343_v48  ;;  %vm7784_vm6 = vmor %vm2506_vm3, %vm2507_vm4 }
 0x166   :  { %2242 = vadd.xlane.f32.xlu1 %v2195_v49  ;;  %v2502_v52 = vmul.f32 %v7605_v60, %v2501_v37  ;;  %v7683_v57 = vadd.f32 %v7468_v22, %v723_v36  ;;  %v7697_v15 = vadd.f32 1e-05, %v1671_v47  ;;  %v725_v36 = vadd.f32 %v7483_v1, %v6988_v63 }
 0x167   :  { %1508 = vadd.xlane.f32.xlu0 %v1460_v50  ;;  %14115 = vst [vmem:[#allocation80_spill] sm:$0xff] %v7651_v55  ;;  %v2084_v37 = vmul.f32 %v1773_v51, %v1700_v26  ;;  %v7690_v51 = vperm.slane %v7668_v56, 0  ;;  %6117 = vrsqrt.f32 %v7665_v14  ;;  %v2407_v26 = vmax.f32 %v2375_v0, 0.0 }
 0x168   :  { %2148 = vadd.xlane.f32.xlu2 %v7589_v3  ;;  %v900_v3 = vpop.f32.mrf.mxu2  ;;  %v2503_v29 = vmul.f32 0.5, %v2502_v52  ;;  %14119 = vst [vmem:[#allocation84_spill] sm:$0xff] %v7683_v57  ;;  %v1461_v18 = vmul.f32 %v7651_v55, %v7651_v55  ;;  %v2197_v22 = vmul.f32 %v7642_v31, %v7642_v31  ;;  %v7718_v0 = vmul.f32 0.0078125, %v7514_v19 }
 0x169   :  { %v7622_v4 = vpop.f32.mrf.mxu0  ;;  %v7624_v49 = vpop.xlane.xlu1 %1486  ;;  %14121 = vst [vmem:[#allocation86_spill] sm:$0xff] %v7690_v51  ;;  %6119 = vrsqrt.f32 %v7697_v15  ;;  %vm2516_vm5 = vweird.f32 %v7598_v27  ;;  %vm2526_vm12 = vweird.f32 %v7665_v14  ;;  %vm1800_vm14 = vweird.f32 %v7697_v15 }
 0x16a   :  { %14110 = vst [vmem:[#allocation77_spill] sm:$0xff] %v7622_v4  ;;  %v7631_v35 = vpop.f32.mrf.mxu1  ;;  %v7633_v50 = vpop.xlane.xlu0 %1392  ;;  %v2504_v1 = vsub.f32 1.5, %v2503_v29  ;;  %v1608_v19 = vmul.f32 %v7718_v0, %v7718_v0  ;;  %v7742_v29 = vmul.f32 0.0078125, %v7549_v12 }
 0x16b   :  { %14111 = vst [vmem:[#allocation78_spill] sm:$0xff] %v7631_v35  ;;  %v7637_v30 = vpop.xlane.xlu2 %2222  ;;  %v7661_v4 = vpop.eup %6113  ;;  %v7674_v35 = vperm.slane %v4324_v32, 1 }
 0x16c   :  { %v7670_v24 = vpop.eup %6115  ;;  %v2511_v41 = vmul.f32 %v7661_v4, %v7598_v27  ;;  %14123 = vst [vmem:[#allocation88_spill] sm:$0xff] %v7718_v0  ;;  %vm2517_vm8 = vweird.f32 %v7661_v4 }
 0x16d   :  { %14117 = vst [vmem:[#allocation82_spill] sm:$0xff] %v7674_v35  ;;  %vm1781_vm9 = vweird.f32 %v7670_v24  ;;  %vm7856_vm10 = vmor %vm2516_vm5, %vm2517_vm8 }
 0x16e   :  { %2244 = vadd.xlane.f32.xlu1 %v2196_v58  ;;  %v7672_v58 = vperm.slane %v4324_v32, 0  ;;  %v1775_v32 = vmul.f32 %v7670_v24, %v7603_v34  ;;  %v2512_v47 = vmul.f32 %v7661_v4, %v2511_v41  ;;  %14125 = vst [vmem:[#allocation90_spill] sm:$0xff] %v7742_v29  ;;  %vm7872_vm11 = vmor %vm1780_vm7, %vm1781_vm9 }
 0x16f   :  { %2150 = vadd.xlane.f32.xlu0 %v7642_v31 }
 0x170   :  { %1414 = vadd.xlane.f32.xlu2 %v7651_v55  ;;  %14116 = vst [vmem:[#allocation81_spill] sm:$0xff] %v7672_v58  ;;  %v1576_v55 = vmul.f32 0.0078125, %v7545_v2  ;;  %v1776_v31 = vmul.f32 %v7670_v24, %v1775_v32  ;;  %v7734_v2 = vadd.f32 1e-05, %v2407_v26  ;;  %1304 = vmatmul.bf16.gmra.mxu3 %v6784_v43  ;;  %v2513_v12 = vmul.f32 0.5, %v2512_v47 }
 0x171   :  { %v7676_v23 = vpop.f32.mrf.mxu0  ;;  %v7678_v7 = vpop.xlane.xlu1 %2128  ;;  %1215 = vmatmul.bf16.gmra.mxu2 %v6782_v42  ;;  %v7730_v42 = vadd.f32 %v7489_v25, %v725_v36  ;;  %v2312_v25 = vmul.f32 0.0078125, %v7579_v45  ;;  %v2344_v45 = vmul.f32 %v7742_v29, %v7742_v29  ;;  %v14174_v29 = vld [vmem:[#allocation23_spill] sm:$0xff] }
 0x172   :  { %14118 = vst [vmem:[#allocation83_spill] sm:$0xff] %v7676_v23  ;;  %v7685_v54 = vpop.f32.mrf.mxu1  ;;  %v7687_v48 = vpop.xlane.xlu0 %1490  ;;  %v7711_v23 = vadd.f32 1e-05, %v1670_v40  ;;  %v1640_v36 = vsub.f32 %v1576_v55, %v1608_v19  ;;  %v1777_v39 = vmul.f32 0.5, %v1776_v31  ;;  %v1462_v19 = vmul.f32 %v7683_v57, %v7683_v57 }
 0x173   :  { %14120 = vst [vmem:[#allocation85_spill] sm:$0xff] %v7685_v54  ;;  %v7699_v52 = vpop.xlane.xlu2 %1488  ;;  %v4334_v54 = vmul.f32 %v7672_v58, %v2084_v37  ;;  %v901_v37 = vadd.f32 %v900_v3, %v7005_v10  ;;  %v902_v3 = vpop.f32.mrf.mxu2  ;;  %v2376_v47 = vsub.f32 %v2312_v25, %v2344_v45  ;;  %v7792_v25 = vmul.f32 0.0078125, %v7583_v59 }
 0x174   :  { %1052 = vmatmul.bf16.gmra.mxu0 %v6866_v8  ;;  %14122 = vst [vmem:[#allocation87_spill] sm:$0xff] %v7711_v23  ;;  %6121 = vrsqrt.f32 %v7711_v23  ;;  %vm2536_vm1 = vweird.f32 %v7734_v2 }
 0x175   :  { %1141 = vmatmul.bf16.gmra.mxu1 %v6868_v9  ;;  %14124 = vst [vmem:[#allocation89_spill] sm:$0xff] %v7730_v42  ;;  %v7750_v26 = vadd.f32 %v989_v62, %v901_v37  ;;  %v7757_v28 = vadd.f32 %v7690_v51, %v4334_v54  ;;  %v7762_v9 = vmul.f32 0.0078125, %v7591_v44  ;;  %6123 = vrsqrt.f32 %v7734_v2 }
 0x176   :  { %1510 = vadd.xlane.f32.xlu1 %v1461_v18  ;;  %v7737_v18 = vpop.eup %6117  ;;  %v903_v62 = vadd.f32 %v902_v3, %v7005_v10  ;;  %v1463_v54 = vmul.f32 %v7730_v42, %v7730_v42  ;;  %v1577_v37 = vmul.f32 0.0078125, %v7624_v49  ;;  %v1672_v44 = vmax.f32 %v1640_v36, 0.0  ;;  %14133 = vst [vmem:[#allocation96_spill] sm:$0xff] %v7792_v25 }
 0x177   :  { %1416 = vadd.xlane.f32.xlu0 %v7683_v57  ;;  %14127 = vst [vmem:[#allocation92_spill] sm:$0xff] %v7750_v26  ;;  %v2521_v55 = vmul.f32 %v7737_v18, %v7665_v14  ;;  %v7772_v31 = vpop.eup %6119  ;;  %v2514_v57 = vsub.f32 1.5, %v2513_v12  ;;  %v1778_v51 = vsub.f32 1.5, %v1777_v39  ;;  %vm2527_vm13 = vweird.f32 %v7737_v18 }
 0x178   :  { %2246 = vadd.xlane.f32.xlu2 %v2197_v22  ;;  %v2505_v22 = vmul.f32 %v7605_v60, %v2504_v1  ;;  %14129 = vst [vmem:[#allocation94_spill] sm:$0xff] %v7757_v28  ;;  %v991_v1 = vpop.f32.mrf.mxu3  ;;  %v1795_v36 = vmul.f32 %v7772_v31, %v7697_v15  ;;  %vm7954_vm15 = vmor %vm2526_vm12, %vm2527_vm13  ;;  %vm1801_vm0 = vweird.f32 %v7772_v31 }
 0x179   :  { %v7745_v41 = vpop.f32.mrf.mxu0  ;;  %v7747_v32 = vpop.xlane.xlu1 %1394  ;;  %14130 = vst [vmem:[#allocation95_spill] sm:$0xff] %v7762_v9  ;;  %v2522_v59 = vmul.f32 %v7737_v18, %v2521_v55  ;;  %v7807_v49 = vadd.f32 %v991_v1, %v903_v62  ;;  %v14137_v55 = vsub.f32 %v7014_v20, %v7504_v16  ;;  %v7822_v62 = vadd.f32 1e-05, %v1672_v44  ;;  %v14143_v20 = vld [vmem:[#allocation33_spill] sm:$0xff]  ;;  %vm7999_vm2 = vmor %vm1800_vm14, %vm1801_vm0 }
 0x17a   :  { %14126 = vst [vmem:[#allocation91_spill] sm:$0xff] %v7745_v41  ;;  %v7752_v43 = vpop.f32.mrf.mxu1  ;;  %v7754_v40 = vpop.xlane.xlu0 %2226  ;;  %v2509_v17 = vsel %vm7784_vm6, %v7605_v60, %v2505_v22  ;;  %v2408_v60 = vmax.f32 %v2376_v47, 0.0  ;;  %v2345_v1 = vmul.f32 %v7792_v25, %v7792_v25  ;;  %v1779_v28 = vmul.f32 %v7670_v24, %v1778_v51  ;;  %v14187_v25 = vld [vmem:[#allocation18_spill] sm:$0xff] }
 0x17b   :  { %14128 = vst [vmem:[#allocation93_spill] sm:$0xff] %v7752_v43  ;;  %v7764_v8 = vpop.xlane.xlu2 %2224  ;;  %v728_v43 = vadd.f32 %v7506_v6, %v6988_v63  ;;  %v7796_v45 = vpop.eup %6121  ;;  %v1609_v6 = vmul.f32 %v7762_v9, %v7762_v9  ;;  %v2820_v3 = vmul.f32 %v2509_v17, %v14137_v55  ;;  %v2523_v55 = vmul.f32 0.5, %v2522_v59  ;;  %v14147_v59 = vld [vmem:[#allocation15_spill] sm:$0xff] }
 0x17c   :  { %14134 = vst [vmem:[#allocation97_spill] sm:$0xff] %v7807_v49  ;;  %v905_v17 = vpop.f32.mrf.mxu2  ;;  %v1796_v41 = vmul.f32 %v7772_v31, %v1795_v36  ;;  %v2198_v16 = vmul.f32 %v7750_v26, %v7750_v26  ;;  %6125 = vrsqrt.f32 %v7822_v62  ;;  %vm1791_vm6 = vweird.f32 %v7796_v45 }
 0x17d   :  { %v1641_v22 = vsub.f32 %v1577_v37, %v1609_v6  ;;  %14138 = vst [vmem:[#allocation100_spill] sm:$0xff] %v7822_v62  ;;  %v2515_v6 = vmul.f32 %v7661_v4, %v2514_v57  ;;  %v2199_v57 = vmul.f32 %v7807_v49, %v7807_v49  ;;  %v4335_v36 = vmul.f32 %v7674_v35, %v2820_v3 }
 0x17e   :  { %2152 = vadd.xlane.f32.xlu1 %v7750_v26  ;;  %v2524_v34 = vsub.f32 1.5, %v2523_v55 }
 0x17f   :  { %1514 = vadd.xlane.f32.xlu0 %v1463_v54  ;;  %v2313_v54 = vmul.f32 0.0078125, %v7637_v30  ;;  %v1785_v30 = vmul.f32 %v7796_v45, %v7711_v23  ;;  %v2519_v3 = vsel %vm7856_vm10, %v7661_v4, %v2515_v6  ;;  %v1783_v4 = vsel %vm7872_vm11, %v7670_v24, %v1779_v28  ;;  %v14157_v28 = vld [vmem:[#allocation71_spill] sm:$0xff] }
 0x180   :  { %1512 = vadd.xlane.f32.xlu2 %v1462_v19  ;;  %v7815_v19 = vpop.eup %6123  ;;  %v994_v26 = vpop.f32.mrf.mxu3  ;;  %v1797_v6 = vmul.f32 0.5, %v1796_v41  ;;  %v730_v24 = vadd.f32 %v14157_v28, %v6988_v63 }
 0x181   :  { %v7811_v39 = vpop.f32.mrf.mxu0  ;;  %v7813_v12 = vpop.xlane.xlu1 %1492  ;;  %v2377_v23 = vsub.f32 %v2313_v54, %v2345_v1  ;;  %v2531_v51 = vmul.f32 %v7815_v19, %v7734_v2  ;;  %1220 = vmatmul.bf16.gmra.mxu2 %v14147_v59  ;;  %v906_v59 = vadd.f32 %v905_v17, %v7005_v10  ;;  %v14155_v1 = vld [vmem:[#allocation16_spill] sm:$0xff]  ;;  %vm2537_vm3 = vweird.f32 %v7815_v19 }
 0x182   :  { %14135 = vst [vmem:[#allocation98_spill] sm:$0xff] %v7811_v39  ;;  %v7826_v47 = vpop.f32.mrf.mxu1  ;;  %v7828_v37 = vpop.xlane.xlu0 %2132  ;;  %v14141_v39 = vld [vmem:[#allocation68_spill] sm:$0xff]  ;;  %1309 = vmatmul.bf16.gmra.mxu3 %v14155_v1  ;;  %vm8043_vm4 = vmor %vm2536_vm1, %vm2537_vm3 }
 0x183   :  { %14136 = vst [vmem:[#allocation99_spill] sm:$0xff] %v7813_v12  ;;  %v7833_v12 = vadd.f32 %v14141_v39, %v728_v43  ;;  %v7837_v44 = vpop.xlane.xlu2 %2130  ;;  %v7845_v43 = vadd.f32 1e-05, %v2408_v60  ;;  %v1673_v39 = vmax.f32 %v1641_v22, 0.0  ;;  %v1786_v60 = vmul.f32 %v7796_v45, %v1785_v30  ;;  %v7920_v22 = vpop.eup %6125 }
 0x184   :  { %14139 = vst [vmem:[#allocation101_spill] sm:$0xff] %v7826_v47  ;;  %v14144_v47 = vld [vmem:[#allocation21_spill] sm:$0xff]  ;;  %v7878_v30 = vmul.f32 0.0078125, %v7633_v50  ;;  %v2409_v54 = vmax.f32 %v2377_v23, 0.0  ;;  %v7900_v23 = vmul.f32 0.0078125, %v7747_v32  ;;  %v7916_v32 = vadd.f32 %v994_v26, %v906_v59  ;;  %v907_v26 = vpop.f32.mrf.mxu2 }
 0x185   :  { %14140 = vst [vmem:[#allocation102_spill] sm:$0xff] %v7828_v37  ;;  %1057 = vmatmul.bf16.gmra.mxu0 %v14144_v47  ;;  %v14146_v37 = vld [vmem:[#allocation22_spill] sm:$0xff]  ;;  %6127 = vrsqrt.f32 %v7845_v43  ;;  %v7890_v50 = vadd.f32 1e-05, %v1673_v39  ;;  %v1787_v0 = vmul.f32 0.5, %v1786_v60  ;;  %v14159_v60 = vsub.f32 %v7016_v21, %v7534_v46  ;;  %v14162_v59 = vld [vmem:[#allocation73_spill] sm:$0xff] }
 0x186   :  { %14142 = vst [vmem:[#allocation68_spill] sm:$0xff] %v7833_v12  ;;  %1146 = vmatmul.bf16.gmra.mxu1 %v14146_v37  ;;  %1418 = vadd.xlane.f32.xlu1 %v7730_v42  ;;  %v2532_v42 = vmul.f32 %v7815_v19, %v2531_v51  ;;  %v1464_v51 = vmul.f32 %v7833_v12, %v7833_v12  ;;  %v7924_v47 = vadd.f32 1e-05, %v2409_v54  ;;  %v1798_v21 = vsub.f32 1.5, %v1797_v6 }
 0x187   :  { %14145 = vst [vmem:[#allocation33_spill] sm:$0xff] %v7845_v43  ;;  %2250 = vadd.xlane.f32.xlu0 %v2199_v57  ;;  %v7882_v57 = vperm.slane %v7668_v56, 1  ;;  %v2085_v1 = vmul.f32 %v1783_v4, %v14159_v60  ;;  %v1610_v27 = vmul.f32 %v7878_v30, %v7878_v30  ;;  %v2525_v37 = vmul.f32 %v7737_v18, %v2524_v34 }
 0x188   :  { %14153 = vst [vmem:[#allocation15_spill] sm:$0xff] %v7878_v30  ;;  %2248 = vadd.xlane.f32.xlu2 %v2198_v16  ;;  %v1578_v16 = vmul.f32 0.0078125, %v7699_v52  ;;  %v14158_v52 = vsub.f32 %v7038_v38, %v7530_v33  ;;  %v2533_v38 = vmul.f32 0.5, %v2532_v42  ;;  %6129 = vrsqrt.f32 %v7890_v50 }
 0x189   :  { %14154 = vst [vmem:[#allocation103_spill] sm:$0xff] %v7882_v57  ;;  %v7893_v17 = vpop.f32.mrf.mxu0  ;;  %v7895_v56 = vpop.xlane.xlu1 %2134  ;;  %v7927_v33 = vadd.f32 %v7882_v57, %v4335_v36  ;;  %v7931_v4 = vadd.f32 %v14162_v59, %v730_v24  ;;  %v1611_v54 = vmul.f32 %v7900_v23, %v7900_v23  ;;  %v7943_v42 = vmul.f32 %v7672_v58, %v2085_v1 }
 0x18a   :  { %14156 = vst [vmem:[#allocation16_spill] sm:$0xff] %v7890_v50  ;;  %v7902_v41 = vpop.f32.mrf.mxu1  ;;  %v7904_v55 = vpop.xlane.xlu0 %1398  ;;  %v2821_v39 = vmul.f32 %v2519_v3, %v14158_v52  ;;  %v1642_v46 = vsub.f32 %v1578_v16, %v1610_v27  ;;  %v1788_v3 = vsub.f32 1.5, %v1787_v0  ;;  %v14164_v52 = vld [vmem:[#allocation35_spill] sm:$0xff]  ;;  %v1805_v0 = vmul.f32 %v7920_v22, %v7822_v62 }
 0x18b   :  { %14160 = vst [vmem:[#allocation71_spill] sm:$0xff] %v7916_v32  ;;  %v7918_v28 = vpop.xlane.xlu2 %1396  ;;  %v7937_v60 = vpop.eup %6127  ;;  %6131 = vrsqrt.f32 %v7924_v47  ;;  %v1579_v16 = vmul.f32 0.0078125, %v7687_v48  ;;  %v908_v24 = vadd.f32 %v907_v26, %v7005_v10  ;;  %v1799_v1 = vmul.f32 %v7772_v31, %v1798_v21 }
 0x18c   :  { %14161 = vst [vmem:[#allocation104_spill] sm:$0xff] %v7924_v47  ;;  %v7940_v36 = vmul.f32 %v7674_v35, %v2821_v39  ;;  %v2529_v39 = vsel %vm7954_vm15, %v7737_v18, %v2525_v37  ;;  %v2534_v14 = vsub.f32 1.5, %v2533_v38  ;;  %v1674_v27 = vmax.f32 %v1642_v46, 0.0  ;;  %v14182_v38 = vld [vmem:[#allocation77_spill] sm:$0xff] }
 0x18d   :  { %14163 = vst [vmem:[#allocation73_spill] sm:$0xff] %v7931_v4  ;;  %v2541_v48 = vmul.f32 %v7937_v60, %v7845_v43  ;;  %v7976_v26 = vmul.f32 0.0078125, %v7678_v7  ;;  %v1643_v62 = vsub.f32 %v1579_v16, %v1611_v54  ;;  %v1806_v21 = vmul.f32 %v7920_v22, %v1805_v0 }
 0x18e   :  { %1516 = vadd.xlane.f32.xlu1 %v1464_v51  ;;  %14165 = vst [vmem:[#allocation35_spill] sm:$0xff] %v7937_v60  ;;  %v996_v51 = vpop.f32.mrf.mxu3  ;;  %v7982_v37 = vpop.eup %6129  ;;  %v14170_v7 = vsub.f32 %v7075_v5, %v7573_v11  ;;  %v2314_v0 = vmul.f32 0.0078125, %v7764_v8  ;;  %v8005_v46 = vmul.f32 0.0078125, %v7837_v44  ;;  %v1803_v5 = vsel %vm7999_vm2, %v7772_v31, %v1799_v1  ;;  %v14177_v8 = vld [vmem:[#allocation17_spill] sm:$0xff] }
 0x18f   :  { %2156 = vadd.xlane.f32.xlu0 %v7916_v32  ;;  %14168 = vst [vmem:[#allocation105_spill] sm:$0xff] %v7976_v26  ;;  %v2535_v11 = vmul.f32 %v7815_v19, %v2534_v14  ;;  %v8015_v15 = vadd.f32 1e-05, %v1674_v27  ;;  %v2346_v31 = vmul.f32 %v7976_v26, %v7976_v26  ;;  %v1675_v1 = vmax.f32 %v1643_v62, 0.0  ;;  %v14179_v27 = vld [vmem:[#allocation74_spill] sm:$0xff] }
 0x190   :  { %2154 = vadd.xlane.f32.xlu2 %v7807_v49  ;;  %v7971_v49 = vmul.f32 %v7796_v45, %v1788_v3  ;;  %v733_v3 = vadd.f32 %v7577_v53, %v6988_v63  ;;  %v2822_v54 = vmul.f32 %v2529_v39, %v14170_v7  ;;  %v8007_v53 = vadd.f32 %v996_v51, %v908_v24  ;;  %v14176_v39 = vld [vmem:[#allocation24_spill] sm:$0xff] }
 0x191   :  { %v7966_v59 = vpop.f32.mrf.mxu0  ;;  %v7968_v34 = vpop.xlane.xlu1 %1400  ;;  %14175 = vst [vmem:[#allocation107_spill] sm:$0xff] %v8015_v15  ;;  %1225 = vmatmul.bf16.gmra.mxu2 %v14177_v8  ;;  %v2542_v24 = vmul.f32 %v7937_v60, %v2541_v48  ;;  %v1815_v51 = vmul.f32 %v7982_v37, %v7890_v50  ;;  %v1807_v14 = vmul.f32 0.5, %v1806_v21  ;;  %v14183_v48 = vsub.f32 %v14143_v20, %v7587_v61 }
 0x192   :  { %v7978_v6 = vpop.f32.mrf.mxu1  ;;  %v7980_v18 = vpop.xlane.xlu0 %2228  ;;  %14173 = vst [vmem:[#allocation106_spill] sm:$0xff] %v8007_v53  ;;  %v8028_v7 = vadd.f32 %v14179_v27, %v733_v3  ;;  %v2347_v8 = vmul.f32 %v8005_v46, %v8005_v46  ;;  %1314 = vmatmul.bf16.gmra.mxu3 %v14187_v25  ;;  %v8053_v61 = vmul.f32 %v7674_v35, %v2822_v54  ;;  %6133 = vrsqrt.f32 %v8015_v15 }
 0x193   :  { %v7990_v43 = vpop.xlane.xlu2 %1494  ;;  %v8019_v44 = vpop.eup %6131  ;;  %v2087_v62 = vmul.f32 %v1803_v5, %v14183_v48  ;;  %v2539_v2 = vsel %vm8043_vm4, %v7815_v19, %v2535_v11  ;;  %v1816_v48 = vmul.f32 %v7982_v37, %v1815_v51  ;;  %v8066_v25 = vadd.f32 1e-05, %v1675_v1  ;;  %v14190_v11 = vld [vmem:[#allocation78_spill] sm:$0xff]  ;;  %v14193_v51 = vld [vmem:[#allocation87_spill] sm:$0xff] }
 0x194   :  { %14178 = vst [vmem:[#allocation17_spill] sm:$0xff] %v8019_v44  ;;  %v2551_v20 = vmul.f32 %v8019_v44, %v7924_v47  ;;  %v2315_v54 = vmul.f32 0.0078125, %v7754_v40  ;;  %v1808_v19 = vsub.f32 1.5, %v1807_v14  ;;  %v8079_v47 = vmul.f32 0.0078125, %v7918_v28  ;;  %v14194_v1 = vld [vmem:[#allocation83_spill] sm:$0xff] }
 0x195   :  { %1062 = vmatmul.bf16.gmra.mxu0 %v14174_v29  ;;  %14180 = vst [vmem:[#allocation74_spill] sm:$0xff] %v8028_v7  ;;  %vm1790_vm5 = vweird.f32 %v14193_v51  ;;  %v8085_v40 = vmul.f32 %v7672_v58, %v2087_v62  ;;  %v738_v50 = vadd.f32 %v14194_v1, %v6988_v63  ;;  %v2200_v28 = vmul.f32 %v7916_v32, %v7916_v32  ;;  %v14196_v29 = vld [vmem:[#allocation91_spill] sm:$0xff] }
 0x196   :  { %1151 = vmatmul.bf16.gmra.mxu1 %v14176_v39  ;;  %2158 = vadd.xlane.f32.xlu1 %v8007_v53  ;;  %v735_v39 = vadd.f32 %v14182_v38, %v6988_v63  ;;  %v2378_v38 = vsub.f32 %v2314_v0, %v2346_v31  ;;  %v2543_v31 = vmul.f32 0.5, %v2542_v24  ;;  %v2552_v3 = vmul.f32 %v8019_v44, %v2551_v20  ;;  %v14200_v20 = vld [vmem:[#allocation85_spill] sm:$0xff]  ;;  %vm8159_vm7 = vmor %vm1790_vm5, %vm1791_vm6 }
 0x197   :  { %1422 = vadd.xlane.f32.xlu0 %v7931_v4  ;;  %v1465_v30 = vmul.f32 %v7931_v4, %v7931_v4  ;;  %v1817_v62 = vmul.f32 0.5, %v1816_v48  ;;  %6135 = vrsqrt.f32 %v8066_v25  ;;  %v2201_v26 = vmul.f32 %v8007_v53, %v8007_v53  ;;  %v14215_v53 = vld [vmem:[#allocation45_spill] sm:$0xff] }
 0x198   :  { %1420 = vadd.xlane.f32.xlu2 %v7833_v12  ;;  %v910_v12 = vpop.f32.mrf.mxu2  ;;  %v8074_v16 = vadd.f32 %v14190_v11, %v735_v39  ;;  %v2410_v14 = vmax.f32 %v2378_v38, 0.0  ;;  %v14195_v39 = vsub.f32 %v14164_v52, %v7613_v13  ;;  %v2544_v9 = vsub.f32 1.5, %v2543_v31  ;;  %v8101_v13 = vpop.eup %6133 }
 0x199   :  { %v8061_v5 = vpop.f32.mrf.mxu0  ;;  %v8063_v0 = vpop.xlane.xlu1 %2230  ;;  %14197 = vst [vmem:[#allocation87_spill] sm:$0xff] %v8101_v13  ;;  %v8105_v52 = vmul.f32 %v7920_v22, %v1808_v19  ;;  %v1612_v38 = vmul.f32 %v8079_v47, %v8079_v47  ;;  %v8112_v31 = vadd.f32 %v14200_v20, %v738_v50  ;;  %v911_v1 = vadd.f32 %v910_v12, %v7005_v10 }
 0x19a   :  { %14188 = vst [vmem:[#allocation77_spill] sm:$0xff] %v8061_v5  ;;  %v8069_v27 = vpop.f32.mrf.mxu1  ;;  %v8071_v21 = vpop.xlane.xlu0 %1496  ;;  %v2823_v11 = vmul.f32 %v2539_v2, %v14195_v39  ;;  %v740_v5 = vadd.f32 %v14196_v29, %v6988_v63  ;;  %v14199_v2 = vld [vmem:[#allocation86_spill] sm:$0xff]  ;;  %v8114_v48 = vadd.f32 1e-05, %v2410_v14  ;;  %v2553_v19 = vmul.f32 0.5, %v2552_v3 }
 0x19b   :  { %14189 = vst [vmem:[#allocation18_spill] sm:$0xff] %v8069_v27  ;;  %v8081_v24 = vpop.xlane.xlu2 %2136  ;;  %v2379_v27 = vsub.f32 %v2315_v54, %v2347_v8  ;;  %v999_v8 = vpop.f32.mrf.mxu3  ;;  %v4476_v29 = vadd.f32 %v14199_v2, %v7943_v42  ;;  %v8128_v50 = vmul.f32 %v7937_v60, %v2544_v9  ;;  %v1818_v14 = vsub.f32 1.5, %v1817_v62 }
 0x19c   :  { %14191 = vst [vmem:[#allocation78_spill] sm:$0xff] %v8074_v16  ;;  %v8118_v39 = vmul.f32 %v7674_v35, %v2823_v11  ;;  %v1825_v12 = vmul.f32 %v8101_v13, %v8015_v15  ;;  %v4477_v9 = vadd.f32 %v7882_v57, %v7940_v36  ;;  %6137 = vrsqrt.f32 %v8114_v48  ;;  %v14236_v35 = vld [vmem:[#allocation76_spill] sm:$0xff] }
 0x19d   :  { %14198 = vst [vmem:[#allocation83_spill] sm:$0xff] %v8105_v52  ;;  %v2411_v54 = vmax.f32 %v2379_v27, 0.0  ;;  %v14207_v27 = vld [vmem:[#allocation93_spill] sm:$0xff]  ;;  %v4604_v4 = vmax.f32 %v4476_v29, 0.0  ;;  %v8145_v62 = vpop.eup %6135  ;;  %v2554_v29 = vsub.f32 1.5, %v2553_v19  ;;  %v8173_v51 = vmul.f32 %v7982_v37, %v1818_v14 }
 0x19e   :  { %1424 = vadd.xlane.f32.xlu1 %v8028_v7  ;;  %14201 = vst [vmem:[#allocation91_spill] sm:$0xff] %v8112_v31  ;;  %v8133_v11 = vadd.f32 %v14207_v27, %v740_v5  ;;  %v14210_v5 = vld [vmem:[#allocation98_spill] sm:$0xff]  ;;  %v4601_v19 = vmax.f32 %v7927_v33, 0.0  ;;  %v1835_v60 = vmul.f32 %v8145_v62, %v8066_v25  ;;  %v14221_v14 = vld [vmem:[#allocation101_spill] sm:$0xff]  ;;  %v8189_v33 = vmul.f32 0.0078125, %v7904_v55 }
 0x19f   :  { %2252 = vadd.xlane.f32.xlu0 %v2200_v28  ;;  %14202 = vst [vmem:[#allocation85_spill] sm:$0xff] %v8114_v48  ;;  %v14204_v28 = vld [vmem:[#allocation99_spill] sm:$0xff]  ;;  %v743_v27 = vadd.f32 %v14210_v5, %v6988_v63  ;;  %v8150_v15 = vadd.f32 1e-05, %v2411_v54  ;;  %v14216_v5 = vld [vmem:[#allocation102_spill] sm:$0xff]  ;;  %v8220_v36 = vmul.f32 %v8074_v16, %v8074_v16  ;;  %vm1841_vm8 = vweird.f32 %v8145_v62 }
 0x1a0   :  { %1518 = vadd.xlane.f32.xlu2 %v1465_v30  ;;  %v1580_v30 = vmul.f32 0.0078125, %v14204_v28  ;;  %14206 = vst [vmem:[#allocation108_spill] sm:$0xff] %v8128_v50  ;;  %v8152_v50 = vadd.f32 %v999_v8, %v911_v1  ;;  %v8166_v54 = vmul.f32 0.0078125, %v14216_v5  ;;  %v14218_v8 = vld [vmem:[#allocation26_spill] sm:$0xff]  ;;  %v1466_v1 = vmul.f32 %v8028_v7, %v8028_v7 }
 0x1a1   :  { %v8123_v52 = vpop.f32.mrf.mxu0  ;;  %v8125_v42 = vpop.xlane.xlu1 %2232  ;;  %14208 = vst [vmem:[#allocation93_spill] sm:$0xff] %v8133_v11  ;;  %v1793_v5 = vsel %vm8159_vm7, %v7796_v45, %v7971_v49  ;;  %v2316_v7 = vmul.f32 0.0078125, %v7980_v18  ;;  %6139 = vrsqrt.f32 %v8150_v15  ;;  %v14224_v49 = vld [vmem:[#allocation20_spill] sm:$0xff]  ;;  %v14225_v45 = vld [vmem:[#allocation94_spill] sm:$0xff]  ;;  %v8198_v18 = vmul.f32 %v8019_v44, %v2554_v29 }
 0x1a2   :  { %14205 = vst [vmem:[#allocation99_spill] sm:$0xff] %v8123_v52  ;;  %v8135_v3 = vpop.f32.mrf.mxu1  ;;  %v8137_v20 = vpop.xlane.xlu0 %2138  ;;  %v1644_v32 = vsub.f32 %v1580_v30, %v1612_v38  ;;  %v14212_v30 = vld [vmem:[#allocation25_spill] sm:$0xff]  ;;  %1319 = vmatmul.bf16.gmra.mxu3 %v14224_v49  ;;  %v1581_v29 = vmul.f32 0.0078125, %v7990_v43  ;;  %v1613_v43 = vmul.f32 %v8189_v33, %v8189_v33  ;;  %vm1840_vm9 = vweird.f32 %v8066_v25 }
 0x1a3   :  { %14209 = vst [vmem:[#allocation109_spill] sm:$0xff] %v8135_v3  ;;  %v8139_v28 = vpop.xlane.xlu2 %1402  ;;  %v912_v38 = vpop.f32.mrf.mxu2  ;;  %v1826_v3 = vmul.f32 %v8101_v13, %v1825_v12  ;;  %v14226_v12 = vmax.f32 %v14225_v45, 0.0  ;;  %vm8344_vm10 = vmor %vm1840_vm9, %vm1841_vm8  ;;  %vm2576_vm11 = vweird.f32 %v8150_v15  ;;  %vm1811_vm12 = vweird.f32 %v7920_v22 }
 0x1a4   :  { %14211 = vst [vmem:[#allocation98_spill] sm:$0xff] %v8152_v50  ;;  %v913_v55 = vadd.f32 %v912_v38, %v7005_v10  ;;  %v8209_v49 = vpop.eup %6137  ;;  %v1836_v38 = vmul.f32 %v8145_v62, %v1835_v60  ;;  %v8238_v60 = vadd.f32 %v14199_v2, %v8085_v40  ;;  %v8256_v40 = vadd.f32 %v7882_v57, %v8053_v61 }
 0x1a5   :  { %1067 = vmatmul.bf16.gmra.mxu0 %v14212_v30  ;;  %14217 = vst [vmem:[#allocation45_spill] sm:$0xff] %v8166_v54  ;;  %v14219_v30 = vld [vmem:[#allocation19_spill] sm:$0xff]  ;;  %v1827_v45 = vmul.f32 0.5, %v1826_v3  ;;  %vm1821_vm3 = vweird.f32 %v7982_v37 }
 0x1a6   :  { %1156 = vmatmul.bf16.gmra.mxu1 %v14218_v8  ;;  %1230 = vmatmul.bf16.gmra.mxu2 %v14219_v30  ;;  %14220 = vst [vmem:[#allocation102_spill] sm:$0xff] %v8173_v51  ;;  %v1676_v8 = vmax.f32 %v1644_v32, 0.0  ;;  %v4605_v30 = vmax.f32 %v4477_v9, 0.0  ;;  %v8185_v51 = vadd.f32 %v14221_v14, %v743_v27  ;;  %v8195_v32 = vpack.c.bf16 %v4604_v4, %v14226_v12  ;;  %v14232_v4 = vld [vmem:[#allocation47_spill] sm:$0xff] }
 0x1a7   :  { %2254 = vadd.xlane.f32.xlu1 %v2201_v26  ;;  %1520 = vadd.xlane.f32.xlu0 %v1466_v1  ;;  %14223 = vst [vmem:[#allocation101_spill] sm:$0xff] %v8189_v33  ;;  %v1001_v26 = vpop.f32.mrf.mxu3  ;;  %v2348_v9 = vmul.f32 %v8166_v54, %v8166_v54  ;;  %v2202_v12 = vmul.f32 %v8152_v50, %v8152_v50 }
 0x1a8   :  { %14222 = vst [vmem:[#allocation19_spill] sm:$0xff] %v8185_v51  ;;  %2160 = vadd.xlane.f32.xlu2 %v8152_v50  ;;  %v8223_v54 = vadd.f32 1e-05, %v1676_v8  ;;  %v8227_v3 = vpack.c.bf16 %v4605_v30, %v4601_v19  ;;  %v745_v8 = vadd.f32 %v7893_v17, %v6988_v63  ;;  %v8245_v19 = vmul.f32 0.0078125, %v7895_v56 }
 0x1a9   :  { %14227 = vst [vmem:[#allocation20_spill] sm:$0xff] %v8195_v32  ;;  %v8205_v1 = vpop.f32.mrf.mxu0  ;;  %v8207_v14 = vpop.xlane.xlu1 %1498  ;;  %v2380_v27 = vsub.f32 %v2316_v7, %v2348_v9  ;;  %v2561_v7 = vmul.f32 %v8209_v49, %v8114_v48  ;;  %v8247_v30 = vadd.f32 %v1001_v26, %v913_v55  ;;  %v1828_v50 = vsub.f32 1.5, %v1827_v45 }
 0x1aa   :  { %14228 = vst [vmem:[#allocation94_spill] sm:$0xff] %v8198_v18  ;;  %v8214_v32 = vpop.f32.mrf.mxu1  ;;  %v8216_v18 = vpop.xlane.xlu0 %1404  ;;  %6141 = vrsqrt.f32 %v8223_v54  ;;  %v2317_v56 = vmul.f32 0.0078125, %v8063_v0  ;;  %v1582_v26 = vmul.f32 0.0078125, %v8071_v21  ;;  %v2349_v21 = vmul.f32 %v8245_v19, %v8245_v19 }
 0x1ab   :  { %14230 = vst [vmem:[#allocation110_spill] sm:$0xff] %v8205_v1  ;;  %v8225_v44 = vpop.xlane.xlu2 %2234  ;;  %v14235_v1 = vld [vmem:[#allocation31_spill] sm:$0xff]  ;;  %v8249_v9 = vpop.eup %6139  ;;  %v2412_v17 = vmax.f32 %v2380_v27, 0.0  ;;  %v8271_v27 = vadd.f32 %v7902_v41, %v745_v8  ;;  %vm1850_vm15 = vweird.f32 %v8223_v54 }
 0x1ac   :  { %14231 = vst [vmem:[#allocation111_spill] sm:$0xff] %v8209_v49  ;;  %v14237_v51 = vsub.f32 %v14235_v1, %v14236_v35  ;;  %v8252_v35 = vmul.f32 0.0078125, %v7968_v34  ;;  %v2562_v1 = vmul.f32 %v8209_v49, %v2561_v7  ;;  %v2571_v0 = vmul.f32 %v8249_v9, %v8150_v15 }
 0x1ad   :  { %14233 = vst [vmem:[#allocation47_spill] sm:$0xff] %v8214_v32  ;;  %v915_v32 = vpop.f32.mrf.mxu2  ;;  %v8292_v48 = vadd.f32 1e-05, %v2412_v17  ;;  %vm2577_vm13 = vweird.f32 %v8249_v9 }
 0x1ae   :  { %14234 = vst [vmem:[#allocation112_spill] sm:$0xff] %v8227_v3  ;;  %v2086_v52 = vmul.f32 %v1793_v5, %v14237_v51  ;;  %v1645_v51 = vsub.f32 %v1581_v29, %v1613_v43  ;;  %v1837_v5 = vmul.f32 0.5, %v1836_v38  ;;  %v1614_v43 = vmul.f32 %v8252_v35, %v8252_v35  ;;  %vm8438_vm0 = vmor %vm2576_vm11, %vm2577_vm13 }
 0x1af   :  { %14238 = vst [vmem:[#allocation31_spill] sm:$0xff] %v8245_v19  ;;  %2256 = vadd.xlane.f32.xlu1 %v2202_v12  ;;  %2162 = vadd.xlane.f32.xlu0 %v8247_v30  ;;  %v1004_v34 = vpop.f32.mrf.mxu3  ;;  %v8297_v38 = vmul.f32 0.0078125, %v8081_v24  ;;  %v2318_v19 = vmul.f32 0.0078125, %v8125_v42  ;;  %v2572_v17 = vmul.f32 %v8249_v9, %v2571_v0  ;;  %v14249_v24 = vld [vmem:[#allocation28_spill] sm:$0xff]  ;;  %v916_v3 = vadd.f32 %v915_v32, %v7005_v10 }
 0x1b0   :  { %14239 = vst [vmem:[#allocation76_spill] sm:$0xff] %v8247_v30  ;;  %1426 = vadd.xlane.f32.xlu2 %v8074_v16  ;;  %v4342_v55 = vmul.f32 %v7672_v58, %v2086_v52  ;;  %v8280_v52 = vmul.f32 %v8101_v13, %v1828_v50  ;;  %v1677_v7 = vmax.f32 %v1645_v51, 0.0  ;;  %v1838_v8 = vsub.f32 1.5, %v1837_v5  ;;  %v14247_v51 = vld [vmem:[#allocation27_spill] sm:$0xff]  ;;  %v8304_v5 = vpop.eup %6141 }
 0x1b1   :  { %14240 = vst [vmem:[#allocation113_spill] sm:$0xff] %v8252_v35  ;;  %v8275_v45 = vpop.f32.mrf.mxu0  ;;  %v8277_v12 = vpop.xlane.xlu1 %2140  ;;  %v2563_v13 = vmul.f32 0.5, %v2562_v1  ;;  %v2203_v1 = vmul.f32 %v8247_v30, %v8247_v30  ;;  %6143 = vrsqrt.f32 %v8292_v48  ;;  %v14254_v30 = vld [vmem:[#allocation22_spill] sm:$0xff]  ;;  %v2573_v16 = vmul.f32 0.5, %v2572_v17 }
 0x1b2   :  { %14241 = vst [vmem:[#allocation114_spill] sm:$0xff] %v8271_v27  ;;  %v8286_v61 = vpop.f32.mrf.mxu1  ;;  %v8288_v41 = vpop.xlane.xlu0 %1502  ;;  %v2381_v27 = vsub.f32 %v2317_v56, %v2349_v21  ;;  %v8302_v29 = vadd.f32 %v14199_v2, %v4342_v55  ;;  %v14248_v56 = vld [vmem:[#allocation50_spill] sm:$0xff]  ;;  %v8313_v42 = vadd.f32 1e-05, %v1677_v7  ;;  %v2350_v55 = vmul.f32 %v8297_v38, %v8297_v38  ;;  %1324 = vmatmul.bf16.gmra.mxu3 %v14254_v30 }
 0x1b3   :  { %14242 = vst [vmem:[#allocation115_spill] sm:$0xff] %v8280_v52  ;;  %v8294_v50 = vpop.xlane.xlu2 %1500  ;;  %v1646_v52 = vsub.f32 %v1582_v26, %v1614_v43  ;;  %v748_v26 = vadd.f32 %v7966_v59, %v6988_v63  ;;  %v14250_v43 = vld [vmem:[#allocation21_spill] sm:$0xff]  ;;  %v1839_v21 = vmul.f32 %v8145_v62, %v1838_v8  ;;  %v1845_v7 = vmul.f32 %v8304_v5, %v8223_v54 }
 0x1b4   :  { %14245 = vst [vmem:[#allocation116_spill] sm:$0xff] %v8292_v48  ;;  %v2413_v59 = vmax.f32 %v2381_v27, 0.0  ;;  %v2382_v33 = vsub.f32 %v2318_v19, %v2350_v55  ;;  %v2564_v8 = vsub.f32 1.5, %v2563_v13  ;;  %v1583_v27 = vmul.f32 0.0078125, %v8207_v14 }
 0x1b5   :  { %14246 = vst [vmem:[#allocation117_spill] sm:$0xff] %v8297_v38  ;;  %1072 = vmatmul.bf16.gmra.mxu0 %v14247_v51  ;;  %v917_v0 = vpop.f32.mrf.mxu2  ;;  %v1678_v32 = vmax.f32 %v1646_v52, 0.0  ;;  %v8338_v51 = vadd.f32 %v7882_v57, %v8118_v39  ;;  %6145 = vrsqrt.f32 %v8313_v42  ;;  %v2319_v13 = vmul.f32 0.0078125, %v8225_v44 }
 0x1b6   :  { %1161 = vmatmul.bf16.gmra.mxu1 %v14249_v24  ;;  %1235 = vmatmul.bf16.gmra.mxu2 %v14250_v43  ;;  %14251 = vst [vmem:[#allocation50_spill] sm:$0xff] %v8313_v42  ;;  %v8324_v43 = vmul.f32 0.0078125, %v8139_v28  ;;  %v8350_v14 = vadd.f32 %v1004_v34, %v916_v3  ;;  %v4608_v39 = vmax.f32 %v8302_v29, 0.0  ;;  %v1843_v25 = vsel %vm8344_vm10, %v8145_v62, %v1839_v21 }
 0x1b7   :  { %1522 = vadd.xlane.f32.xlu1 %v8220_v36  ;;  %1428 = vadd.xlane.f32.xlu0 %v8112_v31  ;;  %v8330_v36 = vmul.f32 0.0078125, %v8137_v20  ;;  %v8362_v52 = vadd.f32 %v7978_v6, %v748_v26  ;;  %v8364_v17 = vadd.f32 1e-05, %v2413_v59  ;;  %v1846_v34 = vmul.f32 %v8304_v5, %v1845_v7  ;;  %v1006_v21 = vpop.f32.mrf.mxu3 }
 0x1b8   :  { %14252 = vst [vmem:[#allocation21_spill] sm:$0xff] %v8324_v43  ;;  %2258 = vadd.xlane.f32.xlu2 %v2203_v1  ;;  %v1615_v44 = vmul.f32 %v8324_v43, %v8324_v43  ;;  %v8371_v55 = vadd.f32 1e-05, %v1678_v32  ;;  %v2414_v29 = vmax.f32 %v2382_v33, 0.0  ;;  %v8375_v1 = vpop.eup %6143  ;;  %v2574_v6 = vsub.f32 1.5, %v2573_v16  ;;  %v14317_v43 = vld [vmem:[#allocation33_spill] sm:$0xff] }
 0x1b9   :  { %14253 = vst [vmem:[#allocation118_spill] sm:$0xff] %v8330_v36  ;;  %v8334_v24 = vpop.f32.mrf.mxu0  ;;  %v1407_v28 = vpop.xlane.xlu1 %1406  ;;  %v2351_v62 = vmul.f32 %v8330_v36, %v8330_v36  ;;  %v918_v59 = vadd.f32 %v917_v0, %v7005_v10  ;;  %v1469_v20 = vmul.f32 %v8133_v11, %v8133_v11  ;;  %v14263_v57 = vsub.f32 %v14215_v53, %v7900_v23  ;;  %v8561_v36 = vld [vmem:[#allocation2] sm:$0xf] }
 0x1ba   :  { %14257 = vst [vmem:[#allocation22_spill] sm:$0xff] %v8350_v14  ;;  %v8352_v19 = vpop.f32.mrf.mxu1  ;;  %v8354_v30 = vpop.xlane.xlu0 %2238  ;;  %v1647_v26 = vsub.f32 %v1583_v27, %v1615_v44  ;;  %v8390_v16 = vmul.f32 %v8209_v49, %v2564_v8  ;;  %6147 = vrsqrt.f32 %v8364_v17  ;;  %v1847_v53 = vmul.f32 0.5, %v1846_v34  ;;  %v14301_v49 = vld [vmem:[#allocation16_spill] sm:$0xff] }
 0x1bb   :  { %14258 = vst [vmem:[#allocation119_spill] sm:$0xff] %v8352_v19  ;;  %v8368_v3 = vpop.xlane.xlu2 %2236  ;;  %v2091_v7 = vmul.f32 %v1843_v25, %v14263_v57  ;;  %v2383_v2 = vsub.f32 %v2319_v13, %v2351_v62  ;;  %v1468_v19 = vmul.f32 %v8112_v31, %v8112_v31  ;;  %v4613_v57 = vmax.f32 %v8338_v51, 0.0  ;;  %v8395_v23 = vpop.eup %6145  ;;  %v14268_v13 = vld [vmem:[#allocation100_spill] sm:$0xff] }
 0x1bc   :  { %14259 = vst [vmem:[#allocation120_spill] sm:$0xff] %v8362_v52  ;;  %v2581_v0 = vmul.f32 %v8375_v1, %v8292_v48  ;;  %6149 = vrsqrt.f32 %v8371_v55  ;;  %v8400_v27 = vadd.f32 1e-05, %v2414_v29  ;;  %vm1810_vm14 = vweird.f32 %v14268_v13  ;;  %v14281_v48 = vld [vmem:[#allocation30_spill] sm:$0xff] }
 0x1bd   :  { %14260 = vst [vmem:[#allocation121_spill] sm:$0xff] %v8364_v17  ;;  %v920_v8 = vpop.f32.mrf.mxu2  ;;  %v2575_v25 = vmul.f32 %v8249_v9, %v2574_v6  ;;  %v1679_v44 = vmax.f32 %v1647_v26, 0.0  ;;  %v8404_v62 = vadd.f32 %v1006_v21, %v918_v59  ;;  %v14270_v34 = vmax.f32 %v8238_v60, 0.0  ;;  %vm8497_vm2 = vmor %vm1810_vm14, %vm1811_vm12 }
 0x1be   :  { %14261 = vst [vmem:[#allocation122_spill] sm:$0xff] %v8371_v55  ;;  %v8415_v29 = vmul.f32 %v7672_v58, %v2091_v7  ;;  %v2415_v32 = vmax.f32 %v2383_v2, 0.0  ;;  %v4609_v21 = vmax.f32 %v8256_v40, 0.0  ;;  %v1855_v60 = vmul.f32 %v8395_v23, %v8313_v42 }
 0x1bf   :  { %14262 = vst [vmem:[#allocation123_spill] sm:$0xff] %v8375_v1  ;;  %2164 = vadd.xlane.f32.xlu1 %v8350_v14  ;;  %1526 = vadd.xlane.f32.xlu0 %v1469_v20  ;;  %v8412_v33 = vpack.c.bf16 %v14270_v34, %v4608_v39  ;;  %v8428_v39 = vmul.f32 0.0078125, %v8216_v18  ;;  %v8430_v26 = vmul.f32 0.0078125, %v1407_v28  ;;  %v1848_v40 = vsub.f32 1.5, %v1847_v53  ;;  %v14277_v34 = vld [vmem:[#allocation29_spill] sm:$0xff] }
 0x1c0   :  { %14265 = vst [vmem:[#allocation124_spill] sm:$0xff] %v8390_v16  ;;  %1524 = vadd.xlane.f32.xlu2 %v1468_v19  ;;  %v14273_v19 = vld [vmem:[#allocation77_spill] sm:$0xff]  ;;  %v2582_v7 = vmul.f32 %v8375_v1, %v2581_v0  ;;  %6151 = vrsqrt.f32 %v8400_v27  ;;  %v8445_v18 = vpack.c.bf16 %v4613_v57, %v4609_v21  ;;  %v8447_v28 = vpop.eup %6147  ;;  %v8452_v15 = vadd.f32 1e-05, %v1679_v44  ;;  %v14282_v0 = vld [vmem:[#allocation23_spill] sm:$0xff]  ;;  %v14284_v57 = vld [vmem:[#allocation18_spill] sm:$0xff] }
 0x1c1   :  { %14266 = vst [vmem:[#allocation125_spill] sm:$0xff] %v8395_v23  ;;  %v8406_v51 = vpop.f32.mrf.mxu0  ;;  %v8408_v20 = vpop.xlane.xlu1 %1504  ;;  %v750_v35 = vadd.f32 %v14273_v19, %v6988_v63  ;;  %v2579_v19 = vsel %vm8438_vm0, %v8249_v9, %v2575_v25  ;;  %v2205_v53 = vmul.f32 %v8404_v62, %v8404_v62  ;;  %vm1851_vm1 = vweird.f32 %v8304_v5 }
 0x1c2   :  { %14267 = vst [vmem:[#allocation126_spill] sm:$0xff] %v8400_v27  ;;  %v8419_v31 = vpop.f32.mrf.mxu1  ;;  %v8421_v6 = vpop.xlane.xlu0 %2144  ;;  %v8465_v2 = vadd.f32 1e-05, %v2415_v32  ;;  %v1856_v25 = vmul.f32 %v8395_v23, %v1855_v60  ;;  %v1616_v44 = vmul.f32 %v8428_v39, %v8428_v39  ;;  %v14288_v60 = vld [vmem:[#allocation24_spill] sm:$0xff]  ;;  %6153 = vrsqrt.f32 %v8452_v15  ;;  %vm8517_vm4 = vmor %vm1850_vm15, %vm1851_vm1 }
 0x1c3   :  { %14269 = vst [vmem:[#allocation100_spill] sm:$0xff] %v8404_v62  ;;  %v8432_v59 = vpop.xlane.xlu2 %2142  ;;  %v8459_v16 = vpop.eup %6149  ;;  %v8463_v21 = vadd.f32 %v14284_v57, %v750_v35  ;;  %v14287_v35 = vsub.f32 %v14232_v4, %v8005_v46  ;;  %v1849_v57 = vmul.f32 %v8304_v5, %v1848_v40  ;;  %1329 = vmatmul.bf16.gmra.mxu3 %v14288_v60  ;;  %vm1820_vm5 = vweird.f32 %v14301_v49  ;;  %v14329_v49 = vld [vmem:[#allocation102_spill] sm:$0xff] }
 0x1c4   :  { %14271 = vst [vmem:[#allocation127_spill] sm:$0xff] %v8412_v33  ;;  %v1584_v33 = vmul.f32 0.0078125, %v8294_v50  ;;  %v1009_v9 = vpop.f32.mrf.mxu3  ;;  %v2204_v50 = vmul.f32 %v8350_v14, %v8350_v14  ;;  %v2591_v14 = vmul.f32 %v8447_v28, %v8364_v17  ;;  %6155 = vrsqrt.f32 %v8465_v2  ;;  %vm8616_vm9 = vmor %vm1820_vm5, %vm1821_vm3 }
 0x1c5   :  { %14272 = vst [vmem:[#allocation128_spill] sm:$0xff] %v8415_v29  ;;  %1077 = vmatmul.bf16.gmra.mxu0 %v14277_v34  ;;  %v2827_v32 = vmul.f32 %v2579_v19, %v14287_v35  ;;  %v1865_v29 = vmul.f32 %v8459_v16, %v8371_v55  ;;  %v14296_v35 = vld [vmem:[#allocation19_spill] sm:$0xff]  ;;  %v1853_v54 = vsel %vm8517_vm4, %v8304_v5, %v1849_v57  ;;  %v2320_v5 = vmul.f32 0.0078125, %v8368_v3 }
 0x1c6   :  { %14274 = vst [vmem:[#allocation77_spill] sm:$0xff] %v8428_v39  ;;  %1166 = vmatmul.bf16.gmra.mxu1 %v14281_v48  ;;  %1240 = vmatmul.bf16.gmra.mxu2 %v14282_v0  ;;  %v1617_v0 = vmul.f32 %v8430_v26, %v8430_v26  ;;  %v8491_v4 = vpop.eup %6151  ;;  %v1470_v13 = vmul.f32 %v14296_v35, %v14296_v35  ;;  %v14300_v55 = vld [vmem:[#allocation83_spill] sm:$0xff]  ;;  %v14302_v48 = vld [vmem:[#allocation82_spill] sm:$0xff]  ;;  %vm2546_vm7 = vweird.f32 %v14317_v43 }
 0x1c7   :  { %14278 = vst [vmem:[#allocation129_spill] sm:$0xff] %v8445_v18  ;;  %1430 = vadd.xlane.f32.xlu1 %v8133_v11  ;;  %v921_v18 = vadd.f32 %v920_v8, %v7005_v10  ;;  %2262 = vadd.xlane.f32.xlu0 %v2205_v53  ;;  %v2583_v11 = vmul.f32 0.5, %v2582_v7  ;;  %v1585_v8 = vmul.f32 0.0078125, %v8288_v41  ;;  %v1648_v53 = vsub.f32 %v1584_v33, %v1616_v44  ;;  %v14294_v33 = vld [vmem:[#allocation99_spill] sm:$0xff] }
 0x1c8   :  { %14279 = vst [vmem:[#allocation130_spill] sm:$0xff] %v8447_v28  ;;  %2260 = vadd.xlane.f32.xlu2 %v2204_v50  ;;  %v753_v19 = vadd.f32 %v14294_v33, %v6988_v63  ;;  %v1857_v41 = vmul.f32 0.5, %v1856_v25  ;;  %v8529_v34 = vmul.f32 %v14302_v48, %v2827_v32  ;;  %v2592_v25 = vmul.f32 %v8447_v28, %v2591_v14  ;;  %v14312_v3 = vld [vmem:[#allocation35_spill] sm:$0xff] }
 0x1c9   :  { %14280 = vst [vmem:[#allocation131_spill] sm:$0xff] %v8452_v15  ;;  %v8487_v42 = vpop.f32.mrf.mxu0  ;;  %v8489_v46 = vpop.xlane.xlu1 %2146  ;;  %v1649_v38 = vsub.f32 %v1585_v8, %v1617_v0  ;;  %v8521_v33 = vadd.f32 %v1009_v9, %v921_v18  ;;  %v8536_v18 = vmul.f32 0.0078125, %v8277_v12  ;;  %v2584_v0 = vsub.f32 1.5, %v2583_v11  ;;  %v14360_v43 = vld [vmem:[#allocation63_spill] sm:$0xff] }
 0x1ca   :  { %14283 = vst [vmem:[#allocation23_spill] sm:$0xff] %v8459_v16  ;;  %v8507_v50 = vpop.f32.mrf.mxu1  ;;  %v8509_v44 = vpop.xlane.xlu0 %1410  ;;  %v1866_v8 = vmul.f32 %v8459_v16, %v1865_v29  ;;  %v2601_v17 = vmul.f32 %v8491_v4, %v8400_v27  ;;  %v8548_v14 = vmul.f32 0.0078125, %v8432_v59  ;;  %v14309_v11 = vsub.f32 %v14248_v56, %v8079_v47 }
 0x1cb   :  { %14285 = vst [vmem:[#allocation18_spill] sm:$0xff] %v8463_v21  ;;  %v1409_v7 = vpop.xlane.xlu2 %1408  ;;  %v922_v9 = vpop.f32.mrf.mxu2  ;;  %v1858_v57 = vsub.f32 1.5, %v1857_v41  ;;  %vm2547_vm6 = vweird.f32 %v14312_v3  ;;  %v2593_v59 = vmul.f32 0.5, %v2592_v25  ;;  %v2352_v47 = vmul.f32 %v8536_v18, %v8536_v18 }
 0x1cc   :  { %14286 = vst [vmem:[#allocation132_spill] sm:$0xff] %v8465_v2  ;;  %v8550_v12 = vpop.eup %6153  ;;  %v2092_v29 = vmul.f32 %v1853_v54, %v14309_v11  ;;  %v923_v56 = vadd.f32 %v922_v9, %v7005_v10  ;;  %v1011_v41 = vpop.f32.mrf.mxu3  ;;  %v1867_v54 = vmul.f32 0.5, %v1866_v8  ;;  %v2602_v11 = vmul.f32 %v8491_v4, %v2601_v17  ;;  %vm8683_vm11 = vmor %vm2546_vm7, %vm2547_vm6 }
 0x1cd   :  { %14289 = vst [vmem:[#allocation24_spill] sm:$0xff] %v8487_v42  ;;  %v14305_v42 = vld [vmem:[#allocation109_spill] sm:$0xff]  ;;  %v8558_v60 = vpop.eup %6155  ;;  %v2384_v27 = vsub.f32 %v2320_v5, %v2352_v47  ;;  %v2594_v47 = vsub.f32 1.5, %v2593_v59 }
 0x1ce   :  { %14290 = vst [vmem:[#allocation133_spill] sm:$0xff] %v8491_v4  ;;  %v8542_v32 = vadd.f32 %v14305_v42, %v753_v19  ;;  %v1681_v19 = vmax.f32 %v1649_v38, 0.0  ;;  %v8571_v38 = vmul.f32 %v8375_v1, %v2584_v0  ;;  %v2353_v0 = vmul.f32 %v8548_v14, %v8548_v14 }
 0x1cf   :  { %14295 = vst [vmem:[#allocation99_spill] sm:$0xff] %v8507_v50  ;;  %v1680_v50 = vmax.f32 %v1648_v53, 0.0  ;;  %1528 = vadd.xlane.f32.xlu1 %v1470_v13  ;;  %2168 = vadd.xlane.f32.xlu0 %v8521_v33  ;;  %v8564_v13 = vperm.slane %v8561_v36, 2  ;;  %v14318_v53 = vld [vmem:[#allocation110_spill] sm:$0xff]  ;;  %v8596_v1 = vmul.f32 %v8395_v23, %v1858_v57  ;;  %v2603_v59 = vmul.f32 0.5, %v2602_v11  ;;  %v14330_v11 = vld [vmem:[#allocation47_spill] sm:$0xff] }
 0x1d0   :  { %14299 = vst [vmem:[#allocation134_spill] sm:$0xff] %v8521_v33  ;;  %2166 = vadd.xlane.f32.xlu2 %v8404_v62  ;;  %v755_v9 = vadd.f32 %v14318_v53, %v6988_v63  ;;  %v1875_v62 = vmul.f32 %v8550_v12, %v8452_v15  ;;  %v2611_v63 = vmul.f32 %v8558_v60, %v8465_v2  ;;  %v8600_v53 = vadd.f32 1e-05, %v1681_v19  ;;  %v14337_v57 = vld [vmem:[#allocation36_spill] sm:$0xff] }
 0x1d1   :  { %14303 = vst [vmem:[#allocation83_spill] sm:$0xff] %v8529_v34  ;;  %v8574_v25 = vadd.f32 1e-05, %v1680_v50  ;;  %v8576_v42 = vpop.f32.mrf.mxu0  ;;  %v8578_v34 = vpop.xlane.xlu1 %1412  ;;  %v14320_v50 = vld [vmem:[#allocation104_spill] sm:$0xff]  ;;  %v2321_v15 = vmul.f32 0.0078125, %v8354_v30  ;;  %v1868_v19 = vsub.f32 1.5, %v1867_v54  ;;  %v1034_v30 = vadd.f32 %v8275_v45, %v8564_v13 }
 0x1d2   :  { %14304 = vst [vmem:[#allocation16_spill] sm:$0xff] %v8536_v18  ;;  %v8587_v8 = vpop.f32.mrf.mxu1  ;;  %v8589_v17 = vpop.xlane.xlu0 %2240  ;;  %vm2556_vm8 = vweird.f32 %v14320_v50  ;;  %v2416_v2 = vmax.f32 %v2384_v27, 0.0  ;;  %v1823_v54 = vsel %vm8616_vm9, %v7982_v37, %v14329_v49  ;;  %v14334_v27 = vld [vmem:[#allocation17_spill] sm:$0xff]  ;;  %v14340_v49 = vsel %vm8497_vm2, %v7920_v22, %v14300_v55  ;;  %v14355_v18 = vld [vmem:[#allocation108_spill] sm:$0xff] }
 0x1d3   :  { %14306 = vst [vmem:[#allocation109_spill] sm:$0xff] %v8542_v32  ;;  %v8602_v5 = vpop.xlane.xlu2 %1506  ;;  %v14324_v32 = vld [vmem:[#allocation32_spill] sm:$0xff]  ;;  %6157 = vrsqrt.f32 %v8574_v25  ;;  %vm2557_vm10 = vweird.f32 %v14334_v27  ;;  %v2604_v23 = vsub.f32 1.5, %v2603_v59  ;;  %v8661_v39 = vadd.f32 %v8286_v61, %v1034_v30 }
 0x1d4   :  { %14308 = vst [vmem:[#allocation135_spill] sm:$0xff] %v8550_v12  ;;  %6159 = vrsqrt.f32 %v8600_v53  ;;  %v1586_v22 = vmul.f32 0.0078125, %v8408_v20  ;;  %v1036_v20 = vadd.f32 %v8334_v24, %v8564_v13  ;;  %vm8699_vm12 = vmor %vm2556_vm8, %vm2557_vm10  ;;  %vm1900_vm0 = vweird.f32 %v8600_v53 }
 0x1d5   :  { %14311 = vst [vmem:[#allocation136_spill] sm:$0xff] %v8558_v60  ;;  %1082 = vmatmul.bf16.gmra.mxu0 %v14324_v32 }
 0x1d6   :  { %14313 = vst [vmem:[#allocation35_spill] sm:$0xff] %v8561_v36  ;;  %v8605_v36 = vmul.f32 0.0078125, %v1409_v7  ;;  %v14327_v7 = vld [vmem:[#allocation34_spill] sm:$0xff] }
 0x1d7   :  { %14314 = vst [vmem:[#allocation137_spill] sm:$0xff] %v8564_v13  ;;  %1171 = vmatmul.bf16.gmra.mxu1 %v14327_v7  ;;  %v2612_v7 = vmul.f32 %v8558_v60, %v2611_v63  ;;  %v14338_v63 = vld [vmem:[#allocation88_spill] sm:$0xff] }
 0x1d8   :  { %14315 = vst [vmem:[#allocation138_spill] sm:$0xff] %v8571_v38  ;;  %v8593_v38 = vmul.f32 %v7672_v58, %v2092_v29  ;;  %v8610_v29 = vpop.f32.mrf.mxu2  ;;  %v1618_v37 = vmul.f32 %v8605_v36, %v8605_v36  ;;  %1432 = vadd.xlane.f32.xlu2 %v14296_v35 }
 0x1d9   :  { %14316 = vst [vmem:[#allocation139_spill] sm:$0xff] %v8574_v25  ;;  %v8663_v35 = vpop.f32.mrf.mxu0  ;;  %v8665_v45 = vpop.xlane.xlu1 %2242 }
 0x1da   :  { %14319 = vst [vmem:[#allocation33_spill] sm:$0xff] %v8587_v8  ;;  %v8607_v8 = vadd.f32 %v1011_v41, %v923_v56  ;;  %v14328_v56 = vld [vmem:[#allocation25_spill] sm:$0xff]  ;;  %v1876_v41 = vmul.f32 %v8550_v12, %v1875_v62  ;;  %v14333_v62 = vld [vmem:[#allocation114_spill] sm:$0xff]  ;;  %v8675_v59 = vpop.xlane.xlu0 %1508  ;;  %v8677_v61 = vpop.eup %6157 }
 0x1db   :  { %14321 = vst [vmem:[#allocation110_spill] sm:$0xff] %v8593_v38  ;;  %1245 = vmatmul.bf16.gmra.mxu2 %v14328_v56  ;;  %v2385_v38 = vsub.f32 %v2321_v15, %v2353_v0  ;;  %1434 = vadd.xlane.f32.xlu0 %v14333_v62  ;;  %v8641_v15 = vmul.f32 %v8447_v28, %v2594_v47  ;;  %v14336_v0 = vld [vmem:[#allocation26_spill] sm:$0xff]  ;;  %v8670_v28 = vadd.f32 1e-05, %v2416_v2 }
 0x1dc   :  { %14322 = vst [vmem:[#allocation104_spill] sm:$0xff] %v8596_v1  ;;  %2170 = vadd.xlane.f32.xlu1 %v8607_v8  ;;  %v8632_v1 = vadd.f32 %v14330_v11, %v755_v9  ;;  %v8646_v9 = vpop.f32.mrf.mxu3  ;;  %1334 = vmatmul.bf16.gmra.mxu3 %v14336_v0  ;;  %v14339_v56 = vsub.f32 %v14337_v57, %v14338_v63  ;;  %v14343_v0 = vld [vmem:[#allocation41_spill] sm:$0xff]  ;;  %v1877_v40 = vmul.f32 0.5, %v1876_v41  ;;  %v2613_v41 = vmul.f32 0.5, %v2612_v7 }
 0x1dd   :  { %14323 = vst [vmem:[#allocation140_spill] sm:$0xff] %v8607_v8  ;;  %v8658_v47 = vmul.f32 %v8459_v16, %v1868_v19  ;;  %v2417_v55 = vmax.f32 %v2385_v38, 0.0  ;;  %v8673_v19 = vpop.f32.mrf.mxu1  ;;  %v8691_v38 = vpop.xlane.xlu2 %2148  ;;  %v1650_v7 = vsub.f32 %v1586_v22, %v1618_v37  ;;  %v2207_v24 = vmul.f32 %v8607_v8, %v8607_v8  ;;  %v14356_v22 = vld [vmem:[#allocation94_spill] sm:$0xff]  ;;  %v14357_v8 = vld [vmem:[#allocation107_spill] sm:$0xff]  ;;  %v14368_v16 = vld [vmem:[#allocation96_spill] sm:$0xff] }
 0x1de   :  { %14331 = vst [vmem:[#allocation25_spill] sm:$0xff] %v8632_v1  ;;  %v2088_v11 = vmul.f32 %v14340_v49, %v14339_v56  ;;  %v1471_v56 = vmul.f32 %v14333_v62, %v14333_v62  ;;  %v2549_v37 = vsel %vm8683_vm11, %v14312_v3, %v14355_v18  ;;  %v2559_v2 = vsel %vm8699_vm12, %v14334_v27, %v14356_v22  ;;  %v14358_v18 = vld [vmem:[#allocation119_spill] sm:$0xff] }
 0x1df   :  { %14335 = vst [vmem:[#allocation102_spill] sm:$0xff] %v8641_v15  ;;  %v14344_v15 = vld [vmem:[#allocation95_spill] sm:$0xff]  ;;  %v1885_v62 = vmul.f32 %v8677_v61, %v8574_v25  ;;  %6161 = vrsqrt.f32 %v8670_v28  ;;  %vm1830_vm14 = vweird.f32 %v14357_v8  ;;  %v2614_v30 = vsub.f32 1.5, %v2613_v41  ;;  %v14365_v25 = vld [vmem:[#allocation90_spill] sm:$0xff] }
 0x1e0   :  { %14341 = vst [vmem:[#allocation47_spill] sm:$0xff] %v8658_v47  ;;  %v14345_v57 = vsub.f32 %v14343_v0, %v14344_v15  ;;  %v2206_v15 = vmul.f32 %v8521_v33, %v8521_v33  ;;  %v4350_v49 = vmul.f32 %v7672_v58, %v2088_v11  ;;  %v8708_v0 = vpop.eup %6159  ;;  %v1878_v11 = vsub.f32 1.5, %v1877_v40  ;;  %1530 = vadd.xlane.f32.xlu2 %v1471_v56 }
 0x1e1   :  { %14342 = vst [vmem:[#allocation17_spill] sm:$0xff] %v8661_v39  ;;  %v8731_v3 = vadd.f32 %v14358_v18, %v1036_v20  ;;  %v1039_v40 = vadd.f32 %v8406_v51, %v8564_v13  ;;  %v1682_v22 = vmax.f32 %v1650_v7, 0.0  ;;  %v926_v33 = vadd.f32 %v8610_v29, %v7005_v10  ;;  %v8747_v18 = vpop.f32.mrf.mxu0  ;;  %v8749_v27 = vpop.xlane.xlu1 %2244 }
 0x1e2   :  { %v2089_v63 = vmul.f32 %v1823_v54, %v14345_v57  ;;  %14346 = vst [vmem:[#allocation26_spill] sm:$0xff] %v8670_v28  ;;  %v14353_v57 = vld [vmem:[#allocation87_spill] sm:$0xff]  ;;  %v8712_v54 = vmul.f32 %v8491_v4, %v2604_v23  ;;  %v8726_v23 = vadd.f32 1e-05, %v2417_v55  ;;  %v1895_v55 = vmul.f32 %v8708_v0, %v8600_v53  ;;  %v14367_v4 = vld [vmem:[#allocation40_spill] sm:$0xff] }
 0x1e3   :  { %14347 = vst [vmem:[#allocation36_spill] sm:$0xff] %v8677_v61  ;;  %vm1831_vm13 = vweird.f32 %v14353_v57  ;;  %2264 = vadd.xlane.f32.xlu0 %v2206_v15  ;;  %v8745_v20 = vmul.f32 0.0078125, %v8421_v6  ;;  %v14364_v15 = vld [vmem:[#allocation39_spill] sm:$0xff]  ;;  %v14369_v29 = vsub.f32 %v14367_v4, %v14368_v16  ;;  %v1886_v6 = vmul.f32 %v8677_v61, %v1885_v62 }
 0x1e4   :  { %14354 = vst [vmem:[#allocation88_spill] sm:$0xff] %v8712_v54  ;;  %v4354_v50 = vmul.f32 %v7672_v58, %v2089_v63  ;;  %1436 = vadd.xlane.f32.xlu1 %v8362_v52  ;;  %v927_v63 = vpop.f32.mrf.mxu2  ;;  %v14361_v54 = vld [vmem:[#allocation86_spill] sm:$0xff]  ;;  %v14366_v47 = vsub.f32 %v14364_v15, %v14365_v25  ;;  %6163 = vrsqrt.f32 %v8726_v23  ;;  %v8771_v25 = vmul.f32 %v8558_v60, %v2614_v30  ;;  %vm8820_vm15 = vmor %vm1830_vm14, %vm1831_vm13 }
 0x1e5   :  { %14359 = vst [vmem:[#allocation41_spill] sm:$0xff] %v8731_v3  ;;  %v8742_v41 = vadd.f32 %v14361_v54, %v4350_v49  ;;  %v2825_v56 = vmul.f32 %v2559_v2, %v14369_v29  ;;  %v8759_v49 = vmul.f32 %v8550_v12, %v1878_v11  ;;  %v8764_v3 = vmul.f32 0.0078125, %v8509_v44  ;;  %v8766_v32 = vpop.f32.mrf.mxu1  ;;  %v8781_v2 = vpop.eup %6161 }
 0x1e6   :  { %14362 = vst [vmem:[#allocation95_spill] sm:$0xff] %v8745_v20  ;;  %v4492_v51 = vadd.f32 %v14361_v54, %v4354_v50  ;;  %v2824_v7 = vmul.f32 %v2549_v37, %v14366_v47  ;;  %v8768_v50 = vpop.xlane.xlu0 %2150  ;;  %v8774_v16 = vadd.f32 %v8419_v31, %v1039_v40  ;;  %v2322_v4 = vmul.f32 0.0078125, %v8589_v17  ;;  %v8777_v47 = vpop.xlane.xlu2 %1414  ;;  %v14377_v31 = vld [vmem:[#allocation37_spill] sm:$0xff] }
 0x1e7   :  { %14363 = vst [vmem:[#allocation87_spill] sm:$0xff] %v8747_v18  ;;  %v1472_v62 = vmul.f32 %v8362_v52, %v8362_v52  ;;  %v1896_v44 = vmul.f32 %v8708_v0, %v1895_v55  ;;  %v8784_v37 = vadd.f32 1e-05, %v1682_v22  ;;  %v1587_v11 = vmul.f32 0.0078125, %v8602_v5  ;;  %1087 = vmatmul.bf16.gmra.mxu0 %v14377_v31  ;;  %v1016_v40 = vpop.f32.mrf.mxu3  ;;  %v14379_v52 = vld [vmem:[#allocation65_spill] sm:$0xff]  ;;  %v14380_v55 = vld [vmem:[#allocation38_spill] sm:$0xff] }
 0x1e8   :  { %14370 = vst [vmem:[#allocation108_spill] sm:$0xff] %v8759_v49  ;;  %v8788_v30 = vadd.f32 %v8646_v9, %v926_v33  ;;  %v2354_v17 = vmul.f32 %v8745_v20, %v8745_v20  ;;  %1176 = vmatmul.bf16.gmra.mxu1 %v14380_v55  ;;  %v14381_v22 = vld [vmem:[#allocation27_spill] sm:$0xff]  ;;  %v4616_v5 = vmax.f32 %v8742_v41, 0.0  ;;  %v1887_v33 = vmul.f32 0.5, %v1886_v6 }
 0x1e9   :  { %14371 = vst [vmem:[#allocation94_spill] sm:$0xff] %v8764_v3  ;;  %v1619_v9 = vmul.f32 %v8764_v3, %v8764_v3  ;;  %v8806_v60 = vmul.f32 %v8463_v21, %v8463_v21  ;;  %v4620_v29 = vmax.f32 %v4492_v51, 0.0  ;;  %v8811_v20 = vmul.f32 0.0078125, %v8489_v46  ;;  %v8832_v8 = vpop.f32.mrf.mxu0  ;;  %v1511_v15 = vpop.xlane.xlu1 %1510 }
 0x1ea   :  { %14372 = vst [vmem:[#allocation107_spill] sm:$0xff] %v8766_v32  ;;  %v4351_v41 = vmul.f32 %v14302_v48, %v2824_v7  ;;  %v8814_v6 = vpop.eup %6163  ;;  %v1897_v51 = vmul.f32 0.5, %v1896_v44  ;;  %6165 = vrsqrt.f32 %v8784_v37  ;;  %v8826_v46 = vmul.f32 0.0078125, %v8578_v34  ;;  %2172 = vadd.xlane.f32.xlu2 %v8788_v30  ;;  %v14386_v7 = vld [vmem:[#allocation28_spill] sm:$0xff]  ;;  %v14388_v44 = vld [vmem:[#allocation115_spill] sm:$0xff] }
 0x1eb   :  { %14373 = vst [vmem:[#allocation119_spill] sm:$0xff] %v8771_v25  ;;  %1250 = vmatmul.bf16.gmra.mxu2 %v14381_v22  ;;  %v2621_v25 = vmul.f32 %v8781_v2, %v8670_v28  ;;  %v2386_v22 = vsub.f32 %v2322_v4, %v2354_v17  ;;  %1532 = vadd.xlane.f32.xlu0 %v1472_v62  ;;  %v2323_v62 = vmul.f32 0.0078125, %v8665_v45  ;;  %v1888_v12 = vsub.f32 1.5, %v1887_v33 }
 0x1ec   :  { %14374 = vst [vmem:[#allocation63_spill] sm:$0xff] %v8774_v16  ;;  %2266 = vadd.xlane.f32.xlu1 %v2207_v24  ;;  %v8802_v49 = vpop.f32.mrf.mxu2  ;;  %v1651_v4 = vsub.f32 %v1587_v11, %v1619_v9  ;;  %1339 = vmatmul.bf16.gmra.mxu3 %v14386_v7  ;;  %v928_v17 = vadd.f32 %v927_v63, %v7005_v10  ;;  %v14389_v11 = vld [vmem:[#allocation24_spill] sm:$0xff]  ;;  %v1588_v45 = vmul.f32 0.0078125, %v8675_v59  ;;  %vm1901_vm1 = vweird.f32 %v8708_v0 }
 0x1ed   :  { %14375 = vst [vmem:[#allocation39_spill] sm:$0xff] %v8781_v2  ;;  %v4355_v28 = vmul.f32 %v14302_v48, %v2825_v56  ;;  %v1041_v9 = vadd.f32 %v14389_v11, %v8564_v13  ;;  %v8843_v7 = vpop.f32.mrf.mxu1  ;;  %v8847_v16 = vpack.c.bf16 %v4620_v29, %v4616_v5  ;;  %v2622_v56 = vmul.f32 %v8781_v2, %v2621_v25  ;;  %v14395_v48 = vld [vmem:[#allocation99_spill] sm:$0xff]  ;;  %vm8916_vm2 = vmor %vm1900_vm0, %vm1901_vm1 }
 0x1ee   :  { %14376 = vst [vmem:[#allocation90_spill] sm:$0xff] %v8788_v30  ;;  %v8845_v63 = vpop.xlane.xlu0 %1416  ;;  %v2631_v55 = vmul.f32 %v8814_v6, %v8726_v23  ;;  %v2355_v33 = vmul.f32 %v8811_v20, %v8811_v20  ;;  %v2418_v34 = vmax.f32 %v2386_v22, 0.0  ;;  %v2247_v31 = vpop.xlane.xlu2 %2246  ;;  %v1620_v59 = vmul.f32 %v8826_v46, %v8826_v46 }
 0x1ef   :  { %14382 = vst [vmem:[#allocation40_spill] sm:$0xff] %v8811_v20  ;;  %v1683_v11 = vmax.f32 %v1651_v4, 0.0  ;;  %v8858_v29 = vpop.f32.mrf.mxu3  ;;  %v8861_v5 = vadd.f32 %v1016_v40, %v928_v17  ;;  %v8872_v4 = vadd.f32 %v14395_v48, %v1041_v9  ;;  %v2623_v54 = vmul.f32 0.5, %v2622_v56 }
 0x1f0   :  { %14385 = vst [vmem:[#allocation96_spill] sm:$0xff] %v8826_v46  ;;  %v2387_v25 = vsub.f32 %v2323_v62, %v2355_v33  ;;  %v8866_v22 = vpop.eup %6165  ;;  %v1652_v18 = vsub.f32 %v1588_v45, %v1620_v59  ;;  %v2632_v40 = vmul.f32 %v8814_v6, %v2631_v55  ;;  %v8879_v17 = vadd.f32 1e-05, %v2418_v34  ;;  %v14402_v55 = vld [vmem:[#allocation66_spill] sm:$0xff] }
 0x1f1   :  { %14387 = vst [vmem:[#allocation65_spill] sm:$0xff] %v8832_v8  ;;  %v1898_v8 = vsub.f32 1.5, %v1897_v51  ;;  %v8869_v51 = vmul.f32 %v8677_v61, %v1888_v12  ;;  %v8883_v33 = vadd.f32 1e-05, %v1683_v11  ;;  %v8886_v48 = vmul.f32 0.0078125, %v8691_v38  ;;  %v8896_v59 = vpop.f32.mrf.mxu0  ;;  %v14407_v62 = vld [vmem:[#allocation42_spill] sm:$0xff] }
 0x1f2   :  { %14390 = vst [vmem:[#allocation27_spill] sm:$0xff] %v8843_v7  ;;  %v2208_v7 = vmul.f32 %v8788_v30, %v8788_v30  ;;  %v2324_v9 = vmul.f32 0.0078125, %v8749_v27  ;;  %1438 = vadd.xlane.f32.xlu2 %v8463_v21  ;;  %v1905_v34 = vmul.f32 %v8866_v22, %v8784_v37  ;;  %v2419_v56 = vmax.f32 %v2387_v25, 0.0  ;;  %v14409_v21 = vld [vmem:[#allocation43_spill] sm:$0xff] }
 0x1f3   :  { %14391 = vst [vmem:[#allocation28_spill] sm:$0xff] %v8847_v16  ;;  %v14393_v16 = vld [vmem:[#allocation103_spill] sm:$0xff]  ;;  %2174 = vadd.xlane.f32.xlu0 %v8861_v5  ;;  %v1899_v12 = vmul.f32 %v8708_v0, %v1898_v8  ;;  %v8898_v8 = vpop.xlane.xlu1 %2152  ;;  %v1044_v27 = vadd.f32 %v8576_v42, %v8564_v13  ;;  %v1684_v11 = vmax.f32 %v1652_v18, 0.0  ;;  %v2356_v39 = vmul.f32 %v8886_v48, %v8886_v48 }
 0x1f4   :  { %14392 = vst [vmem:[#allocation115_spill] sm:$0xff] %v8861_v5  ;;  %v8864_v32 = vadd.f32 %v14393_v16, %v4351_v41  ;;  %2268 = vadd.xlane.f32.xlu1 %v2208_v7  ;;  %v8890_v45 = vpop.f32.mrf.mxu2  ;;  %v4493_v38 = vadd.f32 %v14393_v16, %v4355_v28  ;;  %v8906_v41 = vmul.f32 0.0078125, %v8777_v47  ;;  %v2624_v42 = vsub.f32 1.5, %v2623_v54 }
 0x1f5   :  { %14394 = vst [vmem:[#allocation24_spill] sm:$0xff] %v8869_v51  ;;  %v8908_v7 = vpop.f32.mrf.mxu1  ;;  %v2633_v18 = vmul.f32 0.5, %v2632_v40  ;;  %6167 = vrsqrt.f32 %v8879_v17  ;;  %v8922_v25 = vmul.f32 0.0078125, %v8768_v50  ;;  %v1903_v30 = vsel %vm8916_vm2, %v8708_v0, %v1899_v12  ;;  %v14410_v51 = vld [vmem:[#allocation29_spill] sm:$0xff] }
 0x1f6   :  { %14396 = vst [vmem:[#allocation99_spill] sm:$0xff] %v8872_v4  ;;  %v8910_v20 = vpop.xlane.xlu0 %1514  ;;  %v8924_v47 = vpop.xlane.xlu2 %1512  ;;  %6169 = vrsqrt.f32 %v8883_v33  ;;  %v2388_v53 = vsub.f32 %v2324_v9, %v2356_v39  ;;  %v1589_v3 = vmul.f32 0.0078125, %v1511_v15  ;;  %vm2636_vm3 = vweird.f32 %v8726_v23  ;;  %v14417_v4 = vld [vmem:[#allocation30_spill] sm:$0xff] }
 0x1f7   :  { %14399 = vst [vmem:[#allocation141_spill] sm:$0xff] %v8879_v17  ;;  %1092 = vmatmul.bf16.gmra.mxu0 %v14407_v62  ;;  %v1906_v54 = vmul.f32 %v8866_v22, %v1905_v34  ;;  %v8933_v40 = vadd.f32 1e-05, %v2419_v56  ;;  %v2325_v50 = vmul.f32 0.0078125, %v2247_v31  ;;  %v4621_v61 = vmax.f32 %v4493_v38, 0.0  ;;  %v8946_v12 = vpop.f32.mrf.mxu3  ;;  %v14413_v56 = vld [vmem:[#allocation109_spill] sm:$0xff] }
 0x1f8   :  { %14400 = vst [vmem:[#allocation142_spill] sm:$0xff] %v8883_v33  ;;  %1181 = vmatmul.bf16.gmra.mxu1 %v14409_v21  ;;  %v8937_v28 = vadd.f32 1e-05, %v1684_v11  ;;  %v1621_v39 = vmul.f32 %v8906_v41, %v8906_v41  ;;  %v931_v0 = vadd.f32 %v8802_v49, %v7005_v10  ;;  %v2209_v15 = vmul.f32 %v8861_v5, %v8861_v5  ;;  %v14414_v49 = vld [vmem:[#allocation33_spill] sm:$0xff] }
 0x1f9   :  { %14401 = vst [vmem:[#allocation143_spill] sm:$0xff] %v8886_v48  ;;  %v14412_v31 = vsub.f32 %v14360_v43, %v8430_v26  ;;  %v2634_v9 = vsub.f32 1.5, %v2633_v18  ;;  %v2357_v34 = vmul.f32 %v8922_v25, %v8922_v25  ;;  %v4617_v38 = vmax.f32 %v8864_v32, 0.0  ;;  %v8967_v18 = vpop.f32.mrf.mxu0 }
 0x1fa   :  { %14403 = vst [vmem:[#allocation66_spill] sm:$0xff] %v8906_v41  ;;  %v8956_v11 = vadd.f32 %v14414_v49, %v1044_v27  ;;  %v2420_v21 = vmax.f32 %v2388_v53, 0.0  ;;  %v1653_v62 = vsub.f32 %v1589_v3, %v1621_v39  ;;  %2270 = vadd.xlane.f32.xlu2 %v2209_v15  ;;  %v8964_v43 = vmul.f32 %v8781_v2, %v2624_v42  ;;  %v6076_v53 = vld [vmem:[%s13529_s5 + $0x38] sm:$0xff] }
 0x1fb   :  { %14406 = vst [vmem:[#allocation144_spill] sm:$0xff] %v8922_v25  ;;  %1255 = vmatmul.bf16.gmra.mxu2 %v14410_v51  ;;  %v2097_v51 = vmul.f32 %v1903_v30, %v14412_v31  ;;  %1440 = vadd.xlane.f32.xlu0 %v14413_v56  ;;  %v8961_v26 = vpop.eup %6167  ;;  %v1907_v30 = vmul.f32 0.5, %v1906_v54  ;;  %6171 = vrsqrt.f32 %v8933_v40  ;;  %v2389_v32 = vsub.f32 %v2325_v50, %v2357_v34  ;;  %v1419_v27 = vpop.xlane.xlu1 %1418  ;;  %v6084_v3 = vld [vmem:[%s13529_s5 + $0x78] sm:$0xff]  ;;  %v14424_v31 = vld [vmem:[#allocation15_spill] sm:$0xff] }
 0x1fc   :  { %14408 = vst [vmem:[#allocation145_spill] sm:$0xff] %v8933_v40  ;;  %1534 = vadd.xlane.f32.xlu1 %v8806_v60  ;;  %1344 = vmatmul.bf16.gmra.mxu3 %v14417_v4  ;;  %v8975_v4 = vpop.eup %6169  ;;  %6173 = vrsqrt.f32 %v8937_v28  ;;  %v8979_v42 = vadd.f32 %v8858_v29, %v931_v0  ;;  %v8985_v39 = vpack.c.bf16 %v4621_v61, %v4617_v38  ;;  %v14423_v15 = vld [vmem:[#allocation44_spill] sm:$0xff]  ;;  %vm2637_vm4 = vweird.f32 %v8814_v6  ;;  %v14435_v60 = vld [vmem:[#allocation35_spill] sm:$0xff] }
 0x1fd   :  { %14411 = vst [vmem:[#allocation29_spill] sm:$0xff] %v8937_v28  ;;  %v8981_v54 = vpop.f32.mrf.mxu1  ;;  %v14425_v34 = vsub.f32 %v14423_v15, %v14424_v31  ;;  %v14426_v49 = vsel %vm8820_vm15, %v14353_v57, %v14388_v44  ;;  %v8996_v46 = vmul.f32 %v7672_v58, %v2097_v51  ;;  %v2635_v29 = vmul.f32 %v8814_v6, %v2634_v9  ;;  %v1211_v51 = vpop.f32.mrf.mxu2  ;;  %vm9023_vm6 = vmor %vm2636_vm3, %vm2637_vm4 }
 0x1fe   :  { %14415 = vst [vmem:[#allocation33_spill] sm:$0xff] %v8956_v11  ;;  %v8983_v50 = vpop.xlane.xlu0 %2250  ;;  %v1046_v61 = vadd.f32 %v8663_v35, %v8564_v13  ;;  %v9002_v0 = vpop.xlane.xlu2 %2248  ;;  %5052 = vmatpush.bf16.msra.mxu0 %v6076_v53  ;;  %5141 = vmatpush.bf16.msra.mxu1 %v6084_v3  ;;  %vm1910_vm5 = vweird.f32 %v8784_v37  ;;  %v2641_v57 = vmul.f32 %v8961_v26, %v8879_v17  ;;  %v9007_v24 = vadd.f32 1e-05, %v2420_v21  ;;  %v6075_v53 = vld [vmem:[%s13529_s5 + $0x30] sm:$0xff] }
 0x1ff   :  { %14418 = vst [vmem:[#allocation30_spill] sm:$0xff] %v8961_v26  ;;  %v2090_v5 = vmul.f32 %v14426_v49, %v14425_v34  ;;  %v1685_v44 = vmax.f32 %v1653_v62, 0.0  ;;  %v1908_v38 = vsub.f32 1.5, %v1907_v30  ;;  %v1915_v9 = vmul.f32 %v8975_v4, %v8883_v33  ;;  %v6083_v3 = vld [vmem:[%s13529_s5 + $0x70] sm:$0xff] }
 0x200   :  { %14419 = vst [vmem:[#allocation146_spill] sm:$0xff] %v8964_v43  ;;  %v2421_v15 = vmax.f32 %v2389_v32, 0.0  ;;  %v1475_v35 = vmul.f32 %v8632_v1, %v8632_v1  ;;  %v9028_v62 = vmul.f32 0.0078125, %v8845_v63  ;;  %v9030_v30 = vmul.f32 0.0078125, %v1419_v27  ;;  %v14445_v43 = vld [vmem:[#allocation49_spill] sm:$0xff] }
 0x201   :  { %14420 = vst [vmem:[#allocation147_spill] sm:$0xff] %v8975_v4  ;;  %v1474_v32 = vmul.f32 %v14413_v56, %v14413_v56  ;;  %v4358_v31 = vmul.f32 %v7672_v58, %v2090_v5  ;;  %v9036_v34 = vpop.eup %6171  ;;  %v2639_v23 = vsel %vm9023_vm6, %v8814_v6, %v2635_v29  ;;  %v9042_v49 = vadd.f32 %v8673_v19, %v1046_v61  ;;  %v1300_v19 = vpop.f32.mrf.mxu3 }
 0x202   :  { %14421 = vst [vmem:[#allocation148_spill] sm:$0xff] %v8979_v42  ;;  %5053 = vmatpush.bf16.msra.mxu0 %v6075_v53  ;;  %v9049_v17 = vpop.eup %6173  ;;  %v2642_v5 = vmul.f32 %v8961_v26, %v2641_v57  ;;  %6175 = vrsqrt.f32 %v9007_v24  ;;  %v9053_v33 = vadd.f32 1e-05, %v1685_v44  ;;  %v1590_v6 = vmul.f32 0.0078125, %v8924_v47  ;;  %5142 = vmatpush.bf16.msra.mxu1 %v6083_v3  ;;  %v6074_v44 = vld [vmem:[%s13529_s5 + $0x28] sm:$0xff] }
 0x203   :  { %14422 = vst [vmem:[#allocation149_spill] sm:$0xff] %v8985_v39  ;;  %1538 = vadd.xlane.f32.xlu0 %v1475_v35  ;;  %1536 = vadd.xlane.f32.xlu2 %v1474_v32  ;;  %v1909_v29 = vmul.f32 %v8866_v22, %v1908_v38  ;;  %vm1911_vm7 = vweird.f32 %v8866_v22  ;;  %v9059_v61 = vadd.f32 1e-05, %v2421_v15  ;;  %v9061_v35 = vpop.f32.mrf.mxu0  ;;  %v9063_v57 = vpop.xlane.xlu1 %1516  ;;  %v6082_v47 = vld [vmem:[%s13529_s5 + $0x68] sm:$0xff]  ;;  %v2651_v38 = vmul.f32 %v9036_v34, %v8933_v40  ;;  %v14451_v39 = vld [vmem:[#allocation17_spill] sm:$0xff] }
 0x204   :  { %14427 = vst [vmem:[#allocation44_spill] sm:$0xff] %v8996_v46  ;;  %2176 = vadd.xlane.f32.xlu1 %v8979_v42  ;;  %v9047_v42 = vperm.slane %v14435_v60, 3  ;;  %v1916_v60 = vmul.f32 %v8975_v4, %v1915_v9  ;;  %v1622_v9 = vmul.f32 %v9028_v62, %v9028_v62  ;;  %v933_v15 = vadd.f32 %v8890_v45, %v7005_v10  ;;  %v6092_v10 = vld [vmem:[%s13529_s5 + $0xb8] sm:$0xff]  ;;  %v14440_v45 = vld [vmem:[#allocation86_spill] sm:$0xff]  ;;  %vm9099_vm8 = vmor %vm1910_vm5, %vm1911_vm7 }
 0x205   :  { %14428 = vst [vmem:[#allocation15_spill] sm:$0xff] %v9007_v24  ;;  %v1623_v53 = vmul.f32 %v9030_v30, %v9030_v30  ;;  %v9079_v3 = vpop.f32.mrf.mxu1  ;;  %v14439_v32 = vsub.f32 %v14379_v52, %v8548_v14  ;;  %v1925_v48 = vmul.f32 %v9049_v17, %v8937_v28  ;;  %v9093_v56 = vadd.f32 %v14440_v45, %v4358_v31  ;;  %v6100_v31 = vld [vmem:[%s13529_s5 + $0xf8] sm:$0xff] }
 0x206   :  { %14431 = vst [vmem:[#allocation150_spill] sm:$0xff] %v9028_v62  ;;  %v9081_v21 = vpop.xlane.xlu0 %2156  ;;  %v1212_v63 = vadd.f32 %v1211_v51, %v9047_v42  ;;  %v2155_v40 = vpop.xlane.xlu2 %2154  ;;  %5054 = vmatpush.bf16.msra.mxu0 %v6074_v44  ;;  %v9103_v14 = vmul.f32 0.5, %v2642_v5  ;;  %6177 = vrsqrt.f32 %v9053_v33  ;;  %v1591_v51 = vmul.f32 0.0078125, %v8910_v20  ;;  %5143 = vmatpush.bf16.msra.mxu1 %v6082_v47  ;;  %v14444_v5 = vld [vmem:[#allocation87_spill] sm:$0xff]  ;;  %v6073_v20 = vld [vmem:[%s13529_s5 + $0x20] sm:$0xff] }
 0x207   :  { %14432 = vst [vmem:[#allocation151_spill] sm:$0xff] %v9036_v34  ;;  %v2833_v27 = vmul.f32 %v2639_v23, %v14439_v32  ;;  %v1654_v23 = vsub.f32 %v1590_v6, %v1622_v9  ;;  %v14443_v32 = vld [vmem:[#allocation48_spill] sm:$0xff]  ;;  %v1913_v37 = vsel %vm9099_vm8, %v8866_v22, %v1909_v29  ;;  %v1917_v44 = vmul.f32 0.5, %v1916_v60  ;;  %5230 = vmatpush.bf16.msra.mxu2 %v6092_v10  ;;  %v6081_v6 = vld [vmem:[%s13529_s5 + $0x60] sm:$0xff]  ;;  %v14447_v22 = vld [vmem:[#allocation111_spill] sm:$0xff]  ;;  %v1213_v10 = vpop.f32.mrf.mxu2 }
 0x208   :  { %14433 = vst [vmem:[#allocation152_spill] sm:$0xff] %v9042_v49  ;;  %1097 = vmatmul.bf16.gmra.mxu0 %v14443_v32  ;;  %v1049_v28 = vadd.f32 %v14444_v5, %v8564_v13  ;;  %6179 = vrsqrt.f32 %v9059_v61  ;;  %1186 = vmatmul.bf16.gmra.mxu1 %v14445_v43  ;;  %v9124_v47 = vpop.eup %6175  ;;  %vm2567_vm9 = vweird.f32 %v14447_v22  ;;  %v2652_v29 = vmul.f32 %v9036_v34, %v2651_v38  ;;  %v14452_v38 = vld [vmem:[#allocation85_spill] sm:$0xff] }
 0x209   :  { %14436 = vst [vmem:[#allocation35_spill] sm:$0xff] %v9049_v17  ;;  %v1655_v60 = vsub.f32 %v1591_v51, %v1623_v53  ;;  %v9129_v9 = vadd.f32 %v8946_v12, %v933_v15  ;;  %5319 = vmatpush.bf16.msra.mxu3 %v6100_v31  ;;  %v1926_v52 = vmul.f32 %v9049_v17, %v1925_v48  ;;  %v9134_v5 = vmul.f32 0.0078125, %v8898_v8  ;;  %v14453_v53 = vld [vmem:[#allocation82_spill] sm:$0xff]  ;;  %v1302_v25 = vpop.f32.mrf.mxu3 }
 0x20a   :  { %14437 = vst [vmem:[#allocation153_spill] sm:$0xff] %v9053_v33  ;;  %v9136_v2 = vmul.f32 0.0078125, %v2155_v40  ;;  %v9138_v46 = vadd.f32 %v1300_v19, %v1212_v63  ;;  %vm2566_vm10 = vweird.f32 %v14452_v38  ;;  %v9143_v12 = vmul.f32 %v14453_v53, %v2833_v27  ;;  %5055 = vmatpush.bf16.msra.mxu0 %v6073_v20  ;;  %v14456_v40 = vld [vmem:[#allocation107_spill] sm:$0xff]  ;;  %5144 = vmatpush.bf16.msra.mxu1 %v6081_v6  ;;  %v14464_v20 = vld [vmem:[#allocation125_spill] sm:$0xff] }
 0x20b   :  { %14438 = vst [vmem:[#allocation154_spill] sm:$0xff] %v9059_v61  ;;  %2852 = vadd.xlane.f32.xlu0 %v14451_v39  ;;  %v14455_v15 = vsub.f32 %v14402_v55, %v8605_v36  ;;  %v2644_v48 = vsub.f32 1.5, %v9103_v14  ;;  %v1686_v31 = vmax.f32 %v1654_v23, 0.0  ;;  %2178 = vadd.xlane.f32.xlu2 %v9129_v9  ;;  %v1918_v8 = vsub.f32 1.5, %v1917_v44  ;;  %v6072_v36 = vld [vmem:[%s13529_s5 + $0x18] sm:$0xff]  ;;  %vm9230_vm13 = vmor %vm2566_vm10, %vm2567_vm9  ;;  %v6070_v38 = vld [vmem:[%s13529_s5 + $0x8] sm:$0xff] }
 0x20c   :  { %14446 = vst [vmem:[#allocation87_spill] sm:$0xff] %v9124_v47  ;;  %1442 = vadd.xlane.f32.xlu1 %v8632_v1  ;;  %v9151_v63 = vadd.f32 %v14456_v40, %v1049_v28  ;;  %v2661_v19 = vmul.f32 %v9124_v47, %v9007_v24  ;;  %v2326_v27 = vmul.f32 0.0078125, %v9002_v0  ;;  %v9156_v1 = vpop.f32.mrf.mxu0  ;;  %v6080_v55 = vld [vmem:[%s13529_s5 + $0x58] sm:$0xff]  ;;  %v9167_v14 = vpop.eup %6177  ;;  %v2653_v23 = vmul.f32 0.5, %v2652_v29 }
 0x20d   :  { %14448 = vst [vmem:[#allocation111_spill] sm:$0xff] %v9129_v9  ;;  %v2098_v51 = vmul.f32 %v1913_v37, %v14455_v15  ;;  %v14458_v28 = vld [vmem:[#allocation32_spill] sm:$0xff]  ;;  %v1687_v6 = vmax.f32 %v1655_v60, 0.0  ;;  %v9173_v15 = vpop.f32.mrf.mxu1  ;;  %v14462_v9 = vld [vmem:[#allocation34_spill] sm:$0xff]  ;;  %v2359_v29 = vmul.f32 %v9136_v2, %v9136_v2  ;;  %v3652_v60 = vmul.f32 %v9138_v46, %v9138_v46 }
 0x20e   :  { %14449 = vst [vmem:[#allocation155_spill] sm:$0xff] %v9134_v5  ;;  %1260 = vmatmul.bf16.gmra.mxu2 %v14458_v28  ;;  %v9175_v40 = vpop.xlane.xlu0 %1422  ;;  %1349 = vmatmul.bf16.gmra.mxu3 %v14462_v9  ;;  %v9178_v24 = vpop.eup %6179  ;;  %v2358_v28 = vmul.f32 %v9134_v5, %v9134_v5  ;;  %vm1861_vm11 = vweird.f32 %v14464_v20  ;;  %v9191_v9 = vmul.f32 %v8961_v26, %v2644_v48  ;;  %v9195_v44 = vadd.f32 1e-05, %v1686_v31  ;;  %v6079_v48 = vld [vmem:[%s13529_s5 + $0x50] sm:$0xff]  ;;  %v14470_v31 = vld [vmem:[#allocation50_spill] sm:$0xff] }
 0x20f   :  { %14450 = vst [vmem:[#allocation156_spill] sm:$0xff] %v9138_v46  ;;  %v1421_v37 = vpop.xlane.xlu2 %1420  ;;  %v9188_v0 = vmul.f32 %v7672_v58, %v2098_v51  ;;  %5056 = vmatpush.bf16.msra.mxu0 %v6072_v36  ;;  %v9198_v49 = vmul.f32 %v8975_v4, %v1918_v8  ;;  %v2662_v43 = vmul.f32 %v9124_v47, %v2661_v19  ;;  %v2327_v32 = vmul.f32 0.0078125, %v8983_v50  ;;  %v6071_v51 = vld [vmem:[%s13529_s5 + $0x10] sm:$0xff] }
 0x210   :  { %14454 = vst [vmem:[#allocation85_spill] sm:$0xff] %v9143_v12  ;;  %v9158_v12 = vpop.xlane.xlu1 %2158  ;;  %v2390_v11 = vsub.f32 %v2326_v27, %v2358_v28  ;;  %5145 = vmatpush.bf16.msra.mxu1 %v6080_v55  ;;  %vm1860_vm12 = vweird.f32 %v14470_v31  ;;  %v1935_v8 = vmul.f32 %v9167_v14, %v9053_v33  ;;  %v2671_v19 = vmul.f32 %v9178_v24, %v9059_v61  ;;  %v1216_v27 = vpop.f32.mrf.mxu2 }
 0x211   :  { %14457 = vst [vmem:[#allocation107_spill] sm:$0xff] %v9151_v63  ;;  %v1927_v63 = vmul.f32 0.5, %v1926_v52  ;;  %v14467_v52 = vld [vmem:[#allocation65_spill] sm:$0xff]  ;;  %v9213_v36 = vadd.f32 1e-05, %v1687_v6  ;;  %v2916_v50 = vmul.f32 %v14451_v39, %v14451_v39  ;;  %v2654_v55 = vsub.f32 1.5, %v2653_v23  ;;  %v1305_v23 = vpop.f32.mrf.mxu3  ;;  %vm9302_vm14 = vmor %vm1860_vm12, %vm1861_vm11 }
 0x212   :  { %14459 = vst [vmem:[#allocation32_spill] sm:$0xff] %v9167_v14  ;;  %v1051_v41 = vadd.f32 %v14467_v52, %v8564_v13  ;;  %v2391_v52 = vsub.f32 %v2327_v32, %v2359_v29  ;;  %v1054_v33 = vadd.f32 %v8896_v59, %v8564_v13  ;;  %6181 = vrsqrt.f32 %v9195_v44  ;;  %v14471_v6 = vld [vmem:[#allocation128_spill] sm:$0xff]  ;;  %v14474_v59 = vld [vmem:[#allocation27_spill] sm:$0xff] }
 0x213   :  { %14463 = vst [vmem:[#allocation34_spill] sm:$0xff] %v9178_v24  ;;  %v1928_v28 = vsub.f32 1.5, %v1927_v63  ;;  %3684 = vadd.xlane.f32.xlu0 %v3652_v60  ;;  %v9222_v61 = vmul.f32 0.0078125, %v1421_v37  ;;  %2948 = vadd.xlane.f32.xlu2 %v2916_v50  ;;  %v2422_v29 = vmax.f32 %v2390_v11, 0.0  ;;  %v1936_v50 = vmul.f32 %v9167_v14, %v1935_v8  ;;  %v6078_v11 = vld [vmem:[%s13529_s5 + $0x48] sm:$0xff] }
 0x214   :  { %14465 = vst [vmem:[#allocation125_spill] sm:$0xff] %v9188_v0  ;;  %3588 = vadd.xlane.f32.xlu1 %v9138_v46  ;;  %5057 = vmatpush.bf16.msra.mxu0 %v6071_v51  ;;  %v4500_v46 = vadd.f32 %v14440_v45, %v14471_v6  ;;  %v9237_v63 = vadd.f32 %v14474_v59, %v1051_v41  ;;  %v9241_v60 = vpop.f32.mrf.mxu0  ;;  %6183 = vrsqrt.f32 %v9213_v36  ;;  %v14477_v59 = vld [vmem:[#allocation124_spill] sm:$0xff]  ;;  %v2423_v8 = vmax.f32 %v2391_v52, 0.0  ;;  %v14480_v0 = vld [vmem:[#allocation41_spill] sm:$0xff] }
 0x215   :  { %14466 = vst [vmem:[#allocation157_spill] sm:$0xff] %v9191_v9  ;;  %v1214_v9 = vadd.f32 %v1213_v10, %v9047_v42  ;;  %v9234_v10 = vmul.f32 0.5, %v2662_v43  ;;  %5146 = vmatpush.bf16.msra.mxu1 %v6079_v48  ;;  %v2672_v43 = vmul.f32 %v9178_v24, %v2671_v19  ;;  %v9251_v41 = vpop.f32.mrf.mxu1  ;;  %v2569_v48 = vsel %vm9230_vm13, %v14447_v22, %v14477_v59  ;;  %v14486_v59 = vld [vmem:[#allocation53_spill] sm:$0xff] }
 0x216   :  { %14468 = vst [vmem:[#allocation65_spill] sm:$0xff] %v9195_v44  ;;  %v2253_v6 = vpop.xlane.xlu0 %2252  ;;  %v9261_v37 = vmul.f32 %v9036_v34, %v2654_v55  ;;  %v2917_v39 = vmul.f32 %v14480_v0, %v14480_v0  ;;  %v9273_v26 = vadd.f32 %v8908_v7, %v1054_v33  ;;  %v1624_v22 = vmul.f32 %v9222_v61, %v9222_v61  ;;  %v14483_v55 = vld [vmem:[#allocation52_spill] sm:$0xff]  ;;  %v14487_v7 = vld [vmem:[#allocation46_spill] sm:$0xff] }
 0x217   :  { %14469 = vst [vmem:[#allocation158_spill] sm:$0xff] %v9198_v49  ;;  %v9263_v62 = vadd.f32 %v1302_v25, %v1214_v9  ;;  %v9265_v19 = vpop.xlane.xlu2 %1518  ;;  %v9270_v49 = vmul.f32 %v9049_v17, %v1928_v28  ;;  %v4628_v52 = vmax.f32 %v4500_v46, 0.0  ;;  %v9280_v32 = vadd.f32 1e-05, %v2422_v29  ;;  %v6069_v28 = vld [vmem:[%s13529_s5] sm:$0xff] }
 0x218   :  { %14475 = vst [vmem:[#allocation50_spill] sm:$0xff] %v9237_v63  ;;  %v9243_v51 = vpop.xlane.xlu1 %1424  ;;  %1102 = vmatmul.bf16.gmra.mxu0 %v14483_v55  ;;  %1191 = vmatmul.bf16.gmra.mxu1 %v14486_v59  ;;  %v4624_v33 = vmax.f32 %v9093_v56, 0.0  ;;  %v9290_v34 = vpop.eup %6181  ;;  %v2664_v46 = vsub.f32 1.5, %v9234_v10  ;;  %v1937_v9 = vmul.f32 0.5, %v1936_v50  ;;  %v2673_v29 = vmul.f32 0.5, %v2672_v43  ;;  %v14493_v10 = vld [vmem:[#allocation83_spill] sm:$0xff] }
 0x219   :  { %14478 = vst [vmem:[#allocation128_spill] sm:$0xff] %v9261_v37  ;;  %5058 = vmatpush.bf16.msra.mxu0 %v6070_v38  ;;  %v1592_v5 = vmul.f32 0.0078125, %v9063_v57  ;;  %5147 = vmatpush.bf16.msra.mxu1 %v6078_v11  ;;  %v6077_v38 = vld [vmem:[%s13529_s5 + $0x40] sm:$0xff]  ;;  %v9306_v56 = vadd.f32 1e-05, %v2423_v8  ;;  %v3653_v57 = vmul.f32 %v9263_v62, %v9263_v62  ;;  %v9313_v50 = vadd.f32 %v14393_v16, %v14493_v10 }
 0x21a   :  { %14479 = vst [vmem:[#allocation27_spill] sm:$0xff] %v9263_v62  ;;  %v9315_v43 = vpop.eup %6183  ;;  %v1056_v31 = vadd.f32 %v8967_v18, %v8564_v13  ;;  %v9320_v8 = vpack.c.bf16 %v4628_v52, %v4624_v33  ;;  %6185 = vrsqrt.f32 %v9280_v32  ;;  %v9330_v10 = vmul.f32 0.0078125, %v9081_v21 }
 0x21b   :  { %14481 = vst [vmem:[#allocation124_spill] sm:$0xff] %v9270_v49  ;;  %v14488_v49 = vld [vmem:[#allocation105_spill] sm:$0xff]  ;;  %2950 = vadd.xlane.f32.xlu0 %v2917_v39  ;;  %v1656_v11 = vsub.f32 %v1592_v5, %v1624_v22  ;;  %3590 = vadd.xlane.f32.xlu2 %v9263_v62  ;;  %v9339_v33 = vmul.f32 %v9124_v47, %v2664_v46  ;;  %6187 = vrsqrt.f32 %v9306_v56  ;;  %v14506_v47 = vld [vmem:[#allocation123_spill] sm:$0xff]  ;;  %vm1960_vm3 = vweird.f32 %v9213_v36 }
 0x21c   :  { %14482 = vst [vmem:[#allocation159_spill] sm:$0xff] %v9273_v26  ;;  %v14489_v17 = vsub.f32 %v14487_v7, %v14488_v49  ;;  %2854 = vadd.xlane.f32.xlu1 %v14480_v0  ;;  %v1217_v49 = vadd.f32 %v1216_v27, %v9047_v42  ;;  %v14495_v27 = vld [vmem:[#allocation104_spill] sm:$0xff]  ;;  %v1945_v7 = vmul.f32 %v9290_v34, %v9195_v44  ;;  %v9332_v18 = vpop.f32.mrf.mxu0  ;;  %v14497_v22 = vld [vmem:[#allocation37_spill] sm:$0xff]  ;;  %v14499_v44 = vld [vmem:[#allocation38_spill] sm:$0xff]  ;;  %vm2587_vm15 = vweird.f32 %v14506_v47 }
 0x21d   :  { %14485 = vst [vmem:[#allocation160_spill] sm:$0xff] %v9280_v32  ;;  %v1863_v39 = vsel %vm9302_vm14, %v14464_v20, %v14495_v27  ;;  %5059 = vmatpush.bf16.msra.mxu0 %v6069_v28  ;;  %v1938_v20 = vsub.f32 1.5, %v1937_v9  ;;  %v1059_v27 = vadd.f32 %v9061_v35, %v8564_v13  ;;  %v9343_v25 = vpop.f32.mrf.mxu1  ;;  %5148 = vmatpush.bf16.msra.mxu1 %v6077_v38  ;;  %v14502_v35 = vld [vmem:[#allocation89_spill] sm:$0xff]  ;;  %vm1961_vm4 = vweird.f32 %v9315_v43 }
 0x21e   :  { %v2826_v37 = vmul.f32 %v2569_v48, %v14489_v17  ;;  %14490 = vst [vmem:[#allocation46_spill] sm:$0xff] %v9290_v34  ;;  %v1218_v48 = vpop.f32.mrf.mxu2  ;;  %1265 = vmatmul.bf16.gmra.mxu2 %v14497_v22  ;;  %v2674_v17 = vsub.f32 1.5, %v2673_v29  ;;  %v1521_v21 = vpop.xlane.xlu0 %1520  ;;  %1354 = vmatmul.bf16.gmra.mxu3 %v14499_v44  ;;  %v1955_v28 = vmul.f32 %v9315_v43, %v9213_v36  ;;  %v6091_v44 = vld [vmem:[%s13529_s5 + $0xb0] sm:$0xff]  ;;  %v14504_v29 = vld [vmem:[#allocation101_spill] sm:$0xff]  ;;  %vm9528_vm7 = vmor %vm1960_vm3, %vm1961_vm4  ;;  %vm2696_vm8 = vweird.f32 %v9306_v56 }
 0x21f   :  { %14494 = vst [vmem:[#allocation105_spill] sm:$0xff] %v9320_v8  ;;  %v9349_v22 = vadd.f32 %v1305_v23, %v1217_v49  ;;  %v9351_v46 = vpop.xlane.xlu2 %2160  ;;  %v9354_v9 = vadd.f32 %v8981_v54, %v1056_v31  ;;  %v1219_v38 = vadd.f32 %v1218_v48, %v9047_v42  ;;  %v6099_v23 = vld [vmem:[%s13529_s5 + $0xf0] sm:$0xff]  ;;  %v2360_v54 = vmul.f32 %v9330_v10, %v9330_v10  ;;  %v1307_v49 = vpop.f32.mrf.mxu3 }
 0x220   :  { %14496 = vst [vmem:[#allocation83_spill] sm:$0xff] %v9330_v10  ;;  %v9334_v5 = vpop.xlane.xlu1 %2254  ;;  %v4359_v52 = vmul.f32 %v14453_v53, %v2826_v37  ;;  %v2328_v37 = vmul.f32 0.0078125, %v2253_v6  ;;  %v1946_v6 = vmul.f32 %v9290_v34, %v1945_v7  ;;  %v9376_v0 = vmul.f32 %v9167_v14, %v1938_v20  ;;  %5231 = vmatpush.bf16.msra.mxu2 %v6091_v44 }
 0x221   :  { %14498 = vst [vmem:[#allocation104_spill] sm:$0xff] %v9339_v33  ;;  %v1688_v33 = vmax.f32 %v1656_v11, 0.0  ;;  %v14503_v11 = vld [vmem:[#allocation54_spill] sm:$0xff]  ;;  %v9379_v4 = vmul.f32 %v9178_v24, %v2674_v17  ;;  %v9382_v7 = vadd.f32 %v9079_v3, %v1059_v27  ;;  %5320 = vmatpush.bf16.msra.mxu3 %v6099_v23  ;;  %v4629_v17 = vmax.f32 %v9313_v50, 0.0  ;;  %v14513_v3 = vld [vmem:[#allocation116_spill] sm:$0xff] }
 0x222   :  { %14500 = vst [vmem:[#allocation37_spill] sm:$0xff] %v9349_v22  ;;  %v9369_v31 = vadd.f32 %v14393_v16, %v4359_v52  ;;  %v14505_v48 = vsub.f32 %v14503_v11, %v14504_v29  ;;  %v9387_v52 = vpop.eup %6185  ;;  %v2392_v20 = vsub.f32 %v2328_v37, %v2360_v54  ;;  %vm2586_vm0 = vweird.f32 %v14513_v3  ;;  %v14517_v37 = vld [vmem:[#allocation130_spill] sm:$0xff] }
 0x223   :  { %14501 = vst [vmem:[#allocation38_spill] sm:$0xff] %v9354_v9  ;;  %v9385_v9 = vmul.f32 0.0078125, %v9175_v40  ;;  %3592 = vadd.xlane.f32.xlu0 %v9349_v22  ;;  %v14514_v40 = vld [vmem:[#allocation97_spill] sm:$0xff]  ;;  %v1593_v44 = vmul.f32 0.0078125, %v9265_v19  ;;  %v9403_v11 = vpop.eup %6187  ;;  %vm2597_vm1 = vweird.f32 %v14517_v37  ;;  %v1947_v23 = vmul.f32 0.5, %v1946_v6  ;;  %vm9468_vm5 = vmor %vm2586_vm0, %vm2587_vm15 }
 0x224   :  { %v2093_v62 = vmul.f32 %v1863_v39, %v14505_v48  ;;  %14507 = vst [vmem:[#allocation89_spill] sm:$0xff] %v9376_v0  ;;  %3686 = vadd.xlane.f32.xlu1 %v3653_v57  ;;  %v1956_v39 = vmul.f32 %v9315_v43, %v1955_v28  ;;  %v9397_v57 = vadd.f32 1e-05, %v1688_v33  ;;  %v9400_v48 = vadd.f32 %v1307_v49, %v1219_v38  ;;  %v14516_v28 = vld [vmem:[#allocation63_spill] sm:$0xff]  ;;  %v9409_v54 = vpop.f32.mrf.mxu0 }
 0x225   :  { %14508 = vst [vmem:[#allocation54_spill] sm:$0xff] %v9379_v4  ;;  %2856 = vadd.xlane.f32.xlu2 %v14516_v28  ;;  %v9407_v50 = vmul.f32 0.0078125, %v9158_v12  ;;  %v2918_v33 = vmul.f32 %v14516_v28, %v14516_v28  ;;  %v3654_v19 = vmul.f32 %v9349_v22, %v9349_v22  ;;  %v2681_v38 = vmul.f32 %v9387_v52, %v9280_v32  ;;  %v9424_v12 = vpop.f32.mrf.mxu1  ;;  %v14520_v4 = vld [vmem:[#allocation121_spill] sm:$0xff]  ;;  %v14521_v32 = vld [vmem:[#allocation99_spill] sm:$0xff] }
 0x226   :  { %14509 = vst [vmem:[#allocation101_spill] sm:$0xff] %v9382_v7  ;;  %v1625_v49 = vmul.f32 %v9385_v9, %v9385_v9  ;;  %v9422_v6 = vmul.f32 0.0078125, %v9243_v51  ;;  %v9426_v27 = vpop.xlane.xlu0 %2162  ;;  %v4625_v29 = vmax.f32 %v9369_v31, 0.0  ;;  %vm2596_vm2 = vweird.f32 %v14520_v4  ;;  %v14522_v31 = vld [vmem:[#allocation57_spill] sm:$0xff] }
 0x227   :  { %14510 = vst [vmem:[#allocation123_spill] sm:$0xff] %v9385_v9  ;;  %v1957_v0 = vmul.f32 0.5, %v1956_v39  ;;  %v2424_v28 = vmax.f32 %v2392_v20, 0.0  ;;  %v2329_v22 = vmul.f32 0.0078125, %v9334_v5  ;;  %v9431_v24 = vpop.xlane.xlu2 %1426  ;;  %v9435_v14 = vmul.f32 %v14521_v32, %v14521_v32  ;;  %v14523_v20 = vld [vmem:[#allocation58_spill] sm:$0xff]  ;;  %vm9508_vm6 = vmor %vm2596_vm2, %vm2597_vm1 }
 0x228   :  { %14511 = vst [vmem:[#allocation161_spill] sm:$0xff] %v9387_v52  ;;  %v9411_v10 = vpop.xlane.xlu1 %2256  ;;  %v2691_v51 = vmul.f32 %v9403_v11, %v9306_v56  ;;  %6189 = vrsqrt.f32 %v9397_v57  ;;  %v1657_v7 = vsub.f32 %v1593_v44, %v1625_v49  ;;  %v1594_v8 = vmul.f32 0.0078125, %v1521_v21  ;;  %1107 = vmatmul.bf16.gmra.mxu0 %v14522_v31  ;;  %1196 = vmatmul.bf16.gmra.mxu1 %v14523_v20 }
 0x229   :  { %14515 = vst [vmem:[#allocation116_spill] sm:$0xff] %v9400_v48  ;;  %v1948_v26 = vsub.f32 1.5, %v1947_v23  ;;  %v1061_v5 = vadd.f32 %v9156_v1, %v8564_v13  ;;  %v2361_v39 = vmul.f32 %v9407_v50, %v9407_v50  ;;  %v4370_v63 = vmul.f32 %v7672_v58, %v2093_v62  ;;  %v14524_v23 = vld [vmem:[#allocation110_spill] sm:$0xff] }
 0x22a   :  { %14518 = vst [vmem:[#allocation97_spill] sm:$0xff] %v9407_v50  ;;  %v2682_v59 = vmul.f32 %v9387_v52, %v2681_v38  ;;  %v1626_v21 = vmul.f32 %v9422_v6, %v9422_v6  ;;  %v3655_v44 = vmul.f32 %v9400_v48, %v9400_v48  ;;  %v9455_v49 = vadd.f32 %v14440_v45, %v14524_v23  ;;  %v14534_v50 = vld [vmem:[#allocation43_spill] sm:$0xff] }
 0x22b   :  { %14519 = vst [vmem:[#allocation130_spill] sm:$0xff] %v9422_v6  ;;  %v1958_v1 = vsub.f32 1.5, %v1957_v0  ;;  %v9457_v31 = vadd.f32 1e-05, %v2424_v28  ;;  %v2393_v55 = vsub.f32 %v2329_v22, %v2361_v39  ;;  %2858 = vadd.xlane.f32.xlu0 %v14521_v32  ;;  %v9460_v62 = vpack.c.bf16 %v4629_v17, %v4625_v29  ;;  %v14533_v28 = vld [vmem:[#allocation138_spill] sm:$0xff]  ;;  %v14546_v0 = vld [vmem:[#allocation45_spill] sm:$0xff] }
 0x22c   :  { %2952 = vadd.xlane.f32.xlu1 %v2918_v33  ;;  %v2692_v38 = vmul.f32 %v9403_v11, %v2691_v51  ;;  %v1689_v33 = vmax.f32 %v1657_v7, 0.0  ;;  %v1658_v20 = vsub.f32 %v1594_v8, %v1626_v21  ;;  %v9473_v22 = vmul.f32 %v9290_v34, %v1948_v26  ;;  %v1070_v7 = vpop.f32.mrf.mxu0  ;;  %v1221_v26 = vpop.f32.mrf.mxu2  ;;  %v14556_v6 = vld [vmem:[#allocation31_spill] sm:$0xff] }
 0x22d   :  { %14525 = vst [vmem:[#allocation121_spill] sm:$0xff] %v9457_v31  ;;  %3688 = vadd.xlane.f32.xlu2 %v3654_v19  ;;  %v9476_v29 = vadd.f32 %v9173_v15, %v1061_v5  ;;  %v14531_v19 = vld [vmem:[#allocation42_spill] sm:$0xff]  ;;  %v9482_v51 = vadd.f32 %v14440_v45, %v4370_v63  ;;  %v9486_v39 = vmul.f32 0.5, %v2682_v59  ;;  %v1159_v23 = vpop.f32.mrf.mxu1  ;;  %v1959_v63 = vmul.f32 %v9315_v43, %v1958_v1  ;;  %v14535_v59 = vld [vmem:[#allocation68_spill] sm:$0xff] }
 0x22e   :  { %14528 = vst [vmem:[#allocation110_spill] sm:$0xff] %v9473_v22  ;;  %1270 = vmatmul.bf16.gmra.mxu2 %v14531_v19  ;;  %v9484_v3 = vpop.eup %6189  ;;  %v9490_v15 = vpop.xlane.xlu0 %1428  ;;  %v2589_v19 = vsel %vm9468_vm5, %v14506_v47, %v14533_v28  ;;  %1359 = vmatmul.bf16.gmra.mxu3 %v14534_v50  ;;  %6191 = vrsqrt.f32 %v9457_v31  ;;  %v2425_v21 = vmax.f32 %v2393_v55, 0.0  ;;  %v2693_v47 = vmul.f32 0.5, %v2692_v38  ;;  %v14539_v22 = vld [vmem:[#allocation102_spill] sm:$0xff] }
 0x22f   :  { %14529 = vst [vmem:[#allocation162_spill] sm:$0xff] %v9476_v29  ;;  %v9502_v9 = vpop.xlane.xlu2 %2258  ;;  %v9512_v50 = vadd.f32 1e-05, %v1689_v33  ;;  %v1690_v1 = vmax.f32 %v1658_v20, 0.0  ;;  %v1071_v28 = vadd.f32 %v1070_v7, %v8564_v13  ;;  %v1965_v55 = vmul.f32 %v9484_v3, %v9397_v57 }
 0x230   :  { %v1523_v8 = vpop.xlane.xlu1 %1522  ;;  %v1064_v17 = vadd.f32 %v9241_v60, %v8564_v13  ;;  %v4636_v5 = vmax.f32 %v9482_v51, 0.0  ;;  %v2599_v4 = vsel %vm9508_vm6, %v14517_v37, %v14539_v22  ;;  %v2684_v38 = vsub.f32 1.5, %v9486_v39  ;;  %v1310_v37 = vpop.f32.mrf.mxu3  ;;  %v14545_v39 = vld [vmem:[#allocation51_spill] sm:$0xff] }
 0x231   :  { %14538 = vst [vmem:[#allocation42_spill] sm:$0xff] %v9512_v50  ;;  %v9535_v60 = vmul.f32 0.0078125, %v9351_v46  ;;  %v2330_v33 = vmul.f32 0.0078125, %v9411_v10  ;;  %v9538_v7 = vadd.f32 %v1159_v23, %v1071_v28  ;;  %v1963_v36 = vsel %vm9528_vm7, %v9315_v43, %v1959_v63 }
 0x232   :  { %v9544_v22 = vadd.f32 1e-05, %v2425_v21  ;;  %v1222_v51 = vadd.f32 %v1221_v26, %v9047_v42  ;;  %v14547_v46 = vsub.f32 %v14545_v39, %v14546_v0  ;;  %v2694_v32 = vsub.f32 1.5, %v2693_v47  ;;  %v14554_v0 = vld [vmem:[#allocation33_spill] sm:$0xff] }
 0x233   :  { %14542 = vst [vmem:[#allocation138_spill] sm:$0xff] %v9535_v60  ;;  %3690 = vadd.xlane.f32.xlu0 %v3655_v44  ;;  %6193 = vrsqrt.f32 %v9512_v50  ;;  %v9551_v10 = vadd.f32 1e-05, %v1690_v1  ;;  %v2362_v23 = vmul.f32 %v9535_v60, %v9535_v60  ;;  %v1966_v21 = vmul.f32 %v9484_v3, %v1965_v55 }
 0x234   :  { %14543 = vst [vmem:[#allocation43_spill] sm:$0xff] %v9538_v7  ;;  %3594 = vadd.xlane.f32.xlu1 %v9400_v48  ;;  %v2828_v34 = vmul.f32 %v2589_v19, %v14547_v46  ;;  %v9556_v43 = vpop.eup %6191  ;;  %v9560_v44 = vadd.f32 %v9251_v41, %v1064_v17  ;;  %v9565_v63 = vmul.f32 0.0078125, %v9431_v24  ;;  %v1073_v47 = vpop.f32.mrf.mxu0  ;;  %v14553_v28 = vsub.f32 %v14502_v35, %v9030_v30  ;;  %v14555_v19 = vld [vmem:[#allocation55_spill] sm:$0xff] }
 0x235   :  { %14544 = vst [vmem:[#allocation68_spill] sm:$0xff] %v9544_v22  ;;  %2954 = vadd.xlane.f32.xlu2 %v9435_v14  ;;  %vm2697_vm9 = vweird.f32 %v9403_v11  ;;  %v2394_v20 = vsub.f32 %v2330_v33, %v2362_v23  ;;  %v1074_v55 = vadd.f32 %v1073_v47, %v8564_v13  ;;  %v1162_v41 = vpop.f32.mrf.mxu1  ;;  %6195 = vrsqrt.f32 %v9544_v22  ;;  %v14559_v47 = vld [vmem:[#allocation20_spill] sm:$0xff] }
 0x236   :  { %14548 = vst [vmem:[#allocation102_spill] sm:$0xff] %v9551_v10  ;;  %v2103_v14 = vmul.f32 %v1963_v36, %v14553_v28  ;;  %v9574_v17 = vpop.xlane.xlu0 %1526  ;;  %v1595_v39 = vmul.f32 0.0078125, %v1523_v8  ;;  %v2920_v46 = vmul.f32 %v14554_v0, %v14554_v0  ;;  %v14557_v30 = vsub.f32 %v14555_v19, %v14556_v6  ;;  %vm9617_vm10 = vmor %vm2696_vm8, %vm2697_vm9 }
 0x237   :  { %14549 = vst [vmem:[#allocation51_spill] sm:$0xff] %v9556_v43  ;;  %v9577_v24 = vpop.xlane.xlu2 %1524  ;;  %v2695_v36 = vmul.f32 %v9403_v11, %v2694_v32  ;;  %v2701_v33 = vmul.f32 %v9556_v43, %v9457_v31  ;;  %6197 = vrsqrt.f32 %v9551_v10  ;;  %v9588_v23 = vadd.f32 %v1310_v37, %v1222_v51  ;;  %v14562_v32 = vld [vmem:[#allocation112_spill] sm:$0xff]  ;;  %v14574_v31 = vld [vmem:[#allocation49_spill] sm:$0xff] }
 0x238   :  { %14550 = vst [vmem:[#allocation45_spill] sm:$0xff] %v9560_v44  ;;  %v9567_v1 = vpop.xlane.xlu1 %2164  ;;  %v2829_v35 = vmul.f32 %v2599_v4, %v14557_v30  ;;  %5060 = vmatmul.bf16.vlgmr.msra.gmra.mxu0 %v14559_v47  ;;  %v1967_v8 = vmul.f32 0.5, %v1966_v21  ;;  %v9592_v28 = vmul.f32 0.0078125, %v9426_v27  ;;  %v1627_v26 = vmul.f32 %v9565_v63, %v9565_v63  ;;  %v1223_v4 = vpop.f32.mrf.mxu2  ;;  %5149 = vmatmul.bf16.vlgmr.msra.gmra.mxu1 %v14562_v32 }
 0x239   :  { %14552 = vst [vmem:[#allocation163_spill] sm:$0xff] %v9565_v63  ;;  %v9596_v6 = vadd.f32 %v1162_v41, %v1074_v55  ;;  %v9599_v19 = vpop.eup %6193  ;;  %v9602_v30 = vmul.f32 %v9387_v52, %v2684_v38  ;;  %v2426_v37 = vmax.f32 %v2394_v20, 0.0  ;;  %v14565_v51 = vmax.f32 %v9455_v49, 0.0  ;;  %v1312_v20 = vpop.f32.mrf.mxu3  ;;  %v14600_v63 = vld [vmem:[#allocation129_spill] sm:$0xff] }
 0x23a   :  { %14558 = vst [vmem:[#allocation55_spill] sm:$0xff] %v9588_v23  ;;  %v4367_v21 = vmul.f32 %v14453_v53, %v2828_v34  ;;  %v9611_v55 = vmul.f32 %v7672_v58, %v2103_v14  ;;  %vm1970_vm11 = vweird.f32 %v9397_v57  ;;  %v1659_v38 = vsub.f32 %v1595_v39, %v1627_v26 }
 0x23b   :  { %14560 = vst [vmem:[#allocation31_spill] sm:$0xff] %v9592_v28  ;;  %v9607_v27 = vpack.c.bf16 %v4636_v5, %v14565_v51  ;;  %v2331_v49 = vmul.f32 0.0078125, %v9502_v9  ;;  %2956 = vadd.xlane.f32.xlu0 %v2920_v46  ;;  %v2699_v34 = vsel %vm9617_vm10, %v9403_v11, %v2695_v36  ;;  %v2702_v5 = vmul.f32 %v9556_v43, %v2701_v33  ;;  %v9631_v47 = vpop.eup %6195  ;;  %v14570_v33 = vld [vmem:[#allocation48_spill] sm:$0xff] }
 0x23c   :  { %14561 = vst [vmem:[#allocation20_spill] sm:$0xff] %v9596_v6  ;;  %2860 = vadd.xlane.f32.xlu1 %v14554_v0  ;;  %v1066_v14 = vadd.f32 %v9332_v18, %v8564_v13  ;;  %v1224_v56 = vadd.f32 %v1223_v4, %v9047_v42  ;;  %v1968_v26 = vsub.f32 1.5, %v1967_v8  ;;  %v1975_v9 = vmul.f32 %v9599_v19, %v9512_v50  ;;  %v1075_v11 = vpop.f32.mrf.mxu0  ;;  %v14572_v4 = vld [vmem:[#allocation23_spill] sm:$0xff] }
 0x23d   :  { %14563 = vst [vmem:[#allocation112_spill] sm:$0xff] %v9599_v19  ;;  %3596 = vadd.xlane.f32.xlu2 %v9588_v23  ;;  %v2363_v39 = vmul.f32 %v9592_v28, %v9592_v28  ;;  %v4371_v36 = vmul.f32 %v14453_v53, %v2829_v35  ;;  %v9639_v18 = vpop.eup %6197  ;;  %vm1871_vm12 = vweird.f32 %v14572_v4  ;;  %vm1971_vm13 = vweird.f32 %v9484_v3  ;;  %v1164_v51 = vpop.f32.mrf.mxu1 }
 0x23e   :  { %14564 = vst [vmem:[#allocation164_spill] sm:$0xff] %v9602_v30  ;;  %1275 = vmatmul.bf16.gmra.mxu2 %v14570_v33  ;;  %v9643_v32 = vadd.f32 1e-05, %v2426_v37  ;;  %v1076_v8 = vadd.f32 %v1075_v11, %v8564_v13  ;;  %v9646_v41 = vpop.xlane.xlu0 %2262  ;;  %v9649_v0 = vadd.f32 %v14393_v16, %v4367_v21  ;;  %1364 = vmatmul.bf16.gmra.mxu3 %v14574_v31  ;;  %v1691_v30 = vmax.f32 %v1659_v38, 0.0  ;;  %v14576_v11 = vld [vmem:[#allocation122_spill] sm:$0xff]  ;;  %vm9695_vm0 = vmor %vm1970_vm11, %vm1971_vm13 }
 0x23f   :  { %14566 = vst [vmem:[#allocation165_spill] sm:$0xff] %v9611_v55  ;;  %v14575_v35 = vsub.f32 %v14514_v40, %v9136_v2  ;;  %v1069_v50 = vadd.f32 %v9409_v54, %v8564_v13  ;;  %v2395_v37 = vsub.f32 %v2331_v49, %v2363_v39  ;;  %v9657_v55 = vpop.xlane.xlu2 %2260  ;;  %vm1870_vm14 = vweird.f32 %v14576_v11 }
 0x240   :  { %14569 = vst [vmem:[#allocation166_spill] sm:$0xff] %v9631_v47  ;;  %v1431_v46 = vpop.xlane.xlu1 %1430  ;;  %v2703_v48 = vmul.f32 0.5, %v2702_v5  ;;  %v9660_v52 = vadd.f32 %v1164_v51, %v1076_v8  ;;  %v3656_v31 = vmul.f32 %v9588_v23, %v9588_v23  ;;  %v1969_v2 = vmul.f32 %v9484_v3, %v1968_v26  ;;  %v14581_v26 = vld [vmem:[#allocation135_spill] sm:$0xff]  ;;  %vm9747_vm2 = vmor %vm1870_vm14, %vm1871_vm12 }
 0x241   :  { %14571 = vst [vmem:[#allocation48_spill] sm:$0xff] %v9639_v18  ;;  %v2839_v33 = vmul.f32 %v2699_v34, %v14575_v35  ;;  %v9662_v21 = vmul.f32 0.0078125, %v1431_v46  ;;  %v1976_v40 = vmul.f32 %v9599_v19, %v1975_v9  ;;  %v2711_v54 = vmul.f32 %v9631_v47, %v9544_v22  ;;  %v14588_v35 = vld [vmem:[#allocation152_spill] sm:$0xff]  ;;  %v14595_v23 = vld [vmem:[#allocation127_spill] sm:$0xff] }
 0x242   :  { %14573 = vst [vmem:[#allocation23_spill] sm:$0xff] %v9643_v32  ;;  %v9670_v38 = vadd.f32 %v1312_v20, %v1224_v56  ;;  %v9673_v49 = vadd.f32 %v9343_v25, %v1066_v14  ;;  %v1985_v34 = vmul.f32 %v9639_v18, %v9551_v10  ;;  %6199 = vrsqrt.f32 %v9643_v32 }
 0x243   :  { %14577 = vst [vmem:[#allocation49_spill] sm:$0xff] %v9660_v52  ;;  %vm1881_vm15 = vweird.f32 %v14581_v26  ;;  %v9681_v9 = vadd.f32 1e-05, %v1691_v30  ;;  %v2427_v46 = vmax.f32 %v2395_v37, 0.0  ;;  %v9685_v56 = vadd.f32 %v14393_v16, %v4371_v36  ;;  %v14589_v37 = vld [vmem:[#allocation131_spill] sm:$0xff] }
 0x244   :  { %14578 = vst [vmem:[#allocation122_spill] sm:$0xff] %v9670_v38  ;;  %3692 = vadd.xlane.f32.xlu1 %v3656_v31  ;;  %3598 = vadd.xlane.f32.xlu0 %v9670_v38  ;;  %v9689_v14 = vmul.f32 %v14453_v53, %v2839_v33  ;;  %v9700_v30 = vadd.f32 %v9424_v12, %v1069_v50  ;;  %v1226_v33 = vpop.f32.mrf.mxu2  ;;  %vm1880_vm1 = vweird.f32 %v14589_v37  ;;  %v2704_v31 = vsub.f32 1.5, %v2703_v48  ;;  %v1078_v50 = vpop.f32.mrf.mxu0  ;;  %v14601_v48 = vld [vmem:[#allocation136_spill] sm:$0xff] }
 0x245   :  { %14579 = vst [vmem:[#allocation167_spill] sm:$0xff] %v9673_v49  ;;  %v1629_v51 = vmul.f32 %v9662_v21, %v9662_v21  ;;  %2862 = vadd.xlane.f32.xlu2 %v14588_v35  ;;  %v1973_v57 = vsel %vm9695_vm0, %v9484_v3, %v1969_v2  ;;  %v1977_v39 = vmul.f32 0.5, %v1976_v40  ;;  %v2712_v12 = vmul.f32 %v9631_v47, %v2711_v54  ;;  %v1167_v5 = vpop.f32.mrf.mxu1  ;;  %vm9797_vm7 = vmor %vm1880_vm1, %vm1881_vm15  ;;  %v14668_v49 = vld [vmem:[#allocation62_spill] sm:$0xff] }
 0x246   :  { %14582 = vst [vmem:[#allocation135_spill] sm:$0xff] %v9681_v9  ;;  %v1986_v36 = vmul.f32 %v9639_v18, %v1985_v34  ;;  %v9716_v28 = vmul.f32 0.0078125, %v9490_v15  ;;  %v1597_v8 = vmul.f32 0.0078125, %v9574_v17  ;;  %v1079_v60 = vadd.f32 %v1078_v50, %v8564_v13  ;;  %v9720_v10 = vpop.xlane.xlu0 %2168  ;;  %v6090_v15 = vld [vmem:[%s13529_s5 + $0xa8] sm:$0xff] }
 0x247   :  { %14583 = vst [vmem:[#allocation168_spill] sm:$0xff] %v9689_v14  ;;  %6201 = vrsqrt.f32 %v9681_v9  ;;  %v9725_v2 = vadd.f32 1e-05, %v2427_v46  ;;  %v2167_v40 = vpop.xlane.xlu2 %2166  ;;  %v6098_v46 = vld [vmem:[%s13529_s5 + $0xe8] sm:$0xff]  ;;  %v2921_v3 = vmul.f32 %v14588_v35, %v14588_v35  ;;  %5232 = vmatpush.bf16.msra.mxu2 %v6090_v15  ;;  %vm2617_vm4 = vweird.f32 %v14601_v48 }
 0x248   :  { %14586 = vst [vmem:[#allocation169_spill] sm:$0xff] %v9700_v30  ;;  %v9712_v25 = vpop.xlane.xlu1 %1528  ;;  %v9731_v17 = vpop.eup %6199  ;;  %v1661_v34 = vsub.f32 %v1597_v8, %v1629_v51  ;;  %v9733_v20 = vadd.f32 %v1167_v5, %v1079_v60  ;;  %v9735_v50 = vmul.f32 0.0078125, %v2167_v40  ;;  %5065 = vmatmul.bf16.gmra.mxu0 %v14595_v23  ;;  %v14598_v60 = vld [vmem:[#allocation133_spill] sm:$0xff]  ;;  %v14599_v23 = vsub.f32 %v14535_v59, %v9222_v61  ;;  %v14603_v61 = vld [vmem:[#allocation47_spill] sm:$0xff] }
 0x249   :  { %14590 = vst [vmem:[#allocation131_spill] sm:$0xff] %v9716_v28  ;;  %vm2607_vm3 = vweird.f32 %v14598_v60  ;;  %v1978_v8 = vsub.f32 1.5, %v1977_v39  ;;  %v2713_v51 = vmul.f32 0.5, %v2712_v12  ;;  %v1596_v40 = vmul.f32 0.0078125, %v9577_v24  ;;  %5154 = vmatmul.bf16.gmra.mxu1 %v14600_v63  ;;  %5321 = vmatpush.bf16.msra.mxu3 %v6098_v46  ;;  %v14604_v24 = vld [vmem:[#allocation126_spill] sm:$0xff] }
 0x24a   :  { %14592 = vst [vmem:[#allocation170_spill] sm:$0xff] %v9725_v2  ;;  %v2104_v5 = vmul.f32 %v1973_v57, %v14599_v23  ;;  %v9759_v11 = vmul.f32 %v9556_v43, %v2704_v31  ;;  %v1987_v35 = vmul.f32 0.5, %v1986_v36  ;;  %v1628_v22 = vmul.f32 %v9716_v28, %v9716_v28  ;;  %v14606_v57 = vld [vmem:[#allocation107_spill] sm:$0xff]  ;;  %v14607_v31 = vld [vmem:[#allocation132_spill] sm:$0xff] }
 0x24b   :  { %14593 = vst [vmem:[#allocation171_spill] sm:$0xff] %v9731_v17  ;;  %v1873_v59 = vsel %vm9747_vm2, %v14572_v4, %v14603_v61  ;;  %vm2606_vm5 = vweird.f32 %v14604_v24  ;;  %v2721_v63 = vmul.f32 %v9731_v17, %v9643_v32  ;;  %6203 = vrsqrt.f32 %v9725_v2  ;;  %v14642_v24 = vld [vmem:[#allocation59_spill] sm:$0xff] }
 0x24c   :  { %14594 = vst [vmem:[#allocation172_spill] sm:$0xff] %v9733_v20  ;;  %v1315_v20 = vpop.f32.mrf.mxu3  ;;  %2958 = vadd.xlane.f32.xlu1 %v2921_v3  ;;  %v9772_v39 = vmul.f32 0.0078125, %v9567_v1  ;;  %v2365_v36 = vmul.f32 %v9735_v50, %v9735_v50  ;;  %2864 = vadd.xlane.f32.xlu0 %v14606_v57  ;;  %vm2616_vm6 = vweird.f32 %v14607_v31  ;;  %v1693_v12 = vmax.f32 %v1661_v34, 0.0  ;;  %v1080_v32 = vpop.f32.mrf.mxu0  ;;  %v14611_v34 = vld [vmem:[#allocation52_spill] sm:$0xff]  ;;  %vm9855_vm10 = vmor %vm2606_vm5, %vm2607_vm3 }
 0x24d   :  { %14602 = vst [vmem:[#allocation127_spill] sm:$0xff] %v9759_v11  ;;  %v2333_v4 = vmul.f32 0.0078125, %v9646_v41  ;;  %v1227_v3 = vadd.f32 %v1226_v33, %v9047_v42  ;;  %v3657_v15 = vmul.f32 %v9670_v38, %v9670_v38  ;;  %v9782_v54 = vpop.eup %6201  ;;  %v9785_v1 = vmul.f32 %v7672_v58, %v2104_v5  ;;  %v14614_v33 = vld [vmem:[#allocation36_spill] sm:$0xff]  ;;  %v1228_v28 = vpop.f32.mrf.mxu2  ;;  %vm9870_vm11 = vmor %vm2616_vm6, %vm2617_vm4 }
 0x24e   :  { %14605 = vst [vmem:[#allocation133_spill] sm:$0xff] %v9772_v39  ;;  %v9788_v46 = vmul.f32 %v9599_v19, %v1978_v8  ;;  %v2714_v23 = vsub.f32 1.5, %v2713_v51  ;;  %v1660_v61 = vsub.f32 %v1596_v40, %v1628_v22  ;;  %1280 = vmatmul.bf16.gmra.mxu2 %v14611_v34  ;;  %vm1891_vm8 = vweird.f32 %v14614_v33  ;;  %v1169_v40 = vpop.f32.mrf.mxu1  ;;  %v9804_v38 = vpop.xlane.xlu0 %1434  ;;  %v14615_v34 = vld [vmem:[#allocation53_spill] sm:$0xff]  ;;  %v14617_v19 = vld [vmem:[#allocation108_spill] sm:$0xff] }
 0x24f   :  { %14608 = vst [vmem:[#allocation129_spill] sm:$0xff] %v9782_v54  ;;  %v1988_v5 = vsub.f32 1.5, %v1987_v35  ;;  %v2332_v8 = vmul.f32 0.0078125, %v9657_v55  ;;  %v2397_v51 = vsub.f32 %v2333_v4, %v2365_v36  ;;  %3694 = vadd.xlane.f32.xlu2 %v3657_v15  ;;  %v1081_v22 = vadd.f32 %v1080_v32, %v8564_v13  ;;  %1369 = vmatmul.bf16.gmra.mxu3 %v14615_v34  ;;  %v1433_v43 = vpop.xlane.xlu2 %1432  ;;  %v14618_v35 = vld [vmem:[#allocation56_spill] sm:$0xff]  ;;  %v14619_v36 = vld [vmem:[#allocation113_spill] sm:$0xff]  ;;  %v14621_v15 = vld [vmem:[#allocation139_spill] sm:$0xff] }
 0x250   :  { %14609 = vst [vmem:[#allocation136_spill] sm:$0xff] %v9785_v1  ;;  %v9790_v11 = vpop.xlane.xlu1 %2170  ;;  %v2722_v37 = vmul.f32 %v9731_v17, %v2721_v63  ;;  %v1883_v55 = vsel %vm9797_vm7, %v14581_v26, %v14617_v19  ;;  %v14620_v4 = vsub.f32 %v14618_v35, %v14619_v36  ;;  %vm1890_vm9 = vweird.f32 %v14621_v15  ;;  %v14650_v15 = vld [vmem:[#allocation50_spill] sm:$0xff] }
 0x251   :  { %14610 = vst [vmem:[#allocation47_spill] sm:$0xff] %v9788_v46  ;;  %v2364_v34 = vmul.f32 %v9772_v39, %v9772_v39  ;;  %v9820_v14 = vadd.f32 1e-05, %v1693_v12  ;;  %v9822_v63 = vadd.f32 %v1315_v20, %v1227_v3  ;;  %v9824_v46 = vadd.f32 %v1169_v40, %v1081_v22  ;;  %v9826_v1 = vpop.eup %6203  ;;  %v14639_v39 = vld [vmem:[#allocation119_spill] sm:$0xff]  ;;  %vm9909_vm12 = vmor %vm1890_vm9, %vm1891_vm8 }
 0x252   :  { %v2094_v32 = vmul.f32 %v1873_v59, %v14620_v4  ;;  %14624 = vst [vmem:[#allocation52_spill] sm:$0xff] %v9826_v1  ;;  %v9829_v19 = vmul.f32 %v9631_v47, %v2714_v23  ;;  %v1995_v26 = vmul.f32 %v9782_v54, %v9681_v9  ;;  %v1692_v59 = vmax.f32 %v1660_v61, 0.0  ;;  %v14630_v61 = vld [vmem:[#allocation61_spill] sm:$0xff] }
 0x253   :  { %14622 = vst [vmem:[#allocation126_spill] sm:$0xff] %v9822_v63  ;;  %v14626_v41 = vmax.f32 %v9649_v0, 0.0  ;;  %v14627_v35 = vmax.f32 %v9685_v56, 0.0  ;;  %v9840_v20 = vmul.f32 %v9639_v18, %v1988_v5  ;;  %v2396_v40 = vsub.f32 %v2332_v8, %v2364_v34  ;;  %v14631_v9 = vld [vmem:[#allocation21_spill] sm:$0xff] }
 0x254   :  { %14623 = vst [vmem:[#allocation132_spill] sm:$0xff] %v9824_v46  ;;  %v2429_v36 = vmax.f32 %v2397_v51, 0.0  ;;  %3600 = vadd.xlane.f32.xlu1 %v9822_v63  ;;  %v2723_v23 = vmul.f32 0.5, %v2722_v37  ;;  %v9845_v4 = vmul.f32 0.0078125, %v1433_v43  ;;  %v14632_v0 = vsub.f32 %v14630_v61, %v14631_v9  ;;  %v1317_v43 = vpop.f32.mrf.mxu3  ;;  %v1083_v34 = vpop.f32.mrf.mxu0 }
 0x255   :  { %14625 = vst [vmem:[#allocation36_spill] sm:$0xff] %v9829_v19  ;;  %v9837_v12 = vpack.c.bf16 %v14627_v35, %v14626_v41  ;;  %v4374_v56 = vmul.f32 %v7672_v58, %v2094_v32  ;;  %v2731_v8 = vmul.f32 %v9826_v1, %v9725_v2  ;;  %6205 = vrsqrt.f32 %v9820_v14  ;;  %v14638_v35 = vld [vmem:[#allocation88_spill] sm:$0xff] }
 0x256   :  { %14628 = vst [vmem:[#allocation53_spill] sm:$0xff] %v9840_v20  ;;  %v2095_v19 = vmul.f32 %v1883_v55, %v14632_v0  ;;  %v3658_v9 = vmul.f32 %v9822_v63, %v9822_v63  ;;  %v2922_v51 = vmul.f32 %v14606_v57, %v14606_v57  ;;  %v1996_v37 = vmul.f32 %v9782_v54, %v1995_v26  ;;  %v1172_v26 = vpop.f32.mrf.mxu1 }
 0x257   :  { %v9875_v55 = vadd.f32 1e-05, %v1692_v59  ;;  %v1630_v32 = vmul.f32 %v9845_v4, %v9845_v4  ;;  %v2609_v61 = vsel %vm9855_vm10, %v14598_v60, %v14638_v35  ;;  %v2428_v0 = vmax.f32 %v2396_v40, 0.0  ;;  %v2265_v59 = vpop.xlane.xlu0 %2264  ;;  %v1531_v20 = vpop.xlane.xlu2 %1530 }
 0x258   :  { %v1437_v41 = vpop.xlane.xlu1 %1436  ;;  %v9883_v31 = vadd.f32 1e-05, %v2429_v36  ;;  %3696 = vadd.xlane.f32.xlu0 %v3658_v9  ;;  %2960 = vadd.xlane.f32.xlu2 %v2922_v51  ;;  %v1084_v22 = vadd.f32 %v1083_v34, %v8564_v13  ;;  %v2619_v3 = vsel %vm9870_vm11, %v14601_v48, %v14639_v39  ;;  %v2724_v63 = vsub.f32 1.5, %v2723_v23  ;;  %v1231_v51 = vpop.f32.mrf.mxu2  ;;  %v14641_v34 = vld [vmem:[#allocation28_spill] sm:$0xff]  ;;  %v14643_v48 = vld [vmem:[#allocation117_spill] sm:$0xff] }
 0x259   :  { %14637 = vst [vmem:[#allocation108_spill] sm:$0xff] %v9875_v55  ;;  %v1598_v57 = vmul.f32 0.0078125, %v9712_v25  ;;  %v4378_v60 = vmul.f32 %v7672_v58, %v2095_v19  ;;  %v9893_v40 = vadd.f32 %v14440_v45, %v4374_v56  ;;  %v2732_v36 = vmul.f32 %v9826_v1, %v2731_v8  ;;  %5070 = vmatmul.bf16.gmra.mxu0 %v14641_v34  ;;  %v14648_v56 = vld [vmem:[#allocation149_spill] sm:$0xff] }
 0x25a   :  { %v1229_v5 = vadd.f32 %v1228_v28, %v9047_v42  ;;  %v9897_v9 = vadd.f32 %v1172_v26, %v1084_v22  ;;  %v14644_v39 = vsub.f32 %v14642_v24, %v14643_v48  ;;  %v9913_v19 = vmul.f32 0.5, %v1996_v37  ;;  %5159 = vmatmul.bf16.gmra.mxu1 %v14648_v56  ;;  %v14652_v26 = vld [vmem:[#allocation118_spill] sm:$0xff]  ;;  %v14654_v24 = vld [vmem:[#allocation24_spill] sm:$0xff]  ;;  %v14657_v56 = vld [vmem:[#allocation93_spill] sm:$0xff] }
 0x25b   :  { %6207 = vrsqrt.f32 %v9875_v55  ;;  %v9917_v28 = vmul.f32 0.0078125, %v9720_v10  ;;  %v1662_v22 = vsub.f32 %v1598_v57, %v1630_v32  ;;  %v9920_v8 = vpop.eup %6205  ;;  %v9922_v35 = vadd.f32 1e-05, %v2428_v0 }
 0x25c   :  { %14640 = vst [vmem:[#allocation56_spill] sm:$0xff] %v9897_v9  ;;  %v9903_v23 = vmul.f32 %v2609_v61, %v14644_v39  ;;  %6209 = vrsqrt.f32 %v9883_v31  ;;  %2866 = vadd.xlane.f32.xlu1 %v14650_v15  ;;  %v14651_v61 = vld [vmem:[#allocation60_spill] sm:$0xff]  ;;  %v9934_v57 = vmul.f32 %v9731_v17, %v2724_v63  ;;  %v9936_v32 = vmul.f32 0.0078125, %v1437_v41 }
 0x25d   :  { %14647 = vst [vmem:[#allocation113_spill] sm:$0xff] %v9917_v28  ;;  %v14653_v37 = vsub.f32 %v14651_v61, %v14652_v26  ;;  %v2334_v0 = vmul.f32 0.0078125, %v2265_v59  ;;  %v9939_v48 = vadd.f32 %v14440_v45, %v4378_v60  ;;  %v9941_v39 = vmul.f32 0.5, %v2732_v36  ;;  %v1320_v26 = vpop.f32.mrf.mxu3  ;;  %v1085_v36 = vpop.f32.mrf.mxu0 }
 0x25e   :  { %14649 = vst [vmem:[#allocation139_spill] sm:$0xff] %v9922_v35  ;;  %v1998_v63 = vsub.f32 1.5, %v9913_v19  ;;  %v2015_v41 = vmul.f32 %v9920_v8, %v9820_v14  ;;  %v2366_v59 = vmul.f32 %v9917_v28, %v9917_v28  ;;  %v1694_v60 = vmax.f32 %v1662_v22, 0.0  ;;  %v1174_v61 = vpop.f32.mrf.mxu1 }
 0x25f   :  { %v2831_v34 = vmul.f32 %v2619_v3, %v14653_v37  ;;  %14655 = vst [vmem:[#allocation61_spill] sm:$0xff] %v9934_v57  ;;  %v9945_v3 = vadd.f32 %v1317_v43, %v1229_v5  ;;  %v2923_v37 = vmul.f32 %v14650_v15, %v14650_v15  ;;  %v14659_v57 = vld [vmem:[#allocation57_spill] sm:$0xff]  ;;  %6211 = vrsqrt.f32 %v9922_v35  ;;  %v1533_v15 = vpop.xlane.xlu0 %1532  ;;  %v2173_v9 = vpop.xlane.xlu2 %2172 }
 0x260   :  { %14656 = vst [vmem:[#allocation21_spill] sm:$0xff] %v9936_v32  ;;  %v2267_v10 = vpop.xlane.xlu1 %2266  ;;  %1285 = vmatmul.bf16.gmra.mxu2 %v14659_v57  ;;  %v9957_v43 = vmul.f32 0.0078125, %v9804_v38  ;;  %v1232_v5 = vadd.f32 %v1231_v51, %v9047_v42  ;;  %v1086_v19 = vadd.f32 %v1085_v36, %v8564_v13  ;;  %v9965_v22 = vmul.f32 0.0078125, %v9790_v11  ;;  %v14663_v51 = vld [vmem:[#allocation58_spill] sm:$0xff] }
 0x261   :  { %14658 = vst [vmem:[#allocation88_spill] sm:$0xff] %v9945_v3  ;;  %2962 = vadd.xlane.f32.xlu0 %v2923_v37  ;;  %3602 = vadd.xlane.f32.xlu2 %v9945_v3  ;;  %v9962_v2 = vpop.eup %6207  ;;  %v9969_v57 = vmul.f32 %v9936_v32, %v9936_v32  ;;  %v2398_v38 = vsub.f32 %v2334_v0, %v2366_v59  ;;  %v1600_v17 = vmul.f32 0.0078125, %v1533_v15  ;;  %v2734_v36 = vsub.f32 1.5, %v9941_v39 }
 0x262   :  { %14660 = vst [vmem:[#allocation119_spill] sm:$0xff] %v9957_v43  ;;  %1374 = vmatmul.bf16.gmra.mxu3 %v14663_v51  ;;  %v9972_v37 = vpop.eup %6209  ;;  %v1599_v18 = vmul.f32 0.0078125, %v1531_v20  ;;  %v9975_v46 = vadd.f32 %v1174_v61, %v1086_v19  ;;  %v3659_v11 = vmul.f32 %v9945_v3, %v9945_v3  ;;  %v2016_v47 = vmul.f32 %v9920_v8, %v2015_v41  ;;  %v1233_v20 = vpop.f32.mrf.mxu2  ;;  %v14666_v61 = vld [vmem:[#allocation159_spill] sm:$0xff]  ;;  %v6089_v41 = vld [vmem:[%s13529_s5 + $0xa0] sm:$0xff] }
 0x263   :  { %14661 = vst [vmem:[#allocation28_spill] sm:$0xff] %v9962_v2  ;;  %v9980_v6 = vadd.f32 1e-05, %v1694_v60  ;;  %v2335_v52 = vmul.f32 0.0078125, %v2267_v10  ;;  %v1664_v15 = vsub.f32 %v1600_v17, %v9969_v57  ;;  %v2005_v0 = vmul.f32 %v9962_v2, %v9875_v55  ;;  %v6097_v17 = vld [vmem:[%s13529_s5 + $0xe0] sm:$0xff]  ;;  %5233 = vmatpush.bf16.msra.mxu2 %v6089_v41 }
 0x264   :  { %14662 = vst [vmem:[#allocation59_spill] sm:$0xff] %v9965_v22  ;;  %v1631_v59 = vmul.f32 %v9957_v43, %v9957_v43  ;;  %v9987_v39 = vadd.f32 %v1320_v26, %v1232_v5  ;;  %3698 = vadd.xlane.f32.xlu1 %v3659_v11  ;;  %v2924_v19 = vmul.f32 %v14666_v61, %v14666_v61  ;;  %v2430_v60 = vmax.f32 %v2398_v38, 0.0 }
 0x265   :  { %14664 = vst [vmem:[#allocation117_spill] sm:$0xff] %v9975_v46  ;;  %v2751_v10 = vmul.f32 %v9972_v37, %v9883_v31  ;;  %v2367_v26 = vmul.f32 %v9965_v22, %v9965_v22  ;;  %v4640_v5 = vmax.f32 %v9893_v40, 0.0  ;;  %v10002_v57 = vpop.eup %6211  ;;  %5322 = vmatpush.bf16.msra.mxu3 %v6097_v17  ;;  %v4644_v11 = vmax.f32 %v9939_v48, 0.0  ;;  %v1088_v30 = vpop.f32.mrf.mxu0  ;;  %v14669_v40 = vld [vmem:[#allocation77_spill] sm:$0xff] }
 0x266   :  { %14665 = vst [vmem:[#allocation149_spill] sm:$0xff] %v9987_v39  ;;  %v1663_v51 = vsub.f32 %v1599_v18, %v1631_v59  ;;  %v4375_v3 = vmul.f32 %v14453_v53, %v9903_v23  ;;  %v4379_v55 = vmul.f32 %v14453_v53, %v2831_v34  ;;  %v2017_v46 = vmul.f32 0.5, %v2016_v47  ;;  %v14675_v17 = vld [vmem:[#allocation105_spill] sm:$0xff] }
 0x267   :  { %14667 = vst [vmem:[#allocation60_spill] sm:$0xff] %v10002_v57  ;;  %6213 = vrsqrt.f32 %v9980_v6  ;;  %v2399_v7 = vsub.f32 %v2335_v52, %v2367_v26  ;;  %v14670_v44 = vsub.f32 %v14668_v49, %v14669_v40  ;;  %v14671_v18 = vsel %vm9909_vm12, %v14614_v33, %v14654_v24  ;;  %v1177_v49 = vpop.f32.mrf.mxu1  ;;  %v2175_v34 = vpop.xlane.xlu0 %2174  ;;  %v14677_v40 = vld [vmem:[#allocation100_spill] sm:$0xff] }
 0x268   :  { %v2269_v38 = vpop.xlane.xlu1 %2268  ;;  %v10018_v59 = vmul.f32 %v9782_v54, %v1998_v63  ;;  %v10021_v23 = vmul.f32 %v9826_v1, %v2734_v36  ;;  %v2006_v47 = vmul.f32 %v9962_v2, %v2005_v0  ;;  %v10024_v52 = vmul.f32 0.0078125, %v2173_v9  ;;  %v1322_v63 = vpop.f32.mrf.mxu3 }
 0x269   :  { %v2096_v48 = vmul.f32 %v14671_v18, %v14670_v44  ;;  %2964 = vadd.xlane.f32.xlu0 %v2924_v19  ;;  %3604 = vadd.xlane.f32.xlu2 %v9987_v39  ;;  %vm2020_vm13 = vweird.f32 %v9820_v14  ;;  %v2741_v44 = vmul.f32 %v10002_v57, %v9922_v35  ;;  %v2752_v33 = vmul.f32 %v9972_v37, %v2751_v10  ;;  %v1439_v36 = vpop.xlane.xlu2 %1438 }
 0x26a   :  { %14672 = vst [vmem:[#allocation118_spill] sm:$0xff] %v10018_v59  ;;  %v10031_v25 = vadd.f32 1e-05, %v2430_v60  ;;  %v1234_v24 = vadd.f32 %v1233_v20, %v9047_v42  ;;  %v1695_v9 = vmax.f32 %v1663_v51, 0.0  ;;  %v10036_v0 = vmul.f32 %v10024_v52, %v10024_v52  ;;  %5075 = vmatmul.bf16.gmra.mxu0 %v14675_v17  ;;  %5164 = vmatmul.bf16.gmra.mxu1 %v9460_v62  ;;  %v1236_v20 = vpop.f32.mrf.mxu2  ;;  %v14703_v59 = vld [vmem:[#allocation39_spill] sm:$0xff] }
 0x26b   :  { %14673 = vst [vmem:[#allocation24_spill] sm:$0xff] %v10021_v23  ;;  %v1089_v19 = vadd.f32 %v1088_v30, %v8564_v13  ;;  %v10039_v41 = vmul.f32 0.0078125, %v2269_v38  ;;  %v2018_v26 = vsub.f32 1.5, %v2017_v46  ;;  %v2431_v18 = vmax.f32 %v2399_v7, 0.0 }
 0x26c   :  { %14674 = vst [vmem:[#allocation93_spill] sm:$0xff] %v10024_v52  ;;  %v1696_v51 = vmax.f32 %v1664_v15, 0.0  ;;  %2868 = vadd.xlane.f32.xlu1 %v14666_v61  ;;  %v10052_v38 = vpack.c.bf16 %v4644_v11, %v4640_v5  ;;  %v2007_v17 = vmul.f32 0.5, %v2006_v47  ;;  %v2742_v60 = vmul.f32 %v10002_v57, %v2741_v44  ;;  %v14686_v61 = vld [vmem:[#allocation44_spill] sm:$0xff] }
 0x26d   :  { %v10047_v35 = vadd.f32 %v1177_v49, %v1089_v19  ;;  %v10054_v46 = vpop.eup %6213  ;;  %6215 = vrsqrt.f32 %v10031_v25  ;;  %v10059_v7 = vadd.f32 %v14393_v16, %v4375_v3  ;;  %v2753_v62 = vmul.f32 0.5, %v2752_v33  ;;  %v10071_v47 = vpop.f32.mrf.mxu0 }
 0x26e   :  { %v10061_v15 = vadd.f32 1e-05, %v1695_v9  ;;  %v10063_v49 = vadd.f32 %v1322_v63, %v1234_v24  ;;  %v10065_v19 = vmul.f32 0.0078125, %v1439_v36  ;;  %v2019_v5 = vmul.f32 %v9920_v8, %v2018_v26  ;;  %v14681_v63 = vld [vmem:[#allocation38_spill] sm:$0xff] }
 0x26f   :  { %14678 = vst [vmem:[#allocation57_spill] sm:$0xff] %v10047_v35  ;;  %vm2021_vm14 = vweird.f32 %v9920_v8  ;;  %v10069_v11 = vadd.f32 1e-05, %v2431_v18  ;;  %v4517_v3 = vadd.f32 %v14393_v16, %v4379_v55  ;;  %v2025_v33 = vmul.f32 %v10054_v46, %v9980_v6  ;;  %v10081_v36 = vpop.f32.mrf.mxu1  ;;  %v1441_v26 = vpop.xlane.xlu0 %1440 }
 0x270   :  { %14679 = vst [vmem:[#allocation58_spill] sm:$0xff] %v10063_v49  ;;  %v1535_v44 = vpop.xlane.xlu1 %1534  ;;  %v10076_v9 = vadd.f32 1e-05, %v1696_v51  ;;  %v1237_v24 = vadd.f32 %v1236_v20, %v9047_v42  ;;  %v4382_v18 = vmul.f32 %v7672_v58, %v2096_v48  ;;  %v2008_v30 = vsub.f32 1.5, %v2007_v17  ;;  %vm10091_vm15 = vmor %vm2020_vm13, %vm2021_vm14  ;;  %v1325_v14 = vpop.f32.mrf.mxu3 }
 0x271   :  { %14680 = vst [vmem:[#allocation62_spill] sm:$0xff] %v10065_v19  ;;  %3606 = vadd.xlane.f32.xlu0 %v10063_v49  ;;  %2870 = vadd.xlane.f32.xlu2 %v14681_v63  ;;  %v2743_v28 = vmul.f32 0.5, %v2742_v60  ;;  %v10084_v10 = vmul.f32 0.0078125, %v2175_v34  ;;  %v2271_v55 = vpop.xlane.xlu2 %2270  ;;  %v4641_v35 = vmax.f32 %v10059_v7, 0.0  ;;  %v2754_v51 = vsub.f32 1.5, %v2753_v62 }
 0x272   :  { %6217 = vrsqrt.f32 %v10061_v15  ;;  %v10098_v48 = vmul.f32 %v10065_v19, %v10065_v19  ;;  %v10100_v34 = vmul.f32 0.0078125, %v1535_v44  ;;  %v2023_v17 = vsel %vm10091_vm15, %v9920_v8, %v2019_v5 }
 0x273   :  { %14682 = vst [vmem:[#allocation77_spill] sm:$0xff] %v10084_v10  ;;  %v10102_v60 = vpop.eup %6215  ;;  %6219 = vrsqrt.f32 %v10069_v11  ;;  %v4645_v7 = vmax.f32 %v4517_v3, 0.0  ;;  %v10110_v62 = vadd.f32 %v14440_v45, %v14686_v61  ;;  %v2026_v23 = vmul.f32 %v10054_v46, %v2025_v33 }
 0x274   :  { %14685 = vst [vmem:[#allocation105_spill] sm:$0xff] %v10102_v60  ;;  %6221 = vrsqrt.f32 %v10076_v9  ;;  %v10114_v44 = vadd.f32 %v1325_v14, %v1237_v24  ;;  %v10119_v20 = vmul.f32 %v9962_v2, %v2008_v30  ;;  %v2744_v8 = vsub.f32 1.5, %v2743_v28 }
 0x275   :  { %v10123_v5 = vmul.f32 %v10084_v10, %v10084_v10  ;;  %v10125_v3 = vmul.f32 0.0078125, %v2271_v55  ;;  %v2755_v61 = vmul.f32 %v9972_v37, %v2754_v51  ;;  %vm2757_vm0 = vweird.f32 %v9972_v37  ;;  %v1093_v2 = vpop.f32.mrf.mxu0 }
 0x276   :  { %14687 = vst [vmem:[#allocation100_spill] sm:$0xff] %v10114_v44  ;;  %v2761_v33 = vmul.f32 %v10102_v60, %v10031_v25  ;;  %v3660_v24 = vmul.f32 %v9987_v39, %v9987_v39  ;;  %v14689_v30 = vsub.f32 %v14657_v56, %v9662_v21  ;;  %vm2756_vm1 = vweird.f32 %v9883_v31  ;;  %v14697_v31 = vld [vmem:[#allocation19_spill] sm:$0xff] }
 0x277   :  { %14688 = vst [vmem:[#allocation44_spill] sm:$0xff] %v10119_v20  ;;  %v2027_v39 = vmul.f32 0.5, %v2026_v23  ;;  %v10147_v16 = vmul.f32 0.0078125, %v1441_v26  ;;  %v3661_v21 = vmul.f32 %v10063_v49, %v10063_v49  ;;  %v1182_v56 = vpop.f32.mrf.mxu1  ;;  %vm10158_vm2 = vmor %vm2756_vm1, %vm2757_vm0  ;;  %v1094_v20 = vadd.f32 %v1093_v2, %v8564_v13 }
 0x278   :  { %v2109_v28 = vmul.f32 %v2023_v17, %v14689_v30  ;;  %v10142_v1 = vpop.xlane.xlu1 %2176  ;;  %v10144_v54 = vpop.eup %6217  ;;  %3700 = vadd.xlane.f32.xlu1 %v3660_v24  ;;  %v10167_v22 = vpack.c.bf16 %v4645_v7, %v4641_v35  ;;  %v10172_v43 = vmul.f32 %v10002_v57, %v2744_v8  ;;  %v2759_v55 = vsel %vm10158_vm2, %v9972_v37, %v2755_v61 }
 0x279   :  { %14692 = vst [vmem:[#allocation173_spill] sm:$0xff] %v10144_v54  ;;  %3608 = vadd.xlane.f32.xlu0 %v10114_v44  ;;  %v10152_v17 = vpop.xlane.xlu0 %1538  ;;  %v10154_v30 = vpop.eup %6219  ;;  %v2762_v49 = vmul.f32 %v10102_v60, %v2761_v33  ;;  %3702 = vadd.xlane.f32.xlu2 %v3661_v21  ;;  %v2035_v2 = vmul.f32 %v10144_v54, %v10061_v15  ;;  %vm2627_vm3 = vweird.f32 %v14703_v59  ;;  %v2028_v37 = vsub.f32 1.5, %v2027_v39 }
 0x27a   :  { %14693 = vst [vmem:[#allocation174_spill] sm:$0xff] %v10147_v16  ;;  %v1537_v51 = vpop.xlane.xlu2 %1536  ;;  %v10169_v14 = vpop.eup %6221  ;;  %5080 = vmatmul.bf16.gmra.mxu0 %v9607_v27  ;;  %v10180_v24 = vmul.f32 %v7672_v58, %v2109_v28  ;;  %v10184_v7 = vadd.f32 %v1182_v56, %v1094_v20  ;;  %5169 = vmatmul.bf16.gmra.mxu1 %v9837_v12  ;;  %vm2030_vm5 = vweird.f32 %v9980_v6  ;;  %vm2031_vm6 = vweird.f32 %v10054_v46 }
 0x27b   :  { %14694 = vst [vmem:[#allocation175_spill] sm:$0xff] %v10154_v30  ;;  %v1238_v35 = vpop.f32.mrf.mxu2  ;;  %v4520_v8 = vadd.f32 %v14440_v45, %v4382_v18  ;;  %v14704_v61 = vsub.f32 %v10039_v41, %v10036_v0  ;;  %v10194_v33 = vmul.f32 %v10147_v16, %v10147_v16  ;;  %v10196_v28 = vmul.f32 0.0078125, %v1537_v51  ;;  %v14706_v0 = vld [vmem:[#allocation26_spill] sm:$0xff]  ;;  %vm10246_vm8 = vmor %vm2030_vm5, %vm2031_vm6  ;;  %v14750_v16 = vld [vmem:[#allocation103_spill] sm:$0xff] }
 0x27c   :  { %14699 = vst [vmem:[#allocation19_spill] sm:$0xff] %v10169_v14  ;;  %v14705_v20 = vsub.f32 %v14677_v40, %v9735_v50  ;;  %v2771_v12 = vmul.f32 %v10154_v30, %v10069_v11  ;;  %v2045_v39 = vmul.f32 %v10169_v14, %v10076_v9  ;;  %v4652_v18 = vmax.f32 %v10110_v62, 0.0 }
 0x27d   :  { %14700 = vst [vmem:[#allocation176_spill] sm:$0xff] %v10172_v43  ;;  %v2432_v27 = vmax.f32 %v14704_v61, 0.0  ;;  %vm2626_vm4 = vweird.f32 %v14706_v0  ;;  %v2763_v41 = vmul.f32 0.5, %v2762_v49  ;;  %v1239_v56 = vadd.f32 %v1238_v35, %v9047_v42  ;;  %v1327_v61 = vpop.f32.mrf.mxu3  ;;  %v10216_v62 = vpop.f32.mrf.mxu0 }
 0x27e   :  { %14701 = vst [vmem:[#allocation177_spill] sm:$0xff] %v10180_v24  ;;  %v2845_v21 = vmul.f32 %v2759_v55, %v14705_v20  ;;  %v2925_v50 = vmul.f32 %v14681_v63, %v14681_v63  ;;  %v2036_v40 = vmul.f32 %v10144_v54, %v2035_v2  ;;  %v4648_v49 = vmax.f32 %v4520_v8, 0.0  ;;  %vm10278_vm14 = vmor %vm2626_vm4, %vm2627_vm3 }
 0x27f   :  { %14702 = vst [vmem:[#allocation178_spill] sm:$0xff] %v10184_v7  ;;  %v2029_v35 = vmul.f32 %v10054_v46, %v2028_v37  ;;  %v10220_v32 = vadd.f32 1e-05, %v2432_v27  ;;  %v10223_v51 = vpop.f32.mrf.mxu1  ;;  %vm2767_vm7 = vweird.f32 %v10102_v60  ;;  %v2772_v20 = vmul.f32 %v10154_v30, %v2771_v12  ;;  %v14710_v7 = vld [vmem:[#allocation101_spill] sm:$0xff] }
 0x280   :  { %v1443_v23 = vpop.xlane.xlu1 %1442  ;;  %2966 = vadd.xlane.f32.xlu1 %v2925_v50  ;;  %v2046_v8 = vmul.f32 %v10169_v14, %v2045_v39  ;;  %v10232_v37 = vpack.c.bf16 %v4652_v18, %v4648_v49  ;;  %v10235_v27 = vmul.f32 %v14453_v53, %v2845_v21  ;;  %v2764_v50 = vsub.f32 1.5, %v2763_v41 }
 0x281   :  { %2874 = vadd.xlane.f32.xlu0 %v9476_v29  ;;  %v10225_v26 = vmul.f32 0.0078125, %v1443_v23  ;;  %v2853_v2 = vpop.xlane.xlu0 %2852  ;;  %v10237_v55 = vadd.f32 %v1327_v61, %v1239_v56  ;;  %2872 = vadd.xlane.f32.xlu2 %v14710_v7  ;;  %vm2766_vm9 = vweird.f32 %v10031_v25  ;;  %v2037_v21 = vmul.f32 0.5, %v2036_v40 }
 0x282   :  { %v10230_v52 = vpop.xlane.xlu2 %2178  ;;  %14708 = vst [vmem:[#allocation39_spill] sm:$0xff] %v10235_v27  ;;  %vm2041_vm10 = vweird.f32 %v10144_v54  ;;  %v14713_v39 = vsub.f32 %v10100_v34, %v10098_v48  ;;  %v1603_v41 = vmul.f32 0.0078125, %v10152_v17  ;;  %v2033_v56 = vsel %vm10246_vm8, %v10054_v46, %v2029_v35  ;;  %vm10332_vm1 = vmor %vm2766_vm9, %vm2767_vm7 }
 0x283   :  { %14709 = vst [vmem:[#allocation26_spill] sm:$0xff] %v10237_v55  ;;  %v1635_v23 = vmul.f32 %v10225_v26, %v10225_v26  ;;  %6223 = vrsqrt.f32 %v10220_v32  ;;  %vm2040_vm11 = vweird.f32 %v10061_v15  ;;  %v2773_v63 = vmul.f32 0.5, %v2772_v20  ;;  %v1241_v12 = vpop.f32.mrf.mxu2 }
 0x284   :  { %v1697_v18 = vmax.f32 %v14713_v39, 0.0  ;;  %vm2777_vm12 = vweird.f32 %v10154_v30  ;;  %v2047_v48 = vmul.f32 0.5, %v2046_v8  ;;  %v10267_v17 = vmul.f32 %v10102_v60, %v2764_v50  ;;  %vm10356_vm2 = vmor %vm2040_vm11, %vm2041_vm10 }
 0x285   :  { %v1667_v34 = vsub.f32 %v1603_v41, %v1635_v23  ;;  %vm2051_vm13 = vweird.f32 %v10169_v14  ;;  %v2926_v46 = vmul.f32 %v14710_v7, %v14710_v7  ;;  %v3663_v35 = vmul.f32 %v10237_v55, %v10237_v55  ;;  %v1098_v61 = vpop.f32.mrf.mxu0 }
 0x286   :  { %14716 = vst [vmem:[#allocation179_spill] sm:$0xff] %v10267_v17  ;;  %v14719_v8 = vsub.f32 %v14697_v31, %v9845_v4  ;;  %v2038_v23 = vsub.f32 1.5, %v2037_v21  ;;  %vm2776_vm15 = vweird.f32 %v10069_v11  ;;  %v10286_v39 = vadd.f32 1e-05, %v1697_v18  ;;  %v14720_v21 = vld [vmem:[#allocation146_spill] sm:$0xff] }
 0x287   :  { %v1699_v41 = vmax.f32 %v1667_v34, 0.0  ;;  %vm2050_vm0 = vweird.f32 %v10076_v9  ;;  %v3662_v0 = vmul.f32 %v10114_v44, %v10114_v44  ;;  %v1099_v10 = vadd.f32 %v1098_v61, %v8564_v13  ;;  %v1187_v6 = vpop.f32.mrf.mxu1  ;;  %v6088_v61 = vld [vmem:[%s13529_s5 + $0x98] sm:$0xff]  ;;  %vm10381_vm3 = vmor %vm2776_vm15, %vm2777_vm12 }
 0x288   :  { %v2110_v50 = vmul.f32 %v2033_v56, %v14719_v8  ;;  %v3589_v40 = vpop.xlane.xlu1 %3588  ;;  %2968 = vadd.xlane.f32.xlu1 %v2926_v46  ;;  %v2629_v18 = vsel %vm10278_vm14, %v14703_v59, %v14720_v21  ;;  %v2774_v56 = vsub.f32 1.5, %v2773_v63  ;;  %v2048_v34 = vsub.f32 1.5, %v2047_v48  ;;  %5234 = vmatpush.bf16.msra.mxu2 %v6088_v61  ;;  %vm10405_vm4 = vmor %vm2050_vm0, %vm2051_vm13 }
 0x289   :  { %3706 = vadd.xlane.f32.xlu0 %v3663_v35  ;;  %v10292_v4 = vmul.f32 0.0078125, %v3589_v40  ;;  %v3685_v31 = vpop.xlane.xlu0 %3684  ;;  %v1091_v46 = vadd.f32 %v10071_v47, %v8564_v13  ;;  %v10300_v35 = vadd.f32 1e-05, %v1699_v41  ;;  %v6096_v40 = vld [vmem:[%s13529_s5 + $0xd8] sm:$0xff]  ;;  %v10308_v19 = vpop.eup %6223  ;;  %v10310_v20 = vmul.f32 0.0078125, %v2853_v2  ;;  %3704 = vadd.xlane.f32.xlu2 %v3662_v0 }
 0x28a   :  { %v2949_v8 = vpop.xlane.xlu2 %2948  ;;  %14721 = vst [vmem:[#allocation146_spill] sm:$0xff] %v10308_v19  ;;  %v10312_v63 = vadd.f32 %v1187_v6, %v1099_v10  ;;  %v3780_v59 = vmul.f32 0.0078125, %v3685_v31  ;;  %5085 = vmatmul.bf16.gmra.mxu0 %v10052_v38  ;;  %v10318_v48 = vmul.f32 %v10144_v54, %v2038_v23  ;;  %v14724_v41 = vsub.f32 %v10125_v3, %v10123_v5  ;;  %v14725_v10 = vld [vmem:[#allocation64_spill] sm:$0xff]  ;;  %v1330_v23 = vpop.f32.mrf.mxu3  ;;  %v14780_v54 = vld [vmem:[#allocation94_spill] sm:$0xff] }
 0x28b   :  { %v3812_v47 = vmul.f32 %v10292_v4, %v10292_v4  ;;  %6225 = vrsqrt.f32 %v10300_v35  ;;  %5174 = vmatmul.bf16.gmra.mxu1 %v10167_v22  ;;  %v14726_v2 = vld [vmem:[#allocation16_spill] sm:$0xff]  ;;  %v14728_v38 = vmov 0  ;;  %v3076_v5 = vmul.f32 %v10310_v20, %v10310_v20  ;;  %5323 = vmatpush.bf16.msra.mxu3 %v6096_v40  ;;  %v1243_v7 = vpop.f32.mrf.mxu2 }
 0x28c   :  { %14722 = vst [vmem:[#allocation180_spill] sm:$0xff] %v10312_v63  ;;  %v2433_v21 = vmax.f32 %v14724_v41, 0.0  ;;  %v14727_v6 = vsub.f32 %v14725_v10, %v14726_v2  ;;  %v14729_v38 = vsel %vm10332_vm1, 4294967295, %v14728_v38  ;;  %6227 = vrsqrt.f32 %v10286_v39  ;;  %v14749_v41 = vld [vmem:[#allocation85_spill] sm:$0xff] }
 0x28d   :  { %14723 = vst [vmem:[#allocation181_spill] sm:$0xff] %v10318_v48  ;;  %v1242_v22 = vadd.f32 %v1241_v12, %v9047_v42  ;;  %v3044_v3 = vmul.f32 0.0078125, %v2949_v8  ;;  %v10341_v31 = vmul.f32 %v7672_v58, %v2110_v50  ;;  %v2781_v61 = vmul.f32 %v10308_v19, %v10220_v32  ;;  %v14775_v48 = vld [vmem:[#allocation145_spill] sm:$0xff] }
 0x28e   :  { %v2832_v0 = vmul.f32 %v2629_v18, %v14727_v6  ;;  %14730 = vst [vmem:[#allocation64_spill] sm:$0xff] %v14729_v38  ;;  %v10348_v18 = vmul.f32 %v10154_v30, %v2774_v56  ;;  %v14733_v12 = vmov 0  ;;  %v10361_v50 = vmul.f32 %v10169_v14, %v2048_v34  ;;  %v10374_v6 = vpop.f32.mrf.mxu0 }
 0x28f   :  { %14731 = vst [vmem:[#allocation16_spill] sm:$0xff] %v10341_v31  ;;  %v14734_v12 = vsel %vm10356_vm2, 4294967295, %v14733_v12  ;;  %v10364_v8 = vadd.f32 %v10081_v36, %v1091_v46  ;;  %v3844_v40 = vsub.f32 %v3780_v59, %v3812_v47  ;;  %v3108_v56 = vsub.f32 %v3044_v3, %v3076_v5  ;;  %v14743_v59 = vld [vmem:[#allocation45_spill] sm:$0xff]  ;;  %v10391_v5 = vpop.f32.mrf.mxu1 }
 0x290   :  { %14732 = vst [vmem:[#allocation182_spill] sm:$0xff] %v10348_v18  ;;  %v10372_v2 = vadd.f32 1e-05, %v2433_v21  ;;  %v2855_v25 = vpop.xlane.xlu1 %2854  ;;  %v4383_v34 = vmul.f32 %v14453_v53, %v2832_v0  ;;  %v14739_v36 = vmov 0  ;;  %v10385_v47 = vadd.f32 %v1330_v23, %v1242_v22  ;;  %3610 = vadd.xlane.f32.xlu1 %v10237_v55  ;;  %v14752_v22 = vld [vmem:[#allocation147_spill] sm:$0xff] }
 0x291   :  { %14735 = vst [vmem:[#allocation183_spill] sm:$0xff] %v14734_v12  ;;  %v14740_v36 = vsel %vm10381_vm3, 4294967295, %v14739_v36  ;;  %v3140_v46 = vmax.f32 %v3108_v56, 0.0  ;;  %2876 = vadd.xlane.f32.xlu0 %v14743_v59  ;;  %v2927_v21 = vmul.f32 %v9476_v29, %v9476_v29  ;;  %v10393_v0 = vmul.f32 0.0078125, %v2855_v25  ;;  %v2951_v3 = vpop.xlane.xlu0 %2950  ;;  %v10395_v11 = vpop.eup %6225 }
 0x292   :  { %14736 = vst [vmem:[#allocation184_spill] sm:$0xff] %v10361_v50  ;;  %v14745_v23 = vmov 0  ;;  %v2782_v56 = vmul.f32 %v10308_v19, %v2781_v61  ;;  %v10411_v25 = vmul.f32 0.0078125, %v10142_v1  ;;  %v3591_v15 = vpop.xlane.xlu2 %3590  ;;  %v4525_v10 = vadd.f32 %v14750_v16, %v14749_v41  ;;  %v10415_v63 = vpop.eup %6227 }
 0x293   :  { %14737 = vst [vmem:[#allocation185_spill] sm:$0xff] %v10364_v8  ;;  %v14746_v23 = vsel %vm10405_vm4, 4294967295, %v14745_v23  ;;  %vm1921_vm5 = vweird.f32 %v14752_v22  ;;  %v14753_v49 = vsub.f32 %v10196_v28, %v10194_v33  ;;  %v2075_v1 = vmul.f32 %v10395_v11, %v10300_v35  ;;  %2970 = vadd.xlane.f32.xlu2 %v2927_v21  ;;  %v10446_v14 = vpop.f32.mrf.mxu3 }
 0x294   :  { %14741 = vst [vmem:[#allocation186_spill] sm:$0xff] %v14740_v36  ;;  %v3876_v55 = vmax.f32 %v3844_v40, 0.0  ;;  %v10427_v41 = vadd.f32 1e-05, %v3140_v46  ;;  %v3077_v31 = vmul.f32 %v10393_v0, %v10393_v0  ;;  %v3045_v18 = vmul.f32 0.0078125, %v2951_v3 }
 0x295   :  { %14742 = vst [vmem:[#allocation187_spill] sm:$0xff] %v10385_v47  ;;  %v1698_v61 = vmax.f32 %v14753_v49, 0.0  ;;  %v4521_v30 = vadd.f32 %v14750_v16, %v4383_v34  ;;  %6229 = vrsqrt.f32 %v10372_v2  ;;  %v2076_v33 = vmul.f32 %v10395_v11, %v2075_v1 }
 0x296   :  { %14744 = vst [vmem:[#allocation188_spill] sm:$0xff] %v10391_v5  ;;  %v10435_v28 = vmul.f32 0.0078125, %v3591_v15  ;;  %v3664_v49 = vmul.f32 %v10385_v47, %v10385_v47  ;;  %v2783_v40 = vmul.f32 0.5, %v2782_v56  ;;  %v2055_v46 = vmul.f32 %v10415_v63, %v10286_v39  ;;  %v1103_v1 = vpop.f32.mrf.mxu0  ;;  %v14790_v5 = vld [vmem:[#allocation157_spill] sm:$0xff] }
 0x297   :  { %14747 = vst [vmem:[#allocation189_spill] sm:$0xff] %v14746_v23  ;;  %v14754_v23 = vld [vmem:[#allocation142_spill] sm:$0xff]  ;;  %v3109_v21 = vsub.f32 %v3045_v18, %v3077_v31  ;;  %v4653_v9 = vmax.f32 %v4525_v10, 0.0  ;;  %v10441_v3 = vadd.f32 1e-05, %v1698_v61  ;;  %v2077_v34 = vmul.f32 0.5, %v2076_v33  ;;  %v1192_v10 = vpop.f32.mrf.mxu1 }
 0x298   :  { %14748 = vst [vmem:[#allocation190_spill] sm:$0xff] %v10411_v25  ;;  %vm1920_vm6 = vweird.f32 %v14754_v23  ;;  %v10443_v50 = vadd.f32 1e-05, %v3876_v55  ;;  %6231 = vrsqrt.f32 %v10427_v41  ;;  %vm2081_vm7 = vweird.f32 %v10395_v11  ;;  %v3687_v36 = vpop.xlane.xlu1 %3686  ;;  %3612 = vadd.xlane.f32.xlu1 %v10385_v47 }
 0x299   :  { %14751 = vst [vmem:[#allocation85_spill] sm:$0xff] %v10415_v63  ;;  %v3141_v15 = vmax.f32 %v3109_v21, 0.0  ;;  %v2928_v56 = vmul.f32 %v14743_v59, %v14743_v59  ;;  %v4649_v17 = vmax.f32 %v4521_v30, 0.0  ;;  %vm2786_vm8 = vweird.f32 %v10220_v32  ;;  %3708 = vadd.xlane.f32.xlu0 %v3664_v49  ;;  %v10456_v33 = vpop.xlane.xlu0 %3592  ;;  %vm10488_vm12 = vmor %vm1920_vm6, %vm1921_vm5 }
 0x29a   :  { %14755 = vst [vmem:[#allocation147_spill] sm:$0xff] %v10441_v3  ;;  %v2078_v31 = vsub.f32 1.5, %v2077_v34  ;;  %v3813_v55 = vmul.f32 %v10435_v28, %v10435_v28  ;;  %v1104_v18 = vadd.f32 %v1103_v1, %v8564_v13  ;;  %v3781_v61 = vmul.f32 0.0078125, %v3687_v36  ;;  %v2857_v30 = vpop.xlane.xlu2 %2856  ;;  %v1246_v36 = vpop.f32.mrf.mxu2  ;;  %5090 = vmatmul.bf16.gmra.mxu0 %v10232_v37 }
 0x29b   :  { %v2784_v21 = vsub.f32 1.5, %v2783_v40  ;;  %vm2080_vm9 = vweird.f32 %v10300_v35  ;;  %v10459_v59 = vadd.f32 1e-05, %v3141_v15  ;;  %v4753_v60 = vpack.c.bf16 %v4653_v9, %v4649_v17  ;;  %v10461_v34 = vpop.eup %6229  ;;  %2972 = vadd.xlane.f32.xlu2 %v2928_v56  ;;  %v14758_v17 = vld [vmem:[#allocation25_spill] sm:$0xff]  ;;  %v1335_v23 = vpop.f32.mrf.mxu3 }
 0x29c   :  { %14756 = vst [vmem:[#allocation142_spill] sm:$0xff] %v10461_v34  ;;  %v2079_v38 = vmul.f32 %v10395_v11, %v2078_v31  ;;  %6233 = vrsqrt.f32 %v10443_v50  ;;  %v10465_v49 = vadd.f32 %v1192_v10, %v1104_v18  ;;  %v3845_v1 = vsub.f32 %v3781_v61, %v3813_v55  ;;  %vm2082_vm10 = vmor %vm2080_vm9, %vm2081_vm7  ;;  %v14759_v31 = vld [vmem:[#allocation30_spill] sm:$0xff]  ;;  %v14765_v55 = vld [vmem:[#allocation167_spill] sm:$0xff] }
 0x29d   :  { %v2056_v40 = vmul.f32 %v10415_v63, %v2055_v46  ;;  %v1096_v15 = vadd.f32 %v10216_v62, %v8564_v13  ;;  %v1731_v9 = vsub.f32 %v14758_v17, %v10225_v26  ;;  %6235 = vrsqrt.f32 %v10459_v59  ;;  %5179 = vmatmul.bf16.gmra.mxu1 %v4753_v60  ;;  %v14766_v10 = vld [vmem:[#allocation158_spill] sm:$0xff]  ;;  %v14768_v17 = vld [vmem:[#allocation151_spill] sm:$0xff] }
 0x29e   :  { %14757 = vst [vmem:[#allocation191_spill] sm:$0xff] %v10465_v49  ;;  %v10478_v56 = vpop.eup %6231  ;;  %6237 = vrsqrt.f32 %v10441_v3  ;;  %v2083_v37 = vsel %vm2082_vm10, %v10395_v11, %v2079_v38  ;;  %v1244_v46 = vadd.f32 %v1243_v7, %v9047_v42  ;;  %v3877_v62 = vmax.f32 %v3845_v1, 0.0  ;;  %v14767_v1 = vld [vmem:[#allocation141_spill] sm:$0xff]  ;;  %v10523_v49 = vpop.f32.mrf.mxu0 }
 0x29f   :  { %vm2647_vm11 = vweird.f32 %v14759_v31  ;;  %vm2787_vm13 = vweird.f32 %v10308_v19  ;;  %v2791_v60 = vmul.f32 %v10461_v34, %v10372_v2  ;;  %v10497_v35 = vmul.f32 %v10411_v25, %v10411_v25  ;;  %14771 = vst [vmem:[#allocation141_spill] sm:$0xff] %v10523_v49 }
 0x2a0   :  { %v10499_v7 = vmul.f32 %v2083_v37, %v1731_v9  ;;  %v10502_v38 = vmul.f32 %v10308_v19, %v2784_v21  ;;  %v10504_v11 = vadd.f32 1e-05, %v3877_v62  ;;  %v2929_v18 = vmul.f32 %v14765_v55, %v14765_v55  ;;  %v14770_v21 = vld [vmem:[#allocation17_spill] sm:$0xff]  ;;  %v2953_v26 = vpop.xlane.xlu1 %2952  ;;  %2878 = vadd.xlane.f32.xlu1 %v14765_v55  ;;  %vm10546_vm5 = vmor %vm2786_vm8, %vm2787_vm13 }
 0x2a1   :  { %14762 = vst [vmem:[#allocation25_spill] sm:$0xff] %v10497_v35  ;;  %v1923_v61 = vsel %vm10488_vm12, %v14752_v22, %v14766_v10  ;;  %vm2646_vm14 = vweird.f32 %v14767_v1  ;;  %vm2657_vm15 = vweird.f32 %v14768_v17  ;;  %v10515_v9 = vadd.f32 %v10223_v51, %v1096_v15  ;;  %v6366_v62 = vld [vmem:[#allocation5] sm:$0xf]  ;;  %v10537_v15 = vpop.f32.mrf.mxu1  ;;  %v2859_v37 = vpop.xlane.xlu0 %2858 }
 0x2a2   :  { %14763 = vst [vmem:[#allocation30_spill] sm:$0xff] %v10499_v7  ;;  %v10519_v25 = vperm.slane %v6366_v62, 3  ;;  %v3237_v35 = vmul.f32 %v10478_v56, %v10427_v41  ;;  %v10525_v22 = vpop.eup %6233  ;;  %v10527_v10 = vmul.f32 0.5, %v2056_v40  ;;  %v10530_v47 = vmul.f32 0.0078125, %v10230_v52  ;;  %2974 = vadd.xlane.f32.xlu0 %v2929_v18  ;;  %v3689_v18 = vpop.xlane.xlu2 %3688  ;;  %v14779_v55 = vld [vmem:[#allocation69_spill] sm:$0xff]  ;;  %vm10616_vm6 = vmor %vm2646_vm14, %vm2647_vm11 }
 0x2a3   :  { %14764 = vst [vmem:[#allocation192_spill] sm:$0xff] %v10502_v38  ;;  %v10533_v51 = vadd.f32 %v10446_v14, %v1244_v46  ;;  %6239 = vrsqrt.f32 %v10504_v11  ;;  %vm2656_vm0 = vweird.f32 %v14775_v48  ;;  %v14776_v52 = vmov 0  ;;  %v1248_v38 = vpop.f32.mrf.mxu2  ;;  %v14785_v19 = vld [vmem:[#allocation169_spill] sm:$0xff]  ;;  %v14794_v48 = vld [vmem:[#allocation128_spill] sm:$0xff] }
 0x2a4   :  { %14769 = vst [vmem:[#allocation158_spill] sm:$0xff] %v10515_v9  ;;  %v10539_v9 = vpop.eup %6235  ;;  %v14777_v52 = vsel %vm10546_vm5, 4294967295, %v14776_v52  ;;  %v2792_v14 = vmul.f32 %v10461_v34, %v2791_v60  ;;  %v10551_v40 = vmul.f32 0.0078125, %v2857_v30  ;;  %v3046_v46 = vmul.f32 0.0078125, %v2953_v26  ;;  %vm10638_vm7 = vmor %vm2656_vm0, %vm2657_vm15 }
 0x2a5   :  { %14772 = vst [vmem:[#allocation151_spill] sm:$0xff] %v10530_v47  ;;  %v14781_v12 = vsub.f32 %v14779_v55, %v14780_v54  ;;  %v10556_v44 = vpop.eup %6237  ;;  %v10562_v27 = vperm.slane %v6366_v62, 2  ;;  %v3247_v60 = vmul.f32 %v10539_v9, %v10459_v59  ;;  %v1247_v30 = vadd.f32 %v1246_v36, %v9047_v42  ;;  %3614 = vadd.xlane.f32.xlu2 %v10533_v51  ;;  %v6087_v62 = vld [vmem:[%s13529_s5 + $0x90] sm:$0xff] }
 0x2a6   :  { %14773 = vst [vmem:[#allocation17_spill] sm:$0xff] %v10533_v51  ;;  %v3973_v54 = vmul.f32 %v10525_v22, %v10443_v50  ;;  %v3078_v55 = vmul.f32 %v10551_v40, %v10551_v40  ;;  %v10580_v32 = vmul.f32 %v10530_v47, %v10530_v47  ;;  %v10589_v43 = vmul.f32 %v10556_v44, %v10441_v3 }
 0x2a7   :  { %14774 = vst [vmem:[#allocation193_spill] sm:$0xff] %v10537_v15  ;;  %v2099_v29 = vmul.f32 %v1923_v61, %v14781_v12  ;;  %v3238_v12 = vmul.f32 %v10478_v56, %v3237_v35  ;;  %v14783_v61 = vld [vmem:[#allocation125_spill] sm:$0xff]  ;;  %v3248_v36 = vmul.f32 %v10539_v9, %v3247_v60  ;;  %v10585_v35 = vmul.f32 0.5, %v2792_v14  ;;  %v6095_v60 = vld [vmem:[%s13529_s5 + $0xd0] sm:$0xff]  ;;  %v1108_v15 = vpop.f32.mrf.mxu0  ;;  %5235 = vmatpush.bf16.msra.mxu2 %v6087_v62 }
 0x2a8   :  { %14778 = vst [vmem:[#allocation145_spill] sm:$0xff] %v14777_v52  ;;  %v10575_v26 = vadd.f32 %v14440_v45, %v14783_v61  ;;  %v2930_v52 = vmul.f32 %v14785_v19, %v14785_v19  ;;  %v3110_v61 = vsub.f32 %v3046_v46, %v3078_v55  ;;  %v10601_v14 = vmul.f32 0.0078125, %v10456_v33  ;;  %v3595_v49 = vpop.xlane.xlu1 %3594  ;;  %5324 = vmatpush.bf16.msra.mxu3 %v6095_v60  ;;  %v6086_v33 = vld [vmem:[%s13529_s5 + $0x88] sm:$0xff] }
 0x2a9   :  { %14782 = vst [vmem:[#allocation69_spill] sm:$0xff] %v10556_v44  ;;  %v4394_v24 = vmul.f32 %v7672_v58, %v2099_v29  ;;  %v10598_v47 = vpop.eup %6239  ;;  %v3782_v8 = vmul.f32 0.0078125, %v3689_v18  ;;  %v3665_v46 = vmul.f32 %v10533_v51, %v10533_v51  ;;  %v3974_v29 = vmul.f32 %v10525_v22, %v3973_v54  ;;  %v1337_v54 = vpop.f32.mrf.mxu3 }
 0x2aa   :  { %14784 = vst [vmem:[#allocation94_spill] sm:$0xff] %v10580_v32  ;;  %v10603_v32 = vadd.f32 %v1335_v23, %v1247_v30  ;;  %v3239_v55 = vmul.f32 0.5, %v3238_v12  ;;  %v3249_v57 = vmul.f32 0.5, %v3248_v36  ;;  %v4656_v7 = vmax.f32 %v10575_v26, 0.0  ;;  %2976 = vadd.xlane.f32.xlu0 %v2930_v52  ;;  %v1197_v60 = vpop.f32.mrf.mxu1  ;;  %v2955_v51 = vpop.xlane.xlu2 %2954 }
 0x2ab   :  { %v3983_v18 = vmul.f32 %v10598_v47, %v10504_v11  ;;  %v3814_v30 = vmul.f32 %v10601_v14, %v10601_v14  ;;  %3710 = vadd.xlane.f32.xlu1 %v3665_v46  ;;  %v1109_v12 = vadd.f32 %v1108_v15, %v8564_v13  ;;  %v10625_v26 = vmul.f32 0.0078125, %v3595_v49  ;;  %5236 = vmatpush.bf16.msra.mxu2 %v6086_v33  ;;  %v1251_v15 = vpop.f32.mrf.mxu2  ;;  %v14796_v33 = vld [vmem:[#allocation67_spill] sm:$0xff] }
 0x2ac   :  { %14786 = vst [vmem:[#allocation125_spill] sm:$0xff] %v10603_v32  ;;  %v3142_v62 = vmax.f32 %v3110_v61, 0.0  ;;  %v10627_v36 = vmul.f32 0.0078125, %v2859_v37  ;;  %v1249_v1 = vadd.f32 %v1248_v38, %v9047_v42  ;;  %v2649_v3 = vsel %vm10616_vm6, %v14759_v31, %v14790_v5  ;;  %v3691_v37 = vpop.xlane.xlu0 %3690 }
 0x2ad   :  { %14789 = vst [vmem:[#allocation194_spill] sm:$0xff] %v10625_v26  ;;  %vm3243_vm8 = vweird.f32 %v10478_v56  ;;  %v3846_v49 = vsub.f32 %v3782_v8, %v3814_v30  ;;  %3616 = vadd.xlane.f32.xlu2 %v10603_v32  ;;  %v10644_v38 = vadd.f32 %v1197_v60, %v1109_v12  ;;  %v4532_v52 = vadd.f32 %v14440_v45, %v4394_v24 }
 0x2ae   :  { %v3240_v61 = vsub.f32 1.5, %v3239_v55  ;;  %v3250_v5 = vsub.f32 1.5, %v3249_v57  ;;  %v3815_v31 = vmul.f32 %v10625_v26, %v10625_v26  ;;  %v2659_v46 = vsel %vm10638_vm7, %v14768_v17, %v14794_v48  ;;  %v14799_v26 = vld [vmem:[#allocation70_spill] sm:$0xff] }
 0x2af   :  { %14793 = vst [vmem:[#allocation157_spill] sm:$0xff] %v10644_v38  ;;  %v3975_v23 = vmul.f32 0.5, %v3974_v29  ;;  %vm3253_vm9 = vweird.f32 %v10539_v9  ;;  %v3984_v8 = vmul.f32 %v10598_v47, %v3983_v18  ;;  %v3047_v30 = vmul.f32 0.0078125, %v2955_v51  ;;  %v14797_v29 = vld [vmem:[#allocation95_spill] sm:$0xff]  ;;  %v14800_v18 = vld [vmem:[#allocation40_spill] sm:$0xff] }
 0x2b0   :  { %v10655_v12 = vadd.f32 1e-05, %v3142_v62  ;;  %v3079_v57 = vmul.f32 %v10627_v36, %v10627_v36  ;;  %v10659_v24 = vadd.f32 %v1337_v54, %v1249_v1  ;;  %v3783_v55 = vmul.f32 0.0078125, %v3691_v37  ;;  %v6094_v37 = vld [vmem:[%s13529_s5 + $0xc8] sm:$0xff] }
 0x2b1   :  { %vm2061_vm10 = vweird.f32 %v10415_v63  ;;  %v3878_v60 = vmax.f32 %v3846_v49, 0.0  ;;  %v4660_v17 = vmax.f32 %v4532_v52, 0.0  ;;  %v14798_v48 = vsub.f32 %v14796_v33, %v14797_v29  ;;  %v6085_v49 = vld [vmem:[%s13529_s5 + $0x80] sm:$0xff]  ;;  %5325 = vmatpush.bf16.msra.mxu3 %v6094_v37 }
 0x2b2   :  { %14795 = vst [vmem:[#allocation128_spill] sm:$0xff] %v10659_v24  ;;  %v14801_v51 = vsub.f32 %v14799_v26, %v14800_v18  ;;  %v3241_v45 = vmul.f32 %v10478_v56, %v3240_v61  ;;  %v3251_v58 = vmul.f32 %v10539_v9, %v3250_v5  ;;  %v3847_v54 = vsub.f32 %v3783_v55, %v3815_v31  ;;  %v14839_v18 = vld [vmem:[#allocation37_spill] sm:$0xff] }
 0x2b3   :  { %v2834_v38 = vmul.f32 %v2649_v3, %v14798_v48  ;;  %v1252_v1 = vadd.f32 %v1251_v15, %v9047_v42  ;;  %vm2060_vm11 = vweird.f32 %v10286_v39  ;;  %v3985_v3 = vmul.f32 0.5, %v3984_v8  ;;  %2880 = vadd.xlane.f32.xlu1 %v14785_v19  ;;  %3618 = vadd.xlane.f32.xlu0 %v10659_v24  ;;  %v1340_v15 = vpop.f32.mrf.mxu3  ;;  %v14811_v48 = vld [vmem:[#allocation35_spill] sm:$0xff] }
 0x2b4   :  { %v2835_v62 = vmul.f32 %v2659_v46, %v14801_v51  ;;  %v3111_v26 = vsub.f32 %v3047_v30, %v3079_v57  ;;  %v4756_v52 = vpack.c.bf16 %v4660_v17, %v4656_v7  ;;  %v14802_v5 = vsub.f32 1.5, %v10527_v10  ;;  %5237 = vmatpush.bf16.msra.mxu2 %v6085_v49  ;;  %v2861_v30 = vpop.xlane.xlu1 %2860  ;;  %v14813_v51 = vld [vmem:[#allocation41_spill] sm:$0xff]  ;;  %v14814_v49 = vld [vmem:[#allocation32_spill] sm:$0xff] }
 0x2b5   :  { %v4391_v61 = vmul.f32 %v14453_v53, %v2834_v38  ;;  %vm2797_vm12 = vweird.f32 %v10461_v34  ;;  %v2066_v46 = vmul.f32 %v10556_v44, %v10589_v43  ;;  %vm3242_vm13 = vweird.f32 %v10427_v41  ;;  %v14806_v43 = vld [vmem:[#allocation43_spill] sm:$0xff]  ;;  %v10702_v41 = vpop.f32.mrf.mxu0 }
 0x2b6   :  { %v10684_v31 = vmul.f32 %v10415_v63, %v14802_v5  ;;  %v4395_v7 = vmul.f32 %v14453_v53, %v2835_v62  ;;  %v3976_v38 = vsub.f32 1.5, %v3975_v23  ;;  %vm10693_vm14 = vmor %vm3242_vm13, %vm3243_vm8  ;;  %vm3252_vm15 = vweird.f32 %v10459_v59  ;;  %5095 = vmatmul.bf16.gmra.mxu0 %v4756_v52  ;;  %2882 = vadd.xlane.f32.xlu2 %v14806_v43  ;;  %14807 = vst [vmem:[#allocation95_spill] sm:$0xff] %v10702_v41  ;;  %v14858_v63 = vld [vmem:[#allocation80_spill] sm:$0xff] }
 0x2b7   :  { %6241 = vrsqrt.f32 %v10655_v12  ;;  %v10699_v10 = vadd.f32 1e-05, %v3878_v60  ;;  %v2794_v23 = vsub.f32 1.5, %v10585_v35  ;;  %vm2796_vm0 = vweird.f32 %v10372_v2  ;;  %vm10711_vm6 = vmor %vm3252_vm15, %vm3253_vm9  ;;  %v10815_v2 = vld [vmem:[#allocation8] ss:$0 sm:$0xff] }
 0x2b8   :  { %14803 = vst [vmem:[#allocation67_spill] sm:$0xff] %v10684_v31  ;;  %v3245_v57 = vsel %vm10693_vm14, %v10478_v56, %v3241_v45  ;;  %v3879_v55 = vmax.f32 %v3847_v54, 0.0  ;;  %v4529_v60 = vadd.f32 %v14750_v16, %v4391_v61  ;;  %v3255_v35 = vsel %vm10711_vm6, %v10539_v9, %v3251_v58  ;;  %v14812_v56 = vld [vmem:[#allocation156_spill] sm:$0xff]  ;;  %vm10756_vm6 = vmor %vm2060_vm11, %vm2061_vm10  ;;  %v14854_v31 = vld [vmem:[#allocation89_spill] sm:$0xff] }
 0x2b9   :  { %v3986_v17 = vsub.f32 1.5, %v3985_v3  ;;  %v3143_v33 = vmax.f32 %v3111_v26, 0.0  ;;  %v10719_v29 = vadd.f32 %v1340_v15, %v1252_v1  ;;  %vm1931_vm7 = vweird.f32 %v14811_v48  ;;  %v10734_v1 = vpop.f32.mrf.mxu1  ;;  %v14817_v3 = vld [vmem:[#allocation29_spill] sm:$0xff]  ;;  %v14824_v15 = vld [vmem:[#allocation87_spill] sm:$0xff] }
 0x2ba   :  { %v2067_v45 = vmul.f32 0.5, %v2066_v46  ;;  %v3173_v62 = vsub.f32 %v14813_v51, %v10393_v0  ;;  %v4533_v54 = vadd.f32 %v14750_v16, %v4395_v7  ;;  %v3977_v37 = vmul.f32 %v10525_v22, %v3976_v38  ;;  %14816 = vst [vmem:[#allocation40_spill] sm:$0xff] %v10734_v1  ;;  %v6093_v0 = vld [vmem:[%s13529_s5 + $0xc0] sm:$0xff]  ;;  %s6503_s5 = smov [#allocation10]  }
 0x2bb   :  { %14810 = vst [vmem:[#allocation70_spill] sm:$0xff] %v10719_v29  ;;  %vm3979_vm9 = vweird.f32 %v10525_v22  ;;  %v14815_v58 = vsub.f32 %v14770_v21, %v10310_v20  ;;  %6243 = vrsqrt.f32 %v10699_v10  ;;  %v10740_v52 = vadd.f32 1e-05, %v3879_v55  ;;  %v14818_v7 = vld [vmem:[#allocation153_spill] sm:$0xff]  ;;  %3620 = vadd.xlane.f32.xlu0 %v10719_v29  ;;  %5326 = vmatpush.bf16.msra.mxu3 %v6093_v0  ;;  %s5444_s27 = sshll.u32 %s6503_s5, 4  ;;  %s5445_s27 = int_to_ptr.vmem [resolvable:$true] %s5444_s27 }
 0x2bc   :  { %v3557_v26 = vmul.f32 %v3255_v35, %v3173_v62  ;;  %v4657_v61 = vmax.f32 %v4529_v60, 0.0  ;;  %v4661_v5 = vmax.f32 %v4533_v54, 0.0  ;;  %v3987_v20 = vmul.f32 %v10598_v47, %v3986_v17  ;;  %v3597_v60 = vpop.xlane.xlu2 %3596  ;;  %v14830_v54 = vld [vmem:[#allocation15_spill] sm:$0xff] }
 0x2bd   :  { %v3556_v9 = vmul.f32 %v3245_v57, %v14815_v58  ;;  %v10742_v46 = vpop.eup %6241  ;;  %vm3989_vm15 = vweird.f32 %v10598_v47  ;;  %v10747_v21 = vadd.f32 1e-05, %v3143_v33  ;;  %v3666_v38 = vmul.f32 %v10603_v32, %v10603_v32 }
 0x2be   :  { %v14819_v8 = vmov 0  ;;  %v10761_v57 = vmul.f32 %v10461_v34, %v2794_v23  ;;  %vm3978_vm14 = vweird.f32 %v10443_v50  ;;  %v4757_v59 = vpack.c.bf16 %v4661_v5, %v4657_v61  ;;  %v5061_v61 = vpop.f32.mrf.mxu0  ;;  %v14835_v5 = vld [vmem:[#allocation154_spill] sm:$0xff] }
 0x2bf   :  { %v14820_v8 = vsel %vm10756_vm6, 4294967295, %v14819_v8  ;;  %v10764_v55 = vmul.f32 0.0078125, %v2861_v30  ;;  %v2068_v35 = vsub.f32 1.5, %v2067_v45  ;;  %vm10773_vm10 = vmor %vm3978_vm14, %vm3979_vm9  ;;  %v4336_v50 = vmul.f32 %v10562_v27, %v3556_v9  ;;  %3712 = vadd.xlane.f32.xlu1 %v3666_v38  ;;  %v14827_v30 = vld [vmem:[#allocation34_spill] sm:$0xff] }
 0x2c0   :  { %14821 = vst [vmem:[#allocation35_spill] sm:$0xff] %v14820_v8  ;;  %vm3988_vm11 = vweird.f32 %v10504_v11  ;;  %vm2677_vm13 = vweird.f32 %v14827_v30  ;;  %v3981_v17 = vsel %vm10773_vm10, %v10525_v22, %v3977_v37  ;;  %v4340_v33 = vmul.f32 %v10562_v27, %v3557_v26  ;;  %5184 = vmatmul.bf16.gmra.mxu1 %v4757_v59  ;;  %v2957_v11 = vpop.xlane.xlu0 %2956  ;;  %vm10800_vm14 = vmor %vm2796_vm0, %vm2797_vm12  ;;  %v10810_v9 = vld [vmem:[#allocation7] sm:$0xf]  ;;  %v3693_v26 = vpop.xlane.xlu1 %3692 }
 0x2c1   :  { %14822 = vst [vmem:[#allocation156_spill] sm:$0xff] %v10761_v57  ;;  %vm10786_vm8 = vmor %vm3988_vm11, %vm3989_vm15  ;;  %v3257_v51 = vmul.f32 %v10742_v46, %v10655_v12  ;;  %6245 = vrsqrt.f32 %v10740_v52  ;;  %v10793_v62 = vpop.eup %6243  ;;  %vm2666_vm9 = vweird.f32 %v14830_v54  ;;  %v14831_v22 = vmov 0 }
 0x2c2   :  { %14823 = vst [vmem:[#allocation41_spill] sm:$0xff] %v10764_v55  ;;  %v14832_v22 = vsel %vm10800_vm14, 4294967295, %v14831_v22  ;;  %v3991_v37 = vsel %vm10786_vm8, %v10598_v47, %v3987_v20  ;;  %6247 = vrsqrt.f32 %v10747_v21  ;;  %v3667_v58 = vmul.f32 %v10659_v24, %v10659_v24  ;;  %v14836_v20 = vld [vmem:[#allocation27_spill] sm:$0xff] }
 0x2c3   :  { %14833 = vst [vmem:[#allocation32_spill] sm:$0xff] %v14832_v22  ;;  %v10813_v0 = vperm.slane %v10810_v9, 2  ;;  %vm2676_vm12 = vweird.f32 %v14835_v5  ;;  %v3909_v38 = vsub.f32 %v14836_v20, %v10435_v28  ;;  %v3080_v59 = vmul.f32 %v10764_v55, %v10764_v55  ;;  %v14845_v24 = vld [vmem:[#allocation99_spill] sm:$0xff]  ;;  %v14853_v22 = vld [vmem:[#allocation124_spill] sm:$0xff] }
 0x2c4   :  { %v3048_v23 = vmul.f32 0.0078125, %v2957_v11  ;;  %v10827_v45 = vmul.f32 %v10556_v44, %v2068_v35  ;;  %v10831_v39 = vadd.f32 %v10374_v6, %v8564_v13  ;;  %3714 = vadd.xlane.f32.xlu2 %v3667_v58  ;;  %v14840_v28 = vsub.f32 %v14812_v56, %v10292_v4  ;;  %v14844_v58 = vld [vmem:[#allocation63_spill] sm:$0xff]  ;;  %v14855_v6 = vld [vmem:[#allocation72_spill] sm:$0xff] }
 0x2c5   :  { %14834 = vst [vmem:[#allocation29_spill] sm:$0xff] %v10813_v0  ;;  %v4474_v47 = vadd.f32 %v10813_v0, %v4336_v50  ;;  %v4293_v19 = vmul.f32 %v3991_v37, %v3909_v38  ;;  %v3258_v11 = vmul.f32 %v10742_v46, %v3257_v51  ;;  %v4478_v35 = vadd.f32 %v10813_v0, %v4340_v33  ;;  %v5150_v33 = vpop.f32.mrf.mxu1  ;;  %v14846_v51 = vld [vmem:[#allocation49_spill] sm:$0xff] }
 0x2c6   :  { %14837 = vst [vmem:[#allocation153_spill] sm:$0xff] %v10827_v45  ;;  %v4292_v20 = vmul.f32 %v3981_v17, %v14840_v28  ;;  %vm14841_vm0 = vweird.f32 %v14817_v3  ;;  %v3993_v56 = vmul.f32 %v10793_v62, %v10699_v10  ;;  %v5062_v17 = vadd.f32 %v10815_v2, %v5061_v61  ;;  %2886 = vadd.xlane.f32.xlu0 %v14846_v51  ;;  %v1253_v61 = vpop.f32.mrf.mxu2  ;;  %v14859_v3 = vld [vmem:[#allocation66_spill] sm:$0xff] }
 0x2c7   :  { %14838 = vst [vmem:[#allocation87_spill] sm:$0xff] %v10831_v39  ;;  %vm10845_vm8 = vmor %vm14841_vm0, %vm1931_vm7  ;;  %v10857_v37 = vpop.eup %6245  ;;  %vm14847_vm7 = vweird.f32 %v14814_v49  ;;  %vm14848_vm15 = vweird.f32 %v14818_v7  ;;  %v3112_v38 = vsub.f32 %v3048_v23, %v3080_v59  ;;  %v10867_v28 = vmul.f32 0.0078125, %v3597_v60 }
 0x2c8   :  { %vm10863_vm10 = vmor %vm14848_vm15, %vm14847_vm7  ;;  %v4602_v4 = vmax.f32 %v4474_v47, 0.0  ;;  %v4606_v50 = vmax.f32 %v4478_v35, 0.0  ;;  %v10869_v32 = vpop.eup %6247  ;;  %v3784_v57 = vmul.f32 0.0078125, %v3693_v26  ;;  %v10871_v34 = vadd.f32 %v5150_v33, %v5062_v17  ;;  %v2863_v26 = vpop.xlane.xlu2 %2862 }
 0x2c9   :  { %14851 = vst [vmem:[#allocation34_spill] sm:$0xff] %v10867_v28  ;;  %v1933_v7 = vsel %vm10845_vm8, %v14811_v48, %v14853_v22  ;;  %v1943_v59 = vsel %vm10863_vm10, %v14814_v49, %v14854_v31  ;;  %v4337_v60 = vmul.f32 %v10519_v25, %v4292_v20  ;;  %v4341_v47 = vmul.f32 %v10519_v25, %v4293_v19  ;;  %v14856_v48 = vld [vmem:[#allocation96_spill] sm:$0xff]  ;;  %vm10911_vm8 = vmor %vm2676_vm12, %vm2677_vm13  ;;  %v3599_v5 = vpop.xlane.xlu0 %3598  ;;  %v14874_v19 = vld [vmem:[#allocation46_spill] sm:$0xff] }
 0x2ca   :  { %14852 = vst [vmem:[#allocation15_spill] sm:$0xff] %v10871_v34  ;;  %v10883_v23 = vmul.f32 0.5, %v3258_v11  ;;  %v4730_v35 = vpack.c.bf16 %v4606_v50, %v4602_v4  ;;  %v3994_v17 = vmul.f32 %v10793_v62, %v3993_v56  ;;  %v3816_v33 = vmul.f32 %v10867_v28, %v10867_v28  ;;  %v14866_v56 = vld [vmem:[#allocation81_spill] sm:$0xff] }
 0x2cb   :  { %v14857_v22 = vsub.f32 %v14855_v6, %v14856_v48  ;;  %v14860_v31 = vsub.f32 %v14858_v63, %v14859_v3  ;;  %vm14861_vm11 = vweird.f32 %v14824_v15  ;;  %v4003_v20 = vmul.f32 %v10857_v37, %v10740_v52  ;;  %v14867_v6 = vld [vmem:[#allocation104_spill] sm:$0xff]  ;;  %v10922_v48 = vpop.f32.mrf.mxu0  ;;  %v14870_v3 = vld [vmem:[#allocation54_spill] sm:$0xff] }
 0x2cc   :  { %vm10898_vm0 = vmor %vm2666_vm9, %vm14861_vm11  ;;  %v3267_v11 = vmul.f32 %v10869_v32, %v10747_v21  ;;  %v3144_v50 = vmax.f32 %v3112_v38, 0.0  ;;  %v1254_v4 = vadd.f32 %v1253_v61, %v9047_v42  ;;  %5238 = vmatmul.bf16.vlgmr.msra.gmra.mxu2 %v4730_v35  ;;  %v3848_v54 = vsub.f32 %v3784_v57, %v3816_v33  ;;  %v14868_v61 = vld [vmem:[#allocation20_spill] sm:$0xff]  ;;  %v2959_v35 = vpop.xlane.xlu1 %2958  ;;  %14869 = vst [vmem:[#allocation154_spill] sm:$0xff] %v10922_v48  ;;  %v14871_v57 = vld [vmem:[#allocation75_spill] sm:$0xff] }
 0x2cd   :  { %v2100_v34 = vmul.f32 %v1933_v7, %v14857_v22  ;;  %v2101_v49 = vmul.f32 %v1943_v59, %v14860_v31  ;;  %v2669_v38 = vsel %vm10898_vm0, %v14824_v15, %v14867_v6  ;;  %2884 = vadd.xlane.f32.xlu2 %v14868_v61  ;;  %v10924_v22 = vmul.f32 0.0078125, %v2863_v26  ;;  %v14872_v33 = vld [vmem:[#allocation143_spill] sm:$0xff]  ;;  %v14875_v6 = vld [vmem:[#allocation86_spill] sm:$0xff]  ;;  %v14877_v48 = vld [vmem:[#allocation144_spill] sm:$0xff] }
 0x2ce   :  { %v14873_v31 = vsub.f32 %v14871_v57, %v14872_v33  ;;  %v2931_v15 = vmul.f32 %v14806_v43, %v14806_v43  ;;  %vm1951_vm13 = vweird.f32 %v14874_v19  ;;  %v14876_v26 = vld [vmem:[#allocation79_spill] sm:$0xff]  ;;  %v10942_v63 = vperm.slane %v10810_v9, 3  ;;  %v14879_v33 = vld [vmem:[#allocation65_spill] sm:$0xff] }
 0x2cf   :  { %v4398_v7 = vmul.f32 %v14866_v56, %v2100_v34  ;;  %v4402_v59 = vmul.f32 %v14866_v56, %v2101_v49  ;;  %v2679_v34 = vsel %vm10911_vm8, %v14827_v30, %v14870_v3  ;;  %v14878_v41 = vsub.f32 %v14876_v26, %v14877_v48  ;;  %v10950_v48 = vpop.f32.mrf.mxu1  ;;  %v14881_v9 = vld [vmem:[#allocation161_spill] sm:$0xff] }
 0x2d0   :  { %v2836_v49 = vmul.f32 %v2669_v38, %v14873_v31  ;;  %v4004_v30 = vmul.f32 %v10857_v37, %v4003_v20  ;;  %v3268_v38 = vmul.f32 %v10869_v32, %v3267_v11  ;;  %2978 = vadd.xlane.f32.xlu1 %v2931_v15  ;;  %v3049_v57 = vmul.f32 0.0078125, %v2959_v35  ;;  %14880 = vst [vmem:[#allocation27_spill] sm:$0xff] %v10950_v48 }
 0x2d1   :  { %v4536_v8 = vadd.f32 %v14875_v6, %v4398_v7  ;;  %v4540_v1 = vadd.f32 %v14875_v6, %v4402_v59  ;;  %v2837_v28 = vmul.f32 %v2679_v34, %v14878_v41  ;;  %vm1950_vm9 = vweird.f32 %v14879_v33  ;;  %v1342_v7 = vpop.f32.mrf.mxu3 }
 0x2d2   :  { %v4399_v3 = vmul.f32 %v14453_v53, %v2836_v49  ;;  %v4475_v41 = vadd.f32 %v10942_v63, %v4337_v60  ;;  %vm2687_vm12 = vweird.f32 %v14881_v9  ;;  %v10953_v20 = vadd.f32 1e-05, %v3144_v50  ;;  %v14882_v60 = vld [vmem:[#allocation160_spill] sm:$0xff]  ;;  %vm10987_vm10 = vmor %vm1950_vm9, %vm1951_vm13 }
 0x2d3   :  { %v4664_v31 = vmax.f32 %v4536_v8, 0.0  ;;  %v4668_v59 = vmax.f32 %v4540_v1, 0.0  ;;  %v4403_v43 = vmul.f32 %v14453_v53, %v2837_v28  ;;  %v10955_v11 = vmul.f32 0.0078125, %v3599_v5  ;;  %v3695_v5 = vpop.xlane.xlu2 %3694 }
 0x2d4   :  { %v4537_v34 = vadd.f32 %v14750_v16, %v4399_v3  ;;  %v4479_v35 = vadd.f32 %v10942_v63, %v4341_v47  ;;  %v3880_v49 = vmax.f32 %v3848_v54, 0.0  ;;  %v3081_v1 = vmul.f32 %v10924_v22, %v10924_v22 }
 0x2d5   :  { %v4760_v8 = vpack.c.bf16 %v4668_v59, %v4664_v31  ;;  %v4541_v28 = vadd.f32 %v14750_v16, %v4403_v43  ;;  %vm2686_vm7 = vweird.f32 %v14882_v60  ;;  %v3269_v15 = vmul.f32 0.5, %v3268_v38  ;;  %v5066_v59 = vpop.f32.mrf.mxu0  ;;  %v14897_v60 = vld [vmem:[#allocation165_spill] sm:$0xff] }
 0x2d6   :  { %v10963_v26 = vadd.f32 %v1342_v7, %v1254_v4  ;;  %v4603_v50 = vmax.f32 %v4475_v41, 0.0  ;;  %v4607_v48 = vmax.f32 %v4479_v35, 0.0  ;;  %v3260_v55 = vsub.f32 1.5, %v10883_v23  ;;  %v10972_v41 = vpop.xlane.xlu0 %2864  ;;  %vm11017_vm9 = vmor %vm2686_vm7, %vm2687_vm12 }
 0x2d7   :  { %5100 = vmatmul.bf16.gmra.mxu0 %v4760_v8  ;;  %v4665_v3 = vmax.f32 %v4537_v34, 0.0  ;;  %v4669_v47 = vmax.f32 %v4541_v28, 0.0  ;;  %v3113_v54 = vsub.f32 %v3049_v57, %v3081_v1  ;;  %v3995_v13 = vmul.f32 0.5, %v3994_v17  ;;  %v14887_v28 = vld [vmem:[#allocation116_spill] sm:$0xff]  ;;  %v5155_v33 = vpop.f32.mrf.mxu1 }
 0x2d8   :  { %14883 = vst [vmem:[#allocation37_spill] sm:$0xff] %v10963_v26  ;;  %v4005_v39 = vmul.f32 0.5, %v4004_v30  ;;  %6249 = vrsqrt.f32 %v10953_v20  ;;  %v4731_v31 = vpack.c.bf16 %v4607_v48, %v4603_v50  ;;  %v10967_v43 = vadd.f32 1e-05, %v3880_v49  ;;  %v10981_v49 = vpop.xlane.xlu1 %3600  ;;  %v14898_v1 = vld [vmem:[#allocation164_spill] sm:$0xff] }
 0x2d9   :  { %v3817_v4 = vmul.f32 %v10955_v11, %v10955_v11  ;;  %v4761_v38 = vpack.c.bf16 %v4669_v47, %v4665_v3  ;;  %v3785_v7 = vmul.f32 0.0078125, %v3695_v5  ;;  %vm3263_vm15 = vweird.f32 %v10742_v46  ;;  %v14888_v47 = vld [vmem:[#allocation110_spill] sm:$0xff] }
 0x2da   :  { %v3270_v23 = vsub.f32 1.5, %v3269_v15  ;;  %5327 = vmatmul.bf16.vlgmr.msra.gmra.mxu3 %v4731_v31  ;;  %v2932_v17 = vmul.f32 %v14868_v61, %v14868_v61  ;;  %v3669_v30 = vmul.f32 %v10963_v26, %v10963_v26  ;;  %v3261_v57 = vmul.f32 %v10742_v46, %v3260_v55  ;;  %v14886_v55 = vld [vmem:[#allocation194_spill] sm:$0xff]  ;;  %v14932_v61 = vld [vmem:[#allocation41_spill] sm:$0xff] }
 0x2db   :  { %5189 = vmatmul.bf16.gmra.mxu1 %v4761_v38  ;;  %v3145_v48 = vmax.f32 %v3113_v54, 0.0  ;;  %v3849_v34 = vsub.f32 %v3785_v7, %v3817_v4  ;;  %v3668_v35 = vmul.f32 %v10719_v29, %v10719_v29  ;;  %vm3262_vm11 = vweird.f32 %v10655_v12  ;;  %v14894_v7 = vld [vmem:[#allocation84_spill] sm:$0xff]  ;;  %v14928_v29 = vld [vmem:[#allocation30_spill] sm:$0xff] }
 0x2dc   :  { %v3996_v8 = vsub.f32 1.5, %v3995_v13  ;;  %v3911_v15 = vsub.f32 %v14887_v28, %v14886_v55  ;;  %2980 = vadd.xlane.f32.xlu1 %v2932_v17  ;;  %3718 = vadd.xlane.f32.xlu0 %v3669_v30  ;;  %v5067_v50 = vadd.f32 %v10815_v2, %v5066_v59  ;;  %v4006_v5 = vsub.f32 1.5, %v4005_v39  ;;  %vm11004_vm0 = vmor %vm3262_vm11, %vm3263_vm15  ;;  %v14895_v59 = vld [vmem:[#allocation150_spill] sm:$0xff]  ;;  %v14905_v13 = vld [vmem:[#allocation155_spill] sm:$0xff] }
 0x2dd   :  { %6251 = vrsqrt.f32 %v10967_v43  ;;  %v3881_v3 = vmax.f32 %v3849_v34, 0.0  ;;  %3716 = vadd.xlane.f32.xlu2 %v3668_v35  ;;  %v1953_v54 = vsel %vm10987_vm10, %v14874_v19, %v14888_v47  ;;  %vm3999_vm8 = vweird.f32 %v10793_v62  ;;  %v14907_v19 = vld [vmem:[#allocation147_spill] sm:$0xff] }
 0x2de   :  { %v11000_v12 = vpop.eup %6249  ;;  %v3271_v39 = vmul.f32 %v10869_v32, %v3270_v23  ;;  %vm3273_vm13 = vweird.f32 %v10869_v32  ;;  %v11011_v31 = vadd.f32 %v5155_v33, %v5067_v50  ;;  %v3265_v4 = vsel %vm11004_vm0, %v10742_v46, %v3261_v57  ;;  %v2961_v50 = vpop.xlane.xlu2 %2960 }
 0x2df   :  { %vm3272_vm15 = vweird.f32 %v10747_v21  ;;  %v11025_v38 = vadd.f32 1e-05, %v3145_v48  ;;  %v14896_v23 = vsub.f32 %v14894_v7, %v14895_v59  ;;  %v3997_v30 = vmul.f32 %v10793_v62, %v3996_v8 }
 0x2e0   :  { %14891 = vst [vmem:[#allocation63_spill] sm:$0xff] %v11011_v31  ;;  %v11031_v34 = vadd.f32 1e-05, %v3881_v3  ;;  %v4548_v35 = vadd.f32 %v14875_v6, %v14897_v60  ;;  %v2689_v46 = vsel %vm11017_vm9, %v14881_v9, %v14898_v1  ;;  %v4007_v21 = vmul.f32 %v10857_v37, %v4006_v5  ;;  %vm11041_vm7 = vmor %vm3272_vm15, %vm3273_vm13  ;;  %v14901_v5 = vld [vmem:[#allocation168_spill] sm:$0xff]  ;;  %v14933_v31 = vld [vmem:[#allocation33_spill] sm:$0xff] }
 0x2e1   :  { %v2102_v17 = vmul.f32 %v1953_v54, %v14896_v23  ;;  %vm4009_vm12 = vweird.f32 %v10857_v37  ;;  %v3277_v48 = vmul.f32 %v11000_v12, %v10953_v20  ;;  %vm2071_vm10 = vweird.f32 %v10556_v44  ;;  %v14904_v54 = vld [vmem:[#allocation92_spill] sm:$0xff]  ;;  %v3697_v23 = vpop.xlane.xlu0 %3696 }
 0x2e2   :  { %vm3998_vm11 = vweird.f32 %v10699_v10  ;;  %vm4008_vm0 = vweird.f32 %v10740_v52  ;;  %v3275_v9 = vsel %vm11041_vm7, %v10869_v32, %v3271_v39  ;;  %v4549_v3 = vadd.f32 %v14750_v16, %v14901_v5  ;;  %v2867_v5 = vpop.xlane.xlu1 %2866 }
 0x2e3   :  { %v4406_v8 = vmul.f32 %v14866_v56, %v2102_v17  ;;  %v11056_v33 = vpop.eup %6251  ;;  %vm11060_vm13 = vmor %vm3998_vm11, %vm3999_vm8  ;;  %6253 = vrsqrt.f32 %v11025_v38  ;;  %v4676_v52 = vmax.f32 %v4548_v35, 0.0  ;;  %v14906_v32 = vsub.f32 %v14904_v54, %v14905_v13  ;;  %v14910_v17 = vld [vmem:[#allocation172_spill] sm:$0xff] }
 0x2e4   :  { %vm2070_vm9 = vweird.f32 %v14907_v19  ;;  %v4001_v7 = vsel %vm11060_vm13, %v10793_v62, %v3997_v30  ;;  %vm11075_vm8 = vmor %vm4008_vm0, %vm4009_vm12  ;;  %6255 = vrsqrt.f32 %v11031_v34  ;;  %3622 = vadd.xlane.f32.xlu1 %v10963_v26  ;;  %2888 = vadd.xlane.f32.xlu0 %v14910_v17  ;;  %v2933_v60 = vmul.f32 %v14846_v51, %v14846_v51  ;;  %v14923_v19 = vld [vmem:[#allocation87_spill] sm:$0xff]  ;;  %v14927_v51 = vld [vmem:[#allocation68_spill] sm:$0xff] }
 0x2e5   :  { %v4544_v10 = vadd.f32 %v14875_v6, %v4406_v8  ;;  %v2838_v39 = vmul.f32 %v2689_v46, %v14906_v32  ;;  %v14911_v35 = vsub.f32 %v14844_v58, %v10551_v40  ;;  %v4011_v30 = vsel %vm11075_vm8, %v10857_v37, %v4007_v21  ;;  %v1256_v46 = vpop.f32.mrf.mxu2  ;;  %vm11143_vm11 = vmor %vm2070_vm9, %vm2071_vm10 }
 0x2e6   :  { %v3278_v1 = vmul.f32 %v11000_v12, %v3277_v48  ;;  %v4013_v47 = vmul.f32 %v11056_v33, %v10967_v43  ;;  %v1257_v54 = vadd.f32 %v1256_v46, %v9047_v42  ;;  %v4677_v13 = vmax.f32 %v4549_v3, 0.0  ;;  %2982 = vadd.xlane.f32.xlu2 %v2933_v60 }
 0x2e7   :  { %v3558_v62 = vmul.f32 %v3265_v4, %v14911_v35  ;;  %v4672_v57 = vmax.f32 %v4544_v10, 0.0  ;;  %v4407_v8 = vmul.f32 %v14453_v53, %v2838_v39  ;;  %v14912_v40 = vsub.f32 %v14845_v24, %v10627_v36  ;;  %v1345_v24 = vpop.f32.mrf.mxu3 }
 0x2e8   :  { %v14913_v48 = vsub.f32 %v14839_v18, %v10601_v14  ;;  %v11104_v32 = vmul.f32 0.0078125, %v10972_v41  ;;  %v11107_v39 = vmul.f32 0.0078125, %v10981_v49  ;;  %v3050_v3 = vmul.f32 0.0078125, %v2961_v50  ;;  %v11117_v41 = vpop.f32.mrf.mxu0 }
 0x2e9   :  { %v3559_v58 = vmul.f32 %v3275_v9, %v14912_v40  ;;  %v4764_v4 = vpack.c.bf16 %v4676_v52, %v4672_v57  ;;  %v4545_v37 = vadd.f32 %v14750_v16, %v4407_v8  ;;  %v4344_v21 = vmul.f32 %v10562_v27, %v3558_v62  ;;  %v11110_v36 = vpop.eup %6253  ;;  %v14915_v62 = vld [vmem:[#allocation112_spill] sm:$0xff]  ;;  %v3603_v40 = vpop.xlane.xlu2 %3602 }
 0x2ea   :  { %v4294_v10 = vmul.f32 %v4001_v7, %v14913_v48  ;;  %v4295_v14 = vmul.f32 %v4011_v30, %v3911_v15  ;;  %v11119_v49 = vpop.eup %6255  ;;  %v3279_v50 = vmul.f32 0.5, %v3278_v1  ;;  %v3082_v7 = vmul.f32 %v11104_v32, %v11104_v32  ;;  %v14922_v48 = vld [vmem:[#allocation166_spill] sm:$0xff] }
 0x2eb   :  { %v4348_v59 = vmul.f32 %v10562_v27, %v3559_v58  ;;  %5105 = vmatmul.bf16.gmra.mxu0 %v4764_v4  ;;  %v4673_v9 = vmax.f32 %v4545_v37, 0.0  ;;  %v4482_v52 = vadd.f32 %v10813_v0, %v4344_v21  ;;  %v11123_v60 = vadd.f32 %v1345_v24, %v1257_v54  ;;  %v11134_v54 = vpop.f32.mrf.mxu1  ;;  %v14917_v58 = vld [vmem:[#allocation51_spill] sm:$0xff] }
 0x2ec   :  { %v4345_v18 = vmul.f32 %v10519_v25, %v4294_v10  ;;  %vm1981_vm15 = vweird.f32 %v14915_v62  ;;  %v4014_v46 = vmul.f32 %v11056_v33, %v4013_v47  ;;  %v4349_v28 = vmul.f32 %v10519_v25, %v4295_v14  ;;  %14916 = vst [vmem:[#allocation124_spill] sm:$0xff] %v11134_v54  ;;  %v14918_v47 = vld [vmem:[#allocation42_spill] sm:$0xff]  ;;  %v2963_v14 = vpop.xlane.xlu0 %2962 }
 0x2ed   :  { %14914 = vst [vmem:[#allocation99_spill] sm:$0xff] %v11123_v60  ;;  %v4486_v35 = vadd.f32 %v10813_v0, %v4348_v59  ;;  %v4765_v55 = vpack.c.bf16 %v4677_v13, %v4673_v9  ;;  %v3287_v30 = vmul.f32 %v11110_v36, %v11025_v38  ;;  %v3818_v1 = vmul.f32 %v11107_v39, %v11107_v39 }
 0x2ee   :  { %v4483_v15 = vadd.f32 %v10942_v63, %v4345_v18  ;;  %v3786_v57 = vmul.f32 0.0078125, %v3697_v23  ;;  %v3114_v8 = vsub.f32 %v3050_v3, %v3082_v7  ;;  %3624 = vadd.xlane.f32.xlu1 %v11123_v60  ;;  %vm2707_vm12 = vweird.f32 %v14917_v58  ;;  %v14924_v3 = vld [vmem:[#allocation188_spill] sm:$0xff]  ;;  %v14926_v18 = vld [vmem:[#allocation121_spill] sm:$0xff] }
 0x2ef   :  { %vm1980_vm7 = vweird.f32 %v14918_v47  ;;  %v14919_v13 = vmov 0  ;;  %v4023_v23 = vmul.f32 %v11119_v49, %v11031_v34  ;;  %5194 = vmatmul.bf16.gmra.mxu1 %v4765_v55  ;;  %v4610_v4 = vmax.f32 %v4482_v52, 0.0 }
 0x2f0   :  { %v14920_v13 = vsel %vm11143_vm11, 4294967295, %v14919_v13  ;;  %v4614_v37 = vmax.f32 %v4486_v35, 0.0  ;;  %v4487_v21 = vadd.f32 %v10942_v63, %v4349_v28  ;;  %v11157_v59 = vadd.f32 %v14924_v3, %v14923_v19  ;;  %v3699_v28 = vpop.xlane.xlu1 %3698  ;;  %vm11202_vm0 = vmor %vm1980_vm7, %vm1981_vm15 }
 0x2f1   :  { %14921 = vst [vmem:[#allocation89_spill] sm:$0xff] %v14920_v13  ;;  %v3280_v24 = vsub.f32 1.5, %v3279_v50  ;;  %v11159_v9 = vmul.f32 0.0078125, %v2867_v5  ;;  %vm2706_vm10 = vweird.f32 %v14926_v18  ;;  %v4015_v52 = vmul.f32 0.5, %v4014_v46  ;;  %v14950_v18 = vld [vmem:[#allocation127_spill] sm:$0xff] }
 0x2f2   :  { %14925 = vst [vmem:[#allocation72_spill] sm:$0xff] %v11157_v59  ;;  %v4734_v7 = vpack.c.bf16 %v4614_v37, %v4610_v4  ;;  %v4611_v35 = vmax.f32 %v4483_v15, 0.0  ;;  %v4615_v55 = vmax.f32 %v4487_v21, 0.0  ;;  %v11165_v10 = vmul.f32 %v14866_v56, %v14928_v29  ;;  %v14930_v4 = vld [vmem:[#allocation137_spill] sm:$0xff]  ;;  %vm2708_vm15 = vmor %vm2706_vm10, %vm2707_vm12  ;;  %v14953_v13 = vld [vmem:[#allocation71_spill] sm:$0xff] }
 0x2f3   :  { %v3850_v26 = vsub.f32 %v3786_v57, %v3818_v1  ;;  %v3146_v19 = vmax.f32 %v3114_v8, 0.0  ;;  %v3083_v5 = vmul.f32 %v11159_v9, %v11159_v9  ;;  %v3288_v50 = vmul.f32 %v11110_v36, %v3287_v30  ;;  %v14931_v37 = vld [vmem:[#allocation141_spill] sm:$0xff]  ;;  %v1258_v57 = vpop.f32.mrf.mxu2  ;;  %v5071_v8 = vpop.f32.mrf.mxu0  ;;  %v14934_v30 = vld [vmem:[#allocation34_spill] sm:$0xff] }
 0x2f4   :  { %14929 = vst [vmem:[#allocation96_spill] sm:$0xff] %v11165_v10  ;;  %v4024_v3 = vmul.f32 %v11119_v49, %v4023_v23  ;;  %5243 = vmatmul.bf16.gmra.mxu2 %v4734_v7  ;;  %v4735_v46 = vpack.c.bf16 %v4615_v55, %v4611_v35  ;;  %v3051_v15 = vmul.f32 0.0078125, %v2963_v14  ;;  %v11173_v21 = vadd.f32 %v14931_v37, %v14930_v4  ;;  %v14935_v23 = vld [vmem:[#allocation55_spill] sm:$0xff]  ;;  %v14936_v10 = vld [vmem:[#allocation132_spill] sm:$0xff]  ;;  %v5160_v47 = vpop.f32.mrf.mxu1 }
 0x2f5   :  { %v11178_v1 = vmul.f32 %v11000_v12, %v3280_v24  ;;  %vm3283_vm9 = vweird.f32 %v11000_v12  ;;  %vm3282_vm8 = vweird.f32 %v10953_v20  ;;  %v4016_v14 = vsub.f32 1.5, %v4015_v52  ;;  %v14939_v20 = vld [vmem:[#allocation152_spill] sm:$0xff]  ;;  %v14944_v7 = vld [vmem:[#allocation47_spill] sm:$0xff] }
 0x2f6   :  { %5332 = vmatmul.bf16.gmra.mxu3 %v4735_v46  ;;  %v3115_v35 = vsub.f32 %v3051_v15, %v3083_v5  ;;  %v3882_v55 = vmax.f32 %v3850_v26, 0.0  ;;  %v11184_v37 = vadd.f32 1e-05, %v3146_v19  ;;  %v3670_v29 = vmul.f32 %v11123_v60, %v11123_v60  ;;  %2890 = vadd.xlane.f32.xlu1 %v14936_v10  ;;  %vm11191_vm13 = vmor %vm3282_vm8, %vm3283_vm9  ;;  %v1347_v26 = vpop.f32.mrf.mxu3 }
 0x2f7   :  { %v2934_v24 = vmul.f32 %v14910_v17, %v14910_v17  ;;  %v3289_v46 = vmul.f32 0.5, %v3288_v50  ;;  %v4025_v5 = vmul.f32 0.5, %v4024_v3  ;;  %v5072_v19 = vadd.f32 %v10815_v2, %v5071_v8  ;;  %v11215_v8 = vpop.xlane.xlu2 %3604 }
 0x2f8   :  { %v1259_v50 = vadd.f32 %v1258_v57, %v9047_v42  ;;  %v11213_v3 = vmul.f32 0.0078125, %v3603_v40  ;;  %3720 = vadd.xlane.f32.xlu0 %v3670_v29  ;;  %v11218_v52 = vmul.f32 %v11056_v33, %v4016_v14  ;;  %v3147_v60 = vmax.f32 %v3115_v35, 0.0  ;;  %v2869_v15 = vpop.xlane.xlu1 %2868 }
 0x2f9   :  { %2984 = vadd.xlane.f32.xlu2 %v2934_v24  ;;  %v11220_v17 = vadd.f32 %v5160_v47, %v5072_v19  ;;  %v1983_v44 = vsel %vm11202_vm0, %v14915_v62, %v14944_v7  ;;  %vm3293_vm7 = vweird.f32 %v11110_v36  ;;  %v11231_v40 = vadd.f32 1e-05, %v3882_v55  ;;  %v14947_v62 = vld [vmem:[#allocation73_spill] sm:$0xff]  ;;  %v14948_v7 = vld [vmem:[#allocation123_spill] sm:$0xff] }
 0x2fa   :  { %14942 = vst [vmem:[#allocation80_spill] sm:$0xff] %v11213_v3  ;;  %6257 = vrsqrt.f32 %v11184_v37  ;;  %v3787_v29 = vmul.f32 0.0078125, %v3699_v28  ;;  %vm14945_vm9 = vweird.f32 %v14922_v48  ;;  %vm14946_vm8 = vweird.f32 %v14927_v51 }
 0x2fb   :  { %14943 = vst [vmem:[#allocation66_spill] sm:$0xff] %v11220_v17  ;;  %vm2718_vm11 = vmor %vm14946_vm8, %vm14945_vm9  ;;  %v3290_v57 = vsub.f32 1.5, %v3289_v46  ;;  %v4026_v14 = vsub.f32 1.5, %v4025_v5  ;;  %v14949_v35 = vsub.f32 %v14947_v62, %v14948_v7  ;;  %v2709_v19 = vsel %vm2708_vm15, %v14917_v58, %v14950_v18  ;;  %v1261_v28 = vpop.f32.mrf.mxu2  ;;  %v14952_v17 = vld [vmem:[#allocation36_spill] sm:$0xff]  ;;  %v14954_v46 = vld [vmem:[#allocation83_spill] sm:$0xff] }
 0x2fc   :  { %v3819_v55 = vmul.f32 %v11213_v3, %v11213_v3  ;;  %v11245_v47 = vadd.f32 %v1347_v26, %v1259_v50  ;;  %v2719_v51 = vsel %vm2718_vm11, %v14922_v48, %v14952_v17  ;;  %v14955_v5 = vsub.f32 %v14953_v13, %v14954_v46  ;;  %v14956_v62 = vld [vmem:[#allocation136_spill] sm:$0xff]  ;;  %v14957_v7 = vld [vmem:[#allocation106_spill] sm:$0xff]  ;;  %v2965_v13 = vpop.xlane.xlu0 %2964 }
 0x2fd   :  { %v2105_v24 = vmul.f32 %v1983_v44, %v14949_v35  ;;  %v11252_v54 = vadd.f32 1e-05, %v3147_v60  ;;  %v4552_v58 = vadd.f32 %v14875_v6, %v14956_v62  ;;  %v14958_v35 = vld [vmem:[#allocation97_spill] sm:$0xff]  ;;  %v2935_v17 = vmul.f32 %v14936_v10, %v14936_v10 }
 0x2fe   :  { %14951 = vst [vmem:[#allocation81_spill] sm:$0xff] %v11245_v47  ;;  %v2840_v59 = vmul.f32 %v2709_v19, %v14955_v5  ;;  %v14959_v18 = vsub.f32 %v14957_v7, %v14958_v35  ;;  %v3851_v50 = vsub.f32 %v3787_v29, %v3819_v55  ;;  %v11263_v48 = vmul.f32 0.0078125, %v2869_v15  ;;  %v1350_v46 = vpop.f32.mrf.mxu3  ;;  %v14976_v62 = vld [vmem:[#allocation129_spill] sm:$0xff] }
 0x2ff   :  { %v4418_v44 = vmul.f32 %v14866_v56, %v2105_v24  ;;  %v3291_v60 = vmul.f32 %v11110_v36, %v3290_v57  ;;  %6259 = vrsqrt.f32 %v11231_v40  ;;  %v4027_v29 = vmul.f32 %v11119_v49, %v4026_v14 }
 0x300   :  { %v2841_v26 = vmul.f32 %v2719_v51, %v14959_v18  ;;  %v4415_v3 = vmul.f32 %v14453_v53, %v2840_v59  ;;  %v11269_v5 = vpop.eup %6257  ;;  %vm4029_vm12 = vweird.f32 %v11119_v49  ;;  %v1262_v59 = vadd.f32 %v1261_v28, %v9047_v42  ;;  %2986 = vadd.xlane.f32.xlu0 %v2935_v17 }
 0x301   :  { %v4556_v24 = vadd.f32 %v14875_v6, %v4418_v44  ;;  %3626 = vadd.xlane.f32.xlu2 %v11245_v47  ;;  %vm14960_vm11 = vweird.f32 %v11056_v33  ;;  %vm14961_vm0 = vweird.f32 %v10967_v43  ;;  %6261 = vrsqrt.f32 %v11252_v54  ;;  %v11293_v44 = vpop.xlane.xlu2 %2870 }
 0x302   :  { %v4419_v19 = vmul.f32 %v14453_v53, %v2841_v26  ;;  %v4553_v15 = vadd.f32 %v14750_v16, %v4415_v3  ;;  %vm11280_vm10 = vmor %vm14961_vm0, %vm14960_vm11  ;;  %v4680_v14 = vmax.f32 %v4552_v58, 0.0  ;;  %vm3292_vm9 = vweird.f32 %v11025_v38 }
 0x303   :  { %v4684_v55 = vmax.f32 %v4556_v24, 0.0  ;;  %v4021_v3 = vsel %vm11280_vm10, %v11056_v33, %v11218_v52  ;;  %v3883_v28 = vmax.f32 %v3851_v50, 0.0  ;;  %v3084_v43 = vmul.f32 %v11263_v48, %v11263_v48  ;;  %vm11297_vm8 = vmor %vm3292_vm9, %vm3293_vm7  ;;  %v14969_v50 = vld [vmem:[#allocation48_spill] sm:$0xff]  ;;  %v14981_v33 = vld [vmem:[#allocation135_spill] sm:$0xff] }
 0x304   :  { %v4557_v51 = vadd.f32 %v14750_v16, %v4419_v19  ;;  %vm4028_vm15 = vweird.f32 %v11031_v34  ;;  %v4681_v7 = vmax.f32 %v4553_v15, 0.0  ;;  %v3295_v38 = vsel %vm11297_vm8, %v11110_v36, %v3291_v60  ;;  %v14970_v24 = vld [vmem:[#allocation56_spill] sm:$0xff] }
 0x305   :  { %v4768_v58 = vpack.c.bf16 %v4684_v55, %v4680_v14  ;;  %vm11307_vm11 = vmor %vm4028_vm15, %vm4029_vm12  ;;  %v3297_v52 = vmul.f32 %v11269_v5, %v11184_v37  ;;  %v3052_v18 = vmul.f32 0.0078125, %v2965_v13  ;;  %v11313_v26 = vadd.f32 %v1350_v46, %v1262_v59  ;;  %v11315_v34 = vpop.eup %6259  ;;  %v14971_v13 = vld [vmem:[#allocation193_spill] sm:$0xff]  ;;  %v14973_v59 = vld [vmem:[#allocation122_spill] sm:$0xff]  ;;  %v1263_v55 = vpop.f32.mrf.mxu2 }
 0x306   :  { %v4685_v35 = vmax.f32 %v4557_v51, 0.0  ;;  %vm1991_vm7 = vweird.f32 %v14969_v50  ;;  %v4031_v36 = vsel %vm11307_vm11, %v11119_v49, %v4027_v29  ;;  %v3671_v60 = vmul.f32 %v11245_v47, %v11245_v47  ;;  %v14974_v29 = vld [vmem:[#allocation102_spill] sm:$0xff]  ;;  %v14975_v51 = vld [vmem:[#allocation171_spill] sm:$0xff] }
 0x307   :  { %14968 = vst [vmem:[#allocation104_spill] sm:$0xff] %v11313_v26  ;;  %5110 = vmatmul.bf16.gmra.mxu0 %v4768_v58  ;;  %v2936_v19 = vmul.f32 %v14970_v24, %v14970_v24  ;;  %v11327_v46 = vadd.f32 %v14971_v13, %v11173_v21  ;;  %v3913_v15 = vsub.f32 %v14973_v59, %v10955_v11  ;;  %v11331_v57 = vadd.f32 1e-05, %v3883_v28  ;;  %v11333_v49 = vpop.eup %6261 }
 0x308   :  { %v4769_v17 = vpack.c.bf16 %v4685_v35, %v4681_v7  ;;  %v3116_v14 = vsub.f32 %v3052_v18, %v3084_v43  ;;  %vm1990_vm12 = vweird.f32 %v14974_v29  ;;  %vm2727_vm0 = vweird.f32 %v14975_v51  ;;  %3722 = vadd.xlane.f32.xlu1 %v3671_v60  ;;  %v14982_v18 = vld [vmem:[#allocation52_spill] sm:$0xff]  ;;  %v3701_v60 = vpop.xlane.xlu1 %3700 }
 0x309   :  { %14972 = vst [vmem:[#allocation54_spill] sm:$0xff] %v11327_v46  ;;  %vm2001_vm10 = vweird.f32 %v14976_v62  ;;  %v14977_v21 = vsub.f32 %v14933_v31, %v14932_v61  ;;  %v14978_v11 = vsel %vm11191_vm13, %v11000_v12, %v11178_v1  ;;  %v14979_v43 = vsub.f32 %v14939_v20, %v10924_v22  ;;  %2988 = vadd.xlane.f32.xlu0 %v2936_v19  ;;  %v14983_v31 = vld [vmem:[#allocation23_spill] sm:$0xff]  ;;  %vm11398_vm11 = vmor %vm1990_vm12, %vm1991_vm7  ;;  %v15004_v29 = vld [vmem:[#allocation24_spill] sm:$0xff]  ;;  %v11663_v46 = vpop.f32.mrf.mxu1 }
 0x30a   :  { %5199 = vmatmul.bf16.gmra.mxu1 %v4769_v17  ;;  %v14980_v7 = vsub.f32 %v14935_v23, %v14934_v30  ;;  %vm2000_vm9 = vweird.f32 %v14981_v33  ;;  %vm2737_vm8 = vweird.f32 %v14982_v18  ;;  %v4033_v61 = vmul.f32 %v11315_v34, %v11231_v40  ;;  %3628 = vadd.xlane.f32.xlu2 %v11313_v26  ;;  %v14984_v22 = vld [vmem:[#allocation95_spill] sm:$0xff]  ;;  %v3607_v30 = vpop.xlane.xlu0 %3606  ;;  %v1352_v23 = vpop.f32.mrf.mxu3  ;;  %v14985_v17 = vld [vmem:[#allocation170_spill] sm:$0xff] }
 0x30b   :  { %v3560_v28 = vmul.f32 %v14978_v11, %v14977_v21  ;;  %v3561_v58 = vmul.f32 %v3295_v38, %v14979_v43  ;;  %v3298_v45 = vmul.f32 %v11269_v5, %v3297_v52  ;;  %v4297_v12 = vmul.f32 %v4031_v36, %v3913_v15  ;;  %vm11416_vm7 = vmor %vm2000_vm9, %vm2001_vm10  ;;  %v15010_v33 = vld [vmem:[#allocation31_spill] sm:$0xff] }
 0x30c   :  { %v4296_v35 = vmul.f32 %v4021_v3, %v14980_v7  ;;  %vm2726_vm13 = vweird.f32 %v14983_v31  ;;  %v11361_v1 = vadd.f32 %v14984_v22, %v14930_v4  ;;  %vm2736_vm15 = vweird.f32 %v14985_v17 }
 0x30d   :  { %v4352_v20 = vmul.f32 %v10562_v27, %v3560_v28  ;;  %v4356_v3 = vmul.f32 %v10562_v27, %v3561_v58  ;;  %v3307_v52 = vmul.f32 %v11333_v49, %v11252_v54  ;;  %6263 = vrsqrt.f32 %v11331_v57  ;;  %v3703_v58 = vpop.xlane.xlu2 %3702  ;;  %vm11430_vm12 = vmor %vm2726_vm13, %vm2727_vm0 }
 0x30e   :  { %v4353_v38 = vmul.f32 %v10519_v25, %v4296_v35  ;;  %v1264_v36 = vadd.f32 %v1263_v55, %v9047_v42  ;;  %v4357_v4 = vmul.f32 %v10519_v25, %v4297_v12  ;;  %v3148_v19 = vmax.f32 %v3116_v14, 0.0  ;;  %vm2738_vm0 = vmor %vm2736_vm15, %vm2737_vm8 }
 0x30f   :  { %v4490_v13 = vadd.f32 %v10813_v0, %v4352_v20  ;;  %v4494_v59 = vadd.f32 %v10813_v0, %v4356_v3  ;;  %v4034_v21 = vmul.f32 %v11315_v34, %v4033_v61  ;;  %v11376_v11 = vmul.f32 0.5, %v3298_v45 }
 0x310   :  { %v4491_v15 = vadd.f32 %v10942_v63, %v4353_v38  ;;  %v11378_v28 = vmul.f32 0.0078125, %v3607_v30  ;;  %v4495_v43 = vadd.f32 %v10942_v63, %v4357_v4  ;;  %v11382_v55 = vmul.f32 0.0078125, %v11215_v8  ;;  %2892 = vadd.xlane.f32.xlu1 %v14970_v24 }
 0x311   :  { %v4618_v7 = vmax.f32 %v4490_v13, 0.0  ;;  %v4622_v14 = vmax.f32 %v4494_v59, 0.0  ;;  %v3788_v35 = vmul.f32 0.0078125, %v3701_v60  ;;  %v3308_v12 = vmul.f32 %v11333_v49, %v3307_v52  ;;  %v14989_v52 = vld [vmem:[#allocation154_spill] sm:$0xff]  ;;  %v1266_v13 = vpop.f32.mrf.mxu2  ;;  %v14990_v59 = vld [vmem:[#allocation117_spill] sm:$0xff] }
 0x312   :  { %v11385_v22 = vadd.f32 %v1352_v23, %v1264_v36  ;;  %v4619_v20 = vmax.f32 %v4491_v15, 0.0  ;;  %v4623_v3 = vmax.f32 %v4495_v43, 0.0  ;;  %v3820_v61 = vmul.f32 %v11382_v55, %v11382_v55  ;;  %2894 = vadd.xlane.f32.xlu2 %v14990_v59  ;;  %v1355_v17 = vpop.f32.mrf.mxu3 }
 0x313   :  { %v11389_v45 = vadd.f32 1e-05, %v3148_v19  ;;  %v4738_v30 = vpack.c.bf16 %v4622_v14, %v4618_v7  ;;  %v3789_v38 = vmul.f32 0.0078125, %v3703_v58  ;;  %v11392_v8 = vpop.eup %6263  ;;  %v11404_v36 = vadd.f32 %v10815_v2, %v14989_v52  ;;  %v14993_v58 = vld [vmem:[#allocation53_spill] sm:$0xff] }
 0x314   :  { %14986 = vst [vmem:[#allocation75_spill] sm:$0xff] %v11385_v22  ;;  %v11406_v4 = vmul.f32 0.5, %v4034_v21  ;;  %v3821_v60 = vmul.f32 %v11378_v28, %v11378_v28  ;;  %v4739_v19 = vpack.c.bf16 %v4623_v3, %v4619_v20  ;;  %3630 = vadd.xlane.f32.xlu0 %v11385_v22  ;;  %v3300_v15 = vsub.f32 1.5, %v11376_v11  ;;  %v14996_v20 = vld [vmem:[#allocation118_spill] sm:$0xff] }
 0x315   :  { %5248 = vmatmul.bf16.gmra.mxu2 %v4738_v30  ;;  %v3852_v21 = vsub.f32 %v3788_v35, %v3820_v61  ;;  %v1267_v43 = vadd.f32 %v1266_v13, %v9047_v42  ;;  %v1993_v7 = vsel %vm11398_vm11, %v14969_v50, %v14993_v58  ;;  %v3309_v14 = vmul.f32 0.5, %v3308_v12  ;;  %v14997_v3 = vld [vmem:[#allocation74_spill] sm:$0xff]  ;;  %v11449_v12 = vpop.xlane.xlu0 %3608 }
 0x316   :  { %5337 = vmatmul.bf16.gmra.mxu3 %v4739_v19  ;;  %v3853_v11 = vsub.f32 %v3789_v38, %v3821_v60  ;;  %v2003_v35 = vsel %vm11416_vm7, %v14976_v62, %v14996_v20  ;;  %v14998_v61 = vld [vmem:[#allocation130_spill] sm:$0xff]  ;;  %vm3302_vm10 = vweird.f32 %v11184_v37  ;;  %v4043_v31 = vmul.f32 %v11392_v8, %v11331_v57  ;;  %v15001_v62 = vld [vmem:[#allocation163_spill] sm:$0xff]  ;;  %v15003_v60 = vld [vmem:[#allocation61_spill] sm:$0xff] }
 0x317   :  { %v14999_v30 = vsub.f32 %v14997_v3, %v14998_v61  ;;  %6265 = vrsqrt.f32 %v11389_v45  ;;  %v15000_v38 = vld [vmem:[#allocation78_spill] sm:$0xff]  ;;  %v2729_v19 = vsel %vm11430_vm12, %v14975_v51, %v15003_v60  ;;  %v2739_v58 = vsel %vm2738_vm0, %v14982_v18, %v15004_v29  ;;  %v2967_v29 = vpop.xlane.xlu1 %2966 }
 0x318   :  { %v15002_v23 = vsub.f32 %v15000_v38, %v15001_v62  ;;  %v15006_v20 = vld [vmem:[#allocation138_spill] sm:$0xff]  ;;  %vm3303_vm9 = vweird.f32 %v11269_v5  ;;  %v15009_v62 = vld [vmem:[#allocation76_spill] sm:$0xff]  ;;  %v3310_v60 = vsub.f32 1.5, %v3309_v14  ;;  %vm4039_vm8 = vweird.f32 %v11315_v34 }
 0x319   :  { %v2106_v50 = vmul.f32 %v1993_v7, %v14999_v30  ;;  %v15005_v7 = vld [vmem:[#allocation98_spill] sm:$0xff]  ;;  %v11464_v30 = vadd.f32 %v1355_v17, %v1267_v43  ;;  %v15011_v51 = vsub.f32 %v15009_v62, %v15010_v33  ;;  %v11476_v43 = vmul.f32 0.0078125, %v11293_v44  ;;  %vm11504_vm12 = vmor %vm3302_vm10, %vm3303_vm9 }
 0x31a   :  { %v2107_v52 = vmul.f32 %v2003_v35, %v15002_v23  ;;  %v15007_v3 = vsub.f32 %v15005_v7, %v15006_v20  ;;  %v3884_v35 = vmax.f32 %v3852_v21, 0.0  ;;  %v4044_v17 = vmul.f32 %v11392_v8, %v4043_v31  ;;  %v15012_v7 = vld [vmem:[#allocation28_spill] sm:$0xff] }
 0x31b   :  { %v4422_v13 = vmul.f32 %v14866_v56, %v2106_v50  ;;  %15008 = vst [vmem:[#allocation143_spill] sm:$0xff] %v11464_v30  ;;  %v2843_v23 = vmul.f32 %v2739_v58, %v15011_v51  ;;  %v3885_v50 = vmax.f32 %v3853_v11, 0.0  ;;  %vm3313_vm13 = vweird.f32 %v11333_v49 }
 0x31c   :  { %v2842_v61 = vmul.f32 %v2729_v19, %v15007_v3  ;;  %v4426_v38 = vmul.f32 %v14866_v56, %v2107_v52  ;;  %v4036_v19 = vsub.f32 1.5, %v11406_v4  ;;  %v3301_v52 = vmul.f32 %v11269_v5, %v3300_v15  ;;  %3632 = vadd.xlane.f32.xlu0 %v11464_v30 }
 0x31d   :  { %v4560_v24 = vadd.f32 %v14875_v6, %v4422_v13  ;;  %v4427_v14 = vmul.f32 %v14453_v53, %v2843_v23  ;;  %v11484_v13 = vpop.eup %6265  ;;  %v11487_v4 = vadd.f32 1e-05, %v3884_v35  ;;  %vm2011_vm15 = vweird.f32 %v15012_v7 }
 0x31e   :  { %v4423_v18 = vmul.f32 %v14453_v53, %v2842_v61  ;;  %v4564_v21 = vadd.f32 %v14875_v6, %v4426_v38  ;;  %v3311_v15 = vmul.f32 %v11333_v49, %v3310_v60  ;;  %v11491_v20 = vadd.f32 1e-05, %v3885_v50  ;;  %v11524_v50 = vpop.xlane.xlu0 %2874 }
 0x31f   :  { %v4688_v44 = vmax.f32 %v4560_v24, 0.0  ;;  %v4565_v31 = vadd.f32 %v14750_v16, %v4427_v14  ;;  %v3053_v3 = vmul.f32 0.0078125, %v2967_v29  ;;  %vm3312_vm11 = vweird.f32 %v11252_v54  ;;  %v15013_v24 = vld [vmem:[#allocation108_spill] sm:$0xff]  ;;  %v2969_v62 = vpop.xlane.xlu1 %2968 }
 0x320   :  { %v4561_v11 = vadd.f32 %v14750_v16, %v4423_v18  ;;  %v4692_v58 = vmax.f32 %v4564_v21, 0.0  ;;  %v5069_v61 = vadd.f32 %v10815_v2, %v11117_v41  ;;  %v3085_v35 = vmul.f32 %v11476_v43, %v11476_v43  ;;  %v15016_v41 = vld [vmem:[#allocation60_spill] sm:$0xff]  ;;  %vm11519_vm10 = vmor %vm3312_vm11, %vm3313_vm13  ;;  %v2873_v18 = vpop.xlane.xlu2 %2872 }
 0x321   :  { %vm2010_vm7 = vweird.f32 %v15013_v24  ;;  %v4045_v33 = vmul.f32 0.5, %v4044_v17  ;;  %v3317_v54 = vmul.f32 %v11484_v13, %v11389_v45  ;;  %v4693_v2 = vmax.f32 %v4565_v31, 0.0  ;;  %v15020_v17 = vld [vmem:[#allocation40_spill] sm:$0xff] }
 0x322   :  { %v4772_v38 = vpack.c.bf16 %v4692_v58, %v4688_v44  ;;  %v4689_v51 = vmax.f32 %v4561_v11, 0.0  ;;  %vm2747_vm0 = vweird.f32 %v15016_v41  ;;  %v11512_v23 = vmul.f32 %v11315_v34, %v4036_v19  ;;  %v15022_v11 = vld [vmem:[#allocation107_spill] sm:$0xff] }
 0x323   :  { %v3305_v60 = vsel %vm11504_vm12, %v11269_v5, %v3301_v52  ;;  %6267 = vrsqrt.f32 %v11487_v4  ;;  %v3672_v29 = vmul.f32 %v11313_v26, %v11313_v26  ;;  %v3315_v19 = vsel %vm11519_vm10, %v11333_v49, %v3311_v15  ;;  %v15019_v52 = vld [vmem:[#allocation139_spill] sm:$0xff]  ;;  %vm11591_vm10 = vmor %vm2010_vm7, %vm2011_vm15 }
 0x324   :  { %5115 = vmatmul.bf16.gmra.mxu0 %v4772_v38  ;;  %6269 = vrsqrt.f32 %v11491_v20  ;;  %v4773_v5 = vpack.c.bf16 %v4693_v2, %v4689_v51  ;;  %v3117_v21 = vsub.f32 %v3053_v3, %v3085_v35  ;;  %vm2746_vm9 = vweird.f32 %v15019_v52  ;;  %v15023_v58 = vld [vmem:[#allocation27_spill] sm:$0xff]  ;;  %v15025_v38 = vld [vmem:[#allocation50_spill] sm:$0xff]  ;;  %v5073_v35 = vpop.f32.mrf.mxu0  ;;  %v15031_v2 = vld [vmem:[#allocation185_spill] sm:$0xff] }
 0x325   :  { %v11535_v14 = vadd.f32 %v15020_v17, %v11361_v1  ;;  %v3178_v44 = vsub.f32 %v15022_v11, %v11104_v32  ;;  %v11541_v31 = vadd.f32 %v15023_v58, %v11404_v36  ;;  %v3179_v49 = vsub.f32 %v15025_v38, %v11159_v9  ;;  %3724 = vadd.xlane.f32.xlu1 %v3672_v29  ;;  %v15026_v32 = vld [vmem:[#allocation126_spill] sm:$0xff]  ;;  %v15029_v9 = vld [vmem:[#allocation124_spill] sm:$0xff]  ;;  %v15034_v17 = vld [vmem:[#allocation149_spill] sm:$0xff] }
 0x326   :  { %vm4038_vm13 = vweird.f32 %v11231_v40  ;;  %v4046_v15 = vsub.f32 1.5, %v4045_v33  ;;  %v3318_v3 = vmul.f32 %v11484_v13, %v3317_v54  ;;  %5204 = vmatmul.bf16.gmra.mxu1 %v4773_v5  ;;  %v3673_v1 = vmul.f32 %v11385_v22, %v11385_v22  ;;  %2898 = vadd.xlane.f32.xlu0 %v15031_v2  ;;  %v15032_v29 = vld [vmem:[#allocation80_spill] sm:$0xff]  ;;  %v15038_v36 = vld [vmem:[#allocation58_spill] sm:$0xff]  ;;  %v15042_v22 = vld [vmem:[#allocation91_spill] sm:$0xff] }
 0x327   :  { %15021 = vst [vmem:[#allocation46_spill] sm:$0xff] %v11535_v14  ;;  %v3914_v51 = vsub.f32 %v15026_v32, %v11107_v39  ;;  %vm11553_vm11 = vmor %vm4038_vm13, %vm4039_vm8  ;;  %v11558_v40 = vadd.f32 %v15029_v9, %v5069_v61  ;;  %v3562_v33 = vmul.f32 %v3305_v60, %v3178_v44  ;;  %v3563_v54 = vmul.f32 %v3315_v19, %v3179_v49  ;;  %v15033_v39 = vld [vmem:[#allocation88_spill] sm:$0xff]  ;;  %v11572_v61 = vld [vmem:[#allocation8] ss:$0 sm:$0xff]  ;;  %v1268_v19 = vpop.f32.mrf.mxu2 }
 0x328   :  { %15024 = vst [vmem:[#allocation86_spill] sm:$0xff] %v11541_v31  ;;  %v4041_v37 = vsel %vm11553_vm11, %v11315_v34, %v11512_v23  ;;  %v3915_v5 = vsub.f32 %v15033_v39, %v15032_v29  ;;  %v3149_v58 = vmax.f32 %v3117_v21, 0.0  ;;  %3726 = vadd.xlane.f32.xlu2 %v3673_v1  ;;  %vm4048_vm8 = vweird.f32 %v11331_v57  ;;  %v15035_v21 = vld [vmem:[#allocation159_spill] sm:$0xff]  ;;  %v1357_v39 = vpop.f32.mrf.mxu3  ;;  %v15039_v11 = vld [vmem:[#allocation44_spill] sm:$0xff]  ;;  %v3707_v1 = vpop.xlane.xlu0 %3706  ;;  %vm11627_vm7 = vmor %vm2746_vm9, %vm2747_vm0 }
 0x329   :  { %15030 = vst [vmem:[#allocation79_spill] sm:$0xff] %v11558_v40  ;;  %v11569_v38 = vpop.eup %6267  ;;  %v11575_v60 = vadd.f32 %v11572_v61, %v5073_v35  ;;  %v4360_v34 = vmul.f32 %v10562_v27, %v3562_v33  ;;  %v4364_v23 = vmul.f32 %v10562_v27, %v3563_v54  ;;  %v4047_v49 = vmul.f32 %v11392_v8, %v4046_v15  ;;  %v15043_v26 = vld [vmem:[#allocation131_spill] sm:$0xff]  ;;  %v15051_v57 = vld [vmem:[#allocation133_spill] sm:$0xff] }
 0x32a   :  { %v11579_v44 = vpop.eup %6269  ;;  %vm4049_vm12 = vweird.f32 %v11392_v8  ;;  %v11585_v32 = vmul.f32 0.5, %v3318_v3  ;;  %v11598_v15 = vmul.f32 0.0078125, %v11449_v12  ;;  %v4053_v3 = vmul.f32 %v11569_v38, %v11487_v4  ;;  %v15049_v12 = vld [vmem:[#allocation57_spill] sm:$0xff] }
 0x32b   :  { %v4498_v33 = vadd.f32 %v10813_v0, %v4360_v34  ;;  %v4502_v54 = vadd.f32 %v10813_v0, %v4364_v23  ;;  %v11604_v29 = vadd.f32 1e-05, %v3149_v58  ;;  %v11606_v24 = vmul.f32 0.0078125, %v2873_v18  ;;  %vm11614_vm15 = vmor %vm4048_vm8, %vm4049_vm12  ;;  %v3705_v18 = vpop.xlane.xlu2 %3704 }
 0x32c   :  { %v2013_v9 = vsel %vm11591_vm10, %v15012_v7, %v15039_v11  ;;  %v4063_v34 = vmul.f32 %v11579_v44, %v11491_v20  ;;  %v15044_v47 = vsub.f32 %v15042_v22, %v15043_v26  ;;  %v4051_v7 = vsel %vm11614_vm15, %v11392_v8, %v4047_v49  ;;  %v15047_v26 = vld [vmem:[#allocation177_spill] sm:$0xff] }
 0x32d   :  { %v4626_v23 = vmax.f32 %v4498_v33, 0.0  ;;  %v4630_v58 = vmax.f32 %v4502_v54, 0.0  ;;  %v3320_v11 = vsub.f32 1.5, %v11585_v32  ;;  %v11637_v35 = vmul.f32 %v11598_v15, %v11598_v15  ;;  %v15048_v33 = vld [vmem:[#allocation176_spill] sm:$0xff] }
 0x32e   :  { %v2108_v10 = vmul.f32 %v2013_v9, %v15044_v47  ;;  %v4572_v47 = vadd.f32 %v14875_v6, %v15047_v26  ;;  %v11642_v22 = vmul.f32 0.0078125, %v11524_v50  ;;  %v2749_v8 = vsel %vm11627_vm7, %v15016_v41, %v15048_v33  ;;  %v3611_v50 = vpop.xlane.xlu1 %3610  ;;  %v15050_v26 = vld [vmem:[#allocation22_spill] sm:$0xff] }
 0x32f   :  { %v4742_v52 = vpack.c.bf16 %v4630_v58, %v4626_v23  ;;  %v4054_v49 = vmul.f32 %v11569_v38, %v4053_v3  ;;  %6271 = vrsqrt.f32 %v11604_v29  ;;  %v3086_v32 = vmul.f32 %v11606_v24, %v11606_v24  ;;  %v15053_v3 = vld [vmem:[#allocation39_spill] sm:$0xff]  ;;  %v11666_v0 = vpop.f32.mrf.mxu2 }
 0x330   :  { %v4430_v9 = vmul.f32 %v14866_v56, %v2108_v10  ;;  %v3054_v54 = vmul.f32 0.0078125, %v2969_v62  ;;  %2896 = vadd.xlane.f32.xlu2 %v15049_v12  ;;  %v4064_v23 = vmul.f32 %v11579_v44, %v4063_v34  ;;  %v4700_v58 = vmax.f32 %v4572_v47, 0.0 }
 0x331   :  { %5253 = vmatmul.bf16.gmra.mxu2 %v4742_v52  ;;  %v15052_v41 = vsub.f32 %v15050_v26, %v15051_v57  ;;  %v4573_v14 = vadd.f32 %v14750_v16, %v15053_v3  ;;  %v2937_v40 = vmul.f32 %v14990_v59, %v14990_v59  ;;  %v4298_v62 = vmul.f32 %v4041_v37, %v3914_v51 }
 0x332   :  { %v4568_v10 = vadd.f32 %v14875_v6, %v4430_v9  ;;  %v4299_v31 = vmul.f32 %v4051_v7, %v3915_v5  ;;  %v1269_v34 = vadd.f32 %v1268_v19, %v9047_v42  ;;  %v3790_v52 = vmul.f32 0.0078125, %v3705_v18  ;;  %v11674_v19 = vpop.f32.mrf.mxu3 }
 0x333   :  { %v2844_v33 = vmul.f32 %v2749_v8, %v15052_v41  ;;  %v3118_v26 = vsub.f32 %v3054_v54, %v3086_v32  ;;  %2990 = vadd.xlane.f32.xlu1 %v2937_v40  ;;  %v4361_v8 = vmul.f32 %v10519_v25, %v4298_v62  ;;  %v11671_v41 = vmul.f32 0.0078125, %v3611_v50  ;;  %v11684_v50 = vpop.xlane.xlu0 %2876 }
 0x334   :  { %v4696_v47 = vmax.f32 %v4568_v10, 0.0  ;;  %v4365_v57 = vmul.f32 %v10519_v25, %v4299_v31  ;;  %v4055_v51 = vmul.f32 0.5, %v4054_v49  ;;  %v4701_v7 = vmax.f32 %v4573_v14, 0.0  ;;  %v5076_v10 = vpop.f32.mrf.mxu0 }
 0x335   :  { %v4431_v9 = vmul.f32 %v14453_v53, %v2844_v33  ;;  %15054 = vst [vmem:[#allocation144_spill] sm:$0xff] %v11671_v41  ;;  %v11676_v18 = vpop.eup %6271  ;;  %v4065_v3 = vmul.f32 0.5, %v4064_v23  ;;  %v4499_v32 = vadd.f32 %v10942_v63, %v4361_v8  ;;  %v3823_v31 = vmul.f32 %v11671_v41, %v11671_v41 }
 0x336   :  { %v4776_v37 = vpack.c.bf16 %v4700_v58, %v4696_v47  ;;  %v4503_v40 = vadd.f32 %v10942_v63, %v4365_v57  ;;  %vm3323_vm0 = vweird.f32 %v11484_v13  ;;  %v3791_v49 = vmul.f32 0.0078125, %v3707_v1  ;;  %v2971_v58 = vpop.xlane.xlu2 %2970 }
 0x337   :  { %v4569_v5 = vadd.f32 %v14750_v16, %v4431_v9  ;;  %v3854_v54 = vsub.f32 %v3790_v52, %v11637_v35  ;;  %v11686_v33 = vadd.f32 %v1357_v39, %v1269_v34  ;;  %v3150_v23 = vmax.f32 %v3118_v26, 0.0 }
 0x338   :  { %5120 = vmatmul.bf16.gmra.mxu0 %v4776_v37  ;;  %v4627_v62 = vmax.f32 %v4499_v32, 0.0  ;;  %v4631_v47 = vmax.f32 %v4503_v40, 0.0  ;;  %v3321_v9 = vmul.f32 %v11484_v13, %v3320_v11  ;;  %v3087_v8 = vmul.f32 %v11642_v22, %v11642_v22  ;;  %v11691_v37 = vpop.xlane.xlu1 %3612  ;;  %v5165_v32 = vpop.f32.mrf.mxu1 }
 0x339   :  { %v4697_v14 = vmax.f32 %v4569_v5, 0.0  ;;  %15055 = vst [vmem:[#allocation65_spill] sm:$0xff] %v11686_v33  ;;  %v3855_v59 = vsub.f32 %v3791_v49, %v3823_v31  ;;  %v4056_v1 = vsub.f32 1.5, %v4055_v51  ;;  %v4066_v41 = vsub.f32 1.5, %v4065_v3 }
 0x33a   :  { %v4743_v35 = vpack.c.bf16 %v4631_v47, %v4627_v62  ;;  %v3055_v52 = vmul.f32 0.0078125, %v2971_v58  ;;  %v3327_v39 = vmul.f32 %v11676_v18, %v11604_v29  ;;  %v3886_v34 = vmax.f32 %v3854_v54, 0.0  ;;  %v11730_v62 = vpop.f32.mrf.mxu3 }
 0x33b   :  { %v4777_v57 = vpack.c.bf16 %v4701_v7, %v4697_v14  ;;  %v3887_v26 = vmax.f32 %v3855_v59, 0.0  ;;  %v2938_v11 = vmul.f32 %v15049_v12, %v15049_v12  ;;  %vm3322_vm9 = vweird.f32 %v11389_v45  ;;  %v11712_v45 = vpop.f32.mrf.mxu2 }
 0x33c   :  { %v11698_v5 = vadd.f32 1e-05, %v3150_v23  ;;  %5342 = vmatmul.bf16.gmra.mxu3 %v4743_v35  ;;  %v3119_v51 = vsub.f32 %v3055_v52, %v3087_v8  ;;  %v3675_v7 = vmul.f32 %v11686_v33, %v11686_v33  ;;  %vm11704_vm13 = vmor %vm3322_vm9, %vm3323_vm0  ;;  %vm4059_vm11 = vweird.f32 %v11569_v38  ;;  %v15063_v8 = vld [vmem:[#allocation100_spill] sm:$0xff] }
 0x33d   :  { %5209 = vmatmul.bf16.gmra.mxu1 %v4777_v57  ;;  %v5077_v59 = vadd.f32 %v11572_v61, %v5076_v10  ;;  %v11710_v40 = vadd.f32 1e-05, %v3887_v26  ;;  %2992 = vadd.xlane.f32.xlu1 %v2938_v11  ;;  %v3674_v31 = vmul.f32 %v11464_v30, %v11464_v30  ;;  %v3325_v49 = vsel %vm11704_vm13, %v11484_v13, %v3321_v9  ;;  %v15059_v13 = vld [vmem:[#allocation38_spill] sm:$0xff] }
 0x33e   :  { %v4057_v54 = vmul.f32 %v11569_v38, %v4056_v1  ;;  %v4067_v14 = vmul.f32 %v11579_v44, %v4066_v41  ;;  %vm4069_vm8 = vweird.f32 %v11579_v44  ;;  %3730 = vadd.xlane.f32.xlu0 %v3675_v7  ;;  %v11724_v10 = vadd.f32 %v11663_v46, %v11575_v60  ;;  %v5078_v46 = vpop.f32.mrf.mxu0  ;;  %v2973_v52 = vpop.xlane.xlu2 %2972  ;;  %v15069_v7 = vld [vmem:[#allocation119_spill] sm:$0xff] }
 0x33f   :  { %vm4058_vm12 = vweird.f32 %v11487_v4  ;;  %v3328_v58 = vmul.f32 %v11676_v18, %v3327_v39  ;;  %v11728_v23 = vadd.f32 1e-05, %v3886_v34  ;;  %3728 = vadd.xlane.f32.xlu2 %v3674_v31  ;;  %vm4068_vm15 = vweird.f32 %v11491_v20  ;;  %v3709_v20 = vpop.xlane.xlu0 %3708  ;;  %v15067_v39 = vld [vmem:[#allocation162_spill] sm:$0xff] }
 0x340   :  { %15058 = vst [vmem:[#allocation161_spill] sm:$0xff] %v11724_v10  ;;  %vm11736_vm10 = vmor %vm4058_vm12, %vm4059_vm11  ;;  %6273 = vrsqrt.f32 %v11698_v5  ;;  %v3151_v4 = vmax.f32 %v3119_v51, 0.0  ;;  %v15062_v60 = vsub.f32 %v15035_v21, %v11263_v48  ;;  %v11747_v1 = vadd.f32 %v5165_v32, %v5077_v59  ;;  %v15068_v51 = vld [vmem:[#allocation114_spill] sm:$0xff]  ;;  %v15073_v32 = vld [vmem:[#allocation181_spill] sm:$0xff] }
 0x341   :  { %vm11751_vm7 = vmor %vm4068_vm15, %vm4069_vm8  ;;  %6275 = vrsqrt.f32 %v11710_v40  ;;  %v4061_v48 = vsel %vm11736_vm10, %v11569_v38, %v4057_v54  ;;  %v1272_v26 = vadd.f32 %v11666_v0, %v9047_v42  ;;  %v11766_v11 = vmul.f32 0.5, %v3328_v58  ;;  %v15072_v38 = vld [vmem:[#allocation173_spill] sm:$0xff]  ;;  %v15080_v0 = vld [vmem:[#allocation179_spill] sm:$0xff] }
 0x342   :  { %v3564_v9 = vmul.f32 %v3325_v49, %v15062_v60  ;;  %15064 = vst [vmem:[#allocation160_spill] sm:$0xff] %v11747_v1  ;;  %v4071_v21 = vsel %vm11751_vm7, %v11579_v44, %v4067_v14  ;;  %6277 = vrsqrt.f32 %v11728_v23  ;;  %v15070_v3 = vsub.f32 %v15068_v51, %v15069_v7  ;;  %v15075_v44 = vld [vmem:[#allocation134_spill] sm:$0xff]  ;;  %v15076_v54 = vld [vmem:[#allocation113_spill] sm:$0xff]  ;;  %v15083_v7 = vld [vmem:[#allocation140_spill] sm:$0xff] }
 0x343   :  { %v15074_v31 = vsel %vm10356_vm2, %v15072_v38, %v15073_v32  ;;  %v15077_v14 = vsub.f32 %v15075_v44, %v15076_v54  ;;  %v15079_v60 = vld [vmem:[#allocation105_spill] sm:$0xff]  ;;  %v11786_v57 = vmul.f32 0.0078125, %v11684_v50  ;;  %v11788_v34 = vadd.f32 1e-05, %v3151_v4  ;;  %v15084_v59 = vld [vmem:[#allocation59_spill] sm:$0xff]  ;;  %v15088_v32 = vld [vmem:[#allocation182_spill] sm:$0xff]  ;;  %v2879_v54 = vpop.xlane.xlu1 %2878  ;;  %v11819_v38 = vpop.f32.mrf.mxu2 }
 0x344   :  { %v2111_v49 = vmul.f32 %v15074_v31, %v15070_v3  ;;  %v15081_v58 = vsel %vm10332_vm1, %v15079_v60, %v15080_v0  ;;  %v3056_v51 = vmul.f32 0.0078125, %v2973_v52  ;;  %v15085_v47 = vsub.f32 %v15083_v7, %v15084_v59  ;;  %v15087_v3 = vld [vmem:[#allocation175_spill] sm:$0xff]  ;;  %v15090_v60 = vld [vmem:[#allocation16_spill] sm:$0xff]  ;;  %v15092_v7 = vld [vmem:[#allocation178_spill] sm:$0xff]  ;;  %v5167_v59 = vpop.f32.mrf.mxu1 }
 0x345   :  { %v2846_v35 = vmul.f32 %v15081_v58, %v15077_v14  ;;  %15082 = vst [vmem:[#allocation194_spill] sm:$0xff] %v11786_v57  ;;  %v15089_v31 = vsel %vm10381_vm3, %v15087_v3, %v15088_v32  ;;  %v4576_v14 = vadd.f32 %v14875_v6, %v15090_v60  ;;  %3634 = vadd.xlane.f32.xlu1 %v11686_v33  ;;  %v3330_v60 = vsub.f32 1.5, %v11766_v11 }
 0x346   :  { %v2847_v44 = vmul.f32 %v15089_v31, %v15085_v47  ;;  %v4442_v41 = vmul.f32 %v14866_v56, %v2111_v49  ;;  %v2939_v4 = vmul.f32 %v15031_v2, %v15031_v2  ;;  %v11805_v52 = vpop.eup %6273  ;;  %v11808_v0 = vmul.f32 %v10562_v27, %v3564_v9  ;;  %2900 = vadd.xlane.f32.xlu0 %v15092_v7  ;;  %v3615_v30 = vpop.xlane.xlu2 %3614 }
 0x347   :  { %v4439_v50 = vmul.f32 %v14453_v53, %v2846_v35  ;;  %v3088_v47 = vmul.f32 %v11786_v57, %v11786_v57  ;;  %v11813_v49 = vmul.f32 0.0078125, %v11691_v37  ;;  %v11817_v35 = vpop.eup %6275  ;;  %v15093_v32 = vsub.f32 %v15034_v17, %v11382_v55  ;;  %v15128_v57 = vld [vmem:[#allocation146_spill] sm:$0xff] }
 0x348   :  { %v4443_v58 = vmul.f32 %v14453_v53, %v2847_v44  ;;  %v4580_v3 = vadd.f32 %v14875_v6, %v4442_v41  ;;  %2994 = vadd.xlane.f32.xlu2 %v2939_v4  ;;  %v15094_v37 = vsub.f32 %v15038_v36, %v11378_v28  ;;  %v5079_v33 = vadd.f32 %v11572_v61, %v5078_v46  ;;  %v11833_v41 = vpop.eup %6277  ;;  %v11840_v28 = vpop.f32.mrf.mxu3 }
 0x349   :  { %15091 = vst [vmem:[#allocation116_spill] sm:$0xff] %v11813_v49  ;;  %v4577_v9 = vadd.f32 %v14750_v16, %v4439_v50  ;;  %v4300_v31 = vmul.f32 %v4061_v48, %v15093_v32  ;;  %6279 = vrsqrt.f32 %v11788_v34  ;;  %v3337_v50 = vmul.f32 %v11805_v52, %v11698_v5  ;;  %v5081_v36 = vpop.f32.mrf.mxu0 }
 0x34a   :  { %v4301_v44 = vmul.f32 %v4071_v21, %v15094_v37  ;;  %v4581_v12 = vadd.f32 %v14750_v16, %v4443_v58  ;;  %v11838_v55 = vadd.f32 %v11674_v19, %v1272_v26  ;;  %v3120_v17 = vsub.f32 %v3056_v51, %v3088_v47  ;;  %v2975_v26 = vpop.xlane.xlu0 %2974 }
 0x34b   :  { %v4704_v48 = vmax.f32 %v4576_v14, 0.0  ;;  %v4083_v46 = vmul.f32 %v11817_v35, %v11710_v40  ;;  %v4708_v21 = vmax.f32 %v4580_v3, 0.0  ;;  %v4705_v11 = vmax.f32 %v4577_v9, 0.0 }
 0x34c   :  { %15095 = vst [vmem:[#allocation110_spill] sm:$0xff] %v11838_v55  ;;  %v4709_v4 = vmax.f32 %v4581_v12, 0.0  ;;  %v3824_v58 = vmul.f32 %v11813_v49, %v11813_v49  ;;  %v3792_v32 = vmul.f32 0.0078125, %v3709_v20  ;;  %v4369_v37 = vmul.f32 %v10519_v25, %v4300_v31 }
 0x34d   :  { %v4373_v19 = vmul.f32 %v10519_v25, %v4301_v44  ;;  %v4073_v51 = vmul.f32 %v11833_v41, %v11728_v23  ;;  %v4780_v14 = vpack.c.bf16 %v4708_v21, %v4704_v48  ;;  %v11850_v2 = vmul.f32 0.0078125, %v2879_v54  ;;  %3636 = vadd.xlane.f32.xlu1 %v11838_v55 }
 0x34e   :  { %v4781_v47 = vpack.c.bf16 %v4709_v4, %v4705_v11  ;;  %v3338_v3 = vmul.f32 %v11805_v52, %v3337_v50  ;;  %v5082_v12 = vadd.f32 %v11572_v61, %v5081_v36  ;;  %v4507_v9 = vadd.f32 %v10942_v63, %v4369_v37  ;;  %v3711_v50 = vpop.xlane.xlu1 %3710 }
 0x34f   :  { %15096 = vst [vmem:[#allocation84_spill] sm:$0xff] %v11850_v2  ;;  %v4511_v20 = vadd.f32 %v10942_v63, %v4373_v19  ;;  %v11857_v31 = vpop.eup %6279  ;;  %vm3333_vm1 = vweird.f32 %v11676_v18  ;;  %v4084_v44 = vmul.f32 %v11817_v35, %v4083_v46  ;;  %v3152_v48 = vmax.f32 %v3120_v17, 0.0  ;;  %5125 = vmatmul.bf16.gmra.mxu0 %v4780_v14  ;;  %v15098_v17 = vld [vmem:[#allocation101_spill] sm:$0xff] }
 0x350   :  { %5214 = vmatmul.bf16.gmra.mxu1 %v4781_v47  ;;  %v3089_v54 = vmul.f32 %v11850_v2, %v11850_v2  ;;  %v3331_v36 = vmul.f32 %v11676_v18, %v3330_v60  ;;  %v3856_v21 = vsub.f32 %v3792_v32, %v3824_v58  ;;  %v4635_v11 = vmax.f32 %v4507_v9, 0.0  ;;  %v5170_v47 = vpop.f32.mrf.mxu1  ;;  %v11872_v60 = vpop.f32.mrf.mxu2 }
 0x351   :  { %v3057_v4 = vmul.f32 0.0078125, %v2975_v26  ;;  %vm3332_vm2 = vweird.f32 %v11604_v29  ;;  %v11865_v37 = vadd.f32 %v5167_v59, %v5079_v33  ;;  %v4074_v19 = vmul.f32 %v11833_v41, %v4073_v51 }
 0x352   :  { %v4639_v1 = vmax.f32 %v4511_v20, 0.0  ;;  %v3339_v14 = vmul.f32 0.5, %v3338_v3  ;;  %v3347_v10 = vmul.f32 %v11857_v31, %v11788_v34  ;;  %vm11876_vm3 = vmor %vm3332_vm2, %vm3333_vm1  ;;  %v11880_v33 = vadd.f32 %v5170_v47, %v5082_v12  ;;  %v11889_v20 = vpop.f32.mrf.mxu3  ;;  %v15104_v12 = vld [vmem:[#allocation26_spill] sm:$0xff] }
 0x353   :  { %15097 = vst [vmem:[#allocation150_spill] sm:$0xff] %v11865_v37  ;;  %v3121_v2 = vsub.f32 %v3057_v4, %v3089_v54  ;;  %v4085_v59 = vmul.f32 0.5, %v4084_v44  ;;  %v11882_v58 = vadd.f32 1e-05, %v3152_v48  ;;  %v3335_v26 = vsel %vm11876_vm3, %v11676_v18, %v3331_v36  ;;  %v15103_v4 = vld [vmem:[#allocation144_spill] sm:$0xff]  ;;  %v11901_v18 = vpop.xlane.xlu0 %2976  ;;  %v15105_v36 = vld [vmem:[#allocation158_spill] sm:$0xff] }
 0x354   :  { %15101 = vst [vmem:[#allocation165_spill] sm:$0xff] %v11880_v33  ;;  %v4747_v32 = vpack.c.bf16 %v4639_v1, %v4635_v11  ;;  %v3888_v51 = vmax.f32 %v3856_v21, 0.0  ;;  %v11887_v9 = vmul.f32 0.0078125, %v3615_v30  ;;  %vm3343_vm0 = vweird.f32 %v11805_v52 }
 0x355   :  { %v3153_v3 = vmax.f32 %v3121_v2, 0.0  ;;  %v4075_v54 = vmul.f32 0.5, %v4074_v19  ;;  %v1274_v44 = vadd.f32 %v11712_v45, %v9047_v42  ;;  %v3340_v1 = vsub.f32 1.5, %v3339_v14  ;;  %2902 = vadd.xlane.f32.xlu1 %v15105_v36  ;;  %v11911_v19 = vpop.xlane.xlu2 %3616 }
 0x356   :  { %15102 = vst [vmem:[#allocation164_spill] sm:$0xff] %v11887_v9  ;;  %5347 = vmatmul.bf16.gmra.mxu3 %v4747_v32  ;;  %v3348_v48 = vmul.f32 %v11857_v31, %v3347_v10  ;;  %v3676_v2 = vmul.f32 %v11838_v55, %v11838_v55  ;;  %v2940_v30 = vmul.f32 %v15092_v7, %v15092_v7  ;;  %vm3342_vm9 = vweird.f32 %v11698_v5  ;;  %v15107_v32 = vld [vmem:[#allocation29_spill] sm:$0xff]  ;;  %v15114_v55 = vld [vmem:[#allocation184_spill] sm:$0xff] }
 0x357   :  { %v4086_v21 = vsub.f32 1.5, %v4085_v59  ;;  %6281 = vrsqrt.f32 %v11882_v58  ;;  %v11906_v45 = vadd.f32 1e-05, %v3153_v3  ;;  %v15106_v10 = vsub.f32 %v15059_v13, %v11476_v43  ;;  %v15129_v3 = vld [vmem:[#allocation192_spill] sm:$0xff] }
 0x358   :  { %v11913_v14 = vadd.f32 1e-05, %v3888_v51  ;;  %v3825_v29 = vmul.f32 %v11887_v9, %v11887_v9  ;;  %3732 = vadd.xlane.f32.xlu0 %v3676_v2  ;;  %2996 = vadd.xlane.f32.xlu2 %v2940_v30  ;;  %v4506_v59 = vadd.f32 %v15107_v32, %v11808_v0  ;;  %v3793_v46 = vmul.f32 0.0078125, %v3711_v50  ;;  %v15137_v9 = vld [vmem:[#allocation142_spill] sm:$0xff] }
 0x359   :  { %v3565_v11 = vmul.f32 %v3335_v26, %v15106_v10  ;;  %v4076_v47 = vsub.f32 1.5, %v4075_v54  ;;  %v11922_v43 = vadd.f32 %v11730_v62, %v1274_v44  ;;  %v2881_v26 = vpop.xlane.xlu1 %2880  ;;  %v11926_v51 = vmul.f32 %v11805_v52, %v3340_v1  ;;  %v15109_v54 = vld [vmem:[#allocation120_spill] sm:$0xff]  ;;  %v15110_v10 = vld [vmem:[#allocation21_spill] sm:$0xff] }
 0x35a   :  { %vm4089_vm13 = vweird.f32 %v11817_v35  ;;  %v3349_v2 = vmul.f32 0.5, %v3348_v48  ;;  %v3857_v30 = vsub.f32 %v3793_v46, %v3825_v29  ;;  %v4087_v0 = vmul.f32 %v11817_v35, %v4086_v21  ;;  %v11942_v21 = vpop.f32.mrf.mxu2 }
 0x35b   :  { %v4372_v13 = vmul.f32 %v10562_v27, %v3565_v11  ;;  %6283 = vrsqrt.f32 %v11906_v45  ;;  %v15111_v62 = vsub.f32 %v15109_v54, %v15110_v10  ;;  %v15113_v11 = vld [vmem:[#allocation19_spill] sm:$0xff]  ;;  %vm4088_vm11 = vweird.f32 %v11710_v40  ;;  %15116 = vst [vmem:[#allocation168_spill] sm:$0xff] %v11942_v21  ;;  %v15117_v54 = vld [vmem:[#allocation18_spill] sm:$0xff] }
 0x35c   :  { %v15115_v7 = vsel %vm10405_vm4, %v15113_v11, %v15114_v55  ;;  %6285 = vrsqrt.f32 %v11913_v14  ;;  %v4634_v46 = vmax.f32 %v4506_v59, 0.0  ;;  %v3889_v48 = vmax.f32 %v3857_v30, 0.0  ;;  %v15118_v10 = vld [vmem:[#allocation62_spill] sm:$0xff]  ;;  %v15121_v55 = vld [vmem:[#allocation85_spill] sm:$0xff]  ;;  %vm11969_vm4 = vmor %vm4088_vm11, %vm4089_vm13 }
 0x35d   :  { %v4510_v50 = vadd.f32 %v15107_v32, %v4372_v13  ;;  %v2112_v1 = vmul.f32 %v15115_v7, %v15111_v62  ;;  %v11944_v29 = vpop.eup %6281  ;;  %vm4078_vm8 = vweird.f32 %v11728_v23  ;;  %v15119_v44 = vsub.f32 %v15117_v54, %v15118_v10  ;;  %v15122_v7 = vld [vmem:[#allocation67_spill] sm:$0xff]  ;;  %v15124_v59 = vld [vmem:[#allocation90_spill] sm:$0xff]  ;;  %v15125_v30 = vld [vmem:[#allocation93_spill] sm:$0xff] }
 0x35e   :  { %v15123_v62 = vsel %vm10756_vm6, %v15121_v55, %v15122_v7  ;;  %v15126_v37 = vsub.f32 %v15124_v59, %v15125_v30  ;;  %v15130_v49 = vsel %vm10546_vm5, %v15128_v57, %v15129_v3  ;;  %v11965_v21 = vmul.f32 %v11833_v41, %v4076_v47  ;;  %v15134_v10 = vld [vmem:[#allocation77_spill] sm:$0xff]  ;;  %v15138_v7 = vld [vmem:[#allocation156_spill] sm:$0xff]  ;;  %vm11995_vm5 = vmor %vm3342_vm9, %vm3343_vm0 }
 0x35f   :  { %v4638_v13 = vmax.f32 %v4510_v50, 0.0  ;;  %v2113_v40 = vmul.f32 %v15123_v62, %v15119_v44  ;;  %v4446_v11 = vmul.f32 %v14866_v56, %v2112_v1  ;;  %v3350_v54 = vsub.f32 1.5, %v3349_v2  ;;  %v15133_v1 = vld [vmem:[#allocation115_spill] sm:$0xff] }
 0x360   :  { %v2848_v50 = vmul.f32 %v15130_v49, %v15126_v37  ;;  %v15135_v44 = vsub.f32 %v15133_v1, %v15134_v10  ;;  %v15139_v62 = vsel %vm10800_vm14, %v15137_v9, %v15138_v7  ;;  %v2941_v49 = vmul.f32 %v15105_v36, %v15105_v36  ;;  %v11983_v37 = vpop.f32.mrf.mxu3  ;;  %3638 = vadd.xlane.f32.xlu2 %v11922_v43  ;;  %v12015_v1 = vpop.xlane.xlu2 %2882 }
 0x361   :  { %v4091_v47 = vsel %vm11969_vm4, %v11817_v35, %v4087_v0  ;;  %v1277_v3 = vadd.f32 %v11819_v38, %v9047_v42  ;;  %v4746_v2 = vpack.c.bf16 %v4638_v13, %v4634_v46  ;;  %v4450_v59 = vmul.f32 %v14866_v56, %v2113_v40  ;;  %v3619_v0 = vpop.xlane.xlu0 %3618  ;;  %v12005_v46 = vpop.eup %6283 }
 0x362   :  { %v2849_v57 = vmul.f32 %v15139_v62, %v15135_v44  ;;  %vm4079_vm6 = vweird.f32 %v11833_v41  ;;  %v3357_v33 = vmul.f32 %v11944_v29, %v11882_v58  ;;  %v4584_v35 = vadd.f32 %v14875_v6, %v4446_v11  ;;  %2998 = vadd.xlane.f32.xlu0 %v2941_v49  ;;  %v12054_v30 = vpop.f32.mrf.mxu2 }
 0x363   :  { %v4447_v38 = vmul.f32 %v14453_v53, %v2848_v50  ;;  %v3345_v5 = vsel %vm11995_vm5, %v11805_v52, %v11926_v51  ;;  %5258 = vmatmul.bf16.gmra.mxu2 %v4746_v2  ;;  %v12011_v13 = vadd.f32 1e-05, %v3889_v48  ;;  %v4588_v40 = vadd.f32 %v14875_v6, %v4450_v59  ;;  %v12017_v50 = vpop.eup %6285  ;;  %v5083_v51 = vpop.f32.mrf.mxu0  ;;  %vm12044_vm15 = vmor %vm4078_vm8, %vm4079_vm6 }
 0x364   :  { %v4451_v11 = vmul.f32 %v14453_v53, %v2849_v57  ;;  %v15142_v10 = vsub.f32 %v15104_v12, %v15103_v4  ;;  %v3351_v55 = vmul.f32 %v11857_v31, %v3350_v54  ;;  %vm3353_vm14 = vweird.f32 %v11857_v31  ;;  %v3713_v57 = vpop.xlane.xlu1 %3712 }
 0x365   :  { %v4585_v52 = vadd.f32 %v14750_v16, %v4447_v38  ;;  %v4712_v48 = vmax.f32 %v4584_v35, 0.0  ;;  %v4716_v9 = vmax.f32 %v4588_v40, 0.0  ;;  %v12026_v62 = vmul.f32 0.0078125, %v2881_v26 }
 0x366   :  { %v4303_v44 = vmul.f32 %v4091_v47, %v15142_v10  ;;  %v4589_v7 = vadd.f32 %v14750_v16, %v4451_v11  ;;  %vm3352_vm12 = vweird.f32 %v11788_v34  ;;  %v3358_v49 = vmul.f32 %v11944_v29, %v3357_v33  ;;  %v15181_v16 = vld [vmem:[#allocation54_spill] sm:$0xff] }
 0x367   :  { %v12031_v4 = vadd.f32 %v11840_v28, %v1277_v3  ;;  %v3367_v12 = vmul.f32 %v12005_v46, %v11906_v45  ;;  %vm12035_vm10 = vmor %vm3352_vm12, %vm3353_vm14  ;;  %6287 = vrsqrt.f32 %v12011_v13  ;;  %v4784_v47 = vpack.c.bf16 %v4716_v9, %v4712_v48 }
 0x368   :  { %v4713_v26 = vmax.f32 %v4585_v52, 0.0  ;;  %v4717_v2 = vmax.f32 %v4589_v7, 0.0  ;;  %v4381_v28 = vmul.f32 %v10519_v25, %v4303_v44  ;;  %v3355_v3 = vsel %vm12035_vm10, %v11857_v31, %v3351_v55  ;;  %v15148_v44 = vld [vmem:[#allocation180_spill] sm:$0xff] }
 0x369   :  { %15143 = vst [vmem:[#allocation92_spill] sm:$0xff] %v12031_v4  ;;  %v4093_v59 = vmul.f32 %v12017_v50, %v11913_v14  ;;  %v3677_v33 = vmul.f32 %v11922_v43, %v11922_v43  ;;  %v4081_v23 = vsel %vm12044_vm15, %v11833_v41, %v11965_v21  ;;  %v12063_v35 = vadd.f32 %v11572_v61, %v5083_v51  ;;  %v12076_v41 = vpop.f32.mrf.mxu3  ;;  %v12078_v21 = vpop.xlane.xlu0 %3620 }
 0x36a   :  { %5130 = vmatmul.bf16.gmra.mxu0 %v4784_v47  ;;  %v4785_v38 = vpack.c.bf16 %v4717_v2, %v4713_v26  ;;  %v3090_v31 = vmul.f32 %v12026_v62, %v12026_v62  ;;  %v12067_v40 = vmul.f32 0.5, %v3358_v49  ;;  %v3368_v11 = vmul.f32 %v12005_v46, %v3367_v12  ;;  %3640 = vadd.xlane.f32.xlu2 %v12031_v4  ;;  %v3715_v49 = vpop.xlane.xlu2 %3714 }
 0x36b   :  { %v12071_v10 = vmul.f32 0.0078125, %v11911_v19  ;;  %3734 = vadd.xlane.f32.xlu1 %v3677_v33  ;;  %v2942_v55 = vmul.f32 %v15148_v44, %v15148_v44  ;;  %v3058_v52 = vmul.f32 0.0078125, %v11901_v18  ;;  %v12081_v51 = vmul.f32 0.0078125, %v3619_v0 }
 0x36c   :  { %5219 = vmatmul.bf16.gmra.mxu1 %v4785_v38  ;;  %v15149_v48 = vsub.f32 %v15098_v17, %v11606_v24  ;;  %v15150_v9 = vsub.f32 %v15067_v39, %v11642_v22  ;;  %v4094_v12 = vmul.f32 %v12017_v50, %v4093_v59  ;;  %v15151_v18 = vsub.f32 %v15063_v8, %v11598_v15  ;;  %v5086_v8 = vpop.f32.mrf.mxu0 }
 0x36d   :  { %v3826_v54 = vmul.f32 %v12071_v10, %v12071_v10  ;;  %3000 = vadd.xlane.f32.xlu0 %v2942_v55  ;;  %v4519_v47 = vadd.f32 %v10942_v63, %v4381_v28  ;;  %v12096_v26 = vpop.eup %6287  ;;  %v3122_v24 = vsub.f32 %v3058_v52, %v3090_v31  ;;  %v3794_v39 = vmul.f32 0.0078125, %v3713_v57 }
 0x36e   :  { %v3566_v19 = vmul.f32 %v3345_v5, %v15149_v48  ;;  %v3567_v7 = vmul.f32 %v3355_v3, %v15150_v9  ;;  %v4302_v0 = vmul.f32 %v4081_v23, %v15151_v18  ;;  %v2979_v5 = vpop.xlane.xlu1 %2978  ;;  %v3360_v2 = vsub.f32 1.5, %v12067_v40  ;;  %v15153_v9 = vld [vmem:[#allocation168_spill] sm:$0xff]  ;;  %v12117_v18 = vpop.f32.mrf.mxu2 }
 0x36f   :  { %v3369_v34 = vmul.f32 0.5, %v3368_v11  ;;  %v1279_v3 = vadd.f32 %v11872_v60, %v9047_v42  ;;  %v3827_v28 = vmul.f32 %v12081_v51, %v12081_v51  ;;  %v3858_v23 = vsub.f32 %v3794_v39, %v3826_v54 }
 0x370   :  { %v4376_v17 = vmul.f32 %v10562_v27, %v3566_v19  ;;  %v4380_v22 = vmul.f32 %v10562_v27, %v3567_v7  ;;  %v4377_v15 = vmul.f32 %v10519_v25, %v4302_v0  ;;  %vm3362_vm7 = vweird.f32 %v11882_v58  ;;  %v15154_v0 = vld [vmem:[#allocation72_spill] sm:$0xff] }
 0x371   :  { %v4103_v57 = vmul.f32 %v12096_v26, %v12011_v13  ;;  %v4647_v31 = vmax.f32 %v4519_v47, 0.0  ;;  %v3795_v60 = vmul.f32 0.0078125, %v3715_v49  ;;  %v3154_v40 = vmax.f32 %v3122_v24, 0.0 }
 0x372   :  { %v4514_v59 = vadd.f32 %v15107_v32, %v4376_v17  ;;  %v4518_v33 = vadd.f32 %v15107_v32, %v4380_v22  ;;  %v4515_v38 = vadd.f32 %v10942_v63, %v4377_v15  ;;  %v3890_v52 = vmax.f32 %v3858_v23, 0.0  ;;  %2906 = vadd.xlane.f32.xlu2 %v15154_v0  ;;  %v12126_v22 = vpop.xlane.xlu0 %2886  ;;  %v15161_v23 = vld [vmem:[#allocation153_spill] sm:$0xff] }
 0x373   :  { %v3370_v48 = vsub.f32 1.5, %v3369_v34  ;;  %v12113_v19 = vadd.f32 %v11889_v20, %v1279_v3  ;;  %v1282_v7 = vadd.f32 %v15153_v9, %v9047_v42  ;;  %2904 = vadd.xlane.f32.xlu1 %v15148_v44  ;;  %v12122_v49 = vmul.f32 0.0078125, %v12015_v1  ;;  %v15155_v34 = vld [vmem:[#allocation109_spill] sm:$0xff]  ;;  %v15156_v3 = vld [vmem:[#allocation174_spill] sm:$0xff]  ;;  %v15163_v1 = vld [vmem:[#allocation96_spill] sm:$0xff] }
 0x374   :  { %v4642_v11 = vmax.f32 %v4514_v59, 0.0  ;;  %v4646_v55 = vmax.f32 %v4518_v33, 0.0  ;;  %v4643_v54 = vmax.f32 %v4515_v38, 0.0  ;;  %v12124_v24 = vadd.f32 1e-05, %v3890_v52  ;;  %v15158_v59 = vld [vmem:[#allocation89_spill] sm:$0xff] }
 0x375   :  { %15152 = vst [vmem:[#allocation155_spill] sm:$0xff] %v12113_v19  ;;  %v3859_v17 = vsub.f32 %v3795_v60, %v3827_v28  ;;  %v4104_v20 = vmul.f32 %v12096_v26, %v4103_v57  ;;  %v15157_v15 = vsub.f32 %v15155_v34, %v15156_v3  ;;  %vm15159_vm1 = vnez %v15158_v59  ;;  %v15160_v33 = vld [vmem:[#allocation69_spill] sm:$0xff]  ;;  %v12140_v28 = vpop.f32.mrf.mxu3 }
 0x376   :  { %v4750_v47 = vpack.c.bf16 %v4646_v55, %v4642_v11  ;;  %v4751_v39 = vpack.c.bf16 %v4647_v31, %v4643_v54  ;;  %v15162_v38 = vsel %vm15159_vm1, %v15160_v33, %v15161_v23  ;;  %v4596_v11 = vadd.f32 %v14875_v6, %v15163_v1  ;;  %3642 = vadd.xlane.f32.xlu0 %v12113_v19  ;;  %v2885_v31 = vpop.xlane.xlu2 %2884  ;;  %v2981_v3 = vpop.xlane.xlu1 %2980  ;;  %v15170_v33 = vld [vmem:[#allocation84_spill] sm:$0xff]  ;;  %v15171_v23 = vld [vmem:[#allocation167_spill] sm:$0xff] }
 0x377   :  { %v2114_v9 = vmul.f32 %v15162_v38, %v15157_v15  ;;  %v12142_v60 = vmul.f32 0.5, %v4094_v12  ;;  %vm3363_vm2 = vweird.f32 %v11944_v29  ;;  %v12145_v57 = vadd.f32 1e-05, %v3154_v40 }
 0x378   :  { %5263 = vmatmul.bf16.gmra.mxu2 %v4750_v47  ;;  %6289 = vrsqrt.f32 %v12124_v24  ;;  %v3361_v55 = vmul.f32 %v11944_v29, %v3360_v2  ;;  %v12150_v52 = vadd.f32 %v11983_v37, %v1282_v7  ;;  %5352 = vmatmul.bf16.gmra.mxu3 %v4751_v39  ;;  %v3891_v54 = vmax.f32 %v3859_v17, 0.0  ;;  %vm12167_vm0 = vmor %vm3362_vm7, %vm3363_vm2  ;;  %v15166_v17 = vld [vmem:[#allocation116_spill] sm:$0xff] }
 0x379   :  { %v4454_v34 = vmul.f32 %v14866_v56, %v2114_v9  ;;  %v3371_v12 = vmul.f32 %v12005_v46, %v3370_v48  ;;  %vm3373_vm3 = vweird.f32 %v12005_v46  ;;  %v3091_v40 = vmul.f32 %v12122_v49, %v12122_v49 }
 0x37a   :  { %v3059_v47 = vmul.f32 0.0078125, %v2979_v5  ;;  %v4105_v15 = vmul.f32 0.5, %v4104_v20  ;;  %v12157_v59 = vadd.f32 1e-05, %v3891_v54  ;;  %v4724_v37 = vmax.f32 %v4596_v11, 0.0  ;;  %v5088_v5 = vpop.f32.mrf.mxu0 }
 0x37b   :  { %v4592_v2 = vadd.f32 %v14875_v6, %v4454_v34  ;;  %v12161_v7 = vadd.f32 %v11572_v61, %v5086_v8  ;;  %vm3372_vm9 = vweird.f32 %v11906_v45  ;;  %6291 = vrsqrt.f32 %v12145_v57  ;;  %v15167_v6 = vld [vmem:[#allocation187_spill] sm:$0xff]  ;;  %v12195_v34 = vpop.f32.mrf.mxu2 }
 0x37c   :  { %v3123_v48 = vsub.f32 %v3059_v47, %v3091_v40  ;;  %v3365_v8 = vsel %vm12167_vm0, %v11944_v29, %v3361_v55  ;;  %vm12180_vm13 = vmor %vm3372_vm9, %vm3373_vm3  ;;  %6293 = vrsqrt.f32 %v12157_v59  ;;  %v3185_v38 = vsub.f32 %v15171_v23, %v15170_v33  ;;  %v15175_v23 = vld [vmem:[#allocation164_spill] sm:$0xff] }
 0x37d   :  { %v4720_v45 = vmax.f32 %v4592_v2, 0.0  ;;  %v3375_v9 = vsel %vm12180_vm13, %v12005_v46, %v3371_v12  ;;  %v12192_v29 = vmul.f32 0.0078125, %v2885_v31  ;;  %v4096_v11 = vsub.f32 1.5, %v12142_v60  ;;  %v15172_v31 = vld [vmem:[#allocation45_spill] sm:$0xff]  ;;  %v15173_v12 = vld [vmem:[#allocation194_spill] sm:$0xff]  ;;  %v12208_v2 = vpop.xlane.xlu0 %3718 }
 0x37e   :  { %v12185_v39 = vpop.eup %6289  ;;  %v3155_v1 = vmax.f32 %v3123_v48, 0.0  ;;  %v4106_v55 = vsub.f32 1.5, %v4105_v15  ;;  %v3678_v40 = vmul.f32 %v12031_v4, %v12031_v4  ;;  %3644 = vadd.xlane.f32.xlu0 %v12150_v52  ;;  %vm4098_vm11 = vweird.f32 %v11913_v14  ;;  %v12213_v48 = vpop.f32.mrf.mxu3 }
 0x37f   :  { %v4788_v54 = vpack.c.bf16 %v4724_v37, %v4720_v45  ;;  %v4113_v47 = vmul.f32 %v12185_v39, %v12124_v24  ;;  %v3679_v46 = vmul.f32 %v12113_v19, %v12113_v19  ;;  %v15174_v60 = vsub.f32 %v15172_v31, %v15173_v12  ;;  %v15176_v31 = vld [vmem:[#allocation17_spill] sm:$0xff] }
 0x380   :  { %vm4099_vm8 = vweird.f32 %v12017_v50  ;;  %v12211_v37 = vadd.f32 1e-05, %v3155_v1  ;;  %3736 = vadd.xlane.f32.xlu1 %v3678_v40  ;;  %v3569_v56 = vmul.f32 %v3375_v9, %v3185_v38  ;;  %v3060_v58 = vmul.f32 0.0078125, %v2981_v3  ;;  %v3623_v9 = vpop.xlane.xlu1 %3622 }
 0x381   :  { %v3568_v15 = vmul.f32 %v3365_v8, %v15174_v60  ;;  %5135 = vmatmul.bf16.gmra.mxu0 %v4788_v54  ;;  %v12215_v45 = vpop.eup %6291  ;;  %v12218_v33 = vadd.f32 %v11572_v61, %v5088_v5  ;;  %v3921_v8 = vsub.f32 %v15176_v31, %v15175_v23  ;;  %v3092_v12 = vmul.f32 %v12192_v29, %v12192_v29  ;;  %v3717_v54 = vpop.xlane.xlu2 %3716  ;;  %vm12240_vm5 = vmor %vm4098_vm11, %vm4099_vm8 }
 0x382   :  { %3738 = vadd.xlane.f32.xlu2 %v3679_v46  ;;  %v12225_v40 = vpop.eup %6293  ;;  %v4097_v38 = vmul.f32 %v12017_v50, %v4096_v11  ;;  %v4107_v3 = vmul.f32 %v12096_v26, %v4106_v55  ;;  %vm4109_vm4 = vweird.f32 %v12096_v26  ;;  %v4388_v5 = vmul.f32 %v10562_v27, %v3569_v56  ;;  %v5091_v56 = vpop.f32.mrf.mxu0  ;;  %v15182_v11 = vld [vmem:[#allocation125_spill] sm:$0xff] }
 0x383   :  { %v4384_v1 = vmul.f32 %v10562_v27, %v3568_v15  ;;  %v4114_v60 = vmul.f32 %v12185_v39, %v4113_v47  ;;  %v12233_v23 = vmul.f32 0.0078125, %v12078_v21  ;;  %v3124_v15 = vsub.f32 %v3060_v58, %v3092_v12 }
 0x384   :  { %vm4108_vm6 = vweird.f32 %v12011_v13  ;;  %v4123_v55 = vmul.f32 %v12225_v40, %v12157_v59  ;;  %6295 = vrsqrt.f32 %v12211_v37  ;;  %v4526_v21 = vadd.f32 %v15107_v32, %v4388_v5 }
 0x385   :  { %v4522_v46 = vadd.f32 %v15107_v32, %v4384_v1  ;;  %vm12249_vm14 = vmor %vm4108_vm6, %vm4109_vm4  ;;  %v3377_v14 = vmul.f32 %v12215_v45, %v12145_v57  ;;  %v1284_v58 = vadd.f32 %v12054_v30, %v9047_v42  ;;  %v3828_v13 = vmul.f32 %v12233_v23, %v12233_v23 }
 0x386   :  { %v3796_v31 = vmul.f32 0.0078125, %v3717_v54  ;;  %v4101_v12 = vsel %vm12240_vm5, %v12017_v50, %v4097_v38  ;;  %v4111_v1 = vsel %vm12249_vm14, %v12096_v26, %v4107_v3  ;;  %v4654_v20 = vmax.f32 %v4526_v21, 0.0  ;;  %2910 = vadd.xlane.f32.xlu0 %v15181_v16  ;;  %v5239_v26 = vpop.f32.mrf.mxu2  ;;  %v15183_v3 = vld [vmem:[#allocation169_spill] sm:$0xff]  ;;  %v15185_v21 = vld [vmem:[#allocation191_spill] sm:$0xff] }
 0x387   :  { %v4650_v5 = vmax.f32 %v4522_v46, 0.0  ;;  %v4115_v53 = vmul.f32 0.5, %v4114_v60  ;;  %v3156_v19 = vmax.f32 %v3124_v15, 0.0  ;;  %v2943_v30 = vmul.f32 %v15154_v0, %v15154_v0  ;;  %v5328_v46 = vpop.f32.mrf.mxu3 }
 0x388   :  { %v3860_v44 = vsub.f32 %v3796_v31, %v3828_v13  ;;  %v12269_v54 = vadd.f32 %v11572_v61, %v5091_v56  ;;  %v4124_v38 = vmul.f32 %v12225_v40, %v4123_v55  ;;  %v3378_v60 = vmul.f32 %v12215_v45, %v3377_v14  ;;  %v2889_v61 = vpop.xlane.xlu0 %2888 }
 0x389   :  { %v4754_v47 = vpack.c.bf16 %v4654_v20, %v4650_v5  ;;  %v12278_v15 = vadd.f32 %v12076_v41, %v1284_v58  ;;  %3002 = vadd.xlane.f32.xlu1 %v2943_v30  ;;  %v15186_v20 = vsub.f32 %v15167_v6, %v15166_v17  ;;  %v4305_v31 = vmul.f32 %v4111_v1, %v3921_v8  ;;  %v2983_v50 = vpop.xlane.xlu2 %2982  ;;  %v3625_v6 = vpop.xlane.xlu1 %3624 }
 0x38a   :  { %2908 = vadd.xlane.f32.xlu2 %v15185_v21  ;;  %v12281_v56 = vpop.eup %6295  ;;  %v3892_v13 = vmax.f32 %v3860_v44, 0.0  ;;  %v12286_v5 = vmul.f32 0.0078125, %v3623_v9  ;;  %v4116_v14 = vsub.f32 1.5, %v4115_v53  ;;  %v12289_v41 = vmul.f32 0.0078125, %v12126_v22  ;;  %v15187_v22 = vld [vmem:[#allocation15_spill] sm:$0xff] }
 0x38b   :  { %15184 = vst [vmem:[#allocation147_spill] sm:$0xff] %v12278_v15  ;;  %5268 = vmatmul.bf16.gmra.mxu2 %v4754_v47  ;;  %v4304_v55 = vmul.f32 %v4101_v12, %v15186_v20  ;;  %v12291_v58 = vadd.f32 1e-05, %v3156_v19  ;;  %v3797_v30 = vmul.f32 0.0078125, %v12208_v2  ;;  %v4125_v0 = vmul.f32 0.5, %v4124_v38 }
 0x38c   :  { %v4389_v47 = vmul.f32 %v10519_v25, %v4305_v31  ;;  %v3829_v17 = vmul.f32 %v12286_v5, %v12286_v5  ;;  %vm4118_vm12 = vweird.f32 %v12124_v24  ;;  %v1287_v53 = vadd.f32 %v12117_v18, %v9047_v42 }
 0x38d   :  { %v4385_v44 = vmul.f32 %v10519_v25, %v4304_v55  ;;  %v3387_v19 = vmul.f32 %v12281_v56, %v12211_v37  ;;  %v5240_v2 = vadd.f32 %v5239_v26, %v15187_v22  ;;  %v12304_v8 = vadd.f32 1e-05, %v3892_v13 }
 0x38e   :  { %v4527_v12 = vadd.f32 %v10942_v63, %v4389_v47  ;;  %v3861_v1 = vsub.f32 %v3797_v30, %v3829_v17  ;;  %v3379_v38 = vmul.f32 0.5, %v3378_v60  ;;  %vm4128_vm10 = vweird.f32 %v12157_v59  ;;  %v12314_v60 = vpop.f32.mrf.mxu1 }
 0x38f   :  { %v4523_v9 = vadd.f32 %v10942_v63, %v4385_v44  ;;  %v3093_v20 = vmul.f32 %v12289_v41, %v12289_v41  ;;  %v5329_v55 = vadd.f32 %v5328_v46, %v5240_v2  ;;  %v4117_v18 = vmul.f32 %v12185_v39, %v4116_v14  ;;  %v5241_v46 = vpop.f32.mrf.mxu2 }
 0x390   :  { %vm4119_vm15 = vweird.f32 %v12185_v39  ;;  %v4126_v31 = vsub.f32 1.5, %v4125_v0  ;;  %6297 = vrsqrt.f32 %v12291_v58  ;;  %v4655_v13 = vmax.f32 %v4527_v12, 0.0  ;;  %v3721_v30 = vpop.xlane.xlu0 %3720 }
 0x391   :  { %v4651_v26 = vmax.f32 %v4523_v9, 0.0  ;;  %v3893_v44 = vmax.f32 %v3861_v1, 0.0  ;;  %5408 = vst [vmem:[#allocation10] sm:$0xff] %v5329_v55  ;;  %v3061_v47 = vmul.f32 0.0078125, %v2983_v50  ;;  %v3388_v17 = vmul.f32 %v12281_v56, %v3387_v19  ;;  %v2985_v12 = vpop.xlane.xlu2 %2984  ;;  %v2891_v4 = vpop.xlane.xlu1 %2890  ;;  %vm12336_vm1 = vmor %vm4118_vm12, %vm4119_vm15 }
 0x392   :  { %6299 = vrsqrt.f32 %v12304_v8  ;;  %v2944_v14 = vmul.f32 %v15185_v21, %v15185_v21  ;;  %v3681_v0 = vmul.f32 %v12278_v15, %v12278_v15  ;;  %v3680_v50 = vmul.f32 %v12150_v52, %v12150_v52  ;;  %v5330_v21 = vpop.f32.mrf.mxu3 }
 0x393   :  { %v4755_v22 = vpack.c.bf16 %v4655_v13, %v4651_v26  ;;  %v12322_v2 = vadd.f32 1e-05, %v3893_v44  ;;  %v3125_v9 = vsub.f32 %v3061_v47, %v3093_v20  ;;  %v4127_v1 = vmul.f32 %v12225_v40, %v4126_v31 }
 0x394   :  { %vm4129_vm7 = vweird.f32 %v12225_v40  ;;  %v12328_v19 = vmul.f32 0.0078125, %v2889_v61  ;;  %3004 = vadd.xlane.f32.xlu1 %v2944_v14  ;;  %3742 = vadd.xlane.f32.xlu0 %v3681_v0  ;;  %v12330_v55 = vmul.f32 0.0078125, %v3625_v6  ;;  %v15190_v61 = vld [vmem:[#allocation86_spill] sm:$0xff]  ;;  %v3798_v13 = vmul.f32 0.0078125, %v3721_v30 }
 0x395   :  { %5357 = vmatmul.bf16.gmra.mxu3 %v4755_v22  ;;  %6301 = vrsqrt.f32 %v12322_v2  ;;  %v3157_v31 = vmax.f32 %v3125_v9, 0.0  ;;  %v5242_v26 = vadd.f32 %v5241_v46, %v15190_v61  ;;  %3740 = vadd.xlane.f32.xlu2 %v3680_v50  ;;  %v3380_v44 = vsub.f32 1.5, %v3379_v38  ;;  %vm12353_vm2 = vmor %vm4128_vm10, %vm4129_vm7 }
 0x396   :  { %v12342_v6 = vpop.eup %6297  ;;  %v4121_v47 = vsel %vm12336_vm1, %v12185_v39, %v4117_v18  ;;  %v3389_v24 = vmul.f32 0.5, %v3388_v17  ;;  %v3830_v14 = vmul.f32 %v12330_v55, %v12330_v55  ;;  %v3094_v30 = vmul.f32 %v12328_v19, %v12328_v19  ;;  %v15193_v18 = vld [vmem:[#allocation128_spill] sm:$0xff] }
 0x397   :  { %v12359_v38 = vadd.f32 1e-05, %v3157_v31  ;;  %v5331_v46 = vadd.f32 %v5330_v21, %v5242_v26  ;;  %v3062_v22 = vmul.f32 0.0078125, %v2985_v12  ;;  %vm3383_vm3 = vweird.f32 %v12215_v45 }
 0x398   :  { %v12361_v39 = vpop.eup %6299  ;;  %v3923_v17 = vsub.f32 %v15193_v18, %v12081_v51  ;;  %v4131_v59 = vsel %vm12353_vm2, %v12225_v40, %v4127_v1  ;;  %v3862_v9 = vsub.f32 %v3798_v13, %v3830_v14  ;;  %v12370_v50 = vadd.f32 %v12140_v28, %v1287_v53  ;;  %v2987_v26 = vpop.xlane.xlu0 %2986 }
 0x399   :  { %v12374_v20 = vadd.f32 %v12195_v34, %v9047_v42  ;;  %6303 = vrsqrt.f32 %v12359_v38  ;;  %5409 = vst [vmem:[#allocation10 + $0x8] sm:$0xff] %v5331_v46  ;;  %v3126_v21 = vsub.f32 %v3062_v22, %v3094_v30  ;;  %v3381_v12 = vmul.f32 %v12215_v45, %v3380_v44  ;;  %v12387_v13 = vpop.f32.mrf.mxu1  ;;  %v12410_v46 = vpop.xlane.xlu1 %3722 }
 0x39a   :  { %15194 = vst [vmem:[#allocation112_spill] sm:$0xff] %v12370_v50  ;;  %v3390_v31 = vsub.f32 1.5, %v3389_v24  ;;  %v3894_v51 = vmax.f32 %v3862_v9, 0.0  ;;  %v15195_v61 = vsub.f32 %v15182_v11, %v12071_v10  ;;  %v2945_v53 = vmul.f32 %v15181_v16, %v15181_v16 }
 0x39b   :  { %v12381_v1 = vpop.eup %6301  ;;  %v3158_v28 = vmax.f32 %v3126_v21, 0.0  ;;  %v4307_v42 = vmul.f32 %v4131_v59, %v3923_v17  ;;  %v12385_v34 = vmul.f32 0.0078125, %v2891_v4  ;;  %vm3382_vm0 = vweird.f32 %v12145_v57  ;;  %v3627_v4 = vpop.xlane.xlu2 %3626 }
 0x39c   :  { %v4306_v40 = vmul.f32 %v4121_v47, %v15195_v61  ;;  %v3397_v44 = vmul.f32 %v12342_v6, %v12291_v58  ;;  %v4133_v10 = vmul.f32 %v12361_v39, %v12304_v8  ;;  %v4143_v11 = vmul.f32 %v12381_v1, %v12322_v2  ;;  %3646 = vadd.xlane.f32.xlu1 %v12278_v15  ;;  %v15196_v47 = vld [vmem:[#allocation157_spill] sm:$0xff]  ;;  %vm12400_vm9 = vmor %vm3382_vm0, %vm3383_vm3 }
 0x39d   :  { %2912 = vadd.xlane.f32.xlu0 %v15196_v47  ;;  %v12404_v57 = vadd.f32 1e-05, %v3158_v28  ;;  %3006 = vadd.xlane.f32.xlu2 %v2945_v53  ;;  %v4397_v0 = vmul.f32 %v10519_v25, %v4307_v42  ;;  %v3095_v30 = vmul.f32 %v12385_v34, %v12385_v34  ;;  %v3385_v22 = vsel %vm12400_vm9, %v12215_v45, %v3381_v12  ;;  %v5244_v28 = vpop.f32.mrf.mxu2 }
 0x39e   :  { %v4393_v14 = vmul.f32 %v10519_v25, %v4306_v40  ;;  %vm3393_vm13 = vweird.f32 %v12281_v56  ;;  %v4144_v18 = vmul.f32 %v12381_v1, %v4143_v11  ;;  %v12417_v17 = vadd.f32 1e-05, %v3894_v51  ;;  %v5093_v51 = vpop.f32.mrf.mxu0 }
 0x39f   :  { %v12419_v59 = vpop.eup %6303  ;;  %v3391_v9 = vmul.f32 %v12281_v56, %v3390_v31  ;;  %v4535_v61 = vadd.f32 %v10942_v63, %v4397_v0  ;;  %v3063_v40 = vmul.f32 0.0078125, %v2987_v26  ;;  %v3398_v53 = vmul.f32 %v12342_v6, %v3397_v44  ;;  %v15200_v26 = vld [vmem:[#allocation63_spill] sm:$0xff] }
 0x3a0   :  { %v4531_v21 = vadd.f32 %v10942_v63, %v4393_v14  ;;  %v4134_v45 = vmul.f32 %v12361_v39, %v4133_v10  ;;  %v4145_v12 = vmul.f32 0.5, %v4144_v18  ;;  %v3407_v42 = vmul.f32 %v12419_v59, %v12359_v38  ;;  %v5333_v10 = vpop.f32.mrf.mxu3 }
 0x3a1   :  { %6305 = vrsqrt.f32 %v12404_v57  ;;  %v4663_v24 = vmax.f32 %v4535_v61, 0.0  ;;  %v3127_v31 = vsub.f32 %v3063_v40, %v3095_v30  ;;  %v15199_v14 = vsub.f32 %v15183_v3, %v12026_v62  ;;  %v12444_v3 = vld [vmem:[#allocation8] ss:$0 sm:$0xff] }
 0x3a2   :  { %v4659_v11 = vmax.f32 %v4531_v21, 0.0  ;;  %vm3392_vm11 = vweird.f32 %v12211_v37  ;;  %6307 = vrsqrt.f32 %v12417_v17  ;;  %v5245_v44 = vadd.f32 %v5244_v28, %v15200_v26 }
 0x3a3   :  { %v3570_v0 = vmul.f32 %v3385_v22, %v15199_v14  ;;  %vm12437_vm8 = vmor %vm3392_vm11, %vm3393_vm13  ;;  %v3408_v21 = vmul.f32 %v12419_v59, %v3407_v42  ;;  %v3159_v61 = vmax.f32 %v3127_v31, 0.0  ;;  %v3682_v62 = vmul.f32 %v12370_v50, %v12370_v50  ;;  %v12457_v31 = vpop.xlane.xlu0 %2988 }
 0x3a4   :  { %v4759_v30 = vpack.c.bf16 %v4663_v24, %v4659_v11  ;;  %v12447_v37 = vadd.f32 %v12444_v3, %v5093_v51  ;;  %v3395_v22 = vsel %vm12437_vm8, %v12281_v56, %v3391_v9  ;;  %v3399_v40 = vmul.f32 0.5, %v3398_v53  ;;  %3648 = vadd.xlane.f32.xlu1 %v12370_v50  ;;  %v12459_v51 = vpop.f32.mrf.mxu1  ;;  %v15203_v56 = vld [vmem:[#allocation43_spill] sm:$0xff]  ;;  %v15204_v53 = vld [vmem:[#allocation20_spill] sm:$0xff] }
 0x3a5   :  { %v4146_v28 = vsub.f32 1.5, %v4145_v12  ;;  %v4135_v14 = vmul.f32 0.5, %v4134_v45  ;;  %v12453_v42 = vadd.f32 1e-05, %v3159_v61  ;;  %v12455_v11 = vmul.f32 0.0078125, %v3627_v4  ;;  %3744 = vadd.xlane.f32.xlu0 %v3682_v62  ;;  %v12470_v4 = vpop.xlane.xlu2 %3628 }
 0x3a6   :  { %5362 = vmatmul.bf16.gmra.mxu3 %v4759_v30  ;;  %v5334_v24 = vadd.f32 %v5333_v10, %v5245_v44  ;;  %v4392_v26 = vmul.f32 %v10562_v27, %v3570_v0  ;;  %v3187_v9 = vsub.f32 %v15203_v56, %v12122_v49  ;;  %v12468_v45 = vadd.f32 %v12213_v48, %v12374_v20  ;;  %v15206_v10 = vld [vmem:[#allocation37_spill] sm:$0xff]  ;;  %v2893_v49 = vpop.xlane.xlu1 %2892 }
 0x3a7   :  { %v12472_v44 = vpop.eup %6305  ;;  %vm3402_vm4 = vweird.f32 %v12291_v58  ;;  %v3925_v18 = vsub.f32 %v15206_v10, %v12286_v5  ;;  %v3409_v0 = vmul.f32 0.5, %v3408_v21  ;;  %6309 = vrsqrt.f32 %v12453_v42  ;;  %v5246_v10 = vpop.f32.mrf.mxu2 }
 0x3a8   :  { %15205 = vst [vmem:[#allocation51_spill] sm:$0xff] %v12468_v45  ;;  %v12478_v30 = vpop.eup %6307  ;;  %v4147_v61 = vmul.f32 %v12381_v1, %v4146_v28  ;;  %vm4149_vm5 = vweird.f32 %v12381_v1  ;;  %v2946_v48 = vmul.f32 %v15196_v47, %v15196_v47  ;;  %v3571_v20 = vmul.f32 %v3395_v22, %v3187_v9  ;;  %v15209_v9 = vld [vmem:[#allocation79_spill] sm:$0xff] }
 0x3a9   :  { %5410 = vst [vmem:[#allocation10 + $0x10] sm:$0xff] %v5334_v24  ;;  %v3400_v62 = vsub.f32 1.5, %v3399_v40  ;;  %v4136_v56 = vsub.f32 1.5, %v4135_v14  ;;  %v3831_v5 = vmul.f32 %v12455_v11, %v12455_v11  ;;  %v3799_v21 = vmul.f32 0.0078125, %v12410_v46 }
 0x3aa   :  { %vm4148_vm6 = vweird.f32 %v12322_v2  ;;  %v3417_v24 = vmul.f32 %v12472_v44, %v12404_v57  ;;  %3008 = vadd.xlane.f32.xlu2 %v2946_v48  ;;  %v4396_v28 = vmul.f32 %v10562_v27, %v3571_v20  ;;  %v4530_v12 = vadd.f32 %v15107_v32, %v4392_v26  ;;  %v15210_v20 = vld [vmem:[#allocation46_spill] sm:$0xff] }
 0x3ab   :  { %vm3403_vm14 = vweird.f32 %v12342_v6  ;;  %vm4139_vm12 = vweird.f32 %v12361_v39  ;;  %vm12496_vm10 = vmor %vm4148_vm6, %vm4149_vm5  ;;  %v3410_v46 = vsub.f32 1.5, %v3409_v0  ;;  %v3863_v2 = vsub.f32 %v3799_v21, %v3831_v5  ;;  %v5335_v21 = vpop.f32.mrf.mxu3 }
 0x3ac   :  { %v4151_v40 = vsel %vm12496_vm10, %v12381_v1, %v4147_v61  ;;  %v4153_v14 = vmul.f32 %v12478_v30, %v12417_v17  ;;  %v4534_v26 = vadd.f32 %v15107_v32, %v4396_v28  ;;  %v5247_v48 = vadd.f32 %v5246_v10, %v15209_v9  ;;  %2914 = vadd.xlane.f32.xlu1 %v15210_v20  ;;  %vm12527_vm7 = vmor %vm3402_vm4, %vm3403_vm14 }
 0x3ad   :  { %v12508_v50 = vpop.eup %6309  ;;  %v3401_v47 = vmul.f32 %v12342_v6, %v3400_v62  ;;  %v4137_v0 = vmul.f32 %v12361_v39, %v4136_v56  ;;  %v3895_v5 = vmax.f32 %v3863_v2, 0.0  ;;  %v2947_v1 = vmul.f32 %v15210_v20, %v15210_v20  ;;  %v3631_v56 = vpop.xlane.xlu0 %3630 }
 0x3ae   :  { %v3418_v61 = vmul.f32 %v12472_v44, %v3417_v24  ;;  %v3427_v28 = vmul.f32 %v12508_v50, %v12453_v42  ;;  %v4658_v22 = vmax.f32 %v4530_v12, 0.0  ;;  %v4662_v10 = vmax.f32 %v4534_v26, 0.0  ;;  %v12521_v2 = vpop.f32.mrf.mxu1 }
 0x3af   :  { %v4309_v9 = vmul.f32 %v4151_v40, %v3925_v18  ;;  %v3411_v15 = vmul.f32 %v12419_v59, %v3410_v46  ;;  %vm3413_vm15 = vweird.f32 %v12419_v59  ;;  %v12519_v62 = vadd.f32 1e-05, %v3895_v5  ;;  %3010 = vadd.xlane.f32.xlu0 %v2947_v1  ;;  %v2895_v40 = vpop.xlane.xlu2 %2894 }
 0x3b0   :  { %vm4138_vm1 = vweird.f32 %v12304_v8  ;;  %v4154_v12 = vmul.f32 %v12478_v30, %v4153_v14  ;;  %v4758_v18 = vpack.c.bf16 %v4662_v10, %v4658_v22  ;;  %v5336_v46 = vadd.f32 %v5335_v21, %v5247_v48  ;;  %v3725_v8 = vpop.xlane.xlu1 %3724  ;;  %v15218_v10 = vld [vmem:[#allocation49_spill] sm:$0xff] }
 0x3b1   :  { %vm12535_vm2 = vmor %vm4138_vm1, %vm4139_vm12  ;;  %vm3412_vm3 = vweird.f32 %v12359_v38  ;;  %v3428_v58 = vmul.f32 %v12508_v50, %v3427_v28  ;;  %6311 = vrsqrt.f32 %v12519_v62  ;;  %v12542_v5 = vmul.f32 0.0078125, %v2893_v49  ;;  %v5249_v49 = vpop.f32.mrf.mxu2  ;;  %v15217_v28 = vld [vmem:[#allocation70_spill] sm:$0xff] }
 0x3b2   :  { %v3405_v14 = vsel %vm12527_vm7, %v12342_v6, %v3401_v47  ;;  %vm12549_vm0 = vmor %vm3412_vm3, %vm3413_vm15  ;;  %v3419_v21 = vmul.f32 0.5, %v3418_v61  ;;  %5273 = vmatmul.bf16.gmra.mxu2 %v4758_v18  ;;  %5411 = vst [vmem:[#allocation10 + $0x18] sm:$0xff] %v5336_v46  ;;  %3650 = vadd.xlane.f32.xlu2 %v12468_v45  ;;  %v3683_v38 = vmul.f32 %v12468_v45, %v12468_v45  ;;  %v12569_v18 = vmul.f32 0.5, %v4154_v12 }
 0x3b3   :  { %v4141_v1 = vsel %vm12535_vm2, %v12361_v39, %v4137_v0  ;;  %v4405_v6 = vmul.f32 %v10519_v25, %v4309_v9  ;;  %v3415_v47 = vsel %vm12549_vm0, %v12419_v59, %v3411_v15  ;;  %v3096_v61 = vmul.f32 %v12542_v5, %v12542_v5  ;;  %v15219_v15 = vld [vmem:[#allocation111_spill] sm:$0xff] }
 0x3b4   :  { %v3924_v22 = vsub.f32 %v15217_v28, %v12233_v23  ;;  %v3189_v24 = vsub.f32 %v15218_v10, %v12289_v41  ;;  %v3064_v46 = vmul.f32 0.0078125, %v12457_v31  ;;  %3746 = vadd.xlane.f32.xlu1 %v3683_v38  ;;  %vm3423_vm9 = vweird.f32 %v12472_v44  ;;  %v5338_v28 = vpop.f32.mrf.mxu3 }
 0x3b5   :  { %v3429_v39 = vmul.f32 0.5, %v3428_v58  ;;  %v12574_v0 = vmul.f32 0.0078125, %v12470_v4  ;;  %v2211_v59 = vmul.f32 %v15219_v15, %v15219_v15  ;;  %v15220_v23 = vsub.f32 %v15204_v53, %v12192_v29  ;;  %v12588_v29 = vpop.xlane.xlu0 %3632 }
 0x3b6   :  { %v3420_v26 = vsub.f32 1.5, %v3419_v21  ;;  %v3128_v41 = vsub.f32 %v3064_v46, %v3096_v61  ;;  %v3573_v12 = vmul.f32 %v3415_v47, %v3189_v24  ;;  %v4308_v48 = vmul.f32 %v4141_v1, %v3924_v22  ;;  %v15221_v21 = vld [vmem:[#allocation148_spill] sm:$0xff]  ;;  %v12597_v22 = vpop.f32.mrf.mxu0 }
 0x3b7   :  { %v3572_v9 = vmul.f32 %v3405_v14, %v15220_v23  ;;  %v12581_v31 = vpop.eup %6311  ;;  %vm3422_vm13 = vweird.f32 %v12404_v57  ;;  %v3832_v4 = vmul.f32 %v12574_v0, %v12574_v0  ;;  %2274 = vadd.xlane.f32.xlu0 %v2211_v59  ;;  %v4543_v38 = vadd.f32 %v10942_v63, %v4405_v6  ;;  %v3727_v61 = vpop.xlane.xlu2 %3726  ;;  %v15222_v6 = vld [vmem:[#allocation66_spill] sm:$0xff] }
 0x3b8   :  { %v3800_v10 = vmul.f32 0.0078125, %v3725_v8  ;;  %v4163_v53 = vmul.f32 %v12581_v31, %v12519_v62  ;;  %v12592_v14 = vmul.f32 0.0078125, %v3631_v56  ;;  %v2210_v1 = vmul.f32 %v15221_v21, %v15221_v21  ;;  %v2991_v23 = vpop.xlane.xlu1 %2990  ;;  %vm12627_vm8 = vmor %vm3422_vm13, %vm3423_vm9 }
 0x3b9   :  { %v4400_v58 = vmul.f32 %v10562_v27, %v3572_v9  ;;  %v4404_v47 = vmul.f32 %v10562_v27, %v3573_v12  ;;  %v3430_v24 = vsub.f32 1.5, %v3429_v39  ;;  %v4401_v8 = vmul.f32 %v10519_v25, %v4308_v48  ;;  %v12602_v9 = vpop.f32.mrf.mxu1  ;;  %v5251_v16 = vpop.f32.mrf.mxu2 }
 0x3ba   :  { %v5250_v59 = vadd.f32 %v5249_v49, %v15222_v6  ;;  %v3421_v56 = vmul.f32 %v12472_v44, %v3420_v26  ;;  %v3160_v15 = vmax.f32 %v3128_v41, 0.0  ;;  %2272 = vadd.xlane.f32.xlu2 %v2210_v1  ;;  %v3864_v12 = vsub.f32 %v3800_v10, %v3832_v4 }
 0x3bb   :  { %v4538_v46 = vadd.f32 %v15107_v32, %v4400_v58  ;;  %v4542_v21 = vadd.f32 %v15107_v32, %v4404_v47  ;;  %vm3433_vm11 = vweird.f32 %v12508_v50  ;;  %v12607_v45 = vmul.f32 0.0078125, %v2895_v40 }
 0x3bc   :  { %v4539_v39 = vadd.f32 %v10942_v63, %v4401_v8  ;;  %v4671_v58 = vmax.f32 %v4543_v38, 0.0  ;;  %v4164_v48 = vmul.f32 %v12581_v31, %v4163_v53  ;;  %v3896_v20 = vmax.f32 %v3864_v12, 0.0 }
 0x3bd   :  { %v4666_v49 = vmax.f32 %v4538_v46, 0.0  ;;  %v4670_v6 = vmax.f32 %v4542_v21, 0.0  ;;  %v3431_v26 = vmul.f32 %v12508_v50, %v3430_v24  ;;  %v3833_v41 = vmul.f32 %v12592_v14, %v12592_v14  ;;  %v12620_v46 = vpop.xlane.xlu0 %2898  ;;  %v15223_v24 = vld [vmem:[#allocation161_spill] sm:$0xff] }
 0x3be   :  { %v4667_v1 = vmax.f32 %v4539_v39, 0.0  ;;  %v5339_v4 = vadd.f32 %v5338_v28, %v5250_v59  ;;  %v12614_v10 = vadd.f32 1e-05, %v3160_v15  ;;  %v12616_v47 = vadd.f32 1e-05, %v3896_v20 }
 0x3bf   :  { %v4762_v40 = vpack.c.bf16 %v4670_v6, %v4666_v49  ;;  %v3801_v8 = vmul.f32 0.0078125, %v3727_v61  ;;  %v3097_v38 = vmul.f32 %v12607_v45, %v12607_v45  ;;  %v3065_v21 = vmul.f32 0.0078125, %v2991_v23  ;;  %v5340_v61 = vpop.f32.mrf.mxu3  ;;  %v2897_v59 = vpop.xlane.xlu2 %2896 }
 0x3c0   :  { %v4763_v53 = vpack.c.bf16 %v4671_v58, %v4667_v1  ;;  %5412 = vst [vmem:[#allocation10 + $0x20] sm:$0xff] %v5339_v4  ;;  %v5252_v12 = vadd.f32 %v5251_v16, %v15223_v24  ;;  %vm3432_vm4 = vweird.f32 %v12453_v42  ;;  %v4165_v20 = vmul.f32 0.5, %v4164_v48  ;;  %v2993_v58 = vpop.xlane.xlu1 %2992  ;;  %v15228_v48 = vld [vmem:[#allocation172_spill] sm:$0xff] }
 0x3c1   :  { %6313 = vrsqrt.f32 %v12616_v47  ;;  %v3865_v28 = vsub.f32 %v3801_v8, %v3833_v41  ;;  %v4156_v23 = vsub.f32 1.5, %v12569_v18  ;;  %v3425_v16 = vsel %vm12627_vm8, %v12472_v44, %v3421_v56  ;;  %vm12639_vm5 = vmor %vm3432_vm4, %vm3433_vm11  ;;  %v5098_v41 = vpop.f32.mrf.mxu0  ;;  %v15229_v1 = vld [vmem:[#allocation132_spill] sm:$0xff] }
 0x3c2   :  { %5367 = vmatmul.bf16.gmra.mxu3 %v4763_v53  ;;  %v3129_v42 = vsub.f32 %v3065_v21, %v3097_v38  ;;  %v5341_v39 = vadd.f32 %v5340_v61, %v5252_v12  ;;  %v3190_v49 = vsub.f32 %v15228_v48, %v12328_v19  ;;  %v3435_v18 = vsel %vm12639_vm5, %v12508_v50, %v3431_v26  ;;  %v5185_v26 = vpop.f32.mrf.mxu1 }
 0x3c3   :  { %6315 = vrsqrt.f32 %v12614_v10  ;;  %5278 = vmatmul.bf16.gmra.mxu2 %v4762_v40  ;;  %v3897_v44 = vmax.f32 %v3865_v28, 0.0  ;;  %v12651_v56 = vadd.f32 %v12314_v60, %v12063_v35  ;;  %v12655_v6 = vadd.f32 %v12387_v13, %v12161_v7 }
 0x3c4   :  { %v3191_v19 = vsub.f32 %v15229_v1, %v12385_v34  ;;  %v3161_v4 = vmax.f32 %v3129_v42, 0.0  ;;  %5413 = vst [vmem:[#allocation10 + $0x28] sm:$0xff] %v5341_v39  ;;  %v12661_v50 = vadd.f32 %v12459_v51, %v12218_v33  ;;  %v4166_v40 = vsub.f32 1.5, %v4165_v20  ;;  %v15232_v42 = vld [vmem:[#allocation99_spill] sm:$0xff] }
 0x3c5   :  { %v12663_v8 = vadd.f32 1e-05, %v3897_v44  ;;  %v3574_v35 = vmul.f32 %v3425_v16, %v3190_v49  ;;  %v4157_v60 = vmul.f32 %v12478_v30, %v4156_v23  ;;  %vm4159_vm6 = vweird.f32 %v12478_v30 }
 0x3c6   :  { %v12667_v7 = vadd.f32 1e-05, %v3161_v4  ;;  %v3575_v13 = vmul.f32 %v3435_v18, %v3191_v19  ;;  %v12673_v34 = vadd.f32 %v12521_v2, %v12269_v54  ;;  %v12677_v33 = vadd.f32 %v12602_v9, %v12447_v37  ;;  %v12688_v54 = vpop.xlane.xlu0 %3730 }
 0x3c7   :  { %v12669_v38 = vpop.eup %6313  ;;  %v5097_v51 = vadd.f32 %v12444_v3, %v12597_v22  ;;  %6317 = vrsqrt.f32 %v12663_v8  ;;  %vm4158_vm14 = vweird.f32 %v12417_v17  ;;  %v12686_v21 = vmul.f32 0.0078125, %v2897_v59  ;;  %v3729_v24 = vpop.xlane.xlu2 %3728 }
 0x3c8   :  { %v4173_v53 = vmul.f32 %v12669_v38, %v12616_v47  ;;  %6319 = vrsqrt.f32 %v12667_v7  ;;  %vm12692_vm12 = vmor %vm4158_vm14, %vm4159_vm6  ;;  %v4167_v22 = vmul.f32 %v12581_v31, %v4166_v40  ;;  %vm4169_vm10 = vweird.f32 %v12581_v31  ;;  %v3635_v28 = vpop.xlane.xlu1 %3634 }
 0x3c9   :  { %v12690_v2 = vpop.eup %6315  ;;  %v4408_v17 = vmul.f32 %v10562_v27, %v3574_v35  ;;  %v4412_v9 = vmul.f32 %v10562_v27, %v3575_v13  ;;  %v4161_v12 = vsel %vm12692_vm12, %v12478_v30, %v4157_v60  ;;  %vm4168_vm15 = vweird.f32 %v12519_v62  ;;  %v15235_v13 = vld [vmem:[#allocation81_spill] sm:$0xff]  ;;  %v5343_v30 = vpop.f32.mrf.mxu3 }
 0x3ca   :  { %v4174_v15 = vmul.f32 %v12669_v38, %v4173_v53  ;;  %v3066_v20 = vmul.f32 0.0078125, %v2993_v58  ;;  %v12706_v61 = vmul.f32 0.0078125, %v12588_v29  ;;  %v3802_v16 = vmul.f32 0.0078125, %v3729_v24  ;;  %vm12715_vm7 = vmor %vm4168_vm15, %vm4169_vm10  ;;  %v5187_v60 = vpop.f32.mrf.mxu1 }
 0x3cb   :  { %v4546_v59 = vadd.f32 %v15107_v32, %v4408_v17  ;;  %v4550_v23 = vadd.f32 %v15107_v32, %v4412_v9  ;;  %v5099_v57 = vadd.f32 %v12444_v3, %v5098_v41  ;;  %v3926_v39 = vsub.f32 %v15232_v42, %v12330_v55  ;;  %v5101_v41 = vpop.f32.mrf.mxu0 }
 0x3cc   :  { %v3437_v62 = vmul.f32 %v12690_v2, %v12614_v10  ;;  %v3098_v29 = vmul.f32 %v12686_v21, %v12686_v21  ;;  %v4171_v48 = vsel %vm12715_vm7, %v12581_v31, %v4167_v22  ;;  %v3834_v55 = vmul.f32 %v12706_v61, %v12706_v61  ;;  %v5254_v22 = vpop.f32.mrf.mxu2 }
 0x3cd   :  { %v12723_v58 = vpop.eup %6317  ;;  %v4674_v49 = vmax.f32 %v4546_v59, 0.0  ;;  %v4678_v18 = vmax.f32 %v4550_v23, 0.0  ;;  %v4175_v1 = vmul.f32 0.5, %v4174_v15  ;;  %v4310_v40 = vmul.f32 %v4161_v12, %v3926_v39 }
 0x3ce   :  { %v12730_v44 = vpop.eup %6319  ;;  %v4183_v19 = vmul.f32 %v12723_v58, %v12663_v8  ;;  %v3130_v4 = vsub.f32 %v3066_v20, %v3098_v29  ;;  %v12734_v35 = vadd.f32 %v5185_v26, %v5097_v51  ;;  %v3927_v31 = vsub.f32 %v15235_v13, %v12455_v11  ;;  %v15236_v26 = vld [vmem:[#allocation104_spill] sm:$0xff]  ;;  %v15237_v11 = vld [vmem:[#allocation75_spill] sm:$0xff]  ;;  %v2901_v23 = vpop.xlane.xlu0 %2900 }
 0x3cf   :  { %v4766_v53 = vpack.c.bf16 %v4678_v18, %v4674_v49  ;;  %v3866_v37 = vsub.f32 %v3802_v16, %v3834_v55  ;;  %v12738_v17 = vadd.f32 %v5187_v60, %v5099_v57  ;;  %v3438_v9 = vmul.f32 %v12690_v2, %v3437_v62  ;;  %v2995_v55 = vpop.xlane.xlu2 %2994 }
 0x3d0   :  { %v4184_v24 = vmul.f32 %v12723_v58, %v4183_v19  ;;  %v3447_v15 = vmul.f32 %v12730_v44, %v12667_v7  ;;  %v12745_v12 = vadd.f32 %v12444_v3, %v5101_v41  ;;  %v3928_v51 = vsub.f32 %v15236_v26, %v12574_v0  ;;  %v15247_v26 = vld [vmem:[#allocation56_spill] sm:$0xff] }
 0x3d1   :  { %v4311_v59 = vmul.f32 %v4171_v48, %v3927_v31  ;;  %v4176_v16 = vsub.f32 1.5, %v4175_v1  ;;  %v3162_v42 = vmax.f32 %v3130_v4, 0.0  ;;  %v4409_v39 = vmul.f32 %v10519_v25, %v4310_v40  ;;  %v3637_v1 = vpop.xlane.xlu1 %3636 }
 0x3d2   :  { %v4185_v57 = vmul.f32 0.5, %v4184_v24  ;;  %vm4178_vm1 = vweird.f32 %v12616_v47  ;;  %v3898_v62 = vmax.f32 %v3866_v37, 0.0  ;;  %v12754_v29 = vmul.f32 0.0078125, %v3635_v28 }
 0x3d3   :  { %5283 = vmatmul.bf16.gmra.mxu2 %v4766_v53  ;;  %v4413_v3 = vmul.f32 %v10519_v25, %v4311_v59  ;;  %v3439_v49 = vmul.f32 0.5, %v3438_v9  ;;  %v3448_v18 = vmul.f32 %v12730_v44, %v3447_v15  ;;  %v12758_v48 = vmul.f32 0.0078125, %v12620_v46  ;;  %v15238_v46 = vld [vmem:[#allocation160_spill] sm:$0xff] }
 0x3d4   :  { %v4547_v41 = vadd.f32 %v10942_v63, %v4409_v39  ;;  %vm3443_vm2 = vweird.f32 %v12690_v2  ;;  %v4186_v19 = vsub.f32 1.5, %v4185_v57  ;;  %v3803_v4 = vmul.f32 0.0078125, %v12688_v54 }
 0x3d5   :  { %v4551_v40 = vadd.f32 %v10942_v63, %v4413_v3  ;;  %v3835_v28 = vmul.f32 %v12754_v29, %v12754_v29  ;;  %v4177_v60 = vmul.f32 %v12669_v38, %v4176_v16  ;;  %vm4179_vm3 = vweird.f32 %v12669_v38  ;;  %v5256_v3 = vpop.f32.mrf.mxu2 }
 0x3d6   :  { %v12768_v13 = vadd.f32 1e-05, %v3162_v42  ;;  %v5255_v31 = vadd.f32 %v5254_v22, %v15238_v46  ;;  %v12771_v53 = vadd.f32 1e-05, %v3898_v62  ;;  %v4675_v37 = vmax.f32 %v4547_v41, 0.0  ;;  %v3733_v20 = vpop.xlane.xlu0 %3732  ;;  %vm12781_vm9 = vmor %vm4178_vm1, %vm4179_vm3  ;;  %v5345_v41 = vpop.f32.mrf.mxu3 }
 0x3d7   :  { %v4679_v9 = vmax.f32 %v4551_v40, 0.0  ;;  %v3867_v24 = vsub.f32 %v3803_v4, %v3835_v28  ;;  %v3440_v15 = vsub.f32 1.5, %v3439_v49  ;;  %v3449_v54 = vmul.f32 0.5, %v3448_v18  ;;  %v15243_v4 = vld [vmem:[#allocation150_spill] sm:$0xff] }
 0x3d8   :  { %v3099_v59 = vmul.f32 %v12758_v48, %v12758_v48  ;;  %v5344_v57 = vadd.f32 %v5343_v30, %v5255_v31  ;;  %v4187_v39 = vmul.f32 %v12723_v58, %v4186_v19  ;;  %vm4189_vm0 = vweird.f32 %v12723_v58  ;;  %v2997_v19 = vpop.xlane.xlu2 %2996 }
 0x3d9   :  { %v4767_v16 = vpack.c.bf16 %v4679_v9, %v4675_v37  ;;  %v3899_v42 = vmax.f32 %v3867_v24, 0.0  ;;  %vm4188_vm13 = vweird.f32 %v12663_v8  ;;  %6321 = vrsqrt.f32 %v12768_v13  ;;  %v2903_v28 = vpop.xlane.xlu1 %2902 }
 0x3da   :  { %5414 = vst [vmem:[#allocation10 + $0x30] sm:$0xff] %v5344_v57  ;;  %v3067_v30 = vmul.f32 0.0078125, %v2995_v55  ;;  %v12787_v62 = vmul.f32 0.0078125, %v3637_v1  ;;  %v4181_v49 = vsel %vm12781_vm9, %v12669_v38, %v4177_v60  ;;  %6323 = vrsqrt.f32 %v12771_v53  ;;  %vm12797_vm11 = vmor %vm4188_vm13, %vm4189_vm0 }
 0x3db   :  { %5372 = vmatmul.bf16.gmra.mxu3 %v4767_v16  ;;  %v12793_v47 = vadd.f32 1e-05, %v3899_v42  ;;  %v3804_v18 = vmul.f32 0.0078125, %v3733_v20  ;;  %v3450_v55 = vsub.f32 1.5, %v3449_v54  ;;  %v5257_v40 = vadd.f32 %v5256_v3, %v15243_v4 }
 0x3dc   :  { %v3131_v1 = vsub.f32 %v3067_v30, %v3099_v59  ;;  %v3836_v38 = vmul.f32 %v12787_v62, %v12787_v62  ;;  %v3441_v60 = vmul.f32 %v12690_v2, %v3440_v15  ;;  %v4191_v20 = vsel %vm12797_vm11, %v12723_v58, %v4187_v39 }
 0x3dd   :  { %6325 = vrsqrt.f32 %v12793_v47  ;;  %v12809_v46 = vmul.f32 0.0078125, %v2901_v23  ;;  %vm3442_vm8 = vweird.f32 %v12614_v10  ;;  %v5346_v9 = vadd.f32 %v5345_v41, %v5257_v40 }
 0x3de   :  { %v3163_v31 = vmax.f32 %v3131_v1, 0.0  ;;  %v3868_v37 = vsub.f32 %v3804_v18, %v3836_v38  ;;  %vm3453_vm4 = vweird.f32 %v12730_v44  ;;  %v3068_v54 = vmul.f32 0.0078125, %v2997_v19  ;;  %vm12822_vm5 = vmor %vm3442_vm8, %vm3443_vm2  ;;  %v2999_v30 = vpop.xlane.xlu0 %2998 }
 0x3df   :  { %v3100_v24 = vmul.f32 %v12809_v46, %v12809_v46  ;;  %v4312_v15 = vmul.f32 %v4181_v49, %v3928_v51  ;;  %v12818_v58 = vpop.eup %6321  ;;  %v3451_v10 = vmul.f32 %v12730_v44, %v3450_v55  ;;  %5415 = vst [vmem:[#allocation10 + $0x38] sm:$0xff] %v5346_v9  ;;  %v15246_v39 = vsub.f32 %v15237_v11, %v12592_v14 }
 0x3e0   :  { %v12827_v59 = vadd.f32 1e-05, %v3163_v31  ;;  %v3900_v57 = vmax.f32 %v3868_v37, 0.0  ;;  %v12832_v0 = vpop.eup %6323  ;;  %v3192_v51 = vsub.f32 %v15247_v26, %v12542_v5  ;;  %v3445_v42 = vsel %vm12822_vm5, %v12690_v2, %v3441_v60  ;;  %v3639_v19 = vpop.xlane.xlu2 %3638  ;;  %v15250_v31 = vld [vmem:[#allocation117_spill] sm:$0xff]  ;;  %v15252_v26 = vld [vmem:[#allocation143_spill] sm:$0xff] }
 0x3e1   :  { %v4313_v16 = vmul.f32 %v4191_v20, %v15246_v39  ;;  %v3132_v3 = vsub.f32 %v3068_v54, %v3100_v24  ;;  %v4417_v22 = vmul.f32 %v10519_v25, %v4312_v15  ;;  %vm3452_vm6 = vweird.f32 %v12667_v7  ;;  %v3735_v40 = vpop.xlane.xlu1 %3734  ;;  %v5190_v20 = vpop.f32.mrf.mxu1 }
 0x3e2   :  { %6327 = vrsqrt.f32 %v12827_v59  ;;  %v12842_v49 = vadd.f32 1e-05, %v3900_v57  ;;  %v12844_v14 = vmul.f32 0.0078125, %v2903_v28  ;;  %vm12850_vm14 = vmor %vm3452_vm6, %vm3453_vm4  ;;  %v3457_v2 = vmul.f32 %v12818_v58, %v12768_v13 }
 0x3e3   :  { %v12846_v11 = vpop.eup %6325  ;;  %v3164_v18 = vmax.f32 %v3132_v3, 0.0  ;;  %v4421_v7 = vmul.f32 %v10519_v25, %v4313_v16  ;;  %v4555_v41 = vadd.f32 %v10942_v63, %v4417_v22  ;;  %v3576_v8 = vmul.f32 %v3445_v42, %v3192_v51 }
 0x3e4   :  { %v3455_v55 = vsel %vm12850_vm14, %v12730_v44, %v3451_v10  ;;  %v4193_v1 = vmul.f32 %v12832_v0, %v12771_v53  ;;  %v4203_v4 = vmul.f32 %v12846_v11, %v12793_v47  ;;  %6329 = vrsqrt.f32 %v12842_v49 }
 0x3e5   :  { %v12866_v38 = vadd.f32 1e-05, %v3164_v18  ;;  %v4559_v28 = vadd.f32 %v10942_v63, %v4421_v7  ;;  %v4683_v60 = vmax.f32 %v4555_v41, 0.0  ;;  %v3193_v37 = vsub.f32 %v15250_v31, %v12607_v45  ;;  %v5348_v7 = vpop.f32.mrf.mxu3 }
 0x3e6   :  { %v4204_v44 = vmul.f32 %v12846_v11, %v4203_v4  ;;  %v3101_v9 = vmul.f32 %v12844_v14, %v12844_v14  ;;  %v3069_v24 = vmul.f32 0.0078125, %v2999_v30  ;;  %v12875_v54 = vadd.f32 %v5190_v20, %v12745_v12  ;;  %v12887_v22 = vpop.xlane.xlu0 %3000  ;;  %v15253_v30 = vld [vmem:[#allocation185_spill] sm:$0xff] }
 0x3e7   :  { %v3458_v15 = vmul.f32 %v12818_v58, %v3457_v2  ;;  %6331 = vrsqrt.f32 %v12866_v38  ;;  %v4687_v23 = vmax.f32 %v4559_v28, 0.0  ;;  %v4416_v57 = vmul.f32 %v10562_v27, %v3576_v8  ;;  %v5259_v8 = vpop.f32.mrf.mxu2 }
 0x3e8   :  { %15251 = vst [vmem:[#allocation42_spill] sm:$0xff] %v12875_v54  ;;  %v12879_v10 = vpop.eup %6327  ;;  %v4205_v39 = vmul.f32 0.5, %v4204_v44  ;;  %v3133_v45 = vsub.f32 %v3069_v24, %v3101_v9  ;;  %v3577_v16 = vmul.f32 %v3455_v55, %v3193_v37  ;;  %v4194_v42 = vmul.f32 %v12832_v0, %v4193_v1 }
 0x3e9   :  { %v3467_v12 = vmul.f32 %v12879_v10, %v12827_v59  ;;  %v4771_v3 = vpack.c.bf16 %v4687_v23, %v4683_v60  ;;  %v12891_v41 = vmul.f32 0.0078125, %v3639_v19  ;;  %v3459_v4 = vmul.f32 0.5, %v3458_v15  ;;  %v12898_v60 = vpop.xlane.xlu2 %3640  ;;  %v2905_v44 = vpop.xlane.xlu1 %2904 }
 0x3ea   :  { %v4206_v2 = vsub.f32 1.5, %v4205_v39  ;;  %v3165_v18 = vmax.f32 %v3133_v45, 0.0  ;;  %v12893_v55 = vpop.eup %6329  ;;  %vm4209_vm12 = vweird.f32 %v12846_v11  ;;  %v4420_v28 = vmul.f32 %v10562_v27, %v3577_v16  ;;  %v15254_v39 = vld [vmem:[#allocation57_spill] sm:$0xff] }
 0x3eb   :  { %v3468_v1 = vmul.f32 %v12879_v10, %v3467_v12  ;;  %5377 = vmatmul.bf16.gmra.mxu3 %v4771_v3  ;;  %v4554_v19 = vadd.f32 %v15107_v32, %v4416_v57  ;;  %v3805_v37 = vmul.f32 0.0078125, %v3735_v40  ;;  %v4195_v24 = vmul.f32 0.5, %v4194_v42 }
 0x3ec   :  { %v4207_v20 = vmul.f32 %v12846_v11, %v4206_v2  ;;  %v12901_v31 = vadd.f32 1e-05, %v3165_v18  ;;  %vm4208_vm10 = vweird.f32 %v12793_v47  ;;  %v4558_v23 = vadd.f32 %v15107_v32, %v4420_v28 }
 0x3ed   :  { %v12904_v9 = vpop.eup %6331  ;;  %v3469_v15 = vmul.f32 0.5, %v3468_v1  ;;  %vm12912_vm15 = vmor %vm4208_vm10, %vm4209_vm12  ;;  %v4213_v40 = vmul.f32 %v12893_v55, %v12842_v49  ;;  %v3837_v47 = vmul.f32 %v12891_v41, %v12891_v41  ;;  %v3460_v57 = vsub.f32 1.5, %v3459_v4  ;;  %v15257_v4 = vld [vmem:[#allocation65_spill] sm:$0xff] }
 0x3ee   :  { %6333 = vrsqrt.f32 %v12901_v31  ;;  %vm3462_vm7 = vweird.f32 %v12768_v13  ;;  %v4211_v42 = vsel %vm12912_vm15, %v12846_v11, %v4207_v20  ;;  %v3477_v12 = vmul.f32 %v12904_v9, %v12866_v38  ;;  %v15258_v11 = vld [vmem:[#allocation165_spill] sm:$0xff] }
 0x3ef   :  { %v3470_v3 = vsub.f32 1.5, %v3469_v15  ;;  %v4682_v2 = vmax.f32 %v4554_v19, 0.0  ;;  %v4686_v18 = vmax.f32 %v4558_v23, 0.0  ;;  %v3869_v1 = vsub.f32 %v3805_v37, %v3837_v47  ;;  %v3643_v37 = vpop.xlane.xlu0 %3642  ;;  %v5350_v47 = vpop.f32.mrf.mxu3 }
 0x3f0   :  { %vm3463_vm1 = vweird.f32 %v12818_v58  ;;  %v4196_v28 = vsub.f32 1.5, %v4195_v24  ;;  %vm4198_vm2 = vweird.f32 %v12771_v53  ;;  %v3931_v51 = vsub.f32 %v15257_v4, %v12754_v29 }
 0x3f1   :  { %v4214_v5 = vmul.f32 %v12893_v55, %v4213_v40  ;;  %v4770_v45 = vpack.c.bf16 %v4686_v18, %v4682_v2  ;;  %v3901_v16 = vmax.f32 %v3869_v1, 0.0  ;;  %v5260_v20 = vadd.f32 %v5259_v8, %v15258_v11  ;;  %v5261_v8 = vpop.f32.mrf.mxu2  ;;  %v2907_v18 = vpop.xlane.xlu2 %2906  ;;  %vm12953_vm9 = vmor %vm3462_vm7, %vm3463_vm1 }
 0x3f2   :  { %v3461_v54 = vmul.f32 %v12818_v58, %v3460_v57  ;;  %v4315_v15 = vmul.f32 %v4211_v42, %v3931_v51  ;;  %vm3473_vm3 = vweird.f32 %v12879_v10  ;;  %v3478_v19 = vmul.f32 %v12904_v9, %v3477_v12  ;;  %v15259_v51 = vld [vmem:[#allocation178_spill] sm:$0xff] }
 0x3f3   :  { %v3471_v23 = vmul.f32 %v12879_v10, %v3470_v3  ;;  %5288 = vmatmul.bf16.gmra.mxu2 %v4770_v45  ;;  %v12939_v29 = vadd.f32 1e-05, %v3901_v16  ;;  %v5349_v40 = vadd.f32 %v5348_v7, %v5260_v20  ;;  %v12941_v2 = vmul.f32 0.0078125, %v2905_v44  ;;  %v3737_v3 = vpop.xlane.xlu1 %3736  ;;  %v15262_v44 = vld [vmem:[#allocation110_spill] sm:$0xff] }
 0x3f4   :  { %v12936_v24 = vpop.eup %6333  ;;  %v4197_v57 = vmul.f32 %v12832_v0, %v4196_v28  ;;  %vm4199_vm0 = vweird.f32 %v12832_v0  ;;  %v3196_v42 = vsub.f32 %v15259_v51, %v12809_v46  ;;  %vm3472_vm13 = vweird.f32 %v12827_v59 }
 0x3f5   :  { %v3487_v12 = vmul.f32 %v12936_v24, %v12901_v31  ;;  %v12960_v1 = vmul.f32 0.5, %v4214_v5  ;;  %6335 = vrsqrt.f32 %v12939_v29  ;;  %5416 = vst [vmem:[#allocation10 + $0x40] sm:$0xff] %v5349_v40  ;;  %vm12965_vm11 = vmor %vm3472_vm13, %vm3473_vm3  ;;  %v3479_v13 = vmul.f32 0.5, %v3478_v19 }
 0x3f6   :  { %v3070_v16 = vmul.f32 0.0078125, %v12887_v22  ;;  %v3102_v59 = vmul.f32 %v12941_v2, %v12941_v2  ;;  %v3465_v5 = vsel %vm12953_vm9, %v12818_v58, %v3461_v54  ;;  %vm12980_vm8 = vmor %vm4198_vm2, %vm4199_vm0  ;;  %v4429_v20 = vmul.f32 %v10519_v25, %v4315_v15 }
 0x3f7   :  { %v3488_v4 = vmul.f32 %v12936_v24, %v3487_v12  ;;  %v3475_v22 = vsel %vm12965_vm11, %v12879_v10, %v3471_v23  ;;  %v5262_v19 = vadd.f32 %v5261_v8, %v12651_v56  ;;  %v4201_v58 = vsel %vm12980_vm8, %v12832_v0, %v4197_v57  ;;  %v13005_v28 = vpop.xlane.xlu0 %3644 }
 0x3f8   :  { %v3197_v54 = vsub.f32 %v15105_v36, %v12844_v14  ;;  %v3134_v40 = vsub.f32 %v3070_v16, %v3102_v59  ;;  %v4216_v12 = vsub.f32 1.5, %v12960_v1  ;;  %vm3483_vm4 = vweird.f32 %v12904_v9  ;;  %v15277_v14 = vld [vmem:[#allocation180_spill] sm:$0xff] }
 0x3f9   :  { %v3489_v53 = vmul.f32 0.5, %v3488_v4  ;;  %v12997_v15 = vmul.f32 0.0078125, %v12898_v60  ;;  %v5351_v7 = vadd.f32 %v5350_v47, %v5262_v19  ;;  %v3480_v10 = vsub.f32 1.5, %v3479_v13 }
 0x3fa   :  { %v3166_v23 = vmax.f32 %v3134_v40, 0.0  ;;  %v15267_v56 = vsub.f32 %v15254_v39, %v12686_v21  ;;  %v15268_v0 = vsub.f32 %v15253_v30, %v12758_v48  ;;  %vm4219_vm5 = vweird.f32 %v12893_v55 }
 0x3fb   :  { %v13007_v4 = vpop.eup %6335  ;;  %vm3482_vm6 = vweird.f32 %v12866_v38  ;;  %v13011_v60 = vmul.f32 0.0078125, %v3643_v37  ;;  %5417 = vst [vmem:[#allocation10 + $0x48] sm:$0xff] %v5351_v7  ;;  %v15269_v47 = vsub.f32 %v15252_v26, %v12706_v61  ;;  %v4567_v39 = vadd.f32 %v10942_v63, %v4429_v20  ;;  %v5264_v48 = vpop.f32.mrf.mxu2 }
 0x3fc   :  { %v3578_v8 = vmul.f32 %v3465_v5, %v15267_v56  ;;  %v3579_v57 = vmul.f32 %v3475_v22, %v15268_v0  ;;  %v3806_v1 = vmul.f32 0.0078125, %v3737_v3  ;;  %v3490_v30 = vsub.f32 1.5, %v3489_v53  ;;  %v3739_v5 = vpop.xlane.xlu2 %3738  ;;  %v5353_v37 = vpop.f32.mrf.mxu3  ;;  %vm13055_vm10 = vmor %vm3482_vm6, %vm3483_vm4 }
 0x3fd   :  { %v4314_v21 = vmul.f32 %v4201_v58, %v15269_v47  ;;  %v4223_v13 = vmul.f32 %v13007_v4, %v12939_v29  ;;  %v13019_v16 = vadd.f32 1e-05, %v3166_v23  ;;  %v13021_v59 = vmul.f32 0.0078125, %v2907_v18  ;;  %v3003_v20 = vpop.xlane.xlu1 %3002 }
 0x3fe   :  { %vm4218_vm14 = vweird.f32 %v12842_v49  ;;  %v3838_v61 = vmul.f32 %v12997_v15, %v12997_v15  ;;  %v4424_v26 = vmul.f32 %v10562_v27, %v3578_v8  ;;  %v4428_v3 = vmul.f32 %v10562_v27, %v3579_v57 }
 0x3ff   :  { %v4425_v11 = vmul.f32 %v10519_v25, %v4314_v21  ;;  %vm3493_vm12 = vweird.f32 %v12936_v24  ;;  %v4224_v22 = vmul.f32 %v13007_v4, %v4223_v13  ;;  %6337 = vrsqrt.f32 %v13019_v16  ;;  %vm13078_vm1 = vmor %vm4218_vm14, %vm4219_vm5 }
 0x400   :  { %v4695_v18 = vmax.f32 %v4567_v39, 0.0  ;;  %v4562_v19 = vadd.f32 %v15107_v32, %v4424_v26  ;;  %v4566_v58 = vadd.f32 %v15107_v32, %v4428_v3  ;;  %v3870_v40 = vsub.f32 %v3806_v1, %v3838_v61  ;;  %v13042_v1 = vpop.xlane.xlu0 %2910 }
 0x401   :  { %v4563_v53 = vadd.f32 %v10942_v63, %v4425_v11  ;;  %v3481_v7 = vmul.f32 %v12904_v9, %v3480_v10  ;;  %v3491_v23 = vmul.f32 %v12936_v24, %v3490_v30  ;;  %v3839_v56 = vmul.f32 %v13011_v60, %v13011_v60 }
 0x402   :  { %v3103_v8 = vmul.f32 %v13021_v59, %v13021_v59  ;;  %v4690_v0 = vmax.f32 %v4562_v19, 0.0  ;;  %v4694_v57 = vmax.f32 %v4566_v58, 0.0  ;;  %v3902_v21 = vmax.f32 %v3870_v40, 0.0 }
 0x403   :  { %v4691_v47 = vmax.f32 %v4563_v53, 0.0  ;;  %v4225_v39 = vmul.f32 0.5, %v4224_v22  ;;  %v5265_v13 = vadd.f32 %v5264_v48, %v12655_v6  ;;  %v3807_v26 = vmul.f32 0.0078125, %v3739_v5  ;;  %v5266_v5 = vpop.f32.mrf.mxu2 }
 0x404   :  { %v3071_v3 = vmul.f32 0.0078125, %v3003_v20  ;;  %v13045_v10 = vmul.f32 %v12893_v55, %v4216_v12  ;;  %v4774_v30 = vpack.c.bf16 %v4694_v57, %v4690_v0  ;;  %v13047_v11 = vadd.f32 1e-05, %v3902_v21  ;;  %v2909_v20 = vpop.xlane.xlu2 %2908  ;;  %v15276_v21 = vld [vmem:[#allocation92_spill] sm:$0xff] }
 0x405   :  { %v4775_v61 = vpack.c.bf16 %v4695_v18, %v4691_v47  ;;  %v13049_v45 = vpop.eup %6337  ;;  %vm3492_vm15 = vweird.f32 %v12901_v31  ;;  %v3871_v6 = vsub.f32 %v3807_v26, %v3839_v56  ;;  %v5354_v48 = vadd.f32 %v5353_v37, %v5265_v13 }
 0x406   :  { %v3135_v12 = vsub.f32 %v3071_v3, %v3103_v8  ;;  %v3485_v18 = vsel %vm13055_vm10, %v12904_v9, %v3481_v7  ;;  %vm13065_vm7 = vmor %vm3492_vm15, %vm3493_vm12  ;;  %v3933_v38 = vsub.f32 %v11922_v43, %v12891_v41  ;;  %v3497_v31 = vmul.f32 %v13049_v45, %v13019_v16  ;;  %5293 = vmatmul.bf16.gmra.mxu2 %v4774_v30  ;;  %v5355_v7 = vpop.f32.mrf.mxu3 }
 0x407   :  { %5382 = vmatmul.bf16.gmra.mxu3 %v4775_v61  ;;  %6339 = vrsqrt.f32 %v13047_v11  ;;  %v3495_v37 = vsel %vm13065_vm7, %v12936_v24, %v3491_v23  ;;  %v4226_v58 = vsub.f32 1.5, %v4225_v39  ;;  %v3903_v53 = vmax.f32 %v3871_v6, 0.0  ;;  %5418 = vst [vmem:[#allocation10 + $0x50] sm:$0xff] %v5354_v48  ;;  %v3005_v0 = vpop.xlane.xlu1 %3004  ;;  %v15280_v48 = vld [vmem:[#allocation155_spill] sm:$0xff] }
 0x408   :  { %v3167_v40 = vmax.f32 %v3135_v12, 0.0  ;;  %v4221_v56 = vsel %vm13078_vm1, %v12893_v55, %v13045_v10  ;;  %vm4228_vm2 = vweird.f32 %v12939_v29  ;;  %v3498_v49 = vmul.f32 %v13049_v45, %v3497_v31  ;;  %v3743_v46 = vpop.xlane.xlu0 %3742 }
 0x409   :  { %v5267_v8 = vadd.f32 %v5266_v5, %v12661_v50  ;;  %v13092_v57 = vadd.f32 1e-05, %v3903_v53  ;;  %v13096_v23 = vmul.f32 0.0078125, %v2909_v20  ;;  %v3580_v47 = vmul.f32 %v3485_v18, %v3196_v42 }
 0x40a   :  { %v13094_v24 = vadd.f32 1e-05, %v3167_v40  ;;  %v3934_v55 = vsub.f32 %v15276_v21, %v12997_v15  ;;  %v3581_v13 = vmul.f32 %v3495_v37, %v3197_v54  ;;  %v3072_v50 = vmul.f32 0.0078125, %v3005_v0  ;;  %v15291_v15 = vld [vmem:[#allocation147_spill] sm:$0xff] }
 0x40b   :  { %v5356_v39 = vadd.f32 %v5355_v7, %v5267_v8  ;;  %v4227_v26 = vmul.f32 %v13007_v4, %v4226_v58  ;;  %vm4229_vm3 = vweird.f32 %v13007_v4  ;;  %6341 = vrsqrt.f32 %v13092_v57  ;;  %v15281_v58 = vld [vmem:[#allocation72_spill] sm:$0xff] }
 0x40c   :  { %v3104_v3 = vmul.f32 %v13096_v23, %v13096_v23  ;;  %v3499_v42 = vmul.f32 0.5, %v3498_v49  ;;  %v13114_v10 = vmul.f32 0.0078125, %v13005_v28  ;;  %6343 = vrsqrt.f32 %v13094_v24  ;;  %v3741_v6 = vpop.xlane.xlu2 %3740  ;;  %vm13127_vm0 = vmor %vm4228_vm2, %vm4229_vm3 }
 0x40d   :  { %v13111_v51 = vpop.eup %6339  ;;  %5419 = vst [vmem:[#allocation10 + $0x58] sm:$0xff] %v5356_v39  ;;  %v4432_v36 = vmul.f32 %v10562_v27, %v3580_v47  ;;  %v3198_v54 = vsub.f32 %v15277_v14, %v12941_v2  ;;  %v4436_v61 = vmul.f32 %v10562_v27, %v3581_v13  ;;  %v3935_v12 = vsub.f32 %v15280_v48, %v13011_v60 }
 0x40e   :  { %v4233_v30 = vmul.f32 %v13111_v51, %v13047_v11  ;;  %v3136_v22 = vsub.f32 %v3072_v50, %v3104_v3  ;;  %v3840_v5 = vmul.f32 %v13114_v10, %v13114_v10  ;;  %v3808_v18 = vmul.f32 0.0078125, %v3741_v6 }
 0x40f   :  { %v4570_v20 = vadd.f32 %v15107_v32, %v4432_v36  ;;  %v4231_v19 = vsel %vm13127_vm0, %v13007_v4, %v4227_v26  ;;  %v4574_v29 = vadd.f32 %v15107_v32, %v4436_v61  ;;  %v3500_v37 = vsub.f32 1.5, %v3499_v42  ;;  %v3647_v49 = vpop.xlane.xlu1 %3646 }
 0x410   :  { %v4234_v31 = vmul.f32 %v13111_v51, %v4233_v30  ;;  %v3168_v9 = vmax.f32 %v3136_v22, 0.0  ;;  %v3199_v53 = vsub.f32 %v15281_v58, %v13021_v59  ;;  %v13144_v40 = vmul.f32 0.0078125, %v13042_v1  ;;  %v2913_v41 = vpop.xlane.xlu0 %2912 }
 0x411   :  { %v3872_v7 = vsub.f32 %v3808_v18, %v3840_v5  ;;  %v13146_v8 = vpop.eup %6341  ;;  %v4698_v0 = vmax.f32 %v4570_v20, 0.0  ;;  %v4702_v47 = vmax.f32 %v4574_v29, 0.0  ;;  %v15282_v4 = vsub.f32 %v15262_v44, %v12787_v62  ;;  %v5269_v44 = vpop.f32.mrf.mxu2 }
 0x412   :  { %v13148_v39 = vadd.f32 1e-05, %v3168_v9  ;;  %v13153_v50 = vpop.eup %6343  ;;  %v4235_v26 = vmul.f32 0.5, %v4234_v31  ;;  %v4243_v3 = vmul.f32 %v13146_v8, %v13092_v57  ;;  %v4317_v42 = vmul.f32 %v4231_v19, %v3933_v38  ;;  %v15283_v31 = vld [vmem:[#allocation54_spill] sm:$0xff] }
 0x413   :  { %v4316_v13 = vmul.f32 %v4221_v56, %v15282_v4  ;;  %v3904_v1 = vmax.f32 %v3872_v7, 0.0  ;;  %vm3502_vm9 = vweird.f32 %v13019_v16  ;;  %vm3503_vm13 = vweird.f32 %v13049_v45 }
 0x414   :  { %v3936_v36 = vsub.f32 %v12150_v52, %v13114_v10  ;;  %v3507_v62 = vmul.f32 %v13153_v50, %v13094_v24  ;;  %vm4238_vm11 = vweird.f32 %v13047_v11  ;;  %v4244_v56 = vmul.f32 %v13146_v8, %v4243_v3  ;;  %v3007_v28 = vpop.xlane.xlu2 %3006  ;;  %vm13189_vm5 = vmor %vm3502_vm9, %vm3503_vm13 }
 0x415   :  { %v13170_v30 = vmul.f32 %v13144_v40, %v13144_v40  ;;  %v4778_v43 = vpack.c.bf16 %v4702_v47, %v4698_v0  ;;  %6345 = vrsqrt.f32 %v13148_v39  ;;  %v3501_v38 = vmul.f32 %v13049_v45, %v3500_v37 }
 0x416   :  { %v3508_v61 = vmul.f32 %v13153_v50, %v3507_v62  ;;  %v13175_v22 = vadd.f32 1e-05, %v3904_v1  ;;  %v4433_v6 = vmul.f32 %v10519_v25, %v4316_v13  ;;  %v4236_v5 = vsub.f32 1.5, %v4235_v26 }
 0x417   :  { %v4245_v20 = vmul.f32 0.5, %v4244_v56  ;;  %5298 = vmatmul.bf16.gmra.mxu2 %v4778_v43  ;;  %v4437_v18 = vmul.f32 %v10519_v25, %v4317_v42  ;;  %v13179_v19 = vmul.f32 0.0078125, %v3647_v49  ;;  %vm4239_vm8 = vweird.f32 %v13111_v51  ;;  %v3649_v4 = vpop.xlane.xlu1 %3648 }
 0x418   :  { %vm4248_vm4 = vweird.f32 %v13092_v57  ;;  %v3201_v29 = vsub.f32 %v15283_v31, %v13144_v40  ;;  %v3809_v9 = vmul.f32 0.0078125, %v3743_v46  ;;  %v4571_v49 = vadd.f32 %v10942_v63, %v4433_v6  ;;  %v5358_v26 = vpop.f32.mrf.mxu3  ;;  %vm13218_vm14 = vmor %vm4238_vm11, %vm4239_vm8 }
 0x419   :  { %v4246_v7 = vsub.f32 1.5, %v4245_v20  ;;  %v4575_v0 = vadd.f32 %v10942_v63, %v4437_v18  ;;  %v3841_v47 = vmul.f32 %v13179_v19, %v13179_v19  ;;  %v3505_v46 = vsel %vm13189_vm5, %v13049_v45, %v3501_v38  ;;  %v3745_v18 = vpop.xlane.xlu0 %3744 }
 0x41a   :  { %v3509_v13 = vmul.f32 0.5, %v3508_v61  ;;  %6347 = vrsqrt.f32 %v13175_v22  ;;  %v5270_v16 = vadd.f32 %v5269_v44, %v12673_v34  ;;  %v4237_v1 = vmul.f32 %v13111_v51, %v4236_v5  ;;  %v15286_v61 = vld [vmem:[#allocation191_spill] sm:$0xff] }
 0x41b   :  { %v13202_v3 = vpop.eup %6345  ;;  %v4699_v42 = vmax.f32 %v4571_v49, 0.0  ;;  %v4703_v62 = vmax.f32 %v4575_v0, 0.0  ;;  %v3873_v56 = vsub.f32 %v3809_v9, %v3841_v47  ;;  %v4247_v43 = vmul.f32 %v13146_v8, %v4246_v7 }
 0x41c   :  { %vm4249_vm6 = vweird.f32 %v13146_v8  ;;  %v3517_v45 = vmul.f32 %v13202_v3, %v13148_v39  ;;  %v5359_v38 = vadd.f32 %v5358_v26, %v5270_v16  ;;  %v3200_v6 = vsub.f32 %v15286_v61, %v13096_v23 }
 0x41d   :  { %v4779_v34 = vpack.c.bf16 %v4703_v62, %v4699_v42  ;;  %v3905_v44 = vmax.f32 %v3873_v56, 0.0  ;;  %v3073_v20 = vmul.f32 0.0078125, %v3007_v28  ;;  %v3582_v5 = vmul.f32 %v3505_v46, %v3198_v54  ;;  %v5271_v28 = vpop.f32.mrf.mxu2  ;;  %vm13233_vm15 = vmor %vm4248_vm4, %vm4249_vm6  ;;  %v3009_v0 = vpop.xlane.xlu2 %3008 }
 0x41e   :  { %v3510_v37 = vsub.f32 1.5, %v3509_v13  ;;  %vm3512_vm12 = vweird.f32 %v13094_v24  ;;  %vm3513_vm10 = vweird.f32 %v13153_v50  ;;  %5420 = vst [vmem:[#allocation10 + $0x60] sm:$0xff] %v5359_v38  ;;  %v13224_v7 = vmul.f32 0.0078125, %v3649_v4 }
 0x41f   :  { %v4241_v2 = vsel %vm13218_vm14, %v13111_v51, %v4237_v1  ;;  %5387 = vmatmul.bf16.gmra.mxu3 %v4779_v34  ;;  %v13237_v14 = vadd.f32 1e-05, %v3905_v44  ;;  %v13239_v54 = vmul.f32 0.0078125, %v2913_v41  ;;  %v3137_v49 = vsub.f32 %v3073_v20, %v13170_v30  ;;  %v2915_v16 = vpop.xlane.xlu1 %2914  ;;  %vm13282_vm7 = vmor %vm3512_vm12, %vm3513_vm10 }
 0x420   :  { %v13242_v47 = vpop.eup %6347  ;;  %v4251_v51 = vsel %vm13233_vm15, %v13146_v8, %v4247_v43  ;;  %v3518_v57 = vmul.f32 %v13202_v3, %v3517_v45  ;;  %v3842_v4 = vmul.f32 %v13224_v7, %v13224_v7  ;;  %v3810_v46 = vmul.f32 0.0078125, %v3745_v18  ;;  %v5360_v42 = vpop.f32.mrf.mxu3 }
 0x421   :  { %6349 = vrsqrt.f32 %v13237_v14  ;;  %v3106_v41 = vmul.f32 %v13239_v54, %v13239_v54  ;;  %v3169_v13 = vmax.f32 %v3137_v49, 0.0  ;;  %v5272_v30 = vadd.f32 %v5271_v28, %v12677_v33 }
 0x422   :  { %v3511_v26 = vmul.f32 %v13153_v50, %v3510_v37  ;;  %v3874_v1 = vsub.f32 %v3810_v46, %v3842_v4  ;;  %v3074_v8 = vmul.f32 0.0078125, %v3009_v0  ;;  %v4318_v62 = vmul.f32 %v4241_v2, %v3934_v55  ;;  %v3011_v9 = vpop.xlane.xlu0 %3010  ;;  %v15292_v37 = vld [vmem:[#allocation157_spill] sm:$0xff] }
 0x423   :  { %v4253_v56 = vmul.f32 %v13242_v47, %v13175_v22  ;;  %v13260_v43 = vadd.f32 1e-05, %v3169_v13  ;;  %v5361_v45 = vadd.f32 %v5360_v42, %v5272_v30  ;;  %v4319_v33 = vmul.f32 %v4251_v51, %v3935_v12 }
 0x424   :  { %v3519_v38 = vmul.f32 0.5, %v3518_v57  ;;  %v3906_v34 = vmax.f32 %v3874_v1, 0.0  ;;  %v3138_v44 = vsub.f32 %v3074_v8, %v3106_v41  ;;  %v4441_v20 = vmul.f32 %v10519_v25, %v4318_v62 }
 0x425   :  { %v4440_v18 = vmul.f32 %v10562_v27, %v3582_v5  ;;  %v3937_v21 = vsub.f32 %v15291_v15, %v13179_v19  ;;  %6351 = vrsqrt.f32 %v13260_v43  ;;  %5421 = vst [vmem:[#allocation10 + $0x68] sm:$0xff] %v5361_v45  ;;  %v4445_v55 = vmul.f32 %v10519_v25, %v4319_v33  ;;  %v3651_v51 = vpop.xlane.xlu2 %3650  ;;  %v15298_v15 = vld [vmem:[#allocation25_spill] sm:$0xff] }
 0x426   :  { %v3202_v60 = vsub.f32 %v15292_v37, %v13239_v54  ;;  %v13273_v48 = vadd.f32 1e-05, %v3906_v34  ;;  %v3170_v12 = vmax.f32 %v3138_v44, 0.0  ;;  %v4579_v28 = vadd.f32 %v10942_v63, %v4441_v20  ;;  %v15307_v37 = vld [vmem:[#allocation51_spill] sm:$0xff] }
 0x427   :  { %v13276_v2 = vpop.eup %6349  ;;  %vm3523_vm1 = vweird.f32 %v13202_v3  ;;  %v4254_v11 = vmul.f32 %v13242_v47, %v4253_v56  ;;  %v4583_v49 = vadd.f32 %v10942_v63, %v4445_v55  ;;  %v13289_v0 = vmul.f32 0.0078125, %v2915_v16  ;;  %v3747_v56 = vpop.xlane.xlu1 %3746 }
 0x428   :  { %v3515_v57 = vsel %vm13282_vm7, %v13153_v50, %v3511_v26  ;;  %v3520_v4 = vsub.f32 1.5, %v3519_v38  ;;  %v4263_v24 = vmul.f32 %v13276_v2, %v13237_v14  ;;  %6353 = vrsqrt.f32 %v13273_v48 }
 0x429   :  { %vm3522_vm2 = vweird.f32 %v13148_v39  ;;  %vm4268_vm3 = vweird.f32 %v13237_v14  ;;  %v13299_v46 = vadd.f32 1e-05, %v3170_v12  ;;  %v4707_v41 = vmax.f32 %v4579_v28, 0.0 }
 0x42a   :  { %v4711_v13 = vmax.f32 %v4583_v49, 0.0  ;;  %v4264_v30 = vmul.f32 %v13276_v2, %v4263_v24  ;;  %v3107_v16 = vmul.f32 %v13289_v0, %v13289_v0  ;;  %v3075_v50 = vmul.f32 0.0078125, %v3011_v9  ;;  %v2275_v28 = vpop.xlane.xlu0 %2274  ;;  %vm13343_vm4 = vmor %vm3522_vm2, %vm3523_vm1 }
 0x42b   :  { %v13304_v26 = vmul.f32 0.0078125, %v3651_v51  ;;  %v13306_v1 = vpop.eup %6351  ;;  %v4255_v42 = vmul.f32 0.5, %v4254_v11  ;;  %6355 = vrsqrt.f32 %v13299_v46  ;;  %v3583_v62 = vmul.f32 %v3515_v57, %v3199_v53 }
 0x42c   :  { %v4783_v8 = vpack.c.bf16 %v4711_v13, %v4707_v41  ;;  %v3521_v45 = vmul.f32 %v13202_v3, %v3520_v4  ;;  %v4265_v33 = vmul.f32 0.5, %v4264_v30  ;;  %v3527_v38 = vmul.f32 %v13306_v1, %v13260_v43 }
 0x42d   :  { %v3139_v34 = vsub.f32 %v3075_v50, %v3107_v16  ;;  %vm4269_vm0 = vweird.f32 %v13276_v2  ;;  %v3843_v44 = vmul.f32 %v13304_v26, %v13304_v26  ;;  %v4444_v20 = vmul.f32 %v10562_v27, %v3583_v62 }
 0x42e   :  { %v4578_v55 = vadd.f32 %v15107_v32, %v4440_v18  ;;  %v13320_v9 = vpop.eup %6353  ;;  %vm4259_vm9 = vweird.f32 %v13242_v47  ;;  %v4266_v59 = vsub.f32 1.5, %v4265_v33  ;;  %v3528_v58 = vmul.f32 %v13306_v1, %v3527_v38  ;;  %v2273_v18 = vpop.xlane.xlu2 %2272  ;;  %vm4270_vm8 = vmor %vm4268_vm3, %vm4269_vm0 }
 0x42f   :  { %v3171_v53 = vmax.f32 %v3139_v34, 0.0  ;;  %v3811_v12 = vmul.f32 0.0078125, %v3747_v56  ;;  %v4256_v5 = vsub.f32 1.5, %v4255_v42  ;;  %vm3533_vm13 = vweird.f32 %v13306_v1  ;;  %5392 = vmatmul.bf16.gmra.mxu3 %v4783_v8  ;;  %v5363_v34 = vpop.f32.mrf.mxu3 }
 0x430   :  { %v4273_v11 = vmul.f32 %v13320_v9, %v13273_v48  ;;  %v4582_v49 = vadd.f32 %v15107_v32, %v4444_v20  ;;  %vm4258_vm11 = vweird.f32 %v13175_v22  ;;  %v4267_v51 = vmul.f32 %v13276_v2, %v4266_v59 }
 0x431   :  { %v3529_v57 = vmul.f32 0.5, %v3528_v58  ;;  %v13330_v4 = vadd.f32 1e-05, %v3171_v53  ;;  %v3875_v24 = vsub.f32 %v3811_v12, %v3843_v44  ;;  %v13332_v41 = vpop.eup %6355  ;;  %v2339_v16 = vmul.f32 0.0078125, %v2275_v28  ;;  %v15299_v12 = vld [vmem:[#allocation112_spill] sm:$0xff]  ;;  %vm13385_vm14 = vmor %vm4258_vm11, %vm4259_vm9 }
 0x432   :  { %v4274_v13 = vmul.f32 %v13320_v9, %v4273_v11  ;;  %v4710_v30 = vmax.f32 %v4582_v49, 0.0  ;;  %v2338_v50 = vmul.f32 0.0078125, %v2273_v18  ;;  %v4271_v8 = vsel %vm4270_vm8, %v13276_v2, %v4267_v51 }
 0x433   :  { %v3530_v62 = vsub.f32 1.5, %v3529_v57  ;;  %v3537_v14 = vmul.f32 %v13332_v41, %v13299_v46  ;;  %v4706_v56 = vmax.f32 %v4578_v55, 0.0  ;;  %v3525_v33 = vsel %vm13343_vm4, %v13202_v3, %v3521_v45  ;;  %v15297_v45 = vld [vmem:[#allocation94_spill] sm:$0xff] }
 0x434   :  { %v4321_v38 = vmul.f32 %v4271_v8, %v3937_v21  ;;  %vm3532_vm5 = vweird.f32 %v13260_v43  ;;  %6357 = vrsqrt.f32 %v13330_v4  ;;  %v3907_v20 = vmax.f32 %v3875_v24, 0.0 }
 0x435   :  { %v3531_v39 = vmul.f32 %v13306_v1, %v3530_v62  ;;  %v3538_v2 = vmul.f32 %v13332_v41, %v3537_v14  ;;  %v4782_v44 = vpack.c.bf16 %v4710_v30, %v4706_v56  ;;  %v4257_v55 = vmul.f32 %v13242_v47, %v4256_v5  ;;  %vm3534_vm6 = vmor %vm3532_vm5, %vm3533_vm13  ;;  %v5274_v11 = vpop.f32.mrf.mxu2  ;;  %v15302_v56 = vld [vmem:[#allocation46_spill] sm:$0xff] }
 0x436   :  { %v4275_v3 = vmul.f32 0.5, %v4274_v13  ;;  %v2403_v19 = vsub.f32 %v2339_v16, %v15297_v45  ;;  %v2402_v21 = vsub.f32 %v2338_v50, %v15298_v15  ;;  %v13366_v58 = vadd.f32 1e-05, %v3907_v20 }
 0x437   :  { %v3535_v43 = vsel %vm3534_vm6, %v13306_v1, %v3531_v39  ;;  %v3539_v59 = vmul.f32 0.5, %v3538_v2  ;;  %5303 = vmatmul.bf16.gmra.mxu2 %v4782_v44  ;;  %v3584_v53 = vmul.f32 %v3525_v33, %v3200_v6  ;;  %v3938_v28 = vsub.f32 %v15299_v12, %v13224_v7  ;;  %v5365_v39 = vpop.f32.mrf.mxu3 }
 0x438   :  { %v2435_v5 = vmax.f32 %v2403_v19, 0.0  ;;  %v2434_v49 = vmax.f32 %v2402_v21, 0.0  ;;  %v3585_v18 = vmul.f32 %v3535_v43, %v3201_v29  ;;  %v4453_v1 = vmul.f32 %v10519_v25, %v4321_v38 }
 0x439   :  { %v3540_v51 = vsub.f32 1.5, %v3539_v59  ;;  %6359 = vrsqrt.f32 %v13366_v58  ;;  %v5275_v57 = vadd.f32 %v5274_v11, %v12734_v35  ;;  %v4276_v61 = vsub.f32 1.5, %v4275_v3 }
 0x43a   :  { %v13379_v24 = vpop.eup %6357  ;;  %v13389_v40 = vadd.f32 1e-05, %v2435_v5  ;;  %v13391_v31 = vadd.f32 1e-05, %v2434_v49  ;;  %v4448_v29 = vmul.f32 %v10562_v27, %v3584_v53  ;;  %v4261_v35 = vsel %vm13385_vm14, %v13242_v47, %v4257_v55  ;;  %v5103_v53 = vpop.f32.mrf.mxu0 }
 0x43b   :  { %vm4278_vm12 = vweird.f32 %v13273_v48  ;;  %v3547_v22 = vmul.f32 %v13379_v24, %v13330_v4  ;;  %v5364_v6 = vadd.f32 %v5363_v34, %v5275_v57  ;;  %vm4279_vm10 = vweird.f32 %v13320_v9 }
 0x43c   :  { %vm3543_vm15 = vweird.f32 %v13332_v41  ;;  %6361 = vrsqrt.f32 %v13389_v40  ;;  %v4452_v13 = vmul.f32 %v10562_v27, %v3585_v18  ;;  %v3541_v30 = vmul.f32 %v13332_v41, %v3540_v51  ;;  %vm13434_vm0 = vmor %vm4278_vm12, %vm4279_vm10 }
 0x43d   :  { %v3548_v16 = vmul.f32 %v13379_v24, %v3547_v22  ;;  %5422 = vst [vmem:[#allocation10 + $0x70] sm:$0xff] %v5364_v6  ;;  %6363 = vrsqrt.f32 %v13391_v31  ;;  %v4586_v47 = vadd.f32 %v15107_v32, %v4448_v29  ;;  %v4277_v50 = vmul.f32 %v13320_v9, %v4276_v61  ;;  %v5276_v10 = vpop.f32.mrf.mxu2  ;;  %v13470_v29 = vld [vmem:[#allocation8] ss:$0 sm:$0xff] }
 0x43e   :  { %v4590_v42 = vadd.f32 %v15107_v32, %v4452_v13  ;;  %v4320_v8 = vmul.f32 %v4261_v35, %v3936_v36  ;;  %v4591_v62 = vadd.f32 %v10942_v63, %v4453_v1  ;;  %vm3542_vm7 = vweird.f32 %v13299_v46 }
 0x43f   :  { %v13414_v14 = vpop.eup %6359  ;;  %v3203_v33 = vsub.f32 %v15302_v56, %v13289_v0  ;;  %v3549_v38 = vmul.f32 0.5, %v3548_v16  ;;  %vm3552_vm1 = vweird.f32 %v13330_v4  ;;  %vm13422_vm2 = vmor %vm3542_vm7, %vm3543_vm15  ;;  %vm3553_vm3 = vweird.f32 %v13379_v24  ;;  %v15309_v56 = vld [vmem:[#allocation151_spill] sm:$0xff] }
 0x440   :  { %v4283_v52 = vmul.f32 %v13414_v14, %v13366_v58  ;;  %v4718_v36 = vmax.f32 %v4590_v42, 0.0  ;;  %v4449_v46 = vmul.f32 %v10519_v25, %v4320_v8  ;;  %v3545_v34 = vsel %vm13422_vm2, %v13332_v41, %v3541_v30  ;;  %vm3554_vm9 = vmor %vm3552_vm1, %vm3553_vm3 }
 0x441   :  { %v3550_v44 = vsub.f32 1.5, %v3549_v38  ;;  %v5277_v20 = vadd.f32 %v5276_v10, %v12738_v17  ;;  %v4714_v55 = vmax.f32 %v4586_v47, 0.0  ;;  %v4281_v45 = vsel %vm13434_vm0, %v13320_v9, %v4277_v50 }
 0x442   :  { %v13442_v3 = vpop.eup %6361  ;;  %v4284_v48 = vmul.f32 %v13414_v14, %v4283_v52  ;;  %v4587_v19 = vadd.f32 %v10942_v63, %v4449_v46  ;;  %v4719_v15 = vmax.f32 %v4591_v62, 0.0  ;;  %v3586_v49 = vmul.f32 %v3545_v34, %v3202_v60  ;;  %v5192_v46 = vpop.f32.mrf.mxu1 }
 0x443   :  { %v13449_v21 = vpop.eup %6363  ;;  %v3551_v43 = vmul.f32 %v13379_v24, %v3550_v44  ;;  %v2811_v41 = vmul.f32 %v13442_v3, %v13389_v40  ;;  %v5366_v17 = vadd.f32 %v5365_v39, %v5277_v20  ;;  %v4786_v59 = vpack.c.bf16 %v4718_v36, %v4714_v55  ;;  %v15312_v39 = vld [vmem:[#allocation148_spill] sm:$0xff] }
 0x444   :  { %v4285_v9 = vmul.f32 0.5, %v4284_v48  ;;  %v2801_v5 = vmul.f32 %v13449_v21, %v13391_v31  ;;  %v4715_v11 = vmax.f32 %v4587_v19, 0.0  ;;  %vm4289_vm13 = vweird.f32 %v13414_v14 }
 0x445   :  { %v3555_v18 = vsel %vm3554_vm9, %v13379_v24, %v3551_v43  ;;  %v2812_v1 = vmul.f32 %v13442_v3, %v2811_v41  ;;  %5423 = vst [vmem:[#allocation10 + $0x78] sm:$0xff] %v5366_v17  ;;  %v4322_v4 = vmul.f32 %v4281_v45, %v3938_v28  ;;  %v5104_v54 = vadd.f32 %v13470_v29, %v5103_v53  ;;  %v5368_v35 = vpop.f32.mrf.mxu3  ;;  %v15314_v41 = vld [vmem:[#allocation103_spill] sm:$0xff] }
 0x446   :  { %v4286_v51 = vsub.f32 1.5, %v4285_v9  ;;  %v2802_v57 = vmul.f32 %v13449_v21, %v2801_v5  ;;  %v4787_v23 = vpack.c.bf16 %v4719_v15, %v4715_v11  ;;  %v3587_v61 = vmul.f32 %v3555_v18, %v3203_v33  ;;  %v5279_v28 = vpop.f32.mrf.mxu2  ;;  %v15310_v33 = vld [vmem:[#allocation111_spill] sm:$0xff]  ;;  %v5106_v5 = vpop.f32.mrf.mxu0 }
 0x447   :  { %v3939_v60 = vsub.f32 %v15307_v37, %v13304_v26  ;;  %vm4288_vm11 = vweird.f32 %v13366_v58  ;;  %v2813_v24 = vmul.f32 0.5, %v2812_v1  ;;  %5308 = vmatmul.bf16.gmra.mxu2 %v4786_v59  ;;  %vm2816_vm8 = vweird.f32 %v13389_v40  ;;  %v15308_v26 = vld [vmem:[#allocation42_spill] sm:$0xff] }
 0x448   :  { %v4287_v7 = vmul.f32 %v13414_v14, %v4286_v51  ;;  %v2803_v12 = vmul.f32 0.5, %v2802_v57  ;;  %5397 = vmatmul.bf16.gmra.mxu3 %v4787_v23  ;;  %v4460_v22 = vmul.f32 %v10562_v27, %v3587_v61  ;;  %vm4290_vm4 = vmor %vm4288_vm11, %vm4289_vm13  ;;  %vm2817_vm5 = vweird.f32 %v13442_v3 }
 0x449   :  { %v2814_v6 = vsub.f32 1.5, %v2813_v24  ;;  %v5280_v58 = vadd.f32 %v5279_v28, %v15308_v26  ;;  %v4456_v13 = vmul.f32 %v10562_v27, %v3586_v49  ;;  %vm2807_vm6 = vweird.f32 %v13449_v21  ;;  %vm2818_vm14 = vmor %vm2816_vm8, %vm2817_vm5 }
 0x44a   :  { %v4291_v30 = vsel %vm4290_vm4, %v13414_v14, %v4287_v7  ;;  %v2804_v16 = vsub.f32 1.5, %v2803_v12  ;;  %v4457_v47 = vmul.f32 %v10519_v25, %v4322_v4  ;;  %v4598_v8 = vadd.f32 %v15107_v32, %v4460_v22  ;;  %v15311_v14 = vld [vmem:[#allocation190_spill] sm:$0xff]  ;;  %v5195_v4 = vpop.f32.mrf.mxu1 }
 0x44b   :  { %v2815_v50 = vmul.f32 %v13442_v3, %v2814_v6  ;;  %v5369_v42 = vadd.f32 %v5368_v35, %v5280_v58  ;;  %v4323_v62 = vmul.f32 %v4291_v30, %v3939_v60  ;;  %v2467_v38 = vsub.f32 %v15310_v33, %v15309_v56 }
 0x44c   :  { %v2805_v27 = vmul.f32 %v13449_v21, %v2804_v16  ;;  %vm2806_vm12 = vweird.f32 %v13391_v31  ;;  %v2466_v2 = vsub.f32 %v15312_v39, %v15311_v14  ;;  %v4594_v10 = vadd.f32 %v15107_v32, %v4456_v13 }
 0x44d   :  { %v2819_v52 = vsel %vm2818_vm14, %v13442_v3, %v2815_v50  ;;  %vm2808_vm10 = vmor %vm2806_vm12, %vm2807_vm6  ;;  %5424 = vst [vmem:[#allocation10 + $0x80] sm:$0xff] %v5369_v42  ;;  %v4461_v36 = vmul.f32 %v10519_v25, %v4323_v62  ;;  %v4595_v34 = vadd.f32 %v10942_v63, %v4457_v47  ;;  %v5193_v44 = vadd.f32 %v5192_v46, %v5104_v54  ;;  %v5370_v48 = vpop.f32.mrf.mxu3  ;;  %v15313_v3 = vld [vmem:[#allocation82_spill] sm:$0xff] }
 0x44e   :  { %v2809_v0 = vsel %vm2808_vm10, %v13449_v21, %v2805_v27  ;;  %v2851_v40 = vmul.f32 %v2819_v52, %v2467_v38  ;;  %v4726_v20 = vmax.f32 %v4598_v8, 0.0  ;;  %v5281_v45 = vpop.f32.mrf.mxu2  ;;  %v4722_v43 = vmax.f32 %v4594_v10, 0.0  ;;  %v5108_v23 = vpop.f32.mrf.mxu0 }
 0x44f   :  { %v2850_v31 = vmul.f32 %v2809_v0, %v2466_v2  ;;  %v4599_v55 = vadd.f32 %v10942_v63, %v4461_v36  ;;  %v5282_v15 = vadd.f32 %v5281_v45, %v5193_v44  ;;  %v4723_v21 = vmax.f32 %v4595_v34, 0.0 }
 0x450   :  { %v4459_v19 = vmul.f32 %v15313_v3, %v2851_v40  ;;  %v4790_v53 = vpack.c.bf16 %v4726_v20, %v4722_v43  ;;  %v5107_v1 = vadd.f32 %v13470_v29, %v5106_v5  ;;  %v5109_v37 = vadd.f32 %v13470_v29, %v5108_v23 }
 0x451   :  { %v4455_v32 = vmul.f32 %v15313_v3, %v2850_v31  ;;  %v4727_v25 = vmax.f32 %v4599_v55, 0.0  ;;  %v5371_v59 = vadd.f32 %v5370_v48, %v5282_v15 }
 0x452   :  { %v4597_v17 = vadd.f32 %v15314_v41, %v4459_v19  ;;  %v5196_v57 = vadd.f32 %v5195_v4, %v5107_v1  ;;  %v5197_v24 = vpop.f32.mrf.mxu1 }
 0x453   :  { %v4593_v9 = vadd.f32 %v15314_v41, %v4455_v32  ;;  %v4791_v49 = vpack.c.bf16 %v4727_v25, %v4723_v21  ;;  %5425 = vst [vmem:[#allocation10 + $0x88] sm:$0xff] %v5371_v59  ;;  %v5198_v7 = vadd.f32 %v5197_v24, %v5109_v37 }
 0x454   :  { %v4725_v11 = vmax.f32 %v4597_v17, 0.0 }
 0x455   :  { %v4721_v63 = vmax.f32 %v4593_v9, 0.0 }
 0x456   :  { %v5284_v51 = vpop.f32.mrf.mxu2  ;;  %v5111_v6 = vpop.f32.mrf.mxu0 }
 0x457   :  { %5313 = vmatmul.bf16.gmra.mxu2 %v4790_v53  ;;  %v4789_v18 = vpack.c.bf16 %v4725_v11, %v4721_v63  ;;  %v5285_v61 = vadd.f32 %v5284_v51, %v5196_v57  ;;  %v5112_v58 = vadd.f32 %v13470_v29, %v5111_v6 }
 0x458   :  { %5402 = vmatmul.bf16.gmra.mxu3 %v4791_v49 }
 0x459   :  { %5224 = vmatmul.bf16.gmra.mxu1 %v4789_v18 }
 0x45a   :  { %v5200_v26 = vpop.f32.mrf.mxu1 }
 0x45b   :  { %v5201_v30 = vadd.f32 %v5200_v26, %v5112_v58 }
 0x45e   :  { %v5373_v54 = vpop.f32.mrf.mxu3  ;;  %v5286_v35 = vpop.f32.mrf.mxu2 }
 0x45f   :  { %v5374_v60 = vadd.f32 %v5373_v54, %v5285_v61  ;;  %v5287_v12 = vadd.f32 %v5286_v35, %v5198_v7  ;;  %v5113_v13 = vpop.f32.mrf.mxu0 }
 0x460   :  { %v5114_v42 = vadd.f32 %v13470_v29, %v5113_v13 }
 0x461   :  { %5426 = vst [vmem:[#allocation10 + $0x90] sm:$0xff] %v5374_v60 }
 0x462   :  { %v5202_v62 = vpop.f32.mrf.mxu1 }
 0x463   :  { %v5203_v56 = vadd.f32 %v5202_v62, %v5114_v42 }
 0x466   :  { %v5375_v28 = vpop.f32.mrf.mxu3 }
 0x467   :  { %v5376_v22 = vadd.f32 %v5375_v28, %v5287_v12  ;;  %v5116_v33 = vpop.f32.mrf.mxu0 }
 0x468   :  { %v5117_v2 = vadd.f32 %v13470_v29, %v5116_v33 }
 0x469   :  { %5427 = vst [vmem:[#allocation10 + $0x98] sm:$0xff] %v5376_v22 }
 0x46a   :  { %v5205_v52 = vpop.f32.mrf.mxu1 }
 0x46b   :  { %v5206_v10 = vadd.f32 %v5205_v52, %v5117_v2 }
 0x46e   :  { %v5378_v16 = vpop.f32.mrf.mxu3 }
 0x46f   :  { %v5118_v36 = vpop.f32.mrf.mxu0 }
 0x470   :  { %v5119_v34 = vadd.f32 %v13470_v29, %v5118_v36 }
 0x472   :  { %v5207_v20 = vpop.f32.mrf.mxu1 }
 0x473   :  { %v5208_v31 = vadd.f32 %v5207_v20, %v5119_v34 }
 0x476   :  { %v5289_v47 = vpop.f32.mrf.mxu2  ;;  %v5380_v14 = vpop.f32.mrf.mxu3 }
 0x477   :  { %v5290_v50 = vadd.f32 %v5289_v47, %v5201_v30  ;;  %v5121_v48 = vpop.f32.mrf.mxu0 }
 0x478   :  { %v5122_v15 = vadd.f32 %v13470_v29, %v5121_v48 }
 0x479   :  { %v5379_v8 = vadd.f32 %v5378_v16, %v5290_v50 }
 0x47a   :  { %v5210_v43 = vpop.f32.mrf.mxu1 }
 0x47b   :  { %5428 = vst [vmem:[#allocation10 + $0xa0] sm:$0xff] %v5379_v8  ;;  %v5211_v41 = vadd.f32 %v5210_v43, %v5122_v15 }
 0x47e   :  { %v5291_v38 = vpop.f32.mrf.mxu2 }
 0x47f   :  { %v5292_v27 = vadd.f32 %v5291_v38, %v5203_v56  ;;  %v5123_v25 = vpop.f32.mrf.mxu0 }
 0x480   :  { %v5124_v59 = vadd.f32 %v13470_v29, %v5123_v25 }
 0x481   :  { %v5381_v39 = vadd.f32 %v5380_v14, %v5292_v27 }
 0x482   :  { %v5212_v9 = vpop.f32.mrf.mxu1 }
 0x483   :  { %5429 = vst [vmem:[#allocation10 + $0xa8] sm:$0xff] %v5381_v39  ;;  %v5213_v11 = vadd.f32 %v5212_v9, %v5124_v59 }
 0x487   :  { %v5126_v49 = vpop.f32.mrf.mxu0 }
 0x488   :  { %v5127_v57 = vadd.f32 %v13470_v29, %v5126_v49 }
 0x489   :  { %v5294_v46 = vpop.f32.mrf.mxu2 }
 0x48a   :  { %v5383_v0 = vpop.f32.mrf.mxu3  ;;  %v5295_v40 = vadd.f32 %v5294_v46, %v5206_v10  ;;  %v5215_v4 = vpop.f32.mrf.mxu1 }
 0x48b   :  { %v5216_v23 = vadd.f32 %v5215_v4, %v5127_v57 }
 0x48c   :  { %v5384_v44 = vadd.f32 %v5383_v0, %v5295_v40 }
 0x48e   :  { %5430 = vst [vmem:[#allocation10 + $0xb0] sm:$0xff] %v5384_v44 }
 0x48f   :  { %v5128_v51 = vpop.f32.mrf.mxu0 }
 0x490   :  { %v5129_v35 = vadd.f32 %v13470_v29, %v5128_v51 }
 0x491   :  { %v5296_v55 = vpop.f32.mrf.mxu2 }
 0x492   :  { %v5385_v45 = vpop.f32.mrf.mxu3  ;;  %v5297_v3 = vadd.f32 %v5296_v55, %v5208_v31  ;;  %v5217_v54 = vpop.f32.mrf.mxu1 }
 0x493   :  { %v5218_v12 = vadd.f32 %v5217_v54, %v5129_v35 }
 0x494   :  { %v5386_v19 = vadd.f32 %v5385_v45, %v5297_v3 }
 0x496   :  { %5431 = vst [vmem:[#allocation10 + $0xb8] sm:$0xff] %v5386_v19 }
 0x497   :  { %v5131_v24 = vpop.f32.mrf.mxu0 }
 0x498   :  { %v5132_v58 = vadd.f32 %v13470_v29, %v5131_v24 }
 0x49a   :  { %v5299_v32 = vpop.f32.mrf.mxu2  ;;  %v5220_v26 = vpop.f32.mrf.mxu1 }
 0x49b   :  { %v5300_v17 = vadd.f32 %v5299_v32, %v5211_v41  ;;  %v5221_v16 = vadd.f32 %v5220_v26, %v5132_v58 }
 0x49f   :  { %v5133_v30 = vpop.f32.mrf.mxu0 }
 0x4a0   :  { %v5134_v8 = vadd.f32 %v13470_v29, %v5133_v30 }
 0x4a2   :  { %v5388_v21 = vpop.f32.mrf.mxu3  ;;  %v5301_v5 = vpop.f32.mrf.mxu2 }
 0x4a3   :  { %v5389_v53 = vadd.f32 %v5388_v21, %v5300_v17  ;;  %v5302_v63 = vadd.f32 %v5301_v5, %v5213_v11  ;;  %v5222_v56 = vpop.f32.mrf.mxu1 }
 0x4a4   :  { %v5223_v38 = vadd.f32 %v5222_v56, %v5134_v8 }
 0x4a5   :  { %5432 = vst [vmem:[#allocation10 + $0xc0] sm:$0xff] %v5389_v53 }
 0x4a7   :  { %v5136_v33 = vpop.f32.mrf.mxu0 }
 0x4a8   :  { %v5137_v2 = vadd.f32 %v13470_v29, %v5136_v33 }
 0x4aa   :  { %v5390_v18 = vpop.f32.mrf.mxu3 }
 0x4ab   :  { %v5391_v1 = vadd.f32 %v5390_v18, %v5302_v63 }
 0x4ad   :  { %5433 = vst [vmem:[#allocation10 + $0xc8] sm:$0xff] %v5391_v1 }
 0x4af   :  { %v5138_v46 = vpop.f32.mrf.mxu0 }
 0x4b0   :  { %v5139_v44 = vadd.f32 %v13470_v29, %v5138_v46 }
 0x4b2   :  { %v5393_v61 = vpop.f32.mrf.mxu3 }
 0x4ba   :  { %v5304_v37 = vpop.f32.mrf.mxu2  ;;  %v5395_v22 = vpop.f32.mrf.mxu3 }
 0x4bb   :  { %v5305_v60 = vadd.f32 %v5304_v37, %v5216_v23 }
 0x4bd   :  { %v5394_v7 = vadd.f32 %v5393_v61, %v5305_v60 }
 0x4bf   :  { %5434 = vst [vmem:[#allocation10 + $0xd0] sm:$0xff] %v5394_v7 }
 0x4c2   :  { %v5306_v28 = vpop.f32.mrf.mxu2 }
 0x4c3   :  { %v5307_v6 = vadd.f32 %v5306_v28, %v5218_v12 }
 0x4c5   :  { %v5396_v13 = vadd.f32 %v5395_v22, %v5307_v6 }
 0x4c7   :  { %5435 = vst [vmem:[#allocation10 + $0xd8] sm:$0xff] %v5396_v13 }
 0x4ca   :  { %v5309_v47 = vpop.f32.mrf.mxu2 }
 0x4cb   :  { %v5310_v50 = vadd.f32 %v5309_v47, %v5221_v16  ;;  %v5398_v42 = vpop.f32.mrf.mxu3 }
 0x4cd   :  { %v5399_v62 = vadd.f32 %v5398_v42, %v5310_v50 }
 0x4cf   :  { %5436 = vst [vmem:[#allocation10 + $0xe0] sm:$0xff] %v5399_v62 }
 0x4d2   :  { %v5311_v27 = vpop.f32.mrf.mxu2 }
 0x4d3   :  { %v5312_v14 = vadd.f32 %v5311_v27, %v5223_v38  ;;  %v5400_v39 = vpop.f32.mrf.mxu3 }
 0x4d5   :  { %v5401_v52 = vadd.f32 %v5400_v39, %v5312_v14 }
 0x4d6   :  { %v5225_v10 = vpop.f32.mrf.mxu1 }
 0x4d7   :  { %5437 = vst [vmem:[#allocation10 + $0xe8] sm:$0xff] %v5401_v52  ;;  %v5226_v36 = vadd.f32 %v5225_v10, %v5137_v2 }
 0x4da   :  { %v5314_v0 = vpop.f32.mrf.mxu2 }
 0x4db   :  { %v5315_v40 = vadd.f32 %v5314_v0, %v5226_v36  ;;  %v5403_v34 = vpop.f32.mrf.mxu3 }
 0x4dd   :  { %v5404_v20 = vadd.f32 %v5403_v34, %v5315_v40 }
 0x4de   :  { %v5227_v31 = vpop.f32.mrf.mxu1 }
 0x4df   :  { %5438 = vst [vmem:[#allocation10 + $0xf0] sm:$0xff] %v5404_v20  ;;  %v5228_v55 = vadd.f32 %v5227_v31, %v5139_v44 }
 0x4e2   :  { %v5316_v45 = vpop.f32.mrf.mxu2 }
 0x4e3   :  { %v5317_v48 = vadd.f32 %v5316_v45, %v5228_v55  ;;  %v5405_v3 = vpop.f32.mrf.mxu3 }
 0x4e5   :  { %v5406_v19 = vadd.f32 %v5405_v3, %v5317_v48 }
 0x4e7   :  { %5439 = vst [vmem:[#allocation10 + $0xf8] sm:$0xff] %v5406_v19 }
 0x4e8   :  { %5452 = dma.vmem_to_hbm [thread:$0]  %s5445_s27, 4096, %s5447_s30, [#allocation4], %s6504_s8, %s6504_s8, %s6505_s9  }
 0x4e9   :  { %6497 = dma.done.wait [#allocation4], 4096  }
 0x4ea   :  { %6498 = vsyncadd [#allocation4], 4294963200 }
 0x4eb   :  { %5457 = vsyncpa [#allocation3], 1 }
 0x4ec   :  { %5458 = vsyncpa [#allocation6], 1 }
 0x4ed   :  { %5459 = vsyncpa [#allocation9], 1 }
 0x4ee   :  { %5460 = vsyncpa [#allocation4], 1 }

</bundles_post_ra>
